<compile_context>
chip_gen: v7x
topology: tpu7x:2x2x1
jax: 0.10.0
libtpu: 0.0.40
codegen_flags: <defaults>
</compile_context>

<pallas_src>
import jax
import jax.numpy as jnp
from jax.experimental import pallas as pl
from jax.experimental.pallas import tpu as pltpu

_LANE = 128
_N_OUT = 10  # true number of classes of fc5


def _round_up(x, m):
    return ((x + m - 1) // m) * m


def _fcnet_kernel(x_ref, w1_ref, b1_ref, w2_ref, b2_ref, w3_ref, b3_ref,
                  w4_ref, b4_ref, w5_ref, b5_ref, o_ref):
    """Fused 5-layer MLP.  Grid = (batch tiles,).  All weights VMEM-resident."""
    # fc1 + ReLU (bf16 x bf16 -> f32 accumulate on the MXU).
    h = jnp.maximum(
        jnp.dot(x_ref[...], w1_ref[...],
                preferred_element_type=jnp.float32) + b1_ref[...], 0.0)
    # fc2 + ReLU
    h = jnp.maximum(
        jnp.dot(h.astype(jnp.bfloat16), w2_ref[...],
                preferred_element_type=jnp.float32) + b2_ref[...], 0.0)
    # fc3 + ReLU
    h = jnp.maximum(
        jnp.dot(h.astype(jnp.bfloat16), w3_ref[...],
                preferred_element_type=jnp.float32) + b3_ref[...], 0.0)
    # fc4 + ReLU (lane-padded 64 -> 128; padded lanes are ReLU(0+0)=0)
    h = jnp.maximum(
        jnp.dot(h.astype(jnp.bfloat16), w4_ref[...],
                preferred_element_type=jnp.float32) + b4_ref[...], 0.0)
    # fc5 (lane-padded 10 -> 128; padded rows of W5 are zero)
    out = jnp.dot(h.astype(jnp.bfloat16), w5_ref[...],
                  preferred_element_type=jnp.float32) + b5_ref[...]
    o_ref[...] = out.astype(o_ref.dtype)


def fcnet_pallas(xf, w1, b1, w2, b2, w3, b3, w4, b4, w5, b5):
    """xf: [Bp, 3072] bf16 (batch padded to a sublane multiple).
    Weights: bf16 [in, out], tail layers lane-padded to 128.  Biases: f32 [1, N]."""
    Bp, K1 = xf.shape
    N1, N2, N3 = w1.shape[1], w2.shape[1], w3.shape[1]
    N4, N5 = w4.shape[1], w5.shape[1]

    # Batch tile: whole (padded) batch up to 256 rows, else 256-row tiles
    # (fills the 256-wide MXU on v6e/v7x, fewer grid steps).
    tm = Bp if Bp <= 256 else 256
    assert Bp % tm == 0
    grid = (Bp // tm,)

    return pl.pallas_call(
        _fcnet_kernel,
        out_shape=jax.ShapeDtypeStruct((Bp, N5), jnp.float32),
        grid_spec=pltpu.PrefetchScalarGridSpec(
            num_scalar_prefetch=0,
            grid=grid,
            in_specs=[
                pl.BlockSpec((tm, K1), lambda i: (i, 0)),   # x tile (per batch tile)
                pl.BlockSpec((K1, N1), lambda i: (0, 0)),   # W1 (resident)
                pl.BlockSpec((1, N1), lambda i: (0, 0)),    # b1
                pl.BlockSpec((N1, N2), lambda i: (0, 0)),   # W2 (resident)
                pl.BlockSpec((1, N2), lambda i: (0, 0)),    # b2
                pl.BlockSpec((N2, N3), lambda i: (0, 0)),   # W3 (resident)
                pl.BlockSpec((1, N3), lambda i: (0, 0)),    # b3
                pl.BlockSpec((N3, N4), lambda i: (0, 0)),   # W4 (resident, padded)
                pl.BlockSpec((1, N4), lambda i: (0, 0)),    # b4 (padded)
                pl.BlockSpec((N4, N5), lambda i: (0, 0)),   # W5 (resident, padded)
                pl.BlockSpec((1, N5), lambda i: (0, 0)),    # b5 (padded)
            ],
            out_specs=pl.BlockSpec((tm, N5), lambda i: (i, 0)),
        ),
        compiler_params=pltpu.CompilerParams(
            dimension_semantics=("parallel",),
            # Resident weights (double-buffered by default) + x/out tiles are
            # ~19 MB: above v5e's 16 MiB default scoped VMEM, well under 32 MiB
            # everywhere (v7x physical VMEM is 64 MiB).
            vmem_limit_bytes=32 * 1024 * 1024,
        ),
    )(xf, w1, b1, w2, b2, w3, b3, w4, b4, w5, b5)


def init_params(key):
    """Deterministic synthetic parameters matching FCNet's layer shapes."""
    dims = [3 * 32 * 32, 1024, 512, 256, 64, 10]
    params = []
    for i in range(len(dims) - 1):
        fan_in, fan_out = dims[i], dims[i + 1]
        key, kw, kb = jax.random.split(key, 3)
        bound = 1.0 / jnp.sqrt(fan_in)
        # W stored as [in, out] (transposed vs. PyTorch's [out, in]).
        w = jax.random.uniform(kw, (fan_in, fan_out), jnp.float32, -bound, bound)
        b = jax.random.uniform(kb, (fan_out,), jnp.float32, -bound, bound)
        params.append((w, b))
    return params


@jax.jit
def fcnet_forward(x, params):
    B = x.shape[0]
    xf = x.reshape(B, -1)                          # flatten NCHW -> [B, 3072]
    # Pad batch to a sublane multiple; align to the 256-row tile when large.
    Bp = _round_up(max(B, 8), 8)
    if Bp > 256:
        Bp = _round_up(Bp, 256)
    xf = jnp.pad(xf, ((0, Bp - B), (0, 0))).astype(jnp.bfloat16)

    (w1, b1), (w2, b2), (w3, b3), (w4, b4), (w5, b5) = params
    # Zero-pad the narrow tail layers to lane-dense width 128.
    w4p = jnp.pad(w4, ((0, 0), (0, _LANE - w4.shape[1])))
    b4p = jnp.pad(b4, (0, _LANE - b4.shape[0]))
    w5p = jnp.pad(w5, ((0, _LANE - w5.shape[0]), (0, _LANE - w5.shape[1])))
    b5p = jnp.pad(b5, (0, _LANE - b5.shape[0]))

    bf = lambda w: w.astype(jnp.bfloat16)
    row = lambda b: b.astype(jnp.float32).reshape(1, -1)

    out = fcnet_pallas(
        xf,
        bf(w1), row(b1),
        bf(w2), row(b2),
        bf(w3), row(b3),
        bf(w4p), row(b4p),
        bf(w5p), row(b5p),
    )
    return out[:B, :_N_OUT]


if __name__ == "__main__":
    key = jax.random.PRNGKey(0)
    kx, kp = jax.random.split(key)

    x = jax.random.normal(kx, (2, 3, 32, 32), jnp.float32)   # NCHW, like PyTorch
    params = init_params(kp)

    out = fcnet_forward(x, params)
    jax.block_until_ready(out)
    assert out.shape == (2, 10), out.shape

    # Reference following the same bf16-matmul / f32-accumulate path.
    ref = x.reshape(2, -1)
    for i, (w, b) in enumerate(params):
        ref = jnp.dot(ref.astype(jnp.bfloat16), w.astype(jnp.bfloat16),
                      preferred_element_type=jnp.float32) + b
        if i != len(params) - 1:
            ref = jnp.maximum(ref, 0.0)
    assert jnp.allclose(out, ref, atol=2e-3, rtol=2e-3), float(
        jnp.max(jnp.abs(out - ref)))

    # Loose sanity check against the full-f32 reference (bf16 weights ~<1% err).
    ref32 = x.reshape(2, -1)
    for i, (w, b) in enumerate(params):
        ref32 = ref32 @ w + b
        if i != len(params) - 1:
            ref32 = jnp.maximum(ref32, 0.0)
    assert jnp.allclose(out, ref32, atol=5e-2, rtol=5e-2), float(
        jnp.max(jnp.abs(out - ref32)))

    print("KERNEL_OK")
</pallas_src>

<mosaic_0001>
module attributes {stable_mosaic.version = 11 : i64} {
  func.func @_fcnet_kernel(%arg0: i32, %arg1: memref<8x3072xbf16, #tpu.memory_space<vmem>>, %arg2: memref<3072x1024xbf16, #tpu.memory_space<vmem>>, %arg3: memref<1x1024xf32, #tpu.memory_space<vmem>>, %arg4: memref<1024x512xbf16, #tpu.memory_space<vmem>>, %arg5: memref<1x512xf32, #tpu.memory_space<vmem>>, %arg6: memref<512x256xbf16, #tpu.memory_space<vmem>>, %arg7: memref<1x256xf32, #tpu.memory_space<vmem>>, %arg8: memref<256x128xbf16, #tpu.memory_space<vmem>>, %arg9: memref<1x128xf32, #tpu.memory_space<vmem>>, %arg10: memref<128x128xbf16, #tpu.memory_space<vmem>>, %arg11: memref<1x128xf32, #tpu.memory_space<vmem>>, %arg12: memref<8x128xf32, #tpu.memory_space<vmem>>) attributes {dimension_semantics = [#tpu.dimension_semantics<parallel>], iteration_bounds = array<i64: 1>, scalar_prefetch = 0 : i64, scratch_operands = 0 : i64, tpu.core_type = #tpu.core_type<tc>, window_params = [{transform_indices = @transform_0, window_bounds = array<i64: 8, 3072>}, {pipeline_mode = #tpu.pipeline_mode<synchronous>, transform_indices = @transform_1, window_bounds = array<i64: 3072, 1024>}, {pipeline_mode = #tpu.pipeline_mode<synchronous>, transform_indices = @transform_2, window_bounds = array<i64: 1, 1024>}, {pipeline_mode = #tpu.pipeline_mode<synchronous>, transform_indices = @transform_3, window_bounds = array<i64: 1024, 512>}, {pipeline_mode = #tpu.pipeline_mode<synchronous>, transform_indices = @transform_4, window_bounds = array<i64: 1, 512>}, {pipeline_mode = #tpu.pipeline_mode<synchronous>, transform_indices = @transform_5, window_bounds = array<i64: 512, 256>}, {pipeline_mode = #tpu.pipeline_mode<synchronous>, transform_indices = @transform_6, window_bounds = array<i64: 1, 256>}, {pipeline_mode = #tpu.pipeline_mode<synchronous>, transform_indices = @transform_7, window_bounds = array<i64: 256, 128>}, {pipeline_mode = #tpu.pipeline_mode<synchronous>, transform_indices = @transform_8, window_bounds = array<i64: 1, 128>}, {pipeline_mode = #tpu.pipeline_mode<synchronous>, transform_indices = @transform_9, window_bounds = array<i64: 128, 128>}, {pipeline_mode = #tpu.pipeline_mode<synchronous>, transform_indices = @transform_10, window_bounds = array<i64: 1, 128>}, {transform_indices = @transform_11, window_bounds = array<i64: 8, 128>}]} {
    %c0 = arith.constant 0 : index
    %c0_0 = arith.constant 0 : index
    %0 = vector.load %arg1[%c0, %c0_0] : memref<8x3072xbf16, #tpu.memory_space<vmem>>, vector<8x3072xbf16>
    %c0_1 = arith.constant 0 : index
    %c0_2 = arith.constant 0 : index
    %1 = vector.load %arg2[%c0_1, %c0_2] : memref<3072x1024xbf16, #tpu.memory_space<vmem>>, vector<3072x1024xbf16>
    %cst = arith.constant dense<0.000000e+00> : vector<8x1024xf32>
    %2 = tpu.matmul %0, %1, %cst {dimension_numbers = #tpu.dot_dimension_numbers<[1], [0], [0], [1], [0, 0, 1, 1], [], []>} : vector<8x3072xbf16>, vector<3072x1024xbf16>, vector<8x1024xf32> -> vector<8x1024xf32>
    %c0_3 = arith.constant 0 : index
    %c0_4 = arith.constant 0 : index
    %3 = vector.load %arg3[%c0_3, %c0_4] : memref<1x1024xf32, #tpu.memory_space<vmem>>, vector<1x1024xf32>
    %4 = vector.broadcast %3 : vector<1x1024xf32> to vector<8x1024xf32>
    %5 = arith.addf %2, %4 : vector<8x1024xf32>
    %cst_5 = arith.constant 0.000000e+00 : f32
    %6 = vector.broadcast %cst_5 : f32 to vector<8x1024xf32>
    %7 = arith.maximumf %5, %6 : vector<8x1024xf32>
    %8 = arith.truncf %7 : vector<8x1024xf32> to vector<8x1024xbf16>
    %c0_6 = arith.constant 0 : index
    %c0_7 = arith.constant 0 : index
    %9 = vector.load %arg4[%c0_6, %c0_7] : memref<1024x512xbf16, #tpu.memory_space<vmem>>, vector<1024x512xbf16>
    %cst_8 = arith.constant dense<0.000000e+00> : vector<8x512xf32>
    %10 = tpu.matmul %8, %9, %cst_8 {dimension_numbers = #tpu.dot_dimension_numbers<[1], [0], [0], [1], [0, 0, 1, 1], [], []>} : vector<8x1024xbf16>, vector<1024x512xbf16>, vector<8x512xf32> -> vector<8x512xf32>
    %c0_9 = arith.constant 0 : index
    %c0_10 = arith.constant 0 : index
    %11 = vector.load %arg5[%c0_9, %c0_10] : memref<1x512xf32, #tpu.memory_space<vmem>>, vector<1x512xf32>
    %12 = vector.broadcast %11 : vector<1x512xf32> to vector<8x512xf32>
    %13 = arith.addf %10, %12 : vector<8x512xf32>
    %cst_11 = arith.constant 0.000000e+00 : f32
    %14 = vector.broadcast %cst_11 : f32 to vector<8x512xf32>
    %15 = arith.maximumf %13, %14 : vector<8x512xf32>
    %16 = arith.truncf %15 : vector<8x512xf32> to vector<8x512xbf16>
    %c0_12 = arith.constant 0 : index
    %c0_13 = arith.constant 0 : index
    %17 = vector.load %arg6[%c0_12, %c0_13] : memref<512x256xbf16, #tpu.memory_space<vmem>>, vector<512x256xbf16>
    %cst_14 = arith.constant dense<0.000000e+00> : vector<8x256xf32>
    %18 = tpu.matmul %16, %17, %cst_14 {dimension_numbers = #tpu.dot_dimension_numbers<[1], [0], [0], [1], [0, 0, 1, 1], [], []>} : vector<8x512xbf16>, vector<512x256xbf16>, vector<8x256xf32> -> vector<8x256xf32>
    %c0_15 = arith.constant 0 : index
    %c0_16 = arith.constant 0 : index
    %19 = vector.load %arg7[%c0_15, %c0_16] : memref<1x256xf32, #tpu.memory_space<vmem>>, vector<1x256xf32>
    %20 = vector.broadcast %19 : vector<1x256xf32> to vector<8x256xf32>
    %21 = arith.addf %18, %20 : vector<8x256xf32>
    %cst_17 = arith.constant 0.000000e+00 : f32
    %22 = vector.broadcast %cst_17 : f32 to vector<8x256xf32>
    %23 = arith.maximumf %21, %22 : vector<8x256xf32>
    %24 = arith.truncf %23 : vector<8x256xf32> to vector<8x256xbf16>
    %c0_18 = arith.constant 0 : index
    %c0_19 = arith.constant 0 : index
    %25 = vector.load %arg8[%c0_18, %c0_19] : memref<256x128xbf16, #tpu.memory_space<vmem>>, vector<256x128xbf16>
    %cst_20 = arith.constant dense<0.000000e+00> : vector<8x128xf32>
    %26 = tpu.matmul %24, %25, %cst_20 {dimension_numbers = #tpu.dot_dimension_numbers<[1], [0], [0], [1], [0, 0, 1, 1], [], []>} : vector<8x256xbf16>, vector<256x128xbf16>, vector<8x128xf32> -> vector<8x128xf32>
    %c0_21 = arith.constant 0 : index
    %c0_22 = arith.constant 0 : index
    %27 = vector.load %arg9[%c0_21, %c0_22] : memref<1x128xf32, #tpu.memory_space<vmem>>, vector<1x128xf32>
    %28 = vector.broadcast %27 : vector<1x128xf32> to vector<8x128xf32>
    %29 = arith.addf %26, %28 : vector<8x128xf32>
    %cst_23 = arith.constant 0.000000e+00 : f32
    %30 = vector.broadcast %cst_23 : f32 to vector<8x128xf32>
    %31 = arith.maximumf %29, %30 : vector<8x128xf32>
    %32 = arith.truncf %31 : vector<8x128xf32> to vector<8x128xbf16>
    %c0_24 = arith.constant 0 : index
    %c0_25 = arith.constant 0 : index
    %33 = vector.load %arg10[%c0_24, %c0_25] : memref<128x128xbf16, #tpu.memory_space<vmem>>, vector<128x128xbf16>
    %cst_26 = arith.constant dense<0.000000e+00> : vector<8x128xf32>
    %34 = tpu.matmul %32, %33, %cst_26 {dimension_numbers = #tpu.dot_dimension_numbers<[1], [0], [0], [1], [0, 0, 1, 1], [], []>} : vector<8x128xbf16>, vector<128x128xbf16>, vector<8x128xf32> -> vector<8x128xf32>
    %c0_27 = arith.constant 0 : index
    %c0_28 = arith.constant 0 : index
    %35 = vector.load %arg11[%c0_27, %c0_28] : memref<1x128xf32, #tpu.memory_space<vmem>>, vector<1x128xf32>
    %36 = vector.broadcast %35 : vector<1x128xf32> to vector<8x128xf32>
    %37 = arith.addf %34, %36 : vector<8x128xf32>
    %c0_29 = arith.constant 0 : index
    %c0_30 = arith.constant 0 : index
    %38 = vector.load %arg12[%c0_29, %c0_30] : memref<8x128xf32, #tpu.memory_space<vmem>>, vector<8x128xf32>
    tpu.vector_store %arg12[%c0_29, %c0_30], %37 {strides = array<i32>} : memref<8x128xf32, #tpu.memory_space<vmem>>, vector<8x128xf32>,
    return
  }
  func.func @transform_0(%arg0: i32) -> (i32, i32) {
    %c0_i32 = arith.constant 0 : i32
    %c0_i32_0 = arith.constant 0 : i32
    return %arg0, %c0_i32 : i32, i32
  }
  func.func @transform_1(%arg0: i32) -> (i32, i32) {
    %c0_i32 = arith.constant 0 : i32
    %c0_i32_0 = arith.constant 0 : i32
    %c0_i32_1 = arith.constant 0 : i32
    return %c0_i32, %c0_i32_0 : i32, i32
  }
  func.func @transform_2(%arg0: i32) -> (i32, i32) {
    %c0_i32 = arith.constant 0 : i32
    %c0_i32_0 = arith.constant 0 : i32
    %c0_i32_1 = arith.constant 0 : i32
    return %c0_i32, %c0_i32_0 : i32, i32
  }
  func.func @transform_3(%arg0: i32) -> (i32, i32) {
    %c0_i32 = arith.constant 0 : i32
    %c0_i32_0 = arith.constant 0 : i32
    %c0_i32_1 = arith.constant 0 : i32
    return %c0_i32, %c0_i32_0 : i32, i32
  }
  func.func @transform_4(%arg0: i32) -> (i32, i32) {
    %c0_i32 = arith.constant 0 : i32
    %c0_i32_0 = arith.constant 0 : i32
    %c0_i32_1 = arith.constant 0 : i32
    return %c0_i32, %c0_i32_0 : i32, i32
  }
  func.func @transform_5(%arg0: i32) -> (i32, i32) {
    %c0_i32 = arith.constant 0 : i32
    %c0_i32_0 = arith.constant 0 : i32
    %c0_i32_1 = arith.constant 0 : i32
    return %c0_i32, %c0_i32_0 : i32, i32
  }
  func.func @transform_6(%arg0: i32) -> (i32, i32) {
    %c0_i32 = arith.constant 0 : i32
    %c0_i32_0 = arith.constant 0 : i32
    %c0_i32_1 = arith.constant 0 : i32
    return %c0_i32, %c0_i32_0 : i32, i32
  }
  func.func @transform_7(%arg0: i32) -> (i32, i32) {
    %c0_i32 = arith.constant 0 : i32
    %c0_i32_0 = arith.constant 0 : i32
    %c0_i32_1 = arith.constant 0 : i32
    return %c0_i32, %c0_i32_0 : i32, i32
  }
  func.func @transform_8(%arg0: i32) -> (i32, i32) {
    %c0_i32 = arith.constant 0 : i32
    %c0_i32_0 = arith.constant 0 : i32
    %c0_i32_1 = arith.constant 0 : i32
    return %c0_i32, %c0_i32_0 : i32, i32
  }
  func.func @transform_9(%arg0: i32) -> (i32, i32) {
    %c0_i32 = arith.constant 0 : i32
    %c0_i32_0 = arith.constant 0 : i32
    %c0_i32_1 = arith.constant 0 : i32
    return %c0_i32, %c0_i32_0 : i32, i32
  }
  func.func @transform_10(%arg0: i32) -> (i32, i32) {
    %c0_i32 = arith.constant 0 : i32
    %c0_i32_0 = arith.constant 0 : i32
    %c0_i32_1 = arith.constant 0 : i32
    return %c0_i32, %c0_i32_0 : i32, i32
  }
  func.func @transform_11(%arg0: i32) -> (i32, i32) {
    %c0_i32 = arith.constant 0 : i32
    %c0_i32_0 = arith.constant 0 : i32
    return %arg0, %c0_i32 : i32, i32
  }
}

</mosaic_0001>

<bundles_post_ra>
// kernel: fcnet_forward.1
= control target key start
LH: loop header
LB: loop body
LE: loop exit
PB: predicated region body
PF: predicated region fallthrough
CT: control target
= control target key end

     0   :  { %vm16753_vm0 = vmmov 0   ;;  %s22791_s1 = inlined_call_operand.vmem [shape: bf16[3072,1024], index: 1, kind: input, shape index: {}]   ;;  %s22792_s0 = inlined_call_operand.vmem [shape: bf16[8,3072], index: 0, kind: input, shape index: {}]   ;;  %s22793_s3 = inlined_call_operand.vmem [shape: bf16[1024,512], index: 3, kind: input, shape index: {}]   ;;  %s22794_s2 = inlined_call_operand.vmem [shape: f32[1,1024], index: 2, kind: input, shape index: {}]   ;;  %s22795_s5 = inlined_call_operand.vmem [shape: bf16[512,256], index: 5, kind: input, shape index: {}]   ;;  %s22796_s7 = inlined_call_operand.vmem [shape: bf16[256,128], index: 7, kind: input, shape index: {}]   ;;  %s22797_s4 = inlined_call_operand.vmem [shape: f32[1,512], index: 4, kind: input, shape index: {}]   ;;  %s22798_s9 = inlined_call_operand.vmem [shape: bf16[128,128], index: 9, kind: input, shape index: {}]   ;;  %s22799_s6 = inlined_call_operand.vmem [shape: f32[1,256], index: 6, kind: input, shape index: {}]   ;;  %s22800_s8 = inlined_call_operand.vmem [shape: f32[1,128], index: 8, kind: input, shape index: {}]   ;;  %s22801_s10 = inlined_call_operand.vmem [shape: f32[1,128], index: 10, kind: input, shape index: {}]   ;;  %s22802_s11 = inlined_call_operand.vmem [shape: f32[8,128], index: 11, kind: output, shape index: {}]  }
   0x1   :  { %v51_v0 = vld [vmem:[%s22791_s1] sm:$0xff]  ;;  %v52_v2 = vld [vmem:[%s22791_s1 + $0x8] sm:$0xff] }
   0x2   :  { %v55_v1 = vld [vmem:[%s22791_s1 + $0x20] sm:$0xff]  ;;  %v56_v4 = vld [vmem:[%s22791_s1 + $0x28] sm:$0xff] }
   0x3   :  { %v14071_v3 = vcombine.high %v51_v0, %v55_v1  ;;  %v14070_v5 = vcombine.low %v51_v0, %v55_v1  ;;  %v59_v6 = vld [vmem:[%s22791_s1 + $0x40] sm:$0xff]  ;;  %v14073_v8 = vcombine.high %v52_v2, %v56_v4  ;;  %v14072_v9 = vcombine.low %v52_v2, %v56_v4  ;;  %v60_v11 = vld [vmem:[%s22791_s1 + $0x48] sm:$0xff] }
   0x4   :  { %v63_v7 = vld [vmem:[%s22791_s1 + $0x60] sm:$0xff]  ;;  %v64_v12 = vld [vmem:[%s22791_s1 + $0x68] sm:$0xff] }
   0x5   :  { %v14079_v10 = vcombine.high %v59_v6, %v63_v7  ;;  %v67_v13 = vld [vmem:[%s22791_s1 + $0x80] sm:$0xff]  ;;  %9393 = vmatprep.subr.bf16.mxu0 %v14071_v3  ;;  %v14081_v14 = vcombine.high %v60_v11, %v64_v12  ;;  %v68_v16 = vld [vmem:[%s22791_s1 + $0x88] sm:$0xff]  ;;  %9885 = vmatprep.subr.bf16.mxu1 %v14073_v8  ;;  %v14078_v18 = vcombine.low %v59_v6, %v63_v7 }
   0x6   :  { %v71_v15 = vld [vmem:[%s22791_s1 + $0xa0] sm:$0xff]  ;;  %v72_v17 = vld [vmem:[%s22791_s1 + $0xa8] sm:$0xff]  ;;  %9394 = vmatpush1.bf16.msra.mxu0 %v14070_v5  ;;  %9886 = vmatpush1.bf16.msra.mxu1 %v14072_v9  ;;  %v14080_v19 = vcombine.low %v60_v11, %v64_v12 }
   0x7   :  { %9395 = vmatprep.subr.bf16.mxu0 %v14079_v10  ;;  %v14087_v20 = vcombine.high %v67_v13, %v71_v15  ;;  %9887 = vmatprep.subr.bf16.mxu1 %v14081_v14  ;;  %v14089_v21 = vcombine.high %v68_v16, %v72_v17  ;;  %v75_v22 = vld [vmem:[%s22791_s1 + $0xc0] sm:$0xff]  ;;  %v76_v24 = vld [vmem:[%s22791_s1 + $0xc8] sm:$0xff]  ;;  %v14086_v26 = vcombine.low %v67_v13, %v71_v15 }
   0x8   :  { %v79_v23 = vld [vmem:[%s22791_s1 + $0xe0] sm:$0xff]  ;;  %v80_v25 = vld [vmem:[%s22791_s1 + $0xe8] sm:$0xff]  ;;  %v14088_v27 = vcombine.low %v68_v16, %v72_v17 }
   0x9   :  { %v14095_v28 = vcombine.high %v75_v22, %v79_v23  ;;  %v14097_v29 = vcombine.high %v76_v24, %v80_v25  ;;  %v83_v30 = vld [vmem:[%s22791_s1 + $0x100] sm:$0xff]  ;;  %v84_v32 = vld [vmem:[%s22791_s1 + $0x108] sm:$0xff]  ;;  %v14094_v34 = vcombine.low %v75_v22, %v79_v23  ;;  %v14096_v35 = vcombine.low %v76_v24, %v80_v25 }
   0xa   :  { %9396 = vmatpush1.bf16.msra.mxu0 %v14078_v18  ;;  %9888 = vmatpush1.bf16.msra.mxu1 %v14080_v19  ;;  %v87_v31 = vld [vmem:[%s22791_s1 + $0x120] sm:$0xff]  ;;  %v88_v33 = vld [vmem:[%s22791_s1 + $0x128] sm:$0xff] }
   0xb   :  { %9397 = vmatprep.subr.bf16.mxu0 %v14087_v20  ;;  %9889 = vmatprep.subr.bf16.mxu1 %v14089_v21  ;;  %v14103_v36 = vcombine.high %v83_v30, %v87_v31  ;;  %v14105_v37 = vcombine.high %v84_v32, %v88_v33  ;;  %v91_v38 = vld [vmem:[%s22791_s1 + $0x140] sm:$0xff]  ;;  %v92_v40 = vld [vmem:[%s22791_s1 + $0x148] sm:$0xff]  ;;  %v14102_v42 = vcombine.low %v83_v30, %v87_v31 }
   0xc   :  { %v95_v39 = vld [vmem:[%s22791_s1 + $0x160] sm:$0xff]  ;;  %v96_v41 = vld [vmem:[%s22791_s1 + $0x168] sm:$0xff]  ;;  %v14104_v43 = vcombine.low %v84_v32, %v88_v33 }
   0xd   :  { %v14111_v44 = vcombine.high %v91_v38, %v95_v39  ;;  %v14113_v45 = vcombine.high %v92_v40, %v96_v41  ;;  %v99_v46 = vld [vmem:[%s22791_s1 + $0x180] sm:$0xff]  ;;  %v100_v48 = vld [vmem:[%s22791_s1 + $0x188] sm:$0xff]  ;;  %v14110_v50 = vcombine.low %v91_v38, %v95_v39  ;;  %v14112_v51 = vcombine.low %v92_v40, %v96_v41 }
   0xe   :  { %9398 = vmatpush1.bf16.msra.mxu0 %v14086_v26  ;;  %9890 = vmatpush1.bf16.msra.mxu1 %v14088_v27  ;;  %v103_v47 = vld [vmem:[%s22791_s1 + $0x1a0] sm:$0xff]  ;;  %v104_v49 = vld [vmem:[%s22791_s1 + $0x1a8] sm:$0xff] }
   0xf   :  { %9399 = vmatprep.subr.bf16.mxu0 %v14095_v28  ;;  %9891 = vmatprep.subr.bf16.mxu1 %v14097_v29  ;;  %v14119_v52 = vcombine.high %v99_v46, %v103_v47  ;;  %v16901_v53 = vld [vmem:[%s22792_s0] sm:$0xff]  ;;  %v14121_v54 = vcombine.high %v100_v48, %v104_v49  ;;  %v108_v58 = vld [vmem:[%s22791_s1 + $0x1c8] sm:$0xff]  ;;  %v14118_v60 = vcombine.low %v99_v46, %v103_v47 }
  0x10   :  { %v107_v55 = vld [vmem:[%s22791_s1 + $0x1c0] sm:$0xff]  ;;  %v16911_v57 = vcombine.high %v16901_v53, %v16901_v53  ;;  %v112_v59 = vld [vmem:[%s22791_s1 + $0x1e8] sm:$0xff]  ;;  %v14120_v61 = vcombine.low %v100_v48, %v104_v49 }
  0x11   :  { %v111_v56 = vld [vmem:[%s22791_s1 + $0x1e0] sm:$0xff]  ;;  %v14129_v63 = vcombine.high %v108_v58, %v112_v59  ;;  %v116_v2 = vld [vmem:[%s22791_s1 + $0x208] sm:$0xff]  ;;  %v14128_v5 = vcombine.low %v108_v58, %v112_v59 }
  0x12   :  { %9400 = vmatpush1.bf16.msra.mxu0 %v14094_v34  ;;  %9892 = vmatpush1.bf16.msra.mxu1 %v14096_v35  ;;  %v14127_v62 = vcombine.high %v107_v55, %v111_v56  ;;  %v115_v0 = vld [vmem:[%s22791_s1 + $0x200] sm:$0xff]  ;;  %v120_v3 = vld [vmem:[%s22791_s1 + $0x228] sm:$0xff]  ;;  %v14126_v4 = vcombine.low %v107_v55, %v111_v56 }
  0x13   :  { %9401 = vmatprep.subr.bf16.mxu0 %v14103_v36  ;;  %9893 = vmatprep.subr.bf16.mxu1 %v14105_v37  ;;  %v119_v1 = vld [vmem:[%s22791_s1 + $0x220] sm:$0xff]  ;;  %v14137_v7 = vcombine.high %v116_v2, %v120_v3  ;;  %v124_v10 = vld [vmem:[%s22791_s1 + $0x248] sm:$0xff]  ;;  %v14136_v13 = vcombine.low %v116_v2, %v120_v3 }
  0x14   :  { %9425 = vmatprep.mubr.bf16.mxu0 %v16911_v57  ;;  %9917 = vmatprep.mubr.bf16.mxu1 %v16911_v57  ;;  %v14135_v6 = vcombine.high %v115_v0, %v119_v1  ;;  %v123_v8 = vld [vmem:[%s22791_s1 + $0x240] sm:$0xff]  ;;  %v128_v11 = vld [vmem:[%s22791_s1 + $0x268] sm:$0xff]  ;;  %v14134_v12 = vcombine.low %v115_v0, %v119_v1 }
  0x15   :  { %v127_v9 = vld [vmem:[%s22791_s1 + $0x260] sm:$0xff]  ;;  %v14145_v15 = vcombine.high %v124_v10, %v128_v11  ;;  %v132_v18 = vld [vmem:[%s22791_s1 + $0x288] sm:$0xff]  ;;  %v14144_v21 = vcombine.low %v124_v10, %v128_v11 }
  0x16   :  { %9402 = vmatpush1.bf16.msra.mxu0 %v14102_v42  ;;  %9894 = vmatpush1.bf16.msra.mxu1 %v14104_v43  ;;  %v14143_v14 = vcombine.high %v123_v8, %v127_v9  ;;  %v131_v16 = vld [vmem:[%s22791_s1 + $0x280] sm:$0xff]  ;;  %v136_v19 = vld [vmem:[%s22791_s1 + $0x2a8] sm:$0xff]  ;;  %v14142_v20 = vcombine.low %v123_v8, %v127_v9 }
  0x17   :  { %9403 = vmatprep.subr.bf16.mxu0 %v14111_v44  ;;  %9895 = vmatprep.subr.bf16.mxu1 %v14113_v45  ;;  %v135_v17 = vld [vmem:[%s22791_s1 + $0x2a0] sm:$0xff]  ;;  %v14153_v23 = vcombine.high %v132_v18, %v136_v19  ;;  %v140_v26 = vld [vmem:[%s22791_s1 + $0x2c8] sm:$0xff]  ;;  %v14152_v29 = vcombine.low %v132_v18, %v136_v19 }
  0x18   :  { %v14151_v22 = vcombine.high %v131_v16, %v135_v17  ;;  %v139_v24 = vld [vmem:[%s22791_s1 + $0x2c0] sm:$0xff]  ;;  %v144_v27 = vld [vmem:[%s22791_s1 + $0x2e8] sm:$0xff]  ;;  %v14150_v28 = vcombine.low %v131_v16, %v135_v17 }
  0x19   :  { %v143_v25 = vld [vmem:[%s22791_s1 + $0x2e0] sm:$0xff]  ;;  %v14161_v31 = vcombine.high %v140_v26, %v144_v27  ;;  %v148_v34 = vld [vmem:[%s22791_s1 + $0x308] sm:$0xff]  ;;  %v14160_v37 = vcombine.low %v140_v26, %v144_v27 }
  0x1a   :  { %9404 = vmatpush1.bf16.msra.mxu0 %v14110_v50  ;;  %9896 = vmatpush1.bf16.msra.mxu1 %v14112_v51  ;;  %v14159_v30 = vcombine.high %v139_v24, %v143_v25  ;;  %v147_v32 = vld [vmem:[%s22791_s1 + $0x300] sm:$0xff]  ;;  %v152_v35 = vld [vmem:[%s22791_s1 + $0x328] sm:$0xff]  ;;  %v14158_v36 = vcombine.low %v139_v24, %v143_v25 }
  0x1b   :  { %9405 = vmatprep.subr.bf16.mxu0 %v14119_v52  ;;  %9897 = vmatprep.subr.bf16.mxu1 %v14121_v54  ;;  %v151_v33 = vld [vmem:[%s22791_s1 + $0x320] sm:$0xff]  ;;  %v14169_v39 = vcombine.high %v148_v34, %v152_v35  ;;  %v156_v42 = vld [vmem:[%s22791_s1 + $0x348] sm:$0xff]  ;;  %v14168_v45 = vcombine.low %v148_v34, %v152_v35 }
  0x1c   :  { %v14167_v38 = vcombine.high %v147_v32, %v151_v33  ;;  %v155_v40 = vld [vmem:[%s22791_s1 + $0x340] sm:$0xff]  ;;  %v160_v43 = vld [vmem:[%s22791_s1 + $0x368] sm:$0xff]  ;;  %v14166_v44 = vcombine.low %v147_v32, %v151_v33 }
  0x1d   :  { %v159_v41 = vld [vmem:[%s22791_s1 + $0x360] sm:$0xff]  ;;  %v14177_v47 = vcombine.high %v156_v42, %v160_v43  ;;  %v164_v50 = vld [vmem:[%s22791_s1 + $0x388] sm:$0xff]  ;;  %v14176_v54 = vcombine.low %v156_v42, %v160_v43 }
  0x1e   :  { %9406 = vmatpush1.bf16.msra.mxu0 %v14118_v60  ;;  %9898 = vmatpush1.bf16.msra.mxu1 %v14120_v61  ;;  %v14175_v46 = vcombine.high %v155_v40, %v159_v41  ;;  %v163_v48 = vld [vmem:[%s22791_s1 + $0x380] sm:$0xff]  ;;  %v168_v51 = vld [vmem:[%s22791_s1 + $0x3a8] sm:$0xff]  ;;  %v14174_v52 = vcombine.low %v155_v40, %v159_v41 }
  0x1f   :  { %9407 = vmatprep.subr.bf16.mxu0 %v14127_v62  ;;  %9899 = vmatprep.subr.bf16.mxu1 %v14129_v63  ;;  %v167_v49 = vld [vmem:[%s22791_s1 + $0x3a0] sm:$0xff]  ;;  %v14185_v56 = vcombine.high %v164_v50, %v168_v51  ;;  %v172_v60 = vld [vmem:[%s22791_s1 + $0x3c8] sm:$0xff]  ;;  %v14184_v63 = vcombine.low %v164_v50, %v168_v51 }
  0x20   :  { %v14183_v55 = vcombine.high %v163_v48, %v167_v49  ;;  %v171_v58 = vld [vmem:[%s22791_s1 + $0x3c0] sm:$0xff]  ;;  %v176_v61 = vld [vmem:[%s22791_s1 + $0x3e8] sm:$0xff]  ;;  %v14182_v62 = vcombine.low %v163_v48, %v167_v49 }
  0x21   :  { %v175_v59 = vld [vmem:[%s22791_s1 + $0x3e0] sm:$0xff]  ;;  %v14193_v1 = vcombine.high %v172_v60, %v176_v61 }
  0x22   :  { %9408 = vmatpush1.bf16.msra.mxu0 %v14126_v4  ;;  %9900 = vmatpush1.bf16.msra.mxu1 %v14128_v5  ;;  %v14191_v0 = vcombine.high %v171_v58, %v175_v59  ;;  %v179_v2 = vld [vmem:[%s22791_s1 + $0x400] sm:$0xff]  ;;  %v180_v4 = vld [vmem:[%s22791_s1 + $0x408] sm:$0xff] }
  0x23   :  { %9409 = vmatprep.subr.bf16.mxu0 %v14135_v6  ;;  %9901 = vmatprep.subr.bf16.mxu1 %v14137_v7  ;;  %v183_v3 = vld [vmem:[%s22791_s1 + $0x420] sm:$0xff]  ;;  %v184_v5 = vld [vmem:[%s22791_s1 + $0x428] sm:$0xff]  ;;  %v14190_v6 = vcombine.low %v171_v58, %v175_v59  ;;  %v14192_v7 = vcombine.low %v172_v60, %v176_v61 }
  0x24   :  { %v14199_v8 = vcombine.high %v179_v2, %v183_v3  ;;  %v14201_v9 = vcombine.high %v180_v4, %v184_v5  ;;  %v187_v10 = vld [vmem:[%s22791_s1 + $0x440] sm:$0xff]  ;;  %v14198_v16 = vcombine.low %v179_v2, %v183_v3  ;;  %v14200_v17 = vcombine.low %v180_v4, %v184_v5 }
  0x25   :  { %v191_v11 = vld [vmem:[%s22791_s1 + $0x460] sm:$0xff] }
  0x26   :  { %9410 = vmatpush1.bf16.msra.mxu0 %v14134_v12  ;;  %9902 = vmatpush1.bf16.msra.mxu1 %v14136_v13  ;;  %v17037_v12 = vcombine.low %v16901_v53, %v16901_v53  ;;  %v188_v13 = vld [vmem:[%s22791_s1 + $0x448] sm:$0xff]  ;;  %v14207_v53 = vcombine.high %v187_v10, %v191_v11  ;;  %v195_v19 = vld [vmem:[%s22791_s1 + $0x480] sm:$0xff]  ;;  %v14206_v24 = vcombine.low %v187_v10, %v191_v11 }
  0x27   :  { %9411 = vmatprep.subr.bf16.mxu0 %v14143_v14  ;;  %9903 = vmatprep.subr.bf16.mxu1 %v14145_v15  ;;  %v192_v14 = vld [vmem:[%s22791_s1 + $0x468] sm:$0xff] }
  0x28   :  { %v17048_v15 = vld [vmem:[%s22792_s0 + $0x8] sm:$0xff]  ;;  %v14209_v18 = vcombine.high %v188_v13, %v192_v14  ;;  %v14208_v25 = vcombine.low %v188_v13, %v192_v14 }
  0x2a   :  { %9412 = vmatpush1.bf16.msra.mxu0 %v14142_v20  ;;  %9904 = vmatpush1.bf16.msra.mxu1 %v14144_v21  ;;  %v199_v20 = vld [vmem:[%s22791_s1 + $0x4a0] sm:$0xff]  ;;  %v17058_v21 = vcombine.high %v17048_v15, %v17048_v15 }
  0x2b   :  { %9413 = vmatprep.subr.bf16.mxu0 %v14151_v22  ;;  %9905 = vmatprep.subr.bf16.mxu1 %v14153_v23  ;;  %v196_v22 = vld [vmem:[%s22791_s1 + $0x488] sm:$0xff]  ;;  %v14215_v26 = vcombine.high %v195_v19, %v199_v20  ;;  %v14214_v32 = vcombine.low %v195_v19, %v199_v20 }
  0x2c   :  { %v200_v23 = vld [vmem:[%s22791_s1 + $0x4a8] sm:$0xff] }
  0x2d   :  { %v14217_v27 = vcombine.high %v196_v22, %v200_v23  ;;  %v14216_v33 = vcombine.low %v196_v22, %v200_v23 }
  0x2e   :  { %9414 = vmatpush1.bf16.msra.mxu0 %v14150_v28  ;;  %9906 = vmatpush1.bf16.msra.mxu1 %v14152_v29  ;;  %v203_v28 = vld [vmem:[%s22791_s1 + $0x4c0] sm:$0xff] }
  0x2f   :  { %9415 = vmatprep.subr.bf16.mxu0 %v14159_v30  ;;  %9907 = vmatprep.subr.bf16.mxu1 %v14161_v31  ;;  %v207_v29 = vld [vmem:[%s22791_s1 + $0x4e0] sm:$0xff]  ;;  %v204_v30 = vld [vmem:[%s22791_s1 + $0x4c8] sm:$0xff] }
  0x30   :  { %v208_v31 = vld [vmem:[%s22791_s1 + $0x4e8] sm:$0xff]  ;;  %v14223_v34 = vcombine.high %v203_v28, %v207_v29  ;;  %v14222_v40 = vcombine.low %v203_v28, %v207_v29 }
  0x31   :  { %v14225_v35 = vcombine.high %v204_v30, %v208_v31  ;;  %v14224_v41 = vcombine.low %v204_v30, %v208_v31 }
  0x32   :  { %9416 = vmatpush1.bf16.msra.mxu0 %v14158_v36  ;;  %9908 = vmatpush1.bf16.msra.mxu1 %v14160_v37  ;;  %v211_v36 = vld [vmem:[%s22791_s1 + $0x500] sm:$0xff] }
  0x33   :  { %9417 = vmatprep.subr.bf16.mxu0 %v14167_v38  ;;  %9909 = vmatprep.subr.bf16.mxu1 %v14169_v39  ;;  %v215_v37 = vld [vmem:[%s22791_s1 + $0x520] sm:$0xff]  ;;  %v212_v38 = vld [vmem:[%s22791_s1 + $0x508] sm:$0xff] }
  0x34   :  { %v216_v39 = vld [vmem:[%s22791_s1 + $0x528] sm:$0xff]  ;;  %v14231_v42 = vcombine.high %v211_v36, %v215_v37  ;;  %v14230_v48 = vcombine.low %v211_v36, %v215_v37 }
  0x35   :  { %v14233_v43 = vcombine.high %v212_v38, %v216_v39  ;;  %v14232_v49 = vcombine.low %v212_v38, %v216_v39 }
  0x36   :  { %9418 = vmatpush1.bf16.msra.mxu0 %v14166_v44  ;;  %9910 = vmatpush1.bf16.msra.mxu1 %v14168_v45  ;;  %v219_v44 = vld [vmem:[%s22791_s1 + $0x540] sm:$0xff] }
  0x37   :  { %9419 = vmatprep.subr.bf16.mxu0 %v14175_v46  ;;  %9911 = vmatprep.subr.bf16.mxu1 %v14177_v47  ;;  %v223_v45 = vld [vmem:[%s22791_s1 + $0x560] sm:$0xff]  ;;  %v220_v46 = vld [vmem:[%s22791_s1 + $0x548] sm:$0xff] }
  0x38   :  { %v224_v47 = vld [vmem:[%s22791_s1 + $0x568] sm:$0xff]  ;;  %v14239_v50 = vcombine.high %v219_v44, %v223_v45  ;;  %v14238_v58 = vcombine.low %v219_v44, %v223_v45 }
  0x39   :  { %v14241_v51 = vcombine.high %v220_v46, %v224_v47  ;;  %v14240_v59 = vcombine.low %v220_v46, %v224_v47 }
  0x3a   :  { %9420 = vmatpush1.bf16.msra.mxu0 %v14174_v52  ;;  %9912 = vmatpush1.bf16.msra.mxu1 %v14176_v54  ;;  %v227_v52 = vld [vmem:[%s22791_s1 + $0x580] sm:$0xff] }
  0x3b   :  { %9421 = vmatprep.subr.bf16.mxu0 %v14183_v55  ;;  %9913 = vmatprep.subr.bf16.mxu1 %v14185_v56  ;;  %v231_v54 = vld [vmem:[%s22791_s1 + $0x5a0] sm:$0xff]  ;;  %v228_v55 = vld [vmem:[%s22791_s1 + $0x588] sm:$0xff] }
  0x3c   :  { %v232_v56 = vld [vmem:[%s22791_s1 + $0x5a8] sm:$0xff]  ;;  %v14247_v60 = vcombine.high %v227_v52, %v231_v54  ;;  %v14246_v2 = vcombine.low %v227_v52, %v231_v54 }
  0x3d   :  { %v14249_v61 = vcombine.high %v228_v55, %v232_v56  ;;  %v14248_v3 = vcombine.low %v228_v55, %v232_v56 }
  0x3e   :  { %9422 = vmatpush1.bf16.msra.mxu0 %v14182_v62  ;;  %9914 = vmatpush1.bf16.msra.mxu1 %v14184_v63  ;;  %v235_v62 = vld [vmem:[%s22791_s1 + $0x5c0] sm:$0xff] }
  0x3f   :  { %9423 = vmatprep.subr.bf16.mxu0 %v14191_v0  ;;  %9915 = vmatprep.subr.bf16.mxu1 %v14193_v1  ;;  %v239_v63 = vld [vmem:[%s22791_s1 + $0x5e0] sm:$0xff]  ;;  %v236_v0 = vld [vmem:[%s22791_s1 + $0x5c8] sm:$0xff] }
  0x40   :  { %v240_v1 = vld [vmem:[%s22791_s1 + $0x5e8] sm:$0xff]  ;;  %v14255_v4 = vcombine.high %v235_v62, %v239_v63  ;;  %v14254_v10 = vcombine.low %v235_v62, %v239_v63 }
  0x41   :  { %v14257_v5 = vcombine.high %v236_v0, %v240_v1  ;;  %v14256_v11 = vcombine.low %v236_v0, %v240_v1 }
  0x42   :  { %9424 = vmatpush1.bf16.msra.mxu0 %v14190_v6  ;;  %9916 = vmatpush1.bf16.msra.mxu1 %v14192_v7  ;;  %v243_v6 = vld [vmem:[%s22791_s1 + $0x600] sm:$0xff] }
  0x43   :  { %9434 = vmatprep.subr.bf16.mxu0 %v14199_v8  ;;  %9926 = vmatprep.subr.bf16.mxu1 %v14201_v9  ;;  %v247_v7 = vld [vmem:[%s22791_s1 + $0x620] sm:$0xff]  ;;  %v244_v8 = vld [vmem:[%s22791_s1 + $0x608] sm:$0xff] }
  0x44   :  { %v248_v9 = vld [vmem:[%s22791_s1 + $0x628] sm:$0xff]  ;;  %v14263_v13 = vcombine.high %v243_v6, %v247_v7  ;;  %v14262_v19 = vcombine.low %v243_v6, %v247_v7 }
  0x45   :  { %9426 = vmatmul.mubr.bf16.vlgmr.msra.gmra.mrb[0].mxu0 %v17037_v12  ;;  %9918 = vmatmul.mubr.bf16.vlgmr.msra.gmra.mrb[0].mxu1 %v17037_v12  ;;  %v14265_v14 = vcombine.high %v244_v8, %v248_v9  ;;  %v14264_v20 = vcombine.low %v244_v8, %v248_v9 }
  0x46   :  { %9435 = vmatpush1.bf16.msra.mxu0 %v14198_v16  ;;  %9927 = vmatpush1.bf16.msra.mxu1 %v14200_v17  ;;  %v251_v16 = vld [vmem:[%s22791_s1 + $0x640] sm:$0xff] }
  0x47   :  { %9436 = vmatprep.subr.bf16.mxu0 %v14207_v53  ;;  %9928 = vmatprep.subr.bf16.mxu1 %v14209_v18  ;;  %v255_v17 = vld [vmem:[%s22791_s1 + $0x660] sm:$0xff]  ;;  %v252_v53 = vld [vmem:[%s22791_s1 + $0x648] sm:$0xff] }
  0x48   :  { %9466 = vmatprep.mubr.bf16.mxu0 %v17058_v21  ;;  %9958 = vmatprep.mubr.bf16.mxu1 %v17058_v21  ;;  %v256_v18 = vld [vmem:[%s22791_s1 + $0x668] sm:$0xff]  ;;  %v14271_v22 = vcombine.high %v251_v16, %v255_v17  ;;  %v14270_v28 = vcombine.low %v251_v16, %v255_v17 }
  0x49   :  { %v14273_v23 = vcombine.high %v252_v53, %v256_v18  ;;  %v14272_v29 = vcombine.low %v252_v53, %v256_v18 }
  0x4a   :  { %9437 = vmatpush1.bf16.msra.mxu0 %v14206_v24  ;;  %9929 = vmatpush1.bf16.msra.mxu1 %v14208_v25  ;;  %v259_v24 = vld [vmem:[%s22791_s1 + $0x680] sm:$0xff] }
  0x4b   :  { %9438 = vmatprep.subr.bf16.mxu0 %v14215_v26  ;;  %9930 = vmatprep.subr.bf16.mxu1 %v14217_v27  ;;  %v263_v25 = vld [vmem:[%s22791_s1 + $0x6a0] sm:$0xff]  ;;  %v260_v26 = vld [vmem:[%s22791_s1 + $0x688] sm:$0xff] }
  0x4c   :  { %v264_v27 = vld [vmem:[%s22791_s1 + $0x6a8] sm:$0xff]  ;;  %v14279_v30 = vcombine.high %v259_v24, %v263_v25  ;;  %v14278_v36 = vcombine.low %v259_v24, %v263_v25  ;;  %v17257_v25 = vld [vmem:[%s22792_s0 + $0x10] sm:$0xff] }
  0x4d   :  { %v14281_v31 = vcombine.high %v260_v26, %v264_v27  ;;  %v14280_v37 = vcombine.low %v260_v26, %v264_v27  ;;  %v320_v24 = vld [vmem:[%s22791_s1 + $0x868] sm:$0xff] }
  0x4e   :  { %9439 = vmatpush1.bf16.msra.mxu0 %v14214_v32  ;;  %9931 = vmatpush1.bf16.msra.mxu1 %v14216_v33  ;;  %v267_v32 = vld [vmem:[%s22791_s1 + $0x6c0] sm:$0xff] }
  0x4f   :  { %9440 = vmatprep.subr.bf16.mxu0 %v14223_v34  ;;  %9932 = vmatprep.subr.bf16.mxu1 %v14225_v35  ;;  %v271_v33 = vld [vmem:[%s22791_s1 + $0x6e0] sm:$0xff]  ;;  %v268_v34 = vld [vmem:[%s22791_s1 + $0x6c8] sm:$0xff] }
  0x50   :  { %v272_v35 = vld [vmem:[%s22791_s1 + $0x6e8] sm:$0xff]  ;;  %v14287_v38 = vcombine.high %v267_v32, %v271_v33  ;;  %v14286_v44 = vcombine.low %v267_v32, %v271_v33 }
  0x51   :  { %v14289_v39 = vcombine.high %v268_v34, %v272_v35  ;;  %v14288_v45 = vcombine.low %v268_v34, %v272_v35  ;;  %v324_v32 = vld [vmem:[%s22791_s1 + $0x888] sm:$0xff] }
  0x52   :  { %9441 = vmatpush1.bf16.msra.mxu0 %v14222_v40  ;;  %9933 = vmatpush1.bf16.msra.mxu1 %v14224_v41  ;;  %v275_v40 = vld [vmem:[%s22791_s1 + $0x700] sm:$0xff]  ;;  %v328_v33 = vld [vmem:[%s22791_s1 + $0x8a8] sm:$0xff] }
  0x53   :  { %9442 = vmatprep.subr.bf16.mxu0 %v14231_v42  ;;  %9934 = vmatprep.subr.bf16.mxu1 %v14233_v43  ;;  %v279_v41 = vld [vmem:[%s22791_s1 + $0x720] sm:$0xff]  ;;  %v276_v42 = vld [vmem:[%s22791_s1 + $0x708] sm:$0xff] }
  0x54   :  { %v280_v43 = vld [vmem:[%s22791_s1 + $0x728] sm:$0xff]  ;;  %v14295_v46 = vcombine.high %v275_v40, %v279_v41  ;;  %v14294_v52 = vcombine.low %v275_v40, %v279_v41 }
  0x55   :  { %v14297_v47 = vcombine.high %v276_v42, %v280_v43  ;;  %v14296_v54 = vcombine.low %v276_v42, %v280_v43  ;;  %v332_v40 = vld [vmem:[%s22791_s1 + $0x8c8] sm:$0xff]  ;;  %v14344_v43 = vcombine.low %v324_v32, %v328_v33 }
  0x56   :  { %9443 = vmatpush1.bf16.msra.mxu0 %v14230_v48  ;;  %9935 = vmatpush1.bf16.msra.mxu1 %v14232_v49  ;;  %v283_v48 = vld [vmem:[%s22791_s1 + $0x740] sm:$0xff]  ;;  %v336_v41 = vld [vmem:[%s22791_s1 + $0x8e8] sm:$0xff] }
  0x57   :  { %9444 = vmatprep.subr.bf16.mxu0 %v14239_v50  ;;  %9936 = vmatprep.subr.bf16.mxu1 %v14241_v51  ;;  %v287_v49 = vld [vmem:[%s22791_s1 + $0x760] sm:$0xff]  ;;  %v284_v50 = vld [vmem:[%s22791_s1 + $0x748] sm:$0xff] }
  0x58   :  { %v288_v51 = vld [vmem:[%s22791_s1 + $0x768] sm:$0xff]  ;;  %v14303_v55 = vcombine.high %v283_v48, %v287_v49  ;;  %v14302_v62 = vcombine.low %v283_v48, %v287_v49 }
  0x59   :  { %v14305_v56 = vcombine.high %v284_v50, %v288_v51  ;;  %v14304_v63 = vcombine.low %v284_v50, %v288_v51  ;;  %v340_v48 = vld [vmem:[%s22791_s1 + $0x908] sm:$0xff]  ;;  %v14352_v51 = vcombine.low %v332_v40, %v336_v41 }
  0x5a   :  { %9445 = vmatpush1.bf16.msra.mxu0 %v14238_v58  ;;  %9937 = vmatpush1.bf16.msra.mxu1 %v14240_v59  ;;  %v291_v58 = vld [vmem:[%s22791_s1 + $0x780] sm:$0xff]  ;;  %v344_v49 = vld [vmem:[%s22791_s1 + $0x928] sm:$0xff] }
  0x5b   :  { %9446 = vmatprep.subr.bf16.mxu0 %v14247_v60  ;;  %9938 = vmatprep.subr.bf16.mxu1 %v14249_v61  ;;  %v295_v59 = vld [vmem:[%s22791_s1 + $0x7a0] sm:$0xff]  ;;  %v292_v60 = vld [vmem:[%s22791_s1 + $0x788] sm:$0xff] }
  0x5c   :  { %v296_v61 = vld [vmem:[%s22791_s1 + $0x7a8] sm:$0xff]  ;;  %v14311_v0 = vcombine.high %v291_v58, %v295_v59  ;;  %v14310_v6 = vcombine.low %v291_v58, %v295_v59 }
  0x5d   :  { %v14313_v1 = vcombine.high %v292_v60, %v296_v61  ;;  %v14312_v7 = vcombine.low %v292_v60, %v296_v61  ;;  %v348_v58 = vld [vmem:[%s22791_s1 + $0x948] sm:$0xff]  ;;  %v14360_v61 = vcombine.low %v340_v48, %v344_v49 }
  0x5e   :  { %9447 = vmatpush1.bf16.msra.mxu0 %v14246_v2  ;;  %9939 = vmatpush1.bf16.msra.mxu1 %v14248_v3  ;;  %v299_v2 = vld [vmem:[%s22791_s1 + $0x7c0] sm:$0xff]  ;;  %v352_v59 = vld [vmem:[%s22791_s1 + $0x968] sm:$0xff] }
  0x5f   :  { %9448 = vmatprep.subr.bf16.mxu0 %v14255_v4  ;;  %9940 = vmatprep.subr.bf16.mxu1 %v14257_v5  ;;  %v303_v3 = vld [vmem:[%s22791_s1 + $0x7e0] sm:$0xff]  ;;  %v300_v4 = vld [vmem:[%s22791_s1 + $0x7c8] sm:$0xff] }
  0x60   :  { %v304_v5 = vld [vmem:[%s22791_s1 + $0x7e8] sm:$0xff]  ;;  %v14319_v8 = vcombine.high %v299_v2, %v303_v3  ;;  %v14318_v16 = vcombine.low %v299_v2, %v303_v3 }
  0x61   :  { %v14321_v9 = vcombine.high %v300_v4, %v304_v5  ;;  %v14320_v17 = vcombine.low %v300_v4, %v304_v5  ;;  %v356_v2 = vld [vmem:[%s22791_s1 + $0x988] sm:$0xff]  ;;  %v14368_v5 = vcombine.low %v348_v58, %v352_v59 }
  0x62   :  { %9449 = vmatpush1.bf16.msra.mxu0 %v14254_v10  ;;  %9941 = vmatpush1.bf16.msra.mxu1 %v14256_v11  ;;  %v307_v10 = vld [vmem:[%s22791_s1 + $0x800] sm:$0xff]  ;;  %v360_v3 = vld [vmem:[%s22791_s1 + $0x9a8] sm:$0xff] }
  0x63   :  { %9450 = vmatprep.subr.bf16.mxu0 %v14263_v13  ;;  %9942 = vmatprep.subr.bf16.mxu1 %v14265_v14  ;;  %v311_v11 = vld [vmem:[%s22791_s1 + $0x820] sm:$0xff]  ;;  %v308_v13 = vld [vmem:[%s22791_s1 + $0x808] sm:$0xff] }
  0x64   :  { %v312_v14 = vld [vmem:[%s22791_s1 + $0x828] sm:$0xff]  ;;  %v14327_v53 = vcombine.high %v307_v10, %v311_v11  ;;  %v14326_v26 = vcombine.low %v307_v10, %v311_v11 }
  0x65   :  { %v14329_v18 = vcombine.high %v308_v13, %v312_v14  ;;  %v14328_v27 = vcombine.low %v308_v13, %v312_v14  ;;  %v364_v10 = vld [vmem:[%s22791_s1 + $0x9c8] sm:$0xff]  ;;  %v14376_v14 = vcombine.low %v356_v2, %v360_v3 }
  0x66   :  { %9451 = vmatpush1.bf16.msra.mxu0 %v14262_v19  ;;  %9943 = vmatpush1.bf16.msra.mxu1 %v14264_v20  ;;  %v315_v19 = vld [vmem:[%s22791_s1 + $0x840] sm:$0xff]  ;;  %v368_v11 = vld [vmem:[%s22791_s1 + $0x9e8] sm:$0xff] }
  0x67   :  { %9452 = vmatprep.subr.bf16.mxu0 %v14271_v22  ;;  %9944 = vmatprep.subr.bf16.mxu1 %v14273_v23  ;;  %v319_v20 = vld [vmem:[%s22791_s1 + $0x860] sm:$0xff]  ;;  %v17246_v22 = vcombine.low %v17048_v15, %v17048_v15  ;;  %v316_v23 = vld [vmem:[%s22791_s1 + $0x848] sm:$0xff] }
  0x68   :  { %v14335_v15 = vcombine.high %v315_v19, %v319_v20  ;;  %v14334_v34 = vcombine.low %v315_v19, %v319_v20  ;;  %v14336_v35 = vcombine.low %v316_v23, %v320_v24  ;;  %v372_v19 = vld [vmem:[%s22791_s1 + $0xa08] sm:$0xff] }
  0x69   :  { %v376_v20 = vld [vmem:[%s22791_s1 + $0xa28] sm:$0xff] }
  0x6a   :  { %9453 = vmatpush1.bf16.msra.mxu0 %v14270_v28  ;;  %9945 = vmatpush1.bf16.msra.mxu1 %v14272_v29  ;;  %v14337_v28 = vcombine.high %v316_v23, %v320_v24  ;;  %v323_v29 = vld [vmem:[%s22791_s1 + $0x880] sm:$0xff]  ;;  %v14384_v24 = vcombine.low %v364_v10, %v368_v11 }
  0x6b   :  { %9454 = vmatprep.subr.bf16.mxu0 %v14279_v30  ;;  %9946 = vmatprep.subr.bf16.mxu1 %v14281_v31  ;;  %v327_v30 = vld [vmem:[%s22791_s1 + $0x8a0] sm:$0xff]  ;;  %v17267_v31 = vcombine.high %v17257_v25, %v17257_v25 }
  0x6c   :  { %v14342_v42 = vcombine.low %v323_v29, %v327_v30 }
  0x6e   :  { %9455 = vmatpush1.bf16.msra.mxu0 %v14278_v36  ;;  %9947 = vmatpush1.bf16.msra.mxu1 %v14280_v37  ;;  %v14343_v36 = vcombine.high %v323_v29, %v327_v30  ;;  %v14345_v37 = vcombine.high %v324_v32, %v328_v33  ;;  %v380_v29 = vld [vmem:[%s22791_s1 + $0xa48] sm:$0xff]  ;;  %v14392_v33 = vcombine.low %v372_v19, %v376_v20 }
  0x6f   :  { %9456 = vmatprep.subr.bf16.mxu0 %v14287_v38  ;;  %9948 = vmatprep.subr.bf16.mxu1 %v14289_v39  ;;  %v331_v38 = vld [vmem:[%s22791_s1 + $0x8c0] sm:$0xff]  ;;  %v384_v30 = vld [vmem:[%s22791_s1 + $0xa68] sm:$0xff] }
  0x70   :  { %v335_v39 = vld [vmem:[%s22791_s1 + $0x8e0] sm:$0xff] }
  0x71   :  { %v14350_v50 = vcombine.low %v331_v38, %v335_v39 }
  0x72   :  { %9457 = vmatpush1.bf16.msra.mxu0 %v14286_v44  ;;  %9949 = vmatpush1.bf16.msra.mxu1 %v14288_v45  ;;  %v14351_v44 = vcombine.high %v331_v38, %v335_v39  ;;  %v14353_v45 = vcombine.high %v332_v40, %v336_v41  ;;  %v388_v38 = vld [vmem:[%s22791_s1 + $0xa88] sm:$0xff]  ;;  %v14400_v41 = vcombine.low %v380_v29, %v384_v30 }
  0x73   :  { %9458 = vmatprep.subr.bf16.mxu0 %v14295_v46  ;;  %9950 = vmatprep.subr.bf16.mxu1 %v14297_v47  ;;  %v339_v46 = vld [vmem:[%s22791_s1 + $0x900] sm:$0xff]  ;;  %v392_v39 = vld [vmem:[%s22791_s1 + $0xaa8] sm:$0xff] }
  0x74   :  { %v343_v47 = vld [vmem:[%s22791_s1 + $0x920] sm:$0xff] }
  0x75   :  { %v14358_v60 = vcombine.low %v339_v46, %v343_v47 }
  0x76   :  { %9459 = vmatpush1.bf16.msra.mxu0 %v14294_v52  ;;  %9951 = vmatpush1.bf16.msra.mxu1 %v14296_v54  ;;  %v14359_v52 = vcombine.high %v339_v46, %v343_v47  ;;  %v14361_v54 = vcombine.high %v340_v48, %v344_v49  ;;  %v396_v46 = vld [vmem:[%s22791_s1 + $0xac8] sm:$0xff]  ;;  %v14408_v49 = vcombine.low %v388_v38, %v392_v39 }
  0x77   :  { %9460 = vmatprep.subr.bf16.mxu0 %v14303_v55  ;;  %9952 = vmatprep.subr.bf16.mxu1 %v14305_v56  ;;  %v347_v55 = vld [vmem:[%s22791_s1 + $0x940] sm:$0xff]  ;;  %v400_v47 = vld [vmem:[%s22791_s1 + $0xae8] sm:$0xff] }
  0x78   :  { %v351_v56 = vld [vmem:[%s22791_s1 + $0x960] sm:$0xff] }
  0x79   :  { %v14366_v4 = vcombine.low %v347_v55, %v351_v56 }
  0x7a   :  { %9461 = vmatpush1.bf16.msra.mxu0 %v14302_v62  ;;  %9953 = vmatpush1.bf16.msra.mxu1 %v14304_v63  ;;  %v14367_v62 = vcombine.high %v347_v55, %v351_v56  ;;  %v14369_v63 = vcombine.high %v348_v58, %v352_v59  ;;  %v404_v55 = vld [vmem:[%s22791_s1 + $0xb08] sm:$0xff]  ;;  %v14416_v59 = vcombine.low %v396_v46, %v400_v47 }
  0x7b   :  { %9462 = vmatprep.subr.bf16.mxu0 %v14311_v0  ;;  %9954 = vmatprep.subr.bf16.mxu1 %v14313_v1  ;;  %v355_v0 = vld [vmem:[%s22791_s1 + $0x980] sm:$0xff]  ;;  %v408_v56 = vld [vmem:[%s22791_s1 + $0xb28] sm:$0xff] }
  0x7c   :  { %v359_v1 = vld [vmem:[%s22791_s1 + $0x9a0] sm:$0xff] }
  0x7d   :  { %v14374_v13 = vcombine.low %v355_v0, %v359_v1 }
  0x7e   :  { %9463 = vmatpush1.bf16.msra.mxu0 %v14310_v6  ;;  %9955 = vmatpush1.bf16.msra.mxu1 %v14312_v7  ;;  %v14375_v6 = vcombine.high %v355_v0, %v359_v1  ;;  %v14377_v7 = vcombine.high %v356_v2, %v360_v3  ;;  %v412_v0 = vld [vmem:[%s22791_s1 + $0xb48] sm:$0xff]  ;;  %v14424_v3 = vcombine.low %v404_v55, %v408_v56 }
  0x7f   :  { %9464 = vmatprep.subr.bf16.mxu0 %v14319_v8  ;;  %9956 = vmatprep.subr.bf16.mxu1 %v14321_v9  ;;  %v363_v8 = vld [vmem:[%s22791_s1 + $0x9c0] sm:$0xff]  ;;  %v416_v1 = vld [vmem:[%s22791_s1 + $0xb68] sm:$0xff] }
  0x80   :  { %v367_v9 = vld [vmem:[%s22791_s1 + $0x9e0] sm:$0xff] }
  0x81   :  { %v14382_v23 = vcombine.low %v363_v8, %v367_v9 }
  0x82   :  { %9465 = vmatpush1.bf16.msra.mxu0 %v14318_v16  ;;  %9957 = vmatpush1.bf16.msra.mxu1 %v14320_v17  ;;  %v14383_v16 = vcombine.high %v363_v8, %v367_v9  ;;  %v14385_v17 = vcombine.high %v364_v10, %v368_v11  ;;  %v420_v8 = vld [vmem:[%s22791_s1 + $0xb88] sm:$0xff]  ;;  %v14432_v11 = vcombine.low %v412_v0, %v416_v1 }
  0x83   :  { %9475 = vmatprep.subr.bf16.mxu0 %v14327_v53  ;;  %9967 = vmatprep.subr.bf16.mxu1 %v14329_v18  ;;  %v371_v53 = vld [vmem:[%s22791_s1 + $0xa00] sm:$0xff]  ;;  %v424_v9 = vld [vmem:[%s22791_s1 + $0xba8] sm:$0xff] }
  0x84   :  { %v375_v18 = vld [vmem:[%s22791_s1 + $0xa20] sm:$0xff] }
  0x85   :  { %9467 = vmatmul.mubr.bf16.vlgmr.msra.gmra.mrb[0].mxu0 %v17246_v22  ;;  %9959 = vmatmul.mubr.bf16.vlgmr.msra.gmra.mrb[0].mxu1 %v17246_v22  ;;  %v14390_v32 = vcombine.low %v371_v53, %v375_v18 }
  0x86   :  { %9476 = vmatpush1.bf16.msra.mxu0 %v14326_v26  ;;  %9968 = vmatpush1.bf16.msra.mxu1 %v14328_v27  ;;  %v14391_v26 = vcombine.high %v371_v53, %v375_v18  ;;  %v14393_v27 = vcombine.high %v372_v19, %v376_v20  ;;  %v428_v53 = vld [vmem:[%s22791_s1 + $0xbc8] sm:$0xff]  ;;  %v14440_v20 = vcombine.low %v420_v8, %v424_v9 }
  0x87   :  { %9477 = vmatprep.subr.bf16.mxu0 %v14335_v15  ;;  %9969 = vmatprep.subr.bf16.mxu1 %v14337_v28  ;;  %v379_v15 = vld [vmem:[%s22791_s1 + $0xa40] sm:$0xff]  ;;  %v432_v18 = vld [vmem:[%s22791_s1 + $0xbe8] sm:$0xff] }
  0x88   :  { %9507 = vmatprep.mubr.bf16.mxu0 %v17267_v31  ;;  %9999 = vmatprep.mubr.bf16.mxu1 %v17267_v31  ;;  %v383_v28 = vld [vmem:[%s22791_s1 + $0xa60] sm:$0xff] }
  0x89   :  { %v14398_v40 = vcombine.low %v379_v15, %v383_v28 }
  0x8a   :  { %9478 = vmatpush1.bf16.msra.mxu0 %v14334_v34  ;;  %9970 = vmatpush1.bf16.msra.mxu1 %v14336_v35  ;;  %v14399_v34 = vcombine.high %v379_v15, %v383_v28  ;;  %v14401_v35 = vcombine.high %v380_v29, %v384_v30  ;;  %v436_v15 = vld [vmem:[%s22791_s1 + $0xc08] sm:$0xff]  ;;  %v14448_v30 = vcombine.low %v428_v53, %v432_v18 }
  0x8b   :  { %9479 = vmatprep.subr.bf16.mxu0 %v14343_v36  ;;  %9971 = vmatprep.subr.bf16.mxu1 %v14345_v37  ;;  %v387_v36 = vld [vmem:[%s22791_s1 + $0xa80] sm:$0xff]  ;;  %v440_v28 = vld [vmem:[%s22791_s1 + $0xc28] sm:$0xff] }
  0x8c   :  { %v391_v37 = vld [vmem:[%s22791_s1 + $0xaa0] sm:$0xff] }
  0x8d   :  { %v14406_v48 = vcombine.low %v387_v36, %v391_v37 }
  0x8e   :  { %9480 = vmatpush1.bf16.msra.mxu0 %v14342_v42  ;;  %9972 = vmatpush1.bf16.msra.mxu1 %v14344_v43  ;;  %v14407_v42 = vcombine.high %v387_v36, %v391_v37  ;;  %v14409_v43 = vcombine.high %v388_v38, %v392_v39  ;;  %v17455_v36 = vcombine.low %v17257_v25, %v17257_v25  ;;  %v444_v37 = vld [vmem:[%s22791_s1 + $0xc48] sm:$0xff]  ;;  %v17466_v39 = vld [vmem:[%s22792_s0 + $0x18] sm:$0xff] }
  0x8f   :  { %9481 = vmatprep.subr.bf16.mxu0 %v14351_v44  ;;  %9973 = vmatprep.subr.bf16.mxu1 %v14353_v45  ;;  %v395_v44 = vld [vmem:[%s22791_s1 + $0xac0] sm:$0xff]  ;;  %v448_v38 = vld [vmem:[%s22791_s1 + $0xc68] sm:$0xff] }
  0x90   :  { %v399_v45 = vld [vmem:[%s22791_s1 + $0xae0] sm:$0xff] }
  0x91   :  { %v14414_v58 = vcombine.low %v395_v44, %v399_v45 }
  0x92   :  { %9482 = vmatpush1.bf16.msra.mxu0 %v14350_v50  ;;  %9974 = vmatpush1.bf16.msra.mxu1 %v14352_v51  ;;  %v14415_v50 = vcombine.high %v395_v44, %v399_v45  ;;  %v14417_v51 = vcombine.high %v396_v46, %v400_v47  ;;  %v455_v44 = vld [vmem:[%s22791_s1 + $0xca0] sm:$0xff]  ;;  %v17476_v45 = vcombine.high %v17466_v39, %v17466_v39  ;;  %v452_v46 = vld [vmem:[%s22791_s1 + $0xc88] sm:$0xff] }
  0x93   :  { %9483 = vmatprep.subr.bf16.mxu0 %v14359_v52  ;;  %9975 = vmatprep.subr.bf16.mxu1 %v14361_v54  ;;  %v403_v52 = vld [vmem:[%s22791_s1 + $0xb00] sm:$0xff]  ;;  %v456_v47 = vld [vmem:[%s22791_s1 + $0xca8] sm:$0xff] }
  0x94   :  { %v407_v54 = vld [vmem:[%s22791_s1 + $0xb20] sm:$0xff] }
  0x95   :  { %v14422_v2 = vcombine.low %v403_v52, %v407_v54 }
  0x96   :  { %9484 = vmatpush1.bf16.msra.mxu0 %v14358_v60  ;;  %9976 = vmatpush1.bf16.msra.mxu1 %v14360_v61  ;;  %v14423_v60 = vcombine.high %v403_v52, %v407_v54  ;;  %v14425_v61 = vcombine.high %v404_v55, %v408_v56  ;;  %v459_v52 = vld [vmem:[%s22791_s1 + $0xcc0] sm:$0xff]  ;;  %v460_v55 = vld [vmem:[%s22791_s1 + $0xcc8] sm:$0xff] }
  0x97   :  { %9485 = vmatprep.subr.bf16.mxu0 %v14367_v62  ;;  %9977 = vmatprep.subr.bf16.mxu1 %v14369_v63  ;;  %v411_v62 = vld [vmem:[%s22791_s1 + $0xb40] sm:$0xff]  ;;  %v464_v56 = vld [vmem:[%s22791_s1 + $0xce8] sm:$0xff] }
  0x98   :  { %v415_v63 = vld [vmem:[%s22791_s1 + $0xb60] sm:$0xff] }
  0x99   :  { %v14430_v10 = vcombine.low %v411_v62, %v415_v63  ;;  %v463_v54 = vld [vmem:[%s22791_s1 + $0xce0] sm:$0xff] }
  0x9a   :  { %9486 = vmatpush1.bf16.msra.mxu0 %v14366_v4  ;;  %9978 = vmatpush1.bf16.msra.mxu1 %v14368_v5  ;;  %v14431_v4 = vcombine.high %v411_v62, %v415_v63  ;;  %v14433_v5 = vcombine.high %v412_v0, %v416_v1  ;;  %v467_v62 = vld [vmem:[%s22791_s1 + $0xd00] sm:$0xff]  ;;  %v468_v0 = vld [vmem:[%s22791_s1 + $0xd08] sm:$0xff] }
  0x9b   :  { %9487 = vmatprep.subr.bf16.mxu0 %v14375_v6  ;;  %9979 = vmatprep.subr.bf16.mxu1 %v14377_v7  ;;  %v419_v6 = vld [vmem:[%s22791_s1 + $0xb80] sm:$0xff]  ;;  %v472_v1 = vld [vmem:[%s22791_s1 + $0xd28] sm:$0xff] }
  0x9c   :  { %v423_v7 = vld [vmem:[%s22791_s1 + $0xba0] sm:$0xff] }
  0x9d   :  { %v14438_v19 = vcombine.low %v419_v6, %v423_v7  ;;  %v471_v63 = vld [vmem:[%s22791_s1 + $0xd20] sm:$0xff] }
  0x9e   :  { %9488 = vmatpush1.bf16.msra.mxu0 %v14374_v13  ;;  %9980 = vmatpush1.bf16.msra.mxu1 %v14376_v14  ;;  %v14439_v13 = vcombine.high %v419_v6, %v423_v7  ;;  %v14441_v14 = vcombine.high %v420_v8, %v424_v9  ;;  %v475_v6 = vld [vmem:[%s22791_s1 + $0xd40] sm:$0xff]  ;;  %v476_v8 = vld [vmem:[%s22791_s1 + $0xd48] sm:$0xff] }
  0x9f   :  { %9489 = vmatprep.subr.bf16.mxu0 %v14383_v16  ;;  %9981 = vmatprep.subr.bf16.mxu1 %v14385_v17  ;;  %v427_v16 = vld [vmem:[%s22791_s1 + $0xbc0] sm:$0xff]  ;;  %v480_v9 = vld [vmem:[%s22791_s1 + $0xd68] sm:$0xff] }
  0xa0   :  { %v431_v17 = vld [vmem:[%s22791_s1 + $0xbe0] sm:$0xff] }
  0xa1   :  { %v14446_v29 = vcombine.low %v427_v16, %v431_v17  ;;  %v479_v7 = vld [vmem:[%s22791_s1 + $0xd60] sm:$0xff] }
  0xa2   :  { %9490 = vmatpush1.bf16.msra.mxu0 %v14382_v23  ;;  %9982 = vmatpush1.bf16.msra.mxu1 %v14384_v24  ;;  %v14447_v23 = vcombine.high %v427_v16, %v431_v17  ;;  %v14449_v24 = vcombine.high %v428_v53, %v432_v18  ;;  %v483_v16 = vld [vmem:[%s22791_s1 + $0xd80] sm:$0xff]  ;;  %v484_v53 = vld [vmem:[%s22791_s1 + $0xd88] sm:$0xff] }
  0xa3   :  { %9491 = vmatprep.subr.bf16.mxu0 %v14391_v26  ;;  %9983 = vmatprep.subr.bf16.mxu1 %v14393_v27  ;;  %v435_v26 = vld [vmem:[%s22791_s1 + $0xc00] sm:$0xff]  ;;  %v488_v18 = vld [vmem:[%s22791_s1 + $0xda8] sm:$0xff] }
  0xa4   :  { %v439_v27 = vld [vmem:[%s22791_s1 + $0xc20] sm:$0xff] }
  0xa5   :  { %v487_v17 = vld [vmem:[%s22791_s1 + $0xda0] sm:$0xff] }
  0xa6   :  { %9492 = vmatpush1.bf16.msra.mxu0 %v14390_v32  ;;  %9984 = vmatpush1.bf16.msra.mxu1 %v14392_v33  ;;  %v14455_v32 = vcombine.high %v435_v26, %v439_v27  ;;  %v14457_v33 = vcombine.high %v436_v15, %v440_v28 }
  0xa7   :  { %9493 = vmatprep.subr.bf16.mxu0 %v14399_v34  ;;  %9985 = vmatprep.subr.bf16.mxu1 %v14401_v35  ;;  %v443_v34 = vld [vmem:[%s22791_s1 + $0xc40] sm:$0xff] }
  0xa8   :  { %v447_v35 = vld [vmem:[%s22791_s1 + $0xc60] sm:$0xff] }
  0xa9   :  { %v14463_v25 = vcombine.high %v443_v34, %v447_v35 }
  0xaa   :  { %9494 = vmatpush1.bf16.msra.mxu0 %v14398_v40  ;;  %9986 = vmatpush1.bf16.msra.mxu1 %v14400_v41  ;;  %v14454_v40 = vcombine.low %v435_v26, %v439_v27  ;;  %v14456_v41 = vcombine.low %v436_v15, %v440_v28  ;;  %v491_v26 = vld [vmem:[%s22791_s1 + $0xdc0] sm:$0xff]  ;;  %v492_v15 = vld [vmem:[%s22791_s1 + $0xdc8] sm:$0xff] }
  0xab   :  { %9495 = vmatprep.subr.bf16.mxu0 %v14407_v42  ;;  %9987 = vmatprep.subr.bf16.mxu1 %v14409_v43  ;;  %v14465_v42 = vcombine.high %v444_v37, %v448_v38  ;;  %v451_v43 = vld [vmem:[%s22791_s1 + $0xc80] sm:$0xff]  ;;  %v496_v28 = vld [vmem:[%s22791_s1 + $0xde8] sm:$0xff] }
  0xac   :  { %v495_v27 = vld [vmem:[%s22791_s1 + $0xde0] sm:$0xff] }
  0xae   :  { %9496 = vmatpush1.bf16.msra.mxu0 %v14406_v48  ;;  %9988 = vmatpush1.bf16.msra.mxu1 %v14408_v49  ;;  %v14462_v48 = vcombine.low %v443_v34, %v447_v35  ;;  %v14464_v49 = vcombine.low %v444_v37, %v448_v38  ;;  %v499_v34 = vld [vmem:[%s22791_s1 + $0xe00] sm:$0xff]  ;;  %v500_v37 = vld [vmem:[%s22791_s1 + $0xe08] sm:$0xff] }
  0xaf   :  { %9497 = vmatprep.subr.bf16.mxu0 %v14415_v50  ;;  %9989 = vmatprep.subr.bf16.mxu1 %v14417_v51  ;;  %v14471_v50 = vcombine.high %v451_v43, %v455_v44  ;;  %v14473_v51 = vcombine.high %v452_v46, %v456_v47  ;;  %v503_v35 = vld [vmem:[%s22791_s1 + $0xe20] sm:$0xff]  ;;  %v504_v38 = vld [vmem:[%s22791_s1 + $0xe28] sm:$0xff] }
  0xb2   :  { %9498 = vmatpush1.bf16.msra.mxu0 %v14414_v58  ;;  %9990 = vmatpush1.bf16.msra.mxu1 %v14416_v59  ;;  %v14470_v58 = vcombine.low %v451_v43, %v455_v44  ;;  %v14472_v59 = vcombine.low %v452_v46, %v456_v47  ;;  %v507_v43 = vld [vmem:[%s22791_s1 + $0xe40] sm:$0xff]  ;;  %v508_v46 = vld [vmem:[%s22791_s1 + $0xe48] sm:$0xff] }
  0xb3   :  { %9499 = vmatprep.subr.bf16.mxu0 %v14423_v60  ;;  %9991 = vmatprep.subr.bf16.mxu1 %v14425_v61  ;;  %v14479_v60 = vcombine.high %v459_v52, %v463_v54  ;;  %v14481_v61 = vcombine.high %v460_v55, %v464_v56  ;;  %v511_v44 = vld [vmem:[%s22791_s1 + $0xe60] sm:$0xff]  ;;  %v512_v47 = vld [vmem:[%s22791_s1 + $0xe68] sm:$0xff] }
  0xb6   :  { %9500 = vmatpush1.bf16.msra.mxu0 %v14422_v2  ;;  %9992 = vmatpush1.bf16.msra.mxu1 %v14424_v3  ;;  %v14478_v2 = vcombine.low %v459_v52, %v463_v54  ;;  %v14480_v3 = vcombine.low %v460_v55, %v464_v56  ;;  %v515_v52 = vld [vmem:[%s22791_s1 + $0xe80] sm:$0xff]  ;;  %v516_v55 = vld [vmem:[%s22791_s1 + $0xe88] sm:$0xff] }
  0xb7   :  { %9501 = vmatprep.subr.bf16.mxu0 %v14431_v4  ;;  %9993 = vmatprep.subr.bf16.mxu1 %v14433_v5  ;;  %v14487_v4 = vcombine.high %v467_v62, %v471_v63  ;;  %v14489_v5 = vcombine.high %v468_v0, %v472_v1  ;;  %v519_v54 = vld [vmem:[%s22791_s1 + $0xea0] sm:$0xff]  ;;  %v520_v56 = vld [vmem:[%s22791_s1 + $0xea8] sm:$0xff] }
  0xba   :  { %9502 = vmatpush1.bf16.msra.mxu0 %v14430_v10  ;;  %9994 = vmatpush1.bf16.msra.mxu1 %v14432_v11  ;;  %v14486_v10 = vcombine.low %v467_v62, %v471_v63  ;;  %v14488_v11 = vcombine.low %v468_v0, %v472_v1  ;;  %v523_v62 = vld [vmem:[%s22791_s1 + $0xec0] sm:$0xff]  ;;  %v524_v0 = vld [vmem:[%s22791_s1 + $0xec8] sm:$0xff] }
  0xbb   :  { %9503 = vmatprep.subr.bf16.mxu0 %v14439_v13  ;;  %9995 = vmatprep.subr.bf16.mxu1 %v14441_v14  ;;  %v14495_v13 = vcombine.high %v475_v6, %v479_v7  ;;  %v14497_v14 = vcombine.high %v476_v8, %v480_v9  ;;  %v527_v63 = vld [vmem:[%s22791_s1 + $0xee0] sm:$0xff]  ;;  %v528_v1 = vld [vmem:[%s22791_s1 + $0xee8] sm:$0xff] }
  0xbe   :  { %9504 = vmatpush1.bf16.msra.mxu0 %v14438_v19  ;;  %9996 = vmatpush1.bf16.msra.mxu1 %v14440_v20  ;;  %v14494_v19 = vcombine.low %v475_v6, %v479_v7  ;;  %v14496_v20 = vcombine.low %v476_v8, %v480_v9  ;;  %v531_v6 = vld [vmem:[%s22791_s1 + $0xf00] sm:$0xff]  ;;  %v532_v8 = vld [vmem:[%s22791_s1 + $0xf08] sm:$0xff] }
  0xbf   :  { %9505 = vmatprep.subr.bf16.mxu0 %v14447_v23  ;;  %9997 = vmatprep.subr.bf16.mxu1 %v14449_v24  ;;  %v14503_v23 = vcombine.high %v483_v16, %v487_v17  ;;  %v14505_v24 = vcombine.high %v484_v53, %v488_v18  ;;  %v535_v7 = vld [vmem:[%s22791_s1 + $0xf20] sm:$0xff]  ;;  %v536_v9 = vld [vmem:[%s22791_s1 + $0xf28] sm:$0xff] }
  0xc2   :  { %9506 = vmatpush1.bf16.msra.mxu0 %v14446_v29  ;;  %9998 = vmatpush1.bf16.msra.mxu1 %v14448_v30  ;;  %v14502_v29 = vcombine.low %v483_v16, %v487_v17  ;;  %v14504_v30 = vcombine.low %v484_v53, %v488_v18  ;;  %v539_v16 = vld [vmem:[%s22791_s1 + $0xf40] sm:$0xff]  ;;  %v540_v53 = vld [vmem:[%s22791_s1 + $0xf48] sm:$0xff] }
  0xc3   :  { %9516 = vmatprep.subr.bf16.mxu0 %v14455_v32  ;;  %10008 = vmatprep.subr.bf16.mxu1 %v14457_v33  ;;  %v14511_v32 = vcombine.high %v491_v26, %v495_v27  ;;  %v14513_v33 = vcombine.high %v492_v15, %v496_v28  ;;  %v543_v17 = vld [vmem:[%s22791_s1 + $0xf60] sm:$0xff]  ;;  %v544_v18 = vld [vmem:[%s22791_s1 + $0xf68] sm:$0xff] }
  0xc5   :  { %9508 = vmatmul.mubr.bf16.vlgmr.msra.gmra.mrb[0].mxu0 %v17455_v36  ;;  %10000 = vmatmul.mubr.bf16.vlgmr.msra.gmra.mrb[0].mxu1 %v17455_v36 }
  0xc6   :  { %9517 = vmatpush1.bf16.msra.mxu0 %v14454_v40  ;;  %10009 = vmatpush1.bf16.msra.mxu1 %v14456_v41  ;;  %v14510_v40 = vcombine.low %v491_v26, %v495_v27  ;;  %v14512_v41 = vcombine.low %v492_v15, %v496_v28  ;;  %v547_v26 = vld [vmem:[%s22791_s1 + $0xf80] sm:$0xff]  ;;  %v548_v15 = vld [vmem:[%s22791_s1 + $0xf88] sm:$0xff] }
  0xc7   :  { %9518 = vmatprep.subr.bf16.mxu0 %v14463_v25  ;;  %10010 = vmatprep.subr.bf16.mxu1 %v14465_v42  ;;  %v14519_v25 = vcombine.high %v499_v34, %v503_v35  ;;  %v14521_v42 = vcombine.high %v500_v37, %v504_v38  ;;  %v551_v27 = vld [vmem:[%s22791_s1 + $0xfa0] sm:$0xff]  ;;  %v552_v28 = vld [vmem:[%s22791_s1 + $0xfa8] sm:$0xff] }
  0xc8   :  { %9548 = vmatprep.mubr.bf16.mxu0 %v17476_v45  ;;  %10040 = vmatprep.mubr.bf16.mxu1 %v17476_v45 }
  0xca   :  { %9519 = vmatpush1.bf16.msra.mxu0 %v14462_v48  ;;  %10011 = vmatpush1.bf16.msra.mxu1 %v14464_v49  ;;  %v14518_v48 = vcombine.low %v499_v34, %v503_v35  ;;  %v14520_v49 = vcombine.low %v500_v37, %v504_v38  ;;  %v555_v34 = vld [vmem:[%s22791_s1 + $0xfc0] sm:$0xff]  ;;  %v556_v37 = vld [vmem:[%s22791_s1 + $0xfc8] sm:$0xff] }
  0xcb   :  { %9520 = vmatprep.subr.bf16.mxu0 %v14471_v50  ;;  %10012 = vmatprep.subr.bf16.mxu1 %v14473_v51  ;;  %v14527_v50 = vcombine.high %v507_v43, %v511_v44  ;;  %v14529_v51 = vcombine.high %v508_v46, %v512_v47  ;;  %v559_v35 = vld [vmem:[%s22791_s1 + $0xfe0] sm:$0xff]  ;;  %v560_v38 = vld [vmem:[%s22791_s1 + $0xfe8] sm:$0xff] }
  0xce   :  { %9521 = vmatpush1.bf16.msra.mxu0 %v14470_v58  ;;  %10013 = vmatpush1.bf16.msra.mxu1 %v14472_v59  ;;  %v14526_v58 = vcombine.low %v507_v43, %v511_v44  ;;  %v14528_v59 = vcombine.low %v508_v46, %v512_v47  ;;  %v563_v43 = vld [vmem:[%s22791_s1 + $0x1000] sm:$0xff]  ;;  %v564_v46 = vld [vmem:[%s22791_s1 + $0x1008] sm:$0xff] }
  0xcf   :  { %9522 = vmatprep.subr.bf16.mxu0 %v14479_v60  ;;  %10014 = vmatprep.subr.bf16.mxu1 %v14481_v61  ;;  %v14535_v60 = vcombine.high %v515_v52, %v519_v54  ;;  %v14537_v61 = vcombine.high %v516_v55, %v520_v56  ;;  %v567_v44 = vld [vmem:[%s22791_s1 + $0x1020] sm:$0xff]  ;;  %v568_v47 = vld [vmem:[%s22791_s1 + $0x1028] sm:$0xff] }
  0xd2   :  { %9523 = vmatpush1.bf16.msra.mxu0 %v14478_v2  ;;  %10015 = vmatpush1.bf16.msra.mxu1 %v14480_v3  ;;  %v14534_v2 = vcombine.low %v515_v52, %v519_v54  ;;  %v14536_v3 = vcombine.low %v516_v55, %v520_v56  ;;  %v571_v52 = vld [vmem:[%s22791_s1 + $0x1040] sm:$0xff]  ;;  %v17664_v55 = vcombine.low %v17466_v39, %v17466_v39  ;;  %v572_v56 = vld [vmem:[%s22791_s1 + $0x1048] sm:$0xff] }
  0xd3   :  { %9524 = vmatprep.subr.bf16.mxu0 %v14487_v4  ;;  %10016 = vmatprep.subr.bf16.mxu1 %v14489_v5  ;;  %v14543_v4 = vcombine.high %v523_v62, %v527_v63  ;;  %v14545_v5 = vcombine.high %v524_v0, %v528_v1  ;;  %v575_v54 = vld [vmem:[%s22791_s1 + $0x1060] sm:$0xff] }
  0xd4   :  { %v14591_v39 = vcombine.high %v571_v52, %v575_v54 }
  0xd6   :  { %9525 = vmatpush1.bf16.msra.mxu0 %v14486_v10  ;;  %10017 = vmatpush1.bf16.msra.mxu1 %v14488_v11  ;;  %v14542_v10 = vcombine.low %v523_v62, %v527_v63  ;;  %v14544_v11 = vcombine.low %v524_v0, %v528_v1  ;;  %v579_v63 = vld [vmem:[%s22791_s1 + $0x1080] sm:$0xff] }
  0xd7   :  { %9526 = vmatprep.subr.bf16.mxu0 %v14495_v13  ;;  %10018 = vmatprep.subr.bf16.mxu1 %v14497_v14  ;;  %v14551_v13 = vcombine.high %v531_v6, %v535_v7  ;;  %v14553_v14 = vcombine.high %v532_v8, %v536_v9  ;;  %v583_v0 = vld [vmem:[%s22791_s1 + $0x10a0] sm:$0xff] }
  0xda   :  { %9527 = vmatpush1.bf16.msra.mxu0 %v14494_v19  ;;  %10019 = vmatpush1.bf16.msra.mxu1 %v14496_v20  ;;  %v14550_v19 = vcombine.low %v531_v6, %v535_v7  ;;  %v14552_v20 = vcombine.low %v532_v8, %v536_v9  ;;  %v14599_v6 = vcombine.high %v579_v63, %v583_v0  ;;  %v587_v8 = vld [vmem:[%s22791_s1 + $0x10c0] sm:$0xff] }
  0xdb   :  { %9528 = vmatprep.subr.bf16.mxu0 %v14503_v23  ;;  %10020 = vmatprep.subr.bf16.mxu1 %v14505_v24  ;;  %v14559_v23 = vcombine.high %v539_v16, %v543_v17  ;;  %v14561_v24 = vcombine.high %v540_v53, %v544_v18  ;;  %v591_v9 = vld [vmem:[%s22791_s1 + $0x10e0] sm:$0xff] }
  0xde   :  { %9529 = vmatpush1.bf16.msra.mxu0 %v14502_v29  ;;  %10021 = vmatpush1.bf16.msra.mxu1 %v14504_v30  ;;  %v14558_v29 = vcombine.low %v539_v16, %v543_v17  ;;  %v14560_v30 = vcombine.low %v540_v53, %v544_v18  ;;  %v14607_v16 = vcombine.high %v587_v8, %v591_v9  ;;  %v595_v53 = vld [vmem:[%s22791_s1 + $0x1100] sm:$0xff] }
  0xdf   :  { %9530 = vmatprep.subr.bf16.mxu0 %v14511_v32  ;;  %10022 = vmatprep.subr.bf16.mxu1 %v14513_v33  ;;  %v14567_v32 = vcombine.high %v547_v26, %v551_v27  ;;  %v14569_v33 = vcombine.high %v548_v15, %v552_v28  ;;  %v599_v18 = vld [vmem:[%s22791_s1 + $0x1120] sm:$0xff] }
  0xe2   :  { %9531 = vmatpush1.bf16.msra.mxu0 %v14510_v40  ;;  %10023 = vmatpush1.bf16.msra.mxu1 %v14512_v41  ;;  %v14566_v40 = vcombine.low %v547_v26, %v551_v27  ;;  %v14568_v41 = vcombine.low %v548_v15, %v552_v28  ;;  %v14615_v26 = vcombine.high %v595_v53, %v599_v18  ;;  %v603_v15 = vld [vmem:[%s22791_s1 + $0x1140] sm:$0xff] }
  0xe3   :  { %9532 = vmatprep.subr.bf16.mxu0 %v14519_v25  ;;  %10024 = vmatprep.subr.bf16.mxu1 %v14521_v42  ;;  %v14575_v25 = vcombine.high %v555_v34, %v559_v35  ;;  %v14577_v42 = vcombine.high %v556_v37, %v560_v38  ;;  %v607_v28 = vld [vmem:[%s22791_s1 + $0x1160] sm:$0xff] }
  0xe6   :  { %9533 = vmatpush1.bf16.msra.mxu0 %v14518_v48  ;;  %10025 = vmatpush1.bf16.msra.mxu1 %v14520_v49  ;;  %v14574_v48 = vcombine.low %v555_v34, %v559_v35  ;;  %v14576_v49 = vcombine.low %v556_v37, %v560_v38  ;;  %v14623_v34 = vcombine.high %v603_v15, %v607_v28  ;;  %v611_v37 = vld [vmem:[%s22791_s1 + $0x1180] sm:$0xff] }
  0xe7   :  { %9534 = vmatprep.subr.bf16.mxu0 %v14527_v50  ;;  %10026 = vmatprep.subr.bf16.mxu1 %v14529_v51  ;;  %v14583_v50 = vcombine.high %v563_v43, %v567_v44  ;;  %v14585_v51 = vcombine.high %v564_v46, %v568_v47  ;;  %v615_v38 = vld [vmem:[%s22791_s1 + $0x11a0] sm:$0xff] }
  0xea   :  { %9535 = vmatpush1.bf16.msra.mxu0 %v14526_v58  ;;  %10027 = vmatpush1.bf16.msra.mxu1 %v14528_v59  ;;  %v576_v58 = vld [vmem:[%s22791_s1 + $0x1068] sm:$0xff]  ;;  %v17675_v59 = vld [vmem:[%s22792_s0 + $0x20] sm:$0xff] }
  0xeb   :  { %9536 = vmatprep.subr.bf16.mxu0 %v14535_v60  ;;  %10028 = vmatprep.subr.bf16.mxu1 %v14537_v61  ;;  %v14582_v60 = vcombine.low %v563_v43, %v567_v44  ;;  %v14584_v61 = vcombine.low %v564_v46, %v568_v47  ;;  %v14593_v62 = vcombine.high %v572_v56, %v576_v58  ;;  %v619_v46 = vld [vmem:[%s22791_s1 + $0x11c0] sm:$0xff] }
  0xec   :  { %v17685_v1 = vcombine.high %v17675_v59, %v17675_v59  ;;  %v14631_v43 = vcombine.high %v611_v37, %v615_v38  ;;  %v623_v47 = vld [vmem:[%s22791_s1 + $0x11e0] sm:$0xff] }
  0xee   :  { %9537 = vmatpush1.bf16.msra.mxu0 %v14534_v2  ;;  %10029 = vmatpush1.bf16.msra.mxu1 %v14536_v3  ;;  %v580_v2 = vld [vmem:[%s22791_s1 + $0x1088] sm:$0xff] }
  0xef   :  { %9538 = vmatprep.subr.bf16.mxu0 %v14543_v4  ;;  %10030 = vmatprep.subr.bf16.mxu1 %v14545_v5  ;;  %v584_v3 = vld [vmem:[%s22791_s1 + $0x10a8] sm:$0xff]  ;;  %v14590_v4 = vcombine.low %v571_v52, %v575_v54  ;;  %v14592_v5 = vcombine.low %v572_v56, %v576_v58  ;;  %v14639_v52 = vcombine.high %v619_v46, %v623_v47  ;;  %v627_v56 = vld [vmem:[%s22791_s1 + $0x1200] sm:$0xff] }
  0xf0   :  { %v14601_v7 = vcombine.high %v580_v2, %v584_v3  ;;  %v631_v58 = vld [vmem:[%s22791_s1 + $0x1220] sm:$0xff] }
  0xf2   :  { %9539 = vmatpush1.bf16.msra.mxu0 %v14542_v10  ;;  %10031 = vmatpush1.bf16.msra.mxu1 %v14544_v11  ;;  %v588_v10 = vld [vmem:[%s22791_s1 + $0x10c8] sm:$0xff] }
  0xf3   :  { %9540 = vmatprep.subr.bf16.mxu0 %v14551_v13  ;;  %10032 = vmatprep.subr.bf16.mxu1 %v14553_v14  ;;  %v592_v11 = vld [vmem:[%s22791_s1 + $0x10e8] sm:$0xff]  ;;  %v14598_v13 = vcombine.low %v579_v63, %v583_v0  ;;  %v14600_v14 = vcombine.low %v580_v2, %v584_v3  ;;  %v14647_v63 = vcombine.high %v627_v56, %v631_v58  ;;  %v635_v2 = vld [vmem:[%s22791_s1 + $0x1240] sm:$0xff] }
  0xf4   :  { %v14609_v17 = vcombine.high %v588_v10, %v592_v11  ;;  %v639_v3 = vld [vmem:[%s22791_s1 + $0x1260] sm:$0xff] }
  0xf6   :  { %9541 = vmatpush1.bf16.msra.mxu0 %v14550_v19  ;;  %10033 = vmatpush1.bf16.msra.mxu1 %v14552_v20  ;;  %v596_v19 = vld [vmem:[%s22791_s1 + $0x1108] sm:$0xff] }
  0xf7   :  { %9542 = vmatprep.subr.bf16.mxu0 %v14559_v23  ;;  %10034 = vmatprep.subr.bf16.mxu1 %v14561_v24  ;;  %v600_v20 = vld [vmem:[%s22791_s1 + $0x1128] sm:$0xff]  ;;  %v14606_v23 = vcombine.low %v587_v8, %v591_v9  ;;  %v14608_v24 = vcombine.low %v588_v10, %v592_v11  ;;  %v14655_v8 = vcombine.high %v635_v2, %v639_v3  ;;  %v643_v10 = vld [vmem:[%s22791_s1 + $0x1280] sm:$0xff] }
  0xf8   :  { %v14617_v27 = vcombine.high %v596_v19, %v600_v20  ;;  %v647_v11 = vld [vmem:[%s22791_s1 + $0x12a0] sm:$0xff] }
  0xfa   :  { %9543 = vmatpush1.bf16.msra.mxu0 %v14558_v29  ;;  %10035 = vmatpush1.bf16.msra.mxu1 %v14560_v30  ;;  %v604_v29 = vld [vmem:[%s22791_s1 + $0x1148] sm:$0xff] }
  0xfb   :  { %9544 = vmatprep.subr.bf16.mxu0 %v14567_v32  ;;  %10036 = vmatprep.subr.bf16.mxu1 %v14569_v33  ;;  %v608_v30 = vld [vmem:[%s22791_s1 + $0x1168] sm:$0xff]  ;;  %v14614_v32 = vcombine.low %v595_v53, %v599_v18  ;;  %v14616_v33 = vcombine.low %v596_v19, %v600_v20  ;;  %v14663_v53 = vcombine.high %v643_v10, %v647_v11  ;;  %v651_v19 = vld [vmem:[%s22791_s1 + $0x12c0] sm:$0xff] }
  0xfc   :  { %v14625_v35 = vcombine.high %v604_v29, %v608_v30  ;;  %v655_v20 = vld [vmem:[%s22791_s1 + $0x12e0] sm:$0xff] }
  0xfe   :  { %9545 = vmatpush1.bf16.msra.mxu0 %v14566_v40  ;;  %10037 = vmatpush1.bf16.msra.mxu1 %v14568_v41  ;;  %v612_v40 = vld [vmem:[%s22791_s1 + $0x1188] sm:$0xff] }
  0xff   :  { %9546 = vmatprep.subr.bf16.mxu0 %v14575_v25  ;;  %10038 = vmatprep.subr.bf16.mxu1 %v14577_v42  ;;  %v616_v41 = vld [vmem:[%s22791_s1 + $0x11a8] sm:$0xff]  ;;  %v14622_v25 = vcombine.low %v603_v15, %v607_v28  ;;  %v14624_v42 = vcombine.low %v604_v29, %v608_v30  ;;  %v14671_v15 = vcombine.high %v651_v19, %v655_v20  ;;  %v659_v29 = vld [vmem:[%s22791_s1 + $0x1300] sm:$0xff] }
 0x100   :  { %v14633_v44 = vcombine.high %v612_v40, %v616_v41  ;;  %v663_v30 = vld [vmem:[%s22791_s1 + $0x1320] sm:$0xff] }
 0x102   :  { %9547 = vmatpush1.bf16.msra.mxu0 %v14574_v48  ;;  %10039 = vmatpush1.bf16.msra.mxu1 %v14576_v49  ;;  %v620_v48 = vld [vmem:[%s22791_s1 + $0x11c8] sm:$0xff] }
 0x103   :  { %9557 = vmatprep.subr.bf16.mxu0 %v14583_v50  ;;  %10049 = vmatprep.subr.bf16.mxu1 %v14585_v51  ;;  %v624_v49 = vld [vmem:[%s22791_s1 + $0x11e8] sm:$0xff]  ;;  %v14630_v50 = vcombine.low %v611_v37, %v615_v38  ;;  %v14632_v51 = vcombine.low %v612_v40, %v616_v41  ;;  %v14679_v37 = vcombine.high %v659_v29, %v663_v30  ;;  %v667_v40 = vld [vmem:[%s22791_s1 + $0x1340] sm:$0xff] }
 0x104   :  { %v14641_v54 = vcombine.high %v620_v48, %v624_v49  ;;  %v671_v41 = vld [vmem:[%s22791_s1 + $0x1360] sm:$0xff] }
 0x105   :  { %9549 = vmatmul.mubr.bf16.vlgmr.msra.gmra.mrb[0].mxu0 %v17664_v55  ;;  %10041 = vmatmul.mubr.bf16.vlgmr.msra.gmra.mrb[0].mxu1 %v17664_v55 }
 0x106   :  { %9558 = vmatpush1.bf16.msra.mxu0 %v14582_v60  ;;  %10050 = vmatpush1.bf16.msra.mxu1 %v14584_v61  ;;  %v628_v60 = vld [vmem:[%s22791_s1 + $0x1208] sm:$0xff] }
 0x107   :  { %9559 = vmatprep.subr.bf16.mxu0 %v14591_v39  ;;  %10051 = vmatprep.subr.bf16.mxu1 %v14593_v62  ;;  %v632_v61 = vld [vmem:[%s22791_s1 + $0x1228] sm:$0xff]  ;;  %v14638_v39 = vcombine.low %v619_v46, %v623_v47  ;;  %v14640_v62 = vcombine.low %v620_v48, %v624_v49  ;;  %v14687_v46 = vcombine.high %v667_v40, %v671_v41  ;;  %v675_v48 = vld [vmem:[%s22791_s1 + $0x1380] sm:$0xff] }
 0x108   :  { %9589 = vmatprep.mubr.bf16.mxu0 %v17685_v1  ;;  %10081 = vmatprep.mubr.bf16.mxu1 %v17685_v1  ;;  %v14649_v0 = vcombine.high %v628_v60, %v632_v61  ;;  %v679_v49 = vld [vmem:[%s22791_s1 + $0x13a0] sm:$0xff] }
 0x10a   :  { %9560 = vmatpush1.bf16.msra.mxu0 %v14590_v4  ;;  %10052 = vmatpush1.bf16.msra.mxu1 %v14592_v5  ;;  %v636_v4 = vld [vmem:[%s22791_s1 + $0x1248] sm:$0xff] }
 0x10b   :  { %9561 = vmatprep.subr.bf16.mxu0 %v14599_v6  ;;  %10053 = vmatprep.subr.bf16.mxu1 %v14601_v7  ;;  %v640_v5 = vld [vmem:[%s22791_s1 + $0x1268] sm:$0xff]  ;;  %v14646_v6 = vcombine.low %v627_v56, %v631_v58  ;;  %v14648_v7 = vcombine.low %v628_v60, %v632_v61  ;;  %v14695_v56 = vcombine.high %v675_v48, %v679_v49  ;;  %v683_v60 = vld [vmem:[%s22791_s1 + $0x13c0] sm:$0xff] }
 0x10c   :  { %v14657_v9 = vcombine.high %v636_v4, %v640_v5  ;;  %v687_v61 = vld [vmem:[%s22791_s1 + $0x13e0] sm:$0xff] }
 0x10e   :  { %9562 = vmatpush1.bf16.msra.mxu0 %v14598_v13  ;;  %10054 = vmatpush1.bf16.msra.mxu1 %v14600_v14  ;;  %v644_v13 = vld [vmem:[%s22791_s1 + $0x1288] sm:$0xff] }
 0x10f   :  { %9563 = vmatprep.subr.bf16.mxu0 %v14607_v16  ;;  %10055 = vmatprep.subr.bf16.mxu1 %v14609_v17  ;;  %v648_v14 = vld [vmem:[%s22791_s1 + $0x12a8] sm:$0xff]  ;;  %v14654_v16 = vcombine.low %v635_v2, %v639_v3  ;;  %v14656_v17 = vcombine.low %v636_v4, %v640_v5  ;;  %v14703_v2 = vcombine.high %v683_v60, %v687_v61  ;;  %v691_v4 = vld [vmem:[%s22791_s1 + $0x1400] sm:$0xff] }
 0x110   :  { %v14665_v18 = vcombine.high %v644_v13, %v648_v14  ;;  %v695_v5 = vld [vmem:[%s22791_s1 + $0x1420] sm:$0xff] }
 0x112   :  { %9564 = vmatpush1.bf16.msra.mxu0 %v14606_v23  ;;  %10056 = vmatpush1.bf16.msra.mxu1 %v14608_v24  ;;  %v652_v23 = vld [vmem:[%s22791_s1 + $0x12c8] sm:$0xff] }
 0x113   :  { %9565 = vmatprep.subr.bf16.mxu0 %v14615_v26  ;;  %10057 = vmatprep.subr.bf16.mxu1 %v14617_v27  ;;  %v656_v24 = vld [vmem:[%s22791_s1 + $0x12e8] sm:$0xff]  ;;  %v14662_v26 = vcombine.low %v643_v10, %v647_v11  ;;  %v14664_v27 = vcombine.low %v644_v13, %v648_v14  ;;  %v14711_v10 = vcombine.high %v691_v4, %v695_v5  ;;  %v699_v13 = vld [vmem:[%s22791_s1 + $0x1440] sm:$0xff] }
 0x114   :  { %v14673_v28 = vcombine.high %v652_v23, %v656_v24  ;;  %v703_v14 = vld [vmem:[%s22791_s1 + $0x1460] sm:$0xff] }
 0x116   :  { %9566 = vmatpush1.bf16.msra.mxu0 %v14614_v32  ;;  %10058 = vmatpush1.bf16.msra.mxu1 %v14616_v33  ;;  %v660_v32 = vld [vmem:[%s22791_s1 + $0x1308] sm:$0xff] }
 0x117   :  { %9567 = vmatprep.subr.bf16.mxu0 %v14623_v34  ;;  %10059 = vmatprep.subr.bf16.mxu1 %v14625_v35  ;;  %v664_v33 = vld [vmem:[%s22791_s1 + $0x1328] sm:$0xff]  ;;  %v14670_v34 = vcombine.low %v651_v19, %v655_v20  ;;  %v14672_v35 = vcombine.low %v652_v23, %v656_v24  ;;  %v14710_v19 = vcombine.low %v691_v4, %v695_v5  ;;  %v707_v24 = vld [vmem:[%s22791_s1 + $0x1480] sm:$0xff] }
 0x118   :  { %v14681_v38 = vcombine.high %v660_v32, %v664_v33 }
 0x11a   :  { %9568 = vmatpush1.bf16.msra.mxu0 %v14622_v25  ;;  %10060 = vmatpush1.bf16.msra.mxu1 %v14624_v42  ;;  %v668_v25 = vld [vmem:[%s22791_s1 + $0x1348] sm:$0xff] }
 0x11b   :  { %9569 = vmatprep.subr.bf16.mxu0 %v14631_v43  ;;  %10061 = vmatprep.subr.bf16.mxu1 %v14633_v44  ;;  %v672_v42 = vld [vmem:[%s22791_s1 + $0x1368] sm:$0xff]  ;;  %v14678_v43 = vcombine.low %v659_v29, %v663_v30  ;;  %v14680_v44 = vcombine.low %v660_v32, %v664_v33  ;;  %v14718_v29 = vcombine.low %v699_v13, %v703_v14 }
 0x11c   :  { %v14689_v47 = vcombine.high %v668_v25, %v672_v42 }
 0x11e   :  { %9570 = vmatpush1.bf16.msra.mxu0 %v14630_v50  ;;  %10062 = vmatpush1.bf16.msra.mxu1 %v14632_v51  ;;  %v676_v50 = vld [vmem:[%s22791_s1 + $0x1388] sm:$0xff] }
 0x11f   :  { %9571 = vmatprep.subr.bf16.mxu0 %v14639_v52  ;;  %10063 = vmatprep.subr.bf16.mxu1 %v14641_v54  ;;  %v680_v51 = vld [vmem:[%s22791_s1 + $0x13a8] sm:$0xff]  ;;  %v14686_v52 = vcombine.low %v667_v40, %v671_v41  ;;  %v14688_v54 = vcombine.low %v668_v25, %v672_v42 }
 0x120   :  { %v14697_v58 = vcombine.high %v676_v50, %v680_v51 }
 0x122   :  { %9572 = vmatpush1.bf16.msra.mxu0 %v14638_v39  ;;  %10064 = vmatpush1.bf16.msra.mxu1 %v14640_v62  ;;  %v684_v39 = vld [vmem:[%s22791_s1 + $0x13c8] sm:$0xff] }
 0x123   :  { %9573 = vmatprep.subr.bf16.mxu0 %v14647_v63  ;;  %10065 = vmatprep.subr.bf16.mxu1 %v14649_v0  ;;  %v688_v62 = vld [vmem:[%s22791_s1 + $0x13e8] sm:$0xff]  ;;  %v14694_v63 = vcombine.low %v675_v48, %v679_v49  ;;  %v14696_v0 = vcombine.low %v676_v50, %v680_v51 }
 0x124   :  { %v14705_v3 = vcombine.high %v684_v39, %v688_v62 }
 0x126   :  { %9574 = vmatpush1.bf16.msra.mxu0 %v14646_v6  ;;  %10066 = vmatpush1.bf16.msra.mxu1 %v14648_v7  ;;  %v692_v6 = vld [vmem:[%s22791_s1 + $0x1408] sm:$0xff] }
 0x127   :  { %9575 = vmatprep.subr.bf16.mxu0 %v14655_v8  ;;  %10067 = vmatprep.subr.bf16.mxu1 %v14657_v9  ;;  %v696_v7 = vld [vmem:[%s22791_s1 + $0x1428] sm:$0xff]  ;;  %v14702_v8 = vcombine.low %v683_v60, %v687_v61  ;;  %v14704_v9 = vcombine.low %v684_v39, %v688_v62 }
 0x128   :  { %v14713_v11 = vcombine.high %v692_v6, %v696_v7  ;;  %v14712_v20 = vcombine.low %v692_v6, %v696_v7 }
 0x12a   :  { %9576 = vmatpush1.bf16.msra.mxu0 %v14654_v16  ;;  %10068 = vmatpush1.bf16.msra.mxu1 %v14656_v17  ;;  %v17873_v16 = vcombine.low %v17675_v59, %v17675_v59  ;;  %v700_v17 = vld [vmem:[%s22791_s1 + $0x1448] sm:$0xff]  ;;  %v14719_v59 = vcombine.high %v699_v13, %v703_v14 }
 0x12b   :  { %9577 = vmatprep.subr.bf16.mxu0 %v14663_v53  ;;  %10069 = vmatprep.subr.bf16.mxu1 %v14665_v18  ;;  %v704_v53 = vld [vmem:[%s22791_s1 + $0x1468] sm:$0xff] }
 0x12c   :  { %v17884_v18 = vld [vmem:[%s22792_s0 + $0x28] sm:$0xff]  ;;  %v14721_v23 = vcombine.high %v700_v17, %v704_v53  ;;  %v14720_v30 = vcombine.low %v700_v17, %v704_v53 }
 0x12e   :  { %9578 = vmatpush1.bf16.msra.mxu0 %v14662_v26  ;;  %10070 = vmatpush1.bf16.msra.mxu1 %v14664_v27  ;;  %v711_v26 = vld [vmem:[%s22791_s1 + $0x14a0] sm:$0xff]  ;;  %v17894_v27 = vcombine.high %v17884_v18, %v17884_v18 }
 0x12f   :  { %9579 = vmatprep.subr.bf16.mxu0 %v14671_v15  ;;  %10071 = vmatprep.subr.bf16.mxu1 %v14673_v28  ;;  %v708_v15 = vld [vmem:[%s22791_s1 + $0x1488] sm:$0xff]  ;;  %v14727_v32 = vcombine.high %v707_v24, %v711_v26  ;;  %v14726_v40 = vcombine.low %v707_v24, %v711_v26 }
 0x130   :  { %v712_v28 = vld [vmem:[%s22791_s1 + $0x14a8] sm:$0xff] }
 0x131   :  { %v14729_v33 = vcombine.high %v708_v15, %v712_v28  ;;  %v14728_v41 = vcombine.low %v708_v15, %v712_v28 }
 0x132   :  { %9580 = vmatpush1.bf16.msra.mxu0 %v14670_v34  ;;  %10072 = vmatpush1.bf16.msra.mxu1 %v14672_v35  ;;  %v715_v34 = vld [vmem:[%s22791_s1 + $0x14c0] sm:$0xff] }
 0x133   :  { %9581 = vmatprep.subr.bf16.mxu0 %v14679_v37  ;;  %10073 = vmatprep.subr.bf16.mxu1 %v14681_v38  ;;  %v719_v35 = vld [vmem:[%s22791_s1 + $0x14e0] sm:$0xff]  ;;  %v716_v37 = vld [vmem:[%s22791_s1 + $0x14c8] sm:$0xff] }
 0x134   :  { %v720_v38 = vld [vmem:[%s22791_s1 + $0x14e8] sm:$0xff]  ;;  %v14735_v25 = vcombine.high %v715_v34, %v719_v35  ;;  %v14734_v48 = vcombine.low %v715_v34, %v719_v35 }
 0x135   :  { %v14737_v42 = vcombine.high %v716_v37, %v720_v38  ;;  %v14736_v49 = vcombine.low %v716_v37, %v720_v38 }
 0x136   :  { %9582 = vmatpush1.bf16.msra.mxu0 %v14678_v43  ;;  %10074 = vmatpush1.bf16.msra.mxu1 %v14680_v44  ;;  %v723_v43 = vld [vmem:[%s22791_s1 + $0x1500] sm:$0xff] }
 0x137   :  { %9583 = vmatprep.subr.bf16.mxu0 %v14687_v46  ;;  %10075 = vmatprep.subr.bf16.mxu1 %v14689_v47  ;;  %v727_v44 = vld [vmem:[%s22791_s1 + $0x1520] sm:$0xff]  ;;  %v724_v46 = vld [vmem:[%s22791_s1 + $0x1508] sm:$0xff] }
 0x138   :  { %v728_v47 = vld [vmem:[%s22791_s1 + $0x1528] sm:$0xff]  ;;  %v14743_v50 = vcombine.high %v723_v43, %v727_v44  ;;  %v14742_v60 = vcombine.low %v723_v43, %v727_v44 }
 0x139   :  { %v14745_v51 = vcombine.high %v724_v46, %v728_v47  ;;  %v14744_v61 = vcombine.low %v724_v46, %v728_v47 }
 0x13a   :  { %9584 = vmatpush1.bf16.msra.mxu0 %v14686_v52  ;;  %10076 = vmatpush1.bf16.msra.mxu1 %v14688_v54  ;;  %v731_v52 = vld [vmem:[%s22791_s1 + $0x1540] sm:$0xff] }
 0x13b   :  { %9585 = vmatprep.subr.bf16.mxu0 %v14695_v56  ;;  %10077 = vmatprep.subr.bf16.mxu1 %v14697_v58  ;;  %v735_v54 = vld [vmem:[%s22791_s1 + $0x1560] sm:$0xff]  ;;  %v732_v56 = vld [vmem:[%s22791_s1 + $0x1548] sm:$0xff] }
 0x13c   :  { %v736_v58 = vld [vmem:[%s22791_s1 + $0x1568] sm:$0xff]  ;;  %v14751_v39 = vcombine.high %v731_v52, %v735_v54  ;;  %v14750_v4 = vcombine.low %v731_v52, %v735_v54 }
 0x13d   :  { %v14753_v62 = vcombine.high %v732_v56, %v736_v58  ;;  %v14752_v5 = vcombine.low %v732_v56, %v736_v58 }
 0x13e   :  { %9586 = vmatpush1.bf16.msra.mxu0 %v14694_v63  ;;  %10078 = vmatpush1.bf16.msra.mxu1 %v14696_v0  ;;  %v739_v63 = vld [vmem:[%s22791_s1 + $0x1580] sm:$0xff] }
 0x13f   :  { %9587 = vmatprep.subr.bf16.mxu0 %v14703_v2  ;;  %10079 = vmatprep.subr.bf16.mxu1 %v14705_v3  ;;  %v743_v0 = vld [vmem:[%s22791_s1 + $0x15a0] sm:$0xff]  ;;  %v740_v2 = vld [vmem:[%s22791_s1 + $0x1588] sm:$0xff] }
 0x140   :  { %v744_v3 = vld [vmem:[%s22791_s1 + $0x15a8] sm:$0xff]  ;;  %v14759_v6 = vcombine.high %v739_v63, %v743_v0  ;;  %v14758_v13 = vcombine.low %v739_v63, %v743_v0 }
 0x141   :  { %v14761_v7 = vcombine.high %v740_v2, %v744_v3  ;;  %v14760_v14 = vcombine.low %v740_v2, %v744_v3 }
 0x142   :  { %9588 = vmatpush1.bf16.msra.mxu0 %v14702_v8  ;;  %10080 = vmatpush1.bf16.msra.mxu1 %v14704_v9  ;;  %v747_v8 = vld [vmem:[%s22791_s1 + $0x15c0] sm:$0xff] }
 0x143   :  { %9598 = vmatprep.subr.bf16.mxu0 %v14711_v10  ;;  %10090 = vmatprep.subr.bf16.mxu1 %v14713_v11  ;;  %v751_v9 = vld [vmem:[%s22791_s1 + $0x15e0] sm:$0xff]  ;;  %v748_v10 = vld [vmem:[%s22791_s1 + $0x15c8] sm:$0xff] }
 0x144   :  { %v752_v11 = vld [vmem:[%s22791_s1 + $0x15e8] sm:$0xff]  ;;  %v14767_v17 = vcombine.high %v747_v8, %v751_v9  ;;  %v14766_v24 = vcombine.low %v747_v8, %v751_v9 }
 0x145   :  { %9590 = vmatmul.mubr.bf16.vlgmr.msra.gmra.mrb[0].mxu0 %v17873_v16  ;;  %10082 = vmatmul.mubr.bf16.vlgmr.msra.gmra.mrb[0].mxu1 %v17873_v16  ;;  %v14769_v53 = vcombine.high %v748_v10, %v752_v11  ;;  %v14768_v26 = vcombine.low %v748_v10, %v752_v11 }
 0x146   :  { %9599 = vmatpush1.bf16.msra.mxu0 %v14710_v19  ;;  %10091 = vmatpush1.bf16.msra.mxu1 %v14712_v20  ;;  %v755_v19 = vld [vmem:[%s22791_s1 + $0x1600] sm:$0xff] }
 0x147   :  { %9600 = vmatprep.subr.bf16.mxu0 %v14719_v59  ;;  %10092 = vmatprep.subr.bf16.mxu1 %v14721_v23  ;;  %v759_v20 = vld [vmem:[%s22791_s1 + $0x1620] sm:$0xff]  ;;  %v756_v59 = vld [vmem:[%s22791_s1 + $0x1608] sm:$0xff] }
 0x148   :  { %9630 = vmatprep.mubr.bf16.mxu0 %v17894_v27  ;;  %10122 = vmatprep.mubr.bf16.mxu1 %v17894_v27  ;;  %v760_v23 = vld [vmem:[%s22791_s1 + $0x1628] sm:$0xff]  ;;  %v14775_v15 = vcombine.high %v755_v19, %v759_v20  ;;  %v14774_v34 = vcombine.low %v755_v19, %v759_v20 }
 0x149   :  { %v14777_v28 = vcombine.high %v756_v59, %v760_v23  ;;  %v14776_v35 = vcombine.low %v756_v59, %v760_v23 }
 0x14a   :  { %9601 = vmatpush1.bf16.msra.mxu0 %v14718_v29  ;;  %10093 = vmatpush1.bf16.msra.mxu1 %v14720_v30  ;;  %v763_v29 = vld [vmem:[%s22791_s1 + $0x1640] sm:$0xff] }
 0x14b   :  { %9602 = vmatprep.subr.bf16.mxu0 %v14727_v32  ;;  %10094 = vmatprep.subr.bf16.mxu1 %v14729_v33  ;;  %v767_v30 = vld [vmem:[%s22791_s1 + $0x1660] sm:$0xff]  ;;  %v764_v32 = vld [vmem:[%s22791_s1 + $0x1648] sm:$0xff] }
 0x14c   :  { %v768_v33 = vld [vmem:[%s22791_s1 + $0x1668] sm:$0xff]  ;;  %v14783_v37 = vcombine.high %v763_v29, %v767_v30  ;;  %v14782_v43 = vcombine.low %v763_v29, %v767_v30 }
 0x14d   :  { %v14785_v38 = vcombine.high %v764_v32, %v768_v33  ;;  %v14784_v44 = vcombine.low %v764_v32, %v768_v33 }
 0x14e   :  { %9603 = vmatpush1.bf16.msra.mxu0 %v14726_v40  ;;  %10095 = vmatpush1.bf16.msra.mxu1 %v14728_v41  ;;  %v771_v40 = vld [vmem:[%s22791_s1 + $0x1680] sm:$0xff] }
 0x14f   :  { %9604 = vmatprep.subr.bf16.mxu0 %v14735_v25  ;;  %10096 = vmatprep.subr.bf16.mxu1 %v14737_v42  ;;  %v775_v41 = vld [vmem:[%s22791_s1 + $0x16a0] sm:$0xff]  ;;  %v772_v25 = vld [vmem:[%s22791_s1 + $0x1688] sm:$0xff] }
 0x150   :  { %v776_v42 = vld [vmem:[%s22791_s1 + $0x16a8] sm:$0xff]  ;;  %v14791_v46 = vcombine.high %v771_v40, %v775_v41  ;;  %v14790_v52 = vcombine.low %v771_v40, %v775_v41 }
 0x151   :  { %v14793_v47 = vcombine.high %v772_v25, %v776_v42  ;;  %v14792_v54 = vcombine.low %v772_v25, %v776_v42 }
 0x152   :  { %9605 = vmatpush1.bf16.msra.mxu0 %v14734_v48  ;;  %10097 = vmatpush1.bf16.msra.mxu1 %v14736_v49  ;;  %v779_v48 = vld [vmem:[%s22791_s1 + $0x16c0] sm:$0xff] }
 0x153   :  { %9606 = vmatprep.subr.bf16.mxu0 %v14743_v50  ;;  %10098 = vmatprep.subr.bf16.mxu1 %v14745_v51  ;;  %v783_v49 = vld [vmem:[%s22791_s1 + $0x16e0] sm:$0xff]  ;;  %v780_v50 = vld [vmem:[%s22791_s1 + $0x16c8] sm:$0xff] }
 0x154   :  { %v784_v51 = vld [vmem:[%s22791_s1 + $0x16e8] sm:$0xff]  ;;  %v14799_v56 = vcombine.high %v779_v48, %v783_v49  ;;  %v14798_v63 = vcombine.low %v779_v48, %v783_v49  ;;  %v18093_v49 = vld [vmem:[%s22792_s0 + $0x30] sm:$0xff] }
 0x155   :  { %v14801_v58 = vcombine.high %v780_v50, %v784_v51  ;;  %v14800_v0 = vcombine.low %v780_v50, %v784_v51  ;;  %v832_v48 = vld [vmem:[%s22791_s1 + $0x1868] sm:$0xff] }
 0x156   :  { %9607 = vmatpush1.bf16.msra.mxu0 %v14742_v60  ;;  %10099 = vmatpush1.bf16.msra.mxu1 %v14744_v61  ;;  %v787_v60 = vld [vmem:[%s22791_s1 + $0x1700] sm:$0xff] }
 0x157   :  { %9608 = vmatprep.subr.bf16.mxu0 %v14751_v39  ;;  %10100 = vmatprep.subr.bf16.mxu1 %v14753_v62  ;;  %v791_v61 = vld [vmem:[%s22791_s1 + $0x1720] sm:$0xff]  ;;  %v788_v39 = vld [vmem:[%s22791_s1 + $0x1708] sm:$0xff] }
 0x158   :  { %v792_v62 = vld [vmem:[%s22791_s1 + $0x1728] sm:$0xff]  ;;  %v14807_v2 = vcombine.high %v787_v60, %v791_v61  ;;  %v14806_v8 = vcombine.low %v787_v60, %v791_v61 }
 0x159   :  { %v14809_v3 = vcombine.high %v788_v39, %v792_v62  ;;  %v14808_v9 = vcombine.low %v788_v39, %v792_v62  ;;  %v836_v60 = vld [vmem:[%s22791_s1 + $0x1888] sm:$0xff] }
 0x15a   :  { %9609 = vmatpush1.bf16.msra.mxu0 %v14750_v4  ;;  %10101 = vmatpush1.bf16.msra.mxu1 %v14752_v5  ;;  %v795_v4 = vld [vmem:[%s22791_s1 + $0x1740] sm:$0xff]  ;;  %v840_v61 = vld [vmem:[%s22791_s1 + $0x18a8] sm:$0xff] }
 0x15b   :  { %9610 = vmatprep.subr.bf16.mxu0 %v14759_v6  ;;  %10102 = vmatprep.subr.bf16.mxu1 %v14761_v7  ;;  %v799_v5 = vld [vmem:[%s22791_s1 + $0x1760] sm:$0xff]  ;;  %v796_v6 = vld [vmem:[%s22791_s1 + $0x1748] sm:$0xff] }
 0x15c   :  { %v800_v7 = vld [vmem:[%s22791_s1 + $0x1768] sm:$0xff]  ;;  %v14815_v10 = vcombine.high %v795_v4, %v799_v5  ;;  %v14814_v19 = vcombine.low %v795_v4, %v799_v5 }
 0x15d   :  { %v14817_v11 = vcombine.high %v796_v6, %v800_v7  ;;  %v14816_v20 = vcombine.low %v796_v6, %v800_v7  ;;  %v844_v4 = vld [vmem:[%s22791_s1 + $0x18c8] sm:$0xff]  ;;  %v14856_v7 = vcombine.low %v836_v60, %v840_v61 }
 0x15e   :  { %9611 = vmatpush1.bf16.msra.mxu0 %v14758_v13  ;;  %10103 = vmatpush1.bf16.msra.mxu1 %v14760_v14  ;;  %v803_v13 = vld [vmem:[%s22791_s1 + $0x1780] sm:$0xff]  ;;  %v848_v5 = vld [vmem:[%s22791_s1 + $0x18e8] sm:$0xff] }
 0x15f   :  { %9612 = vmatprep.subr.bf16.mxu0 %v14767_v17  ;;  %10104 = vmatprep.subr.bf16.mxu1 %v14769_v53  ;;  %v807_v14 = vld [vmem:[%s22791_s1 + $0x17a0] sm:$0xff]  ;;  %v804_v17 = vld [vmem:[%s22791_s1 + $0x1788] sm:$0xff] }
 0x160   :  { %v808_v53 = vld [vmem:[%s22791_s1 + $0x17a8] sm:$0xff]  ;;  %v14823_v59 = vcombine.high %v803_v13, %v807_v14  ;;  %v14822_v29 = vcombine.low %v803_v13, %v807_v14 }
 0x161   :  { %v14825_v23 = vcombine.high %v804_v17, %v808_v53  ;;  %v14824_v30 = vcombine.low %v804_v17, %v808_v53  ;;  %v852_v13 = vld [vmem:[%s22791_s1 + $0x1908] sm:$0xff]  ;;  %v14864_v53 = vcombine.low %v844_v4, %v848_v5 }
 0x162   :  { %9613 = vmatpush1.bf16.msra.mxu0 %v14766_v24  ;;  %10105 = vmatpush1.bf16.msra.mxu1 %v14768_v26  ;;  %v811_v24 = vld [vmem:[%s22791_s1 + $0x17c0] sm:$0xff]  ;;  %v856_v14 = vld [vmem:[%s22791_s1 + $0x1928] sm:$0xff] }
 0x163   :  { %9614 = vmatprep.subr.bf16.mxu0 %v14775_v15  ;;  %10106 = vmatprep.subr.bf16.mxu1 %v14777_v28  ;;  %v815_v26 = vld [vmem:[%s22791_s1 + $0x17e0] sm:$0xff]  ;;  %v812_v15 = vld [vmem:[%s22791_s1 + $0x17c8] sm:$0xff] }
 0x164   :  { %v816_v28 = vld [vmem:[%s22791_s1 + $0x17e8] sm:$0xff]  ;;  %v14831_v32 = vcombine.high %v811_v24, %v815_v26  ;;  %v14830_v40 = vcombine.low %v811_v24, %v815_v26 }
 0x165   :  { %v14833_v33 = vcombine.high %v812_v15, %v816_v28  ;;  %v14832_v41 = vcombine.low %v812_v15, %v816_v28  ;;  %v860_v24 = vld [vmem:[%s22791_s1 + $0x1948] sm:$0xff]  ;;  %v14872_v28 = vcombine.low %v852_v13, %v856_v14 }
 0x166   :  { %9615 = vmatpush1.bf16.msra.mxu0 %v14774_v34  ;;  %10107 = vmatpush1.bf16.msra.mxu1 %v14776_v35  ;;  %v819_v34 = vld [vmem:[%s22791_s1 + $0x1800] sm:$0xff]  ;;  %v864_v26 = vld [vmem:[%s22791_s1 + $0x1968] sm:$0xff] }
 0x167   :  { %9616 = vmatprep.subr.bf16.mxu0 %v14783_v37  ;;  %10108 = vmatprep.subr.bf16.mxu1 %v14785_v38  ;;  %v823_v35 = vld [vmem:[%s22791_s1 + $0x1820] sm:$0xff]  ;;  %v820_v37 = vld [vmem:[%s22791_s1 + $0x1808] sm:$0xff] }
 0x168   :  { %v824_v38 = vld [vmem:[%s22791_s1 + $0x1828] sm:$0xff]  ;;  %v14839_v25 = vcombine.high %v819_v34, %v823_v35  ;;  %v14838_v50 = vcombine.low %v819_v34, %v823_v35 }
 0x169   :  { %v14841_v42 = vcombine.high %v820_v37, %v824_v38  ;;  %v14840_v51 = vcombine.low %v820_v37, %v824_v38  ;;  %v868_v34 = vld [vmem:[%s22791_s1 + $0x1988] sm:$0xff]  ;;  %v14880_v38 = vcombine.low %v860_v24, %v864_v26 }
 0x16a   :  { %9617 = vmatpush1.bf16.msra.mxu0 %v14782_v43  ;;  %10109 = vmatpush1.bf16.msra.mxu1 %v14784_v44  ;;  %v827_v43 = vld [vmem:[%s22791_s1 + $0x1840] sm:$0xff]  ;;  %v872_v35 = vld [vmem:[%s22791_s1 + $0x19a8] sm:$0xff] }
 0x16b   :  { %9618 = vmatprep.subr.bf16.mxu0 %v14791_v46  ;;  %10110 = vmatprep.subr.bf16.mxu1 %v14793_v47  ;;  %v831_v44 = vld [vmem:[%s22791_s1 + $0x1860] sm:$0xff]  ;;  %v18082_v46 = vcombine.low %v17884_v18, %v17884_v18  ;;  %v828_v47 = vld [vmem:[%s22791_s1 + $0x1848] sm:$0xff] }
 0x16c   :  { %v14847_v18 = vcombine.high %v827_v43, %v831_v44  ;;  %v14846_v39 = vcombine.low %v827_v43, %v831_v44  ;;  %v14848_v62 = vcombine.low %v828_v47, %v832_v48  ;;  %v876_v43 = vld [vmem:[%s22791_s1 + $0x19c8] sm:$0xff] }
 0x16d   :  { %v880_v44 = vld [vmem:[%s22791_s1 + $0x19e8] sm:$0xff] }
 0x16e   :  { %9619 = vmatpush1.bf16.msra.mxu0 %v14790_v52  ;;  %10111 = vmatpush1.bf16.msra.mxu1 %v14792_v54  ;;  %v14849_v52 = vcombine.high %v828_v47, %v832_v48  ;;  %v835_v54 = vld [vmem:[%s22791_s1 + $0x1880] sm:$0xff]  ;;  %v14888_v48 = vcombine.low %v868_v34, %v872_v35 }
 0x16f   :  { %9620 = vmatprep.subr.bf16.mxu0 %v14799_v56  ;;  %10112 = vmatprep.subr.bf16.mxu1 %v14801_v58  ;;  %v839_v56 = vld [vmem:[%s22791_s1 + $0x18a0] sm:$0xff]  ;;  %v18103_v58 = vcombine.high %v18093_v49, %v18093_v49 }
 0x170   :  { %v14854_v6 = vcombine.low %v835_v54, %v839_v56 }
 0x172   :  { %9621 = vmatpush1.bf16.msra.mxu0 %v14798_v63  ;;  %10113 = vmatpush1.bf16.msra.mxu1 %v14800_v0  ;;  %v14855_v63 = vcombine.high %v835_v54, %v839_v56  ;;  %v14857_v0 = vcombine.high %v836_v60, %v840_v61  ;;  %v884_v54 = vld [vmem:[%s22791_s1 + $0x1a08] sm:$0xff]  ;;  %v14896_v61 = vcombine.low %v876_v43, %v880_v44 }
 0x173   :  { %9622 = vmatprep.subr.bf16.mxu0 %v14807_v2  ;;  %10114 = vmatprep.subr.bf16.mxu1 %v14809_v3  ;;  %v843_v2 = vld [vmem:[%s22791_s1 + $0x18c0] sm:$0xff]  ;;  %v888_v56 = vld [vmem:[%s22791_s1 + $0x1a28] sm:$0xff] }
 0x174   :  { %v847_v3 = vld [vmem:[%s22791_s1 + $0x18e0] sm:$0xff] }
 0x175   :  { %v14862_v17 = vcombine.low %v843_v2, %v847_v3 }
 0x176   :  { %9623 = vmatpush1.bf16.msra.mxu0 %v14806_v8  ;;  %10115 = vmatpush1.bf16.msra.mxu1 %v14808_v9  ;;  %v14863_v8 = vcombine.high %v843_v2, %v847_v3  ;;  %v14865_v9 = vcombine.high %v844_v4, %v848_v5  ;;  %v892_v2 = vld [vmem:[%s22791_s1 + $0x1a48] sm:$0xff]  ;;  %v14904_v5 = vcombine.low %v884_v54, %v888_v56 }
 0x177   :  { %9624 = vmatprep.subr.bf16.mxu0 %v14815_v10  ;;  %10116 = vmatprep.subr.bf16.mxu1 %v14817_v11  ;;  %v851_v10 = vld [vmem:[%s22791_s1 + $0x1900] sm:$0xff]  ;;  %v896_v3 = vld [vmem:[%s22791_s1 + $0x1a68] sm:$0xff] }
 0x178   :  { %v855_v11 = vld [vmem:[%s22791_s1 + $0x1920] sm:$0xff] }
 0x179   :  { %v14870_v15 = vcombine.low %v851_v10, %v855_v11 }
 0x17a   :  { %9625 = vmatpush1.bf16.msra.mxu0 %v14814_v19  ;;  %10117 = vmatpush1.bf16.msra.mxu1 %v14816_v20  ;;  %v14871_v19 = vcombine.high %v851_v10, %v855_v11  ;;  %v14873_v20 = vcombine.high %v852_v13, %v856_v14  ;;  %v900_v10 = vld [vmem:[%s22791_s1 + $0x1a88] sm:$0xff]  ;;  %v14912_v14 = vcombine.low %v892_v2, %v896_v3 }
 0x17b   :  { %9626 = vmatprep.subr.bf16.mxu0 %v14823_v59  ;;  %10118 = vmatprep.subr.bf16.mxu1 %v14825_v23  ;;  %v859_v59 = vld [vmem:[%s22791_s1 + $0x1940] sm:$0xff]  ;;  %v904_v11 = vld [vmem:[%s22791_s1 + $0x1aa8] sm:$0xff] }
 0x17c   :  { %v863_v23 = vld [vmem:[%s22791_s1 + $0x1960] sm:$0xff] }
 0x17d   :  { %v14878_v37 = vcombine.low %v859_v59, %v863_v23 }
 0x17e   :  { %9627 = vmatpush1.bf16.msra.mxu0 %v14822_v29  ;;  %10119 = vmatpush1.bf16.msra.mxu1 %v14824_v30  ;;  %v14879_v29 = vcombine.high %v859_v59, %v863_v23  ;;  %v14881_v30 = vcombine.high %v860_v24, %v864_v26  ;;  %v908_v59 = vld [vmem:[%s22791_s1 + $0x1ac8] sm:$0xff]  ;;  %v14920_v26 = vcombine.low %v900_v10, %v904_v11 }
 0x17f   :  { %9628 = vmatprep.subr.bf16.mxu0 %v14831_v32  ;;  %10120 = vmatprep.subr.bf16.mxu1 %v14833_v33  ;;  %v867_v32 = vld [vmem:[%s22791_s1 + $0x1980] sm:$0xff]  ;;  %v912_v23 = vld [vmem:[%s22791_s1 + $0x1ae8] sm:$0xff] }
 0x180   :  { %v871_v33 = vld [vmem:[%s22791_s1 + $0x19a0] sm:$0xff] }
 0x181   :  { %v14886_v47 = vcombine.low %v867_v32, %v871_v33 }
 0x182   :  { %9629 = vmatpush1.bf16.msra.mxu0 %v14830_v40  ;;  %10121 = vmatpush1.bf16.msra.mxu1 %v14832_v41  ;;  %v14887_v40 = vcombine.high %v867_v32, %v871_v33  ;;  %v14889_v41 = vcombine.high %v868_v34, %v872_v35  ;;  %v916_v32 = vld [vmem:[%s22791_s1 + $0x1b08] sm:$0xff]  ;;  %v14928_v35 = vcombine.low %v908_v59, %v912_v23 }
 0x183   :  { %9639 = vmatprep.subr.bf16.mxu0 %v14839_v25  ;;  %10131 = vmatprep.subr.bf16.mxu1 %v14841_v42  ;;  %v875_v25 = vld [vmem:[%s22791_s1 + $0x19c0] sm:$0xff]  ;;  %v920_v33 = vld [vmem:[%s22791_s1 + $0x1b28] sm:$0xff] }
 0x184   :  { %v879_v42 = vld [vmem:[%s22791_s1 + $0x19e0] sm:$0xff] }
 0x185   :  { %9631 = vmatmul.mubr.bf16.vlgmr.msra.gmra.mrb[0].mxu0 %v18082_v46  ;;  %10123 = vmatmul.mubr.bf16.vlgmr.msra.gmra.mrb[0].mxu1 %v18082_v46  ;;  %v14894_v60 = vcombine.low %v875_v25, %v879_v42 }
 0x186   :  { %9640 = vmatpush1.bf16.msra.mxu0 %v14838_v50  ;;  %10132 = vmatpush1.bf16.msra.mxu1 %v14840_v51  ;;  %v14895_v50 = vcombine.high %v875_v25, %v879_v42  ;;  %v14897_v51 = vcombine.high %v876_v43, %v880_v44  ;;  %v924_v25 = vld [vmem:[%s22791_s1 + $0x1b48] sm:$0xff]  ;;  %v14936_v44 = vcombine.low %v916_v32, %v920_v33 }
 0x187   :  { %9641 = vmatprep.subr.bf16.mxu0 %v14847_v18  ;;  %10133 = vmatprep.subr.bf16.mxu1 %v14849_v52  ;;  %v883_v18 = vld [vmem:[%s22791_s1 + $0x1a00] sm:$0xff]  ;;  %v928_v42 = vld [vmem:[%s22791_s1 + $0x1b68] sm:$0xff] }
 0x188   :  { %9671 = vmatprep.mubr.bf16.mxu0 %v18103_v58  ;;  %10163 = vmatprep.mubr.bf16.mxu1 %v18103_v58  ;;  %v887_v52 = vld [vmem:[%s22791_s1 + $0x1a20] sm:$0xff] }
 0x189   :  { %v14902_v4 = vcombine.low %v883_v18, %v887_v52 }
 0x18a   :  { %9642 = vmatpush1.bf16.msra.mxu0 %v14846_v39  ;;  %10134 = vmatpush1.bf16.msra.mxu1 %v14848_v62  ;;  %v14903_v39 = vcombine.high %v883_v18, %v887_v52  ;;  %v14905_v62 = vcombine.high %v884_v54, %v888_v56  ;;  %v932_v18 = vld [vmem:[%s22791_s1 + $0x1b88] sm:$0xff]  ;;  %v14944_v56 = vcombine.low %v924_v25, %v928_v42 }
 0x18b   :  { %9643 = vmatprep.subr.bf16.mxu0 %v14855_v63  ;;  %10135 = vmatprep.subr.bf16.mxu1 %v14857_v0  ;;  %v891_v63 = vld [vmem:[%s22791_s1 + $0x1a40] sm:$0xff]  ;;  %v936_v52 = vld [vmem:[%s22791_s1 + $0x1ba8] sm:$0xff] }
 0x18c   :  { %v895_v0 = vld [vmem:[%s22791_s1 + $0x1a60] sm:$0xff] }
 0x18d   :  { %v14910_v13 = vcombine.low %v891_v63, %v895_v0 }
 0x18e   :  { %9644 = vmatpush1.bf16.msra.mxu0 %v14854_v6  ;;  %10136 = vmatpush1.bf16.msra.mxu1 %v14856_v7  ;;  %v14911_v6 = vcombine.high %v891_v63, %v895_v0  ;;  %v14913_v7 = vcombine.high %v892_v2, %v896_v3  ;;  %v940_v63 = vld [vmem:[%s22791_s1 + $0x1bc8] sm:$0xff]  ;;  %v14952_v3 = vcombine.low %v932_v18, %v936_v52 }
 0x18f   :  { %9645 = vmatprep.subr.bf16.mxu0 %v14863_v8  ;;  %10137 = vmatprep.subr.bf16.mxu1 %v14865_v9  ;;  %v899_v8 = vld [vmem:[%s22791_s1 + $0x1a80] sm:$0xff]  ;;  %v944_v0 = vld [vmem:[%s22791_s1 + $0x1be8] sm:$0xff] }
 0x190   :  { %v903_v9 = vld [vmem:[%s22791_s1 + $0x1aa0] sm:$0xff] }
 0x191   :  { %v14918_v24 = vcombine.low %v899_v8, %v903_v9 }
 0x192   :  { %9646 = vmatpush1.bf16.msra.mxu0 %v14862_v17  ;;  %10138 = vmatpush1.bf16.msra.mxu1 %v14864_v53  ;;  %v14919_v17 = vcombine.high %v899_v8, %v903_v9  ;;  %v14921_v53 = vcombine.high %v900_v10, %v904_v11  ;;  %v948_v8 = vld [vmem:[%s22791_s1 + $0x1c08] sm:$0xff]  ;;  %v14960_v11 = vcombine.low %v940_v63, %v944_v0 }
 0x193   :  { %9647 = vmatprep.subr.bf16.mxu0 %v14871_v19  ;;  %10139 = vmatprep.subr.bf16.mxu1 %v14873_v20  ;;  %v907_v19 = vld [vmem:[%s22791_s1 + $0x1ac0] sm:$0xff]  ;;  %v952_v9 = vld [vmem:[%s22791_s1 + $0x1c28] sm:$0xff] }
 0x194   :  { %v911_v20 = vld [vmem:[%s22791_s1 + $0x1ae0] sm:$0xff] }
 0x195   :  { %v14926_v34 = vcombine.low %v907_v19, %v911_v20 }
 0x196   :  { %9648 = vmatpush1.bf16.msra.mxu0 %v14870_v15  ;;  %10140 = vmatpush1.bf16.msra.mxu1 %v14872_v28  ;;  %v14927_v15 = vcombine.high %v907_v19, %v911_v20  ;;  %v14929_v28 = vcombine.high %v908_v59, %v912_v23  ;;  %v18291_v19 = vcombine.low %v18093_v49, %v18093_v49  ;;  %v956_v20 = vld [vmem:[%s22791_s1 + $0x1c48] sm:$0xff]  ;;  %v18302_v23 = vld [vmem:[%s22792_s0 + $0x38] sm:$0xff] }
 0x197   :  { %9649 = vmatprep.subr.bf16.mxu0 %v14879_v29  ;;  %10141 = vmatprep.subr.bf16.mxu1 %v14881_v30  ;;  %v915_v29 = vld [vmem:[%s22791_s1 + $0x1b00] sm:$0xff]  ;;  %v960_v59 = vld [vmem:[%s22791_s1 + $0x1c68] sm:$0xff] }
 0x198   :  { %v919_v30 = vld [vmem:[%s22791_s1 + $0x1b20] sm:$0xff] }
 0x199   :  { %v14934_v43 = vcombine.low %v915_v29, %v919_v30 }
 0x19a   :  { %9650 = vmatpush1.bf16.msra.mxu0 %v14878_v37  ;;  %10142 = vmatpush1.bf16.msra.mxu1 %v14880_v38  ;;  %v14935_v37 = vcombine.high %v915_v29, %v919_v30  ;;  %v14937_v38 = vcombine.high %v916_v32, %v920_v33  ;;  %v967_v29 = vld [vmem:[%s22791_s1 + $0x1ca0] sm:$0xff]  ;;  %v18312_v30 = vcombine.high %v18302_v23, %v18302_v23  ;;  %v964_v32 = vld [vmem:[%s22791_s1 + $0x1c88] sm:$0xff] }
 0x19b   :  { %9651 = vmatprep.subr.bf16.mxu0 %v14887_v40  ;;  %10143 = vmatprep.subr.bf16.mxu1 %v14889_v41  ;;  %v923_v40 = vld [vmem:[%s22791_s1 + $0x1b40] sm:$0xff]  ;;  %v968_v33 = vld [vmem:[%s22791_s1 + $0x1ca8] sm:$0xff] }
 0x19c   :  { %v927_v41 = vld [vmem:[%s22791_s1 + $0x1b60] sm:$0xff] }
 0x19d   :  { %v14942_v54 = vcombine.low %v923_v40, %v927_v41 }
 0x19e   :  { %9652 = vmatpush1.bf16.msra.mxu0 %v14886_v47  ;;  %10144 = vmatpush1.bf16.msra.mxu1 %v14888_v48  ;;  %v14943_v47 = vcombine.high %v923_v40, %v927_v41  ;;  %v14945_v48 = vcombine.high %v924_v25, %v928_v42  ;;  %v971_v40 = vld [vmem:[%s22791_s1 + $0x1cc0] sm:$0xff]  ;;  %v972_v25 = vld [vmem:[%s22791_s1 + $0x1cc8] sm:$0xff] }
 0x19f   :  { %9653 = vmatprep.subr.bf16.mxu0 %v14895_v50  ;;  %10145 = vmatprep.subr.bf16.mxu1 %v14897_v51  ;;  %v931_v50 = vld [vmem:[%s22791_s1 + $0x1b80] sm:$0xff]  ;;  %v976_v42 = vld [vmem:[%s22791_s1 + $0x1ce8] sm:$0xff] }
 0x1a0   :  { %v935_v51 = vld [vmem:[%s22791_s1 + $0x1ba0] sm:$0xff] }
 0x1a1   :  { %v14950_v2 = vcombine.low %v931_v50, %v935_v51  ;;  %v975_v41 = vld [vmem:[%s22791_s1 + $0x1ce0] sm:$0xff] }
 0x1a2   :  { %9654 = vmatpush1.bf16.msra.mxu0 %v14894_v60  ;;  %10146 = vmatpush1.bf16.msra.mxu1 %v14896_v61  ;;  %v14951_v60 = vcombine.high %v931_v50, %v935_v51  ;;  %v14953_v61 = vcombine.high %v932_v18, %v936_v52  ;;  %v979_v50 = vld [vmem:[%s22791_s1 + $0x1d00] sm:$0xff]  ;;  %v980_v18 = vld [vmem:[%s22791_s1 + $0x1d08] sm:$0xff] }
 0x1a3   :  { %9655 = vmatprep.subr.bf16.mxu0 %v14903_v39  ;;  %10147 = vmatprep.subr.bf16.mxu1 %v14905_v62  ;;  %v939_v39 = vld [vmem:[%s22791_s1 + $0x1bc0] sm:$0xff]  ;;  %v984_v52 = vld [vmem:[%s22791_s1 + $0x1d28] sm:$0xff] }
 0x1a4   :  { %v943_v62 = vld [vmem:[%s22791_s1 + $0x1be0] sm:$0xff] }
 0x1a5   :  { %v14958_v10 = vcombine.low %v939_v39, %v943_v62  ;;  %v983_v51 = vld [vmem:[%s22791_s1 + $0x1d20] sm:$0xff] }
 0x1a6   :  { %9656 = vmatpush1.bf16.msra.mxu0 %v14902_v4  ;;  %10148 = vmatpush1.bf16.msra.mxu1 %v14904_v5  ;;  %v14959_v4 = vcombine.high %v939_v39, %v943_v62  ;;  %v14961_v5 = vcombine.high %v940_v63, %v944_v0  ;;  %v987_v39 = vld [vmem:[%s22791_s1 + $0x1d40] sm:$0xff]  ;;  %v988_v63 = vld [vmem:[%s22791_s1 + $0x1d48] sm:$0xff] }
 0x1a7   :  { %9657 = vmatprep.subr.bf16.mxu0 %v14911_v6  ;;  %10149 = vmatprep.subr.bf16.mxu1 %v14913_v7  ;;  %v947_v6 = vld [vmem:[%s22791_s1 + $0x1c00] sm:$0xff]  ;;  %v992_v0 = vld [vmem:[%s22791_s1 + $0x1d68] sm:$0xff] }
 0x1a8   :  { %v951_v7 = vld [vmem:[%s22791_s1 + $0x1c20] sm:$0xff] }
 0x1a9   :  { %v991_v62 = vld [vmem:[%s22791_s1 + $0x1d60] sm:$0xff] }
 0x1aa   :  { %9658 = vmatpush1.bf16.msra.mxu0 %v14910_v13  ;;  %10150 = vmatpush1.bf16.msra.mxu1 %v14912_v14  ;;  %v14967_v13 = vcombine.high %v947_v6, %v951_v7  ;;  %v14969_v14 = vcombine.high %v948_v8, %v952_v9 }
 0x1ab   :  { %9659 = vmatprep.subr.bf16.mxu0 %v14919_v17  ;;  %10151 = vmatprep.subr.bf16.mxu1 %v14921_v53  ;;  %v955_v17 = vld [vmem:[%s22791_s1 + $0x1c40] sm:$0xff] }
 0x1ac   :  { %v959_v53 = vld [vmem:[%s22791_s1 + $0x1c60] sm:$0xff] }
 0x1ad   :  { %v14975_v49 = vcombine.high %v955_v17, %v959_v53 }
 0x1ae   :  { %9660 = vmatpush1.bf16.msra.mxu0 %v14918_v24  ;;  %10152 = vmatpush1.bf16.msra.mxu1 %v14920_v26  ;;  %v14966_v24 = vcombine.low %v947_v6, %v951_v7  ;;  %v14968_v26 = vcombine.low %v948_v8, %v952_v9  ;;  %v995_v6 = vld [vmem:[%s22791_s1 + $0x1d80] sm:$0xff]  ;;  %v996_v8 = vld [vmem:[%s22791_s1 + $0x1d88] sm:$0xff] }
 0x1af   :  { %9661 = vmatprep.subr.bf16.mxu0 %v14927_v15  ;;  %10153 = vmatprep.subr.bf16.mxu1 %v14929_v28  ;;  %v14977_v15 = vcombine.high %v956_v20, %v960_v59  ;;  %v963_v28 = vld [vmem:[%s22791_s1 + $0x1c80] sm:$0xff]  ;;  %v1000_v9 = vld [vmem:[%s22791_s1 + $0x1da8] sm:$0xff] }
 0x1b0   :  { %v999_v7 = vld [vmem:[%s22791_s1 + $0x1da0] sm:$0xff] }
 0x1b2   :  { %9662 = vmatpush1.bf16.msra.mxu0 %v14926_v34  ;;  %10154 = vmatpush1.bf16.msra.mxu1 %v14928_v35  ;;  %v14974_v34 = vcombine.low %v955_v17, %v959_v53  ;;  %v14976_v35 = vcombine.low %v956_v20, %v960_v59  ;;  %v1003_v17 = vld [vmem:[%s22791_s1 + $0x1dc0] sm:$0xff]  ;;  %v1004_v20 = vld [vmem:[%s22791_s1 + $0x1dc8] sm:$0xff] }
 0x1b3   :  { %9663 = vmatprep.subr.bf16.mxu0 %v14935_v37  ;;  %10155 = vmatprep.subr.bf16.mxu1 %v14937_v38  ;;  %v14983_v37 = vcombine.high %v963_v28, %v967_v29  ;;  %v14985_v38 = vcombine.high %v964_v32, %v968_v33  ;;  %v1007_v53 = vld [vmem:[%s22791_s1 + $0x1de0] sm:$0xff]  ;;  %v1008_v59 = vld [vmem:[%s22791_s1 + $0x1de8] sm:$0xff] }
 0x1b6   :  { %9664 = vmatpush1.bf16.msra.mxu0 %v14934_v43  ;;  %10156 = vmatpush1.bf16.msra.mxu1 %v14936_v44  ;;  %v14982_v43 = vcombine.low %v963_v28, %v967_v29  ;;  %v14984_v44 = vcombine.low %v964_v32, %v968_v33  ;;  %v1011_v28 = vld [vmem:[%s22791_s1 + $0x1e00] sm:$0xff]  ;;  %v1012_v32 = vld [vmem:[%s22791_s1 + $0x1e08] sm:$0xff] }
 0x1b7   :  { %9665 = vmatprep.subr.bf16.mxu0 %v14943_v47  ;;  %10157 = vmatprep.subr.bf16.mxu1 %v14945_v48  ;;  %v14991_v47 = vcombine.high %v971_v40, %v975_v41  ;;  %v14993_v48 = vcombine.high %v972_v25, %v976_v42  ;;  %v1015_v29 = vld [vmem:[%s22791_s1 + $0x1e20] sm:$0xff]  ;;  %v1016_v33 = vld [vmem:[%s22791_s1 + $0x1e28] sm:$0xff] }
 0x1ba   :  { %9666 = vmatpush1.bf16.msra.mxu0 %v14942_v54  ;;  %10158 = vmatpush1.bf16.msra.mxu1 %v14944_v56  ;;  %v14990_v54 = vcombine.low %v971_v40, %v975_v41  ;;  %v14992_v56 = vcombine.low %v972_v25, %v976_v42  ;;  %v1019_v40 = vld [vmem:[%s22791_s1 + $0x1e40] sm:$0xff]  ;;  %v1020_v25 = vld [vmem:[%s22791_s1 + $0x1e48] sm:$0xff] }
 0x1bb   :  { %9667 = vmatprep.subr.bf16.mxu0 %v14951_v60  ;;  %10159 = vmatprep.subr.bf16.mxu1 %v14953_v61  ;;  %v14999_v60 = vcombine.high %v979_v50, %v983_v51  ;;  %v15001_v61 = vcombine.high %v980_v18, %v984_v52  ;;  %v1023_v41 = vld [vmem:[%s22791_s1 + $0x1e60] sm:$0xff]  ;;  %v1024_v42 = vld [vmem:[%s22791_s1 + $0x1e68] sm:$0xff] }
 0x1be   :  { %9668 = vmatpush1.bf16.msra.mxu0 %v14950_v2  ;;  %10160 = vmatpush1.bf16.msra.mxu1 %v14952_v3  ;;  %v14998_v2 = vcombine.low %v979_v50, %v983_v51  ;;  %v15000_v3 = vcombine.low %v980_v18, %v984_v52  ;;  %v1027_v50 = vld [vmem:[%s22791_s1 + $0x1e80] sm:$0xff]  ;;  %v1028_v18 = vld [vmem:[%s22791_s1 + $0x1e88] sm:$0xff] }
 0x1bf   :  { %9669 = vmatprep.subr.bf16.mxu0 %v14959_v4  ;;  %10161 = vmatprep.subr.bf16.mxu1 %v14961_v5  ;;  %v15007_v4 = vcombine.high %v987_v39, %v991_v62  ;;  %v15009_v5 = vcombine.high %v988_v63, %v992_v0  ;;  %v1031_v51 = vld [vmem:[%s22791_s1 + $0x1ea0] sm:$0xff]  ;;  %v1032_v52 = vld [vmem:[%s22791_s1 + $0x1ea8] sm:$0xff] }
 0x1c2   :  { %9670 = vmatpush1.bf16.msra.mxu0 %v14958_v10  ;;  %10162 = vmatpush1.bf16.msra.mxu1 %v14960_v11  ;;  %v15006_v10 = vcombine.low %v987_v39, %v991_v62  ;;  %v15008_v11 = vcombine.low %v988_v63, %v992_v0  ;;  %v1035_v39 = vld [vmem:[%s22791_s1 + $0x1ec0] sm:$0xff]  ;;  %v1036_v63 = vld [vmem:[%s22791_s1 + $0x1ec8] sm:$0xff] }
 0x1c3   :  { %9680 = vmatprep.subr.bf16.mxu0 %v14967_v13  ;;  %10172 = vmatprep.subr.bf16.mxu1 %v14969_v14  ;;  %v15015_v13 = vcombine.high %v995_v6, %v999_v7  ;;  %v15017_v14 = vcombine.high %v996_v8, %v1000_v9  ;;  %v1039_v62 = vld [vmem:[%s22791_s1 + $0x1ee0] sm:$0xff]  ;;  %v1040_v0 = vld [vmem:[%s22791_s1 + $0x1ee8] sm:$0xff] }
 0x1c5   :  { %9672 = vmatmul.mubr.bf16.vlgmr.msra.gmra.mrb[0].mxu0 %v18291_v19  ;;  %10164 = vmatmul.mubr.bf16.vlgmr.msra.gmra.mrb[0].mxu1 %v18291_v19 }
 0x1c6   :  { %9681 = vmatpush1.bf16.msra.mxu0 %v14966_v24  ;;  %10173 = vmatpush1.bf16.msra.mxu1 %v14968_v26  ;;  %v15014_v24 = vcombine.low %v995_v6, %v999_v7  ;;  %v15016_v26 = vcombine.low %v996_v8, %v1000_v9  ;;  %v1043_v6 = vld [vmem:[%s22791_s1 + $0x1f00] sm:$0xff]  ;;  %v1044_v8 = vld [vmem:[%s22791_s1 + $0x1f08] sm:$0xff] }
 0x1c7   :  { %9682 = vmatprep.subr.bf16.mxu0 %v14975_v49  ;;  %10174 = vmatprep.subr.bf16.mxu1 %v14977_v15  ;;  %v15023_v49 = vcombine.high %v1003_v17, %v1007_v53  ;;  %v15025_v15 = vcombine.high %v1004_v20, %v1008_v59  ;;  %v1047_v7 = vld [vmem:[%s22791_s1 + $0x1f20] sm:$0xff]  ;;  %v1048_v9 = vld [vmem:[%s22791_s1 + $0x1f28] sm:$0xff] }
 0x1c8   :  { %9712 = vmatprep.mubr.bf16.mxu0 %v18312_v30  ;;  %10204 = vmatprep.mubr.bf16.mxu1 %v18312_v30 }
 0x1ca   :  { %9683 = vmatpush1.bf16.msra.mxu0 %v14974_v34  ;;  %10175 = vmatpush1.bf16.msra.mxu1 %v14976_v35  ;;  %v15022_v34 = vcombine.low %v1003_v17, %v1007_v53  ;;  %v15024_v35 = vcombine.low %v1004_v20, %v1008_v59  ;;  %v1051_v17 = vld [vmem:[%s22791_s1 + $0x1f40] sm:$0xff]  ;;  %v1052_v20 = vld [vmem:[%s22791_s1 + $0x1f48] sm:$0xff] }
 0x1cb   :  { %9684 = vmatprep.subr.bf16.mxu0 %v14983_v37  ;;  %10176 = vmatprep.subr.bf16.mxu1 %v14985_v38  ;;  %v15031_v37 = vcombine.high %v1011_v28, %v1015_v29  ;;  %v15033_v38 = vcombine.high %v1012_v32, %v1016_v33  ;;  %v1055_v53 = vld [vmem:[%s22791_s1 + $0x1f60] sm:$0xff]  ;;  %v1056_v59 = vld [vmem:[%s22791_s1 + $0x1f68] sm:$0xff] }
 0x1ce   :  { %9685 = vmatpush1.bf16.msra.mxu0 %v14982_v43  ;;  %10177 = vmatpush1.bf16.msra.mxu1 %v14984_v44  ;;  %v15030_v43 = vcombine.low %v1011_v28, %v1015_v29  ;;  %v15032_v44 = vcombine.low %v1012_v32, %v1016_v33  ;;  %v1059_v28 = vld [vmem:[%s22791_s1 + $0x1f80] sm:$0xff]  ;;  %v1060_v32 = vld [vmem:[%s22791_s1 + $0x1f88] sm:$0xff] }
 0x1cf   :  { %9686 = vmatprep.subr.bf16.mxu0 %v14991_v47  ;;  %10178 = vmatprep.subr.bf16.mxu1 %v14993_v48  ;;  %v15039_v47 = vcombine.high %v1019_v40, %v1023_v41  ;;  %v15041_v48 = vcombine.high %v1020_v25, %v1024_v42  ;;  %v1063_v29 = vld [vmem:[%s22791_s1 + $0x1fa0] sm:$0xff]  ;;  %v1064_v33 = vld [vmem:[%s22791_s1 + $0x1fa8] sm:$0xff] }
 0x1d2   :  { %9687 = vmatpush1.bf16.msra.mxu0 %v14990_v54  ;;  %10179 = vmatpush1.bf16.msra.mxu1 %v14992_v56  ;;  %v15038_v54 = vcombine.low %v1019_v40, %v1023_v41  ;;  %v15040_v56 = vcombine.low %v1020_v25, %v1024_v42  ;;  %v1067_v40 = vld [vmem:[%s22791_s1 + $0x1fc0] sm:$0xff]  ;;  %v1068_v25 = vld [vmem:[%s22791_s1 + $0x1fc8] sm:$0xff] }
 0x1d3   :  { %9688 = vmatprep.subr.bf16.mxu0 %v14999_v60  ;;  %10180 = vmatprep.subr.bf16.mxu1 %v15001_v61  ;;  %v15047_v60 = vcombine.high %v1027_v50, %v1031_v51  ;;  %v15049_v61 = vcombine.high %v1028_v18, %v1032_v52  ;;  %v1071_v41 = vld [vmem:[%s22791_s1 + $0x1fe0] sm:$0xff]  ;;  %v1072_v42 = vld [vmem:[%s22791_s1 + $0x1fe8] sm:$0xff] }
 0x1d6   :  { %9689 = vmatpush1.bf16.msra.mxu0 %v14998_v2  ;;  %10181 = vmatpush1.bf16.msra.mxu1 %v15000_v3  ;;  %v15046_v2 = vcombine.low %v1027_v50, %v1031_v51  ;;  %v15048_v3 = vcombine.low %v1028_v18, %v1032_v52  ;;  %v1075_v50 = vld [vmem:[%s22791_s1 + $0x2000] sm:$0xff]  ;;  %v1076_v18 = vld [vmem:[%s22791_s1 + $0x2008] sm:$0xff] }
 0x1d7   :  { %9690 = vmatprep.subr.bf16.mxu0 %v15007_v4  ;;  %10182 = vmatprep.subr.bf16.mxu1 %v15009_v5  ;;  %v15055_v4 = vcombine.high %v1035_v39, %v1039_v62  ;;  %v15057_v5 = vcombine.high %v1036_v63, %v1040_v0  ;;  %v1079_v51 = vld [vmem:[%s22791_s1 + $0x2020] sm:$0xff]  ;;  %v1080_v52 = vld [vmem:[%s22791_s1 + $0x2028] sm:$0xff] }
 0x1da   :  { %9691 = vmatpush1.bf16.msra.mxu0 %v15006_v10  ;;  %10183 = vmatpush1.bf16.msra.mxu1 %v15008_v11  ;;  %v15054_v10 = vcombine.low %v1035_v39, %v1039_v62  ;;  %v15056_v11 = vcombine.low %v1036_v63, %v1040_v0  ;;  %v1083_v39 = vld [vmem:[%s22791_s1 + $0x2040] sm:$0xff]  ;;  %v18500_v63 = vcombine.low %v18302_v23, %v18302_v23  ;;  %v1084_v0 = vld [vmem:[%s22791_s1 + $0x2048] sm:$0xff] }
 0x1db   :  { %9692 = vmatprep.subr.bf16.mxu0 %v15015_v13  ;;  %10184 = vmatprep.subr.bf16.mxu1 %v15017_v14  ;;  %v15063_v13 = vcombine.high %v1043_v6, %v1047_v7  ;;  %v15065_v14 = vcombine.high %v1044_v8, %v1048_v9  ;;  %v1087_v62 = vld [vmem:[%s22791_s1 + $0x2060] sm:$0xff] }
 0x1dc   :  { %v15103_v23 = vcombine.high %v1083_v39, %v1087_v62 }
 0x1de   :  { %9693 = vmatpush1.bf16.msra.mxu0 %v15014_v24  ;;  %10185 = vmatpush1.bf16.msra.mxu1 %v15016_v26  ;;  %v15062_v24 = vcombine.low %v1043_v6, %v1047_v7  ;;  %v15064_v26 = vcombine.low %v1044_v8, %v1048_v9  ;;  %v1091_v7 = vld [vmem:[%s22791_s1 + $0x2080] sm:$0xff] }
 0x1df   :  { %9694 = vmatprep.subr.bf16.mxu0 %v15023_v49  ;;  %10186 = vmatprep.subr.bf16.mxu1 %v15025_v15  ;;  %v15071_v49 = vcombine.high %v1051_v17, %v1055_v53  ;;  %v15073_v15 = vcombine.high %v1052_v20, %v1056_v59  ;;  %v1095_v8 = vld [vmem:[%s22791_s1 + $0x20a0] sm:$0xff] }
 0x1e2   :  { %9695 = vmatpush1.bf16.msra.mxu0 %v15022_v34  ;;  %10187 = vmatpush1.bf16.msra.mxu1 %v15024_v35  ;;  %v15070_v34 = vcombine.low %v1051_v17, %v1055_v53  ;;  %v15072_v35 = vcombine.low %v1052_v20, %v1056_v59  ;;  %v15111_v17 = vcombine.high %v1091_v7, %v1095_v8  ;;  %v1099_v20 = vld [vmem:[%s22791_s1 + $0x20c0] sm:$0xff] }
 0x1e3   :  { %9696 = vmatprep.subr.bf16.mxu0 %v15031_v37  ;;  %10188 = vmatprep.subr.bf16.mxu1 %v15033_v38  ;;  %v15079_v37 = vcombine.high %v1059_v28, %v1063_v29  ;;  %v15081_v38 = vcombine.high %v1060_v32, %v1064_v33  ;;  %v1103_v59 = vld [vmem:[%s22791_s1 + $0x20e0] sm:$0xff] }
 0x1e6   :  { %9697 = vmatpush1.bf16.msra.mxu0 %v15030_v43  ;;  %10189 = vmatpush1.bf16.msra.mxu1 %v15032_v44  ;;  %v15078_v43 = vcombine.low %v1059_v28, %v1063_v29  ;;  %v15080_v44 = vcombine.low %v1060_v32, %v1064_v33  ;;  %v15119_v28 = vcombine.high %v1099_v20, %v1103_v59  ;;  %v1107_v32 = vld [vmem:[%s22791_s1 + $0x2100] sm:$0xff] }
 0x1e7   :  { %9698 = vmatprep.subr.bf16.mxu0 %v15039_v47  ;;  %10190 = vmatprep.subr.bf16.mxu1 %v15041_v48  ;;  %v15087_v47 = vcombine.high %v1067_v40, %v1071_v41  ;;  %v15089_v48 = vcombine.high %v1068_v25, %v1072_v42  ;;  %v1111_v33 = vld [vmem:[%s22791_s1 + $0x2120] sm:$0xff] }
 0x1ea   :  { %9699 = vmatpush1.bf16.msra.mxu0 %v15038_v54  ;;  %10191 = vmatpush1.bf16.msra.mxu1 %v15040_v56  ;;  %v15086_v54 = vcombine.low %v1067_v40, %v1071_v41  ;;  %v15088_v56 = vcombine.low %v1068_v25, %v1072_v42  ;;  %v15127_v40 = vcombine.high %v1107_v32, %v1111_v33  ;;  %v1115_v25 = vld [vmem:[%s22791_s1 + $0x2140] sm:$0xff] }
 0x1eb   :  { %9700 = vmatprep.subr.bf16.mxu0 %v15047_v60  ;;  %10192 = vmatprep.subr.bf16.mxu1 %v15049_v61  ;;  %v15095_v60 = vcombine.high %v1075_v50, %v1079_v51  ;;  %v15097_v61 = vcombine.high %v1076_v18, %v1080_v52  ;;  %v1119_v42 = vld [vmem:[%s22791_s1 + $0x2160] sm:$0xff] }
 0x1ee   :  { %9701 = vmatpush1.bf16.msra.mxu0 %v15046_v2  ;;  %10193 = vmatpush1.bf16.msra.mxu1 %v15048_v3  ;;  %v1088_v2 = vld [vmem:[%s22791_s1 + $0x2068] sm:$0xff]  ;;  %v18511_v3 = vld [vmem:[%s22792_s0 + $0x40] sm:$0xff] }
 0x1ef   :  { %9702 = vmatprep.subr.bf16.mxu0 %v15055_v4  ;;  %10194 = vmatprep.subr.bf16.mxu1 %v15057_v5  ;;  %v15094_v4 = vcombine.low %v1075_v50, %v1079_v51  ;;  %v15096_v5 = vcombine.low %v1076_v18, %v1080_v52  ;;  %v15105_v6 = vcombine.high %v1084_v0, %v1088_v2  ;;  %v1123_v18 = vld [vmem:[%s22791_s1 + $0x2180] sm:$0xff] }
 0x1f0   :  { %v18521_v9 = vcombine.high %v18511_v3, %v18511_v3  ;;  %v15135_v50 = vcombine.high %v1115_v25, %v1119_v42  ;;  %v1127_v52 = vld [vmem:[%s22791_s1 + $0x21a0] sm:$0xff] }
 0x1f2   :  { %9703 = vmatpush1.bf16.msra.mxu0 %v15054_v10  ;;  %10195 = vmatpush1.bf16.msra.mxu1 %v15056_v11  ;;  %v1092_v10 = vld [vmem:[%s22791_s1 + $0x2088] sm:$0xff] }
 0x1f3   :  { %9704 = vmatprep.subr.bf16.mxu0 %v15063_v13  ;;  %10196 = vmatprep.subr.bf16.mxu1 %v15065_v14  ;;  %v1096_v11 = vld [vmem:[%s22791_s1 + $0x20a8] sm:$0xff]  ;;  %v15102_v13 = vcombine.low %v1083_v39, %v1087_v62  ;;  %v15104_v14 = vcombine.low %v1084_v0, %v1088_v2  ;;  %v15143_v39 = vcombine.high %v1123_v18, %v1127_v52  ;;  %v1131_v0 = vld [vmem:[%s22791_s1 + $0x21c0] sm:$0xff] }
 0x1f4   :  { %v15113_v53 = vcombine.high %v1092_v10, %v1096_v11  ;;  %v1135_v2 = vld [vmem:[%s22791_s1 + $0x21e0] sm:$0xff] }
 0x1f6   :  { %9705 = vmatpush1.bf16.msra.mxu0 %v15062_v24  ;;  %10197 = vmatpush1.bf16.msra.mxu1 %v15064_v26  ;;  %v1100_v24 = vld [vmem:[%s22791_s1 + $0x20c8] sm:$0xff] }
 0x1f7   :  { %9706 = vmatprep.subr.bf16.mxu0 %v15071_v49  ;;  %10198 = vmatprep.subr.bf16.mxu1 %v15073_v15  ;;  %v1104_v26 = vld [vmem:[%s22791_s1 + $0x20e8] sm:$0xff]  ;;  %v15110_v49 = vcombine.low %v1091_v7, %v1095_v8  ;;  %v15112_v15 = vcombine.low %v1092_v10, %v1096_v11  ;;  %v15151_v7 = vcombine.high %v1131_v0, %v1135_v2  ;;  %v1139_v10 = vld [vmem:[%s22791_s1 + $0x2200] sm:$0xff] }
 0x1f8   :  { %v15121_v29 = vcombine.high %v1100_v24, %v1104_v26  ;;  %v1143_v11 = vld [vmem:[%s22791_s1 + $0x2220] sm:$0xff] }
 0x1fa   :  { %9707 = vmatpush1.bf16.msra.mxu0 %v15070_v34  ;;  %10199 = vmatpush1.bf16.msra.mxu1 %v15072_v35  ;;  %v1108_v34 = vld [vmem:[%s22791_s1 + $0x2108] sm:$0xff] }
 0x1fb   :  { %9708 = vmatprep.subr.bf16.mxu0 %v15079_v37  ;;  %10200 = vmatprep.subr.bf16.mxu1 %v15081_v38  ;;  %v1112_v35 = vld [vmem:[%s22791_s1 + $0x2128] sm:$0xff]  ;;  %v15118_v37 = vcombine.low %v1099_v20, %v1103_v59  ;;  %v15120_v38 = vcombine.low %v1100_v24, %v1104_v26  ;;  %v15159_v20 = vcombine.high %v1139_v10, %v1143_v11  ;;  %v1147_v24 = vld [vmem:[%s22791_s1 + $0x2240] sm:$0xff] }
 0x1fc   :  { %v15129_v41 = vcombine.high %v1108_v34, %v1112_v35  ;;  %v1151_v26 = vld [vmem:[%s22791_s1 + $0x2260] sm:$0xff] }
 0x1fe   :  { %9709 = vmatpush1.bf16.msra.mxu0 %v15078_v43  ;;  %10201 = vmatpush1.bf16.msra.mxu1 %v15080_v44  ;;  %v1116_v43 = vld [vmem:[%s22791_s1 + $0x2148] sm:$0xff] }
 0x1ff   :  { %9710 = vmatprep.subr.bf16.mxu0 %v15087_v47  ;;  %10202 = vmatprep.subr.bf16.mxu1 %v15089_v48  ;;  %v1120_v44 = vld [vmem:[%s22791_s1 + $0x2168] sm:$0xff]  ;;  %v15126_v47 = vcombine.low %v1107_v32, %v1111_v33  ;;  %v15128_v48 = vcombine.low %v1108_v34, %v1112_v35  ;;  %v15167_v32 = vcombine.high %v1147_v24, %v1151_v26  ;;  %v1155_v34 = vld [vmem:[%s22791_s1 + $0x2280] sm:$0xff] }
 0x200   :  { %v15137_v51 = vcombine.high %v1116_v43, %v1120_v44  ;;  %v1159_v35 = vld [vmem:[%s22791_s1 + $0x22a0] sm:$0xff] }
 0x202   :  { %9711 = vmatpush1.bf16.msra.mxu0 %v15086_v54  ;;  %10203 = vmatpush1.bf16.msra.mxu1 %v15088_v56  ;;  %v1124_v54 = vld [vmem:[%s22791_s1 + $0x2188] sm:$0xff] }
 0x203   :  { %9721 = vmatprep.subr.bf16.mxu0 %v15095_v60  ;;  %10213 = vmatprep.subr.bf16.mxu1 %v15097_v61  ;;  %v1128_v56 = vld [vmem:[%s22791_s1 + $0x21a8] sm:$0xff]  ;;  %v15134_v60 = vcombine.low %v1115_v25, %v1119_v42  ;;  %v15136_v61 = vcombine.low %v1116_v43, %v1120_v44  ;;  %v15175_v25 = vcombine.high %v1155_v34, %v1159_v35  ;;  %v1163_v43 = vld [vmem:[%s22791_s1 + $0x22c0] sm:$0xff] }
 0x204   :  { %v15145_v62 = vcombine.high %v1124_v54, %v1128_v56  ;;  %v1167_v44 = vld [vmem:[%s22791_s1 + $0x22e0] sm:$0xff] }
 0x205   :  { %9713 = vmatmul.mubr.bf16.vlgmr.msra.gmra.mrb[0].mxu0 %v18500_v63  ;;  %10205 = vmatmul.mubr.bf16.vlgmr.msra.gmra.mrb[0].mxu1 %v18500_v63 }
 0x206   :  { %9722 = vmatpush1.bf16.msra.mxu0 %v15094_v4  ;;  %10214 = vmatpush1.bf16.msra.mxu1 %v15096_v5  ;;  %v1132_v4 = vld [vmem:[%s22791_s1 + $0x21c8] sm:$0xff] }
 0x207   :  { %9723 = vmatprep.subr.bf16.mxu0 %v15103_v23  ;;  %10215 = vmatprep.subr.bf16.mxu1 %v15105_v6  ;;  %v1136_v5 = vld [vmem:[%s22791_s1 + $0x21e8] sm:$0xff]  ;;  %v15142_v23 = vcombine.low %v1123_v18, %v1127_v52  ;;  %v15144_v6 = vcombine.low %v1124_v54, %v1128_v56  ;;  %v15183_v18 = vcombine.high %v1163_v43, %v1167_v44  ;;  %v1171_v54 = vld [vmem:[%s22791_s1 + $0x2300] sm:$0xff] }
 0x208   :  { %9753 = vmatprep.mubr.bf16.mxu0 %v18521_v9  ;;  %10245 = vmatprep.mubr.bf16.mxu1 %v18521_v9  ;;  %v15153_v8 = vcombine.high %v1132_v4, %v1136_v5  ;;  %v1175_v56 = vld [vmem:[%s22791_s1 + $0x2320] sm:$0xff] }
 0x20a   :  { %9724 = vmatpush1.bf16.msra.mxu0 %v15102_v13  ;;  %10216 = vmatpush1.bf16.msra.mxu1 %v15104_v14  ;;  %v1140_v13 = vld [vmem:[%s22791_s1 + $0x2208] sm:$0xff] }
 0x20b   :  { %9725 = vmatprep.subr.bf16.mxu0 %v15111_v17  ;;  %10217 = vmatprep.subr.bf16.mxu1 %v15113_v53  ;;  %v1144_v14 = vld [vmem:[%s22791_s1 + $0x2228] sm:$0xff]  ;;  %v15150_v17 = vcombine.low %v1131_v0, %v1135_v2  ;;  %v15152_v53 = vcombine.low %v1132_v4, %v1136_v5  ;;  %v15191_v0 = vcombine.high %v1171_v54, %v1175_v56  ;;  %v1179_v4 = vld [vmem:[%s22791_s1 + $0x2340] sm:$0xff] }
 0x20c   :  { %v15161_v59 = vcombine.high %v1140_v13, %v1144_v14  ;;  %v1183_v5 = vld [vmem:[%s22791_s1 + $0x2360] sm:$0xff] }
 0x20e   :  { %9726 = vmatpush1.bf16.msra.mxu0 %v15110_v49  ;;  %10218 = vmatpush1.bf16.msra.mxu1 %v15112_v15  ;;  %v1148_v49 = vld [vmem:[%s22791_s1 + $0x2248] sm:$0xff] }
 0x20f   :  { %9727 = vmatprep.subr.bf16.mxu0 %v15119_v28  ;;  %10219 = vmatprep.subr.bf16.mxu1 %v15121_v29  ;;  %v1152_v15 = vld [vmem:[%s22791_s1 + $0x2268] sm:$0xff]  ;;  %v15158_v28 = vcombine.low %v1139_v10, %v1143_v11  ;;  %v15160_v29 = vcombine.low %v1140_v13, %v1144_v14  ;;  %v15199_v10 = vcombine.high %v1179_v4, %v1183_v5  ;;  %v1187_v13 = vld [vmem:[%s22791_s1 + $0x2380] sm:$0xff] }
 0x210   :  { %v15169_v33 = vcombine.high %v1148_v49, %v1152_v15  ;;  %v1191_v14 = vld [vmem:[%s22791_s1 + $0x23a0] sm:$0xff] }
 0x212   :  { %9728 = vmatpush1.bf16.msra.mxu0 %v15118_v37  ;;  %10220 = vmatpush1.bf16.msra.mxu1 %v15120_v38  ;;  %v1156_v37 = vld [vmem:[%s22791_s1 + $0x2288] sm:$0xff] }
 0x213   :  { %9729 = vmatprep.subr.bf16.mxu0 %v15127_v40  ;;  %10221 = vmatprep.subr.bf16.mxu1 %v15129_v41  ;;  %v1160_v38 = vld [vmem:[%s22791_s1 + $0x22a8] sm:$0xff]  ;;  %v15166_v40 = vcombine.low %v1147_v24, %v1151_v26  ;;  %v15168_v41 = vcombine.low %v1148_v49, %v1152_v15  ;;  %v15207_v24 = vcombine.high %v1187_v13, %v1191_v14  ;;  %v1195_v49 = vld [vmem:[%s22791_s1 + $0x23c0] sm:$0xff] }
 0x214   :  { %v15177_v42 = vcombine.high %v1156_v37, %v1160_v38  ;;  %v1199_v15 = vld [vmem:[%s22791_s1 + $0x23e0] sm:$0xff] }
 0x216   :  { %9730 = vmatpush1.bf16.msra.mxu0 %v15126_v47  ;;  %10222 = vmatpush1.bf16.msra.mxu1 %v15128_v48  ;;  %v1164_v47 = vld [vmem:[%s22791_s1 + $0x22c8] sm:$0xff] }
 0x217   :  { %9731 = vmatprep.subr.bf16.mxu0 %v15135_v50  ;;  %10223 = vmatprep.subr.bf16.mxu1 %v15137_v51  ;;  %v1168_v48 = vld [vmem:[%s22791_s1 + $0x22e8] sm:$0xff]  ;;  %v15174_v50 = vcombine.low %v1155_v34, %v1159_v35  ;;  %v15176_v51 = vcombine.low %v1156_v37, %v1160_v38  ;;  %v15215_v34 = vcombine.high %v1195_v49, %v1199_v15  ;;  %v1203_v37 = vld [vmem:[%s22791_s1 + $0x2400] sm:$0xff] }
 0x218   :  { %v15185_v52 = vcombine.high %v1164_v47, %v1168_v48  ;;  %v1207_v38 = vld [vmem:[%s22791_s1 + $0x2420] sm:$0xff] }
 0x21a   :  { %9732 = vmatpush1.bf16.msra.mxu0 %v15134_v60  ;;  %10224 = vmatpush1.bf16.msra.mxu1 %v15136_v61  ;;  %v1172_v60 = vld [vmem:[%s22791_s1 + $0x2308] sm:$0xff] }
 0x21b   :  { %9733 = vmatprep.subr.bf16.mxu0 %v15143_v39  ;;  %10225 = vmatprep.subr.bf16.mxu1 %v15145_v62  ;;  %v1176_v61 = vld [vmem:[%s22791_s1 + $0x2328] sm:$0xff]  ;;  %v15182_v39 = vcombine.low %v1163_v43, %v1167_v44  ;;  %v15184_v62 = vcombine.low %v1164_v47, %v1168_v48  ;;  %v15223_v43 = vcombine.high %v1203_v37, %v1207_v38  ;;  %v1211_v47 = vld [vmem:[%s22791_s1 + $0x2440] sm:$0xff] }
 0x21c   :  { %v15193_v2 = vcombine.high %v1172_v60, %v1176_v61  ;;  %v1215_v48 = vld [vmem:[%s22791_s1 + $0x2460] sm:$0xff] }
 0x21e   :  { %9734 = vmatpush1.bf16.msra.mxu0 %v15142_v23  ;;  %10226 = vmatpush1.bf16.msra.mxu1 %v15144_v6  ;;  %v1180_v23 = vld [vmem:[%s22791_s1 + $0x2348] sm:$0xff] }
 0x21f   :  { %9735 = vmatprep.subr.bf16.mxu0 %v15151_v7  ;;  %10227 = vmatprep.subr.bf16.mxu1 %v15153_v8  ;;  %v1184_v6 = vld [vmem:[%s22791_s1 + $0x2368] sm:$0xff]  ;;  %v15190_v7 = vcombine.low %v1171_v54, %v1175_v56  ;;  %v15192_v8 = vcombine.low %v1172_v60, %v1176_v61  ;;  %v15222_v54 = vcombine.low %v1203_v37, %v1207_v38  ;;  %v1219_v61 = vld [vmem:[%s22791_s1 + $0x2480] sm:$0xff] }
 0x220   :  { %v15201_v11 = vcombine.high %v1180_v23, %v1184_v6 }
 0x222   :  { %9736 = vmatpush1.bf16.msra.mxu0 %v15150_v17  ;;  %10228 = vmatpush1.bf16.msra.mxu1 %v15152_v53  ;;  %v1188_v17 = vld [vmem:[%s22791_s1 + $0x2388] sm:$0xff] }
 0x223   :  { %9737 = vmatprep.subr.bf16.mxu0 %v15159_v20  ;;  %10229 = vmatprep.subr.bf16.mxu1 %v15161_v59  ;;  %v1192_v53 = vld [vmem:[%s22791_s1 + $0x23a8] sm:$0xff]  ;;  %v15198_v20 = vcombine.low %v1179_v4, %v1183_v5  ;;  %v15200_v59 = vcombine.low %v1180_v23, %v1184_v6  ;;  %v15230_v4 = vcombine.low %v1211_v47, %v1215_v48 }
 0x224   :  { %v15209_v26 = vcombine.high %v1188_v17, %v1192_v53 }
 0x226   :  { %9738 = vmatpush1.bf16.msra.mxu0 %v15158_v28  ;;  %10230 = vmatpush1.bf16.msra.mxu1 %v15160_v29  ;;  %v1196_v28 = vld [vmem:[%s22791_s1 + $0x23c8] sm:$0xff] }
 0x227   :  { %9739 = vmatprep.subr.bf16.mxu0 %v15167_v32  ;;  %10231 = vmatprep.subr.bf16.mxu1 %v15169_v33  ;;  %v1200_v29 = vld [vmem:[%s22791_s1 + $0x23e8] sm:$0xff]  ;;  %v15206_v32 = vcombine.low %v1187_v13, %v1191_v14  ;;  %v15208_v33 = vcombine.low %v1188_v17, %v1192_v53 }
 0x228   :  { %v15217_v35 = vcombine.high %v1196_v28, %v1200_v29 }
 0x22a   :  { %9740 = vmatpush1.bf16.msra.mxu0 %v15166_v40  ;;  %10232 = vmatpush1.bf16.msra.mxu1 %v15168_v41  ;;  %v1204_v40 = vld [vmem:[%s22791_s1 + $0x2408] sm:$0xff] }
 0x22b   :  { %9741 = vmatprep.subr.bf16.mxu0 %v15175_v25  ;;  %10233 = vmatprep.subr.bf16.mxu1 %v15177_v42  ;;  %v1208_v41 = vld [vmem:[%s22791_s1 + $0x2428] sm:$0xff]  ;;  %v15214_v25 = vcombine.low %v1195_v49, %v1199_v15  ;;  %v15216_v42 = vcombine.low %v1196_v28, %v1200_v29 }
 0x22c   :  { %v15225_v44 = vcombine.high %v1204_v40, %v1208_v41  ;;  %v15224_v56 = vcombine.low %v1204_v40, %v1208_v41 }
 0x22e   :  { %9742 = vmatpush1.bf16.msra.mxu0 %v15174_v50  ;;  %10234 = vmatpush1.bf16.msra.mxu1 %v15176_v51  ;;  %v18709_v50 = vcombine.low %v18511_v3, %v18511_v3  ;;  %v1212_v51 = vld [vmem:[%s22791_s1 + $0x2448] sm:$0xff]  ;;  %v15231_v3 = vcombine.high %v1211_v47, %v1215_v48 }
 0x22f   :  { %9743 = vmatprep.subr.bf16.mxu0 %v15183_v18  ;;  %10235 = vmatprep.subr.bf16.mxu1 %v15185_v52  ;;  %v1216_v18 = vld [vmem:[%s22791_s1 + $0x2468] sm:$0xff] }
 0x230   :  { %v18720_v52 = vld [vmem:[%s22792_s0 + $0x48] sm:$0xff]  ;;  %v15233_v60 = vcombine.high %v1212_v51, %v1216_v18  ;;  %v15232_v5 = vcombine.low %v1212_v51, %v1216_v18 }
 0x232   :  { %9744 = vmatpush1.bf16.msra.mxu0 %v15182_v39  ;;  %10236 = vmatpush1.bf16.msra.mxu1 %v15184_v62  ;;  %v1223_v39 = vld [vmem:[%s22791_s1 + $0x24a0] sm:$0xff]  ;;  %v18730_v62 = vcombine.high %v18720_v52, %v18720_v52 }
 0x233   :  { %9745 = vmatprep.subr.bf16.mxu0 %v15191_v0  ;;  %10237 = vmatprep.subr.bf16.mxu1 %v15193_v2  ;;  %v1220_v0 = vld [vmem:[%s22791_s1 + $0x2488] sm:$0xff]  ;;  %v15239_v23 = vcombine.high %v1219_v61, %v1223_v39  ;;  %v15238_v13 = vcombine.low %v1219_v61, %v1223_v39 }
 0x234   :  { %v1224_v2 = vld [vmem:[%s22791_s1 + $0x24a8] sm:$0xff] }
 0x235   :  { %v15241_v6 = vcombine.high %v1220_v0, %v1224_v2  ;;  %v15240_v14 = vcombine.low %v1220_v0, %v1224_v2 }
 0x236   :  { %9746 = vmatpush1.bf16.msra.mxu0 %v15190_v7  ;;  %10238 = vmatpush1.bf16.msra.mxu1 %v15192_v8  ;;  %v1227_v7 = vld [vmem:[%s22791_s1 + $0x24c0] sm:$0xff] }
 0x237   :  { %9747 = vmatprep.subr.bf16.mxu0 %v15199_v10  ;;  %10239 = vmatprep.subr.bf16.mxu1 %v15201_v11  ;;  %v1231_v8 = vld [vmem:[%s22791_s1 + $0x24e0] sm:$0xff]  ;;  %v1228_v10 = vld [vmem:[%s22791_s1 + $0x24c8] sm:$0xff] }
 0x238   :  { %v1232_v11 = vld [vmem:[%s22791_s1 + $0x24e8] sm:$0xff]  ;;  %v15247_v17 = vcombine.high %v1227_v7, %v1231_v8  ;;  %v15246_v49 = vcombine.low %v1227_v7, %v1231_v8 }
 0x239   :  { %v15249_v53 = vcombine.high %v1228_v10, %v1232_v11  ;;  %v15248_v15 = vcombine.low %v1228_v10, %v1232_v11 }
 0x23a   :  { %9748 = vmatpush1.bf16.msra.mxu0 %v15198_v20  ;;  %10240 = vmatpush1.bf16.msra.mxu1 %v15200_v59  ;;  %v1235_v20 = vld [vmem:[%s22791_s1 + $0x2500] sm:$0xff] }
 0x23b   :  { %9749 = vmatprep.subr.bf16.mxu0 %v15207_v24  ;;  %10241 = vmatprep.subr.bf16.mxu1 %v15209_v26  ;;  %v1239_v59 = vld [vmem:[%s22791_s1 + $0x2520] sm:$0xff]  ;;  %v1236_v24 = vld [vmem:[%s22791_s1 + $0x2508] sm:$0xff] }
 0x23c   :  { %v1240_v26 = vld [vmem:[%s22791_s1 + $0x2528] sm:$0xff]  ;;  %v15255_v28 = vcombine.high %v1235_v20, %v1239_v59  ;;  %v15254_v37 = vcombine.low %v1235_v20, %v1239_v59 }
 0x23d   :  { %v15257_v29 = vcombine.high %v1236_v24, %v1240_v26  ;;  %v15256_v38 = vcombine.low %v1236_v24, %v1240_v26 }
 0x23e   :  { %9750 = vmatpush1.bf16.msra.mxu0 %v15206_v32  ;;  %10242 = vmatpush1.bf16.msra.mxu1 %v15208_v33  ;;  %v1243_v32 = vld [vmem:[%s22791_s1 + $0x2540] sm:$0xff] }
 0x23f   :  { %9751 = vmatprep.subr.bf16.mxu0 %v15215_v34  ;;  %10243 = vmatprep.subr.bf16.mxu1 %v15217_v35  ;;  %v1247_v33 = vld [vmem:[%s22791_s1 + $0x2560] sm:$0xff]  ;;  %v1244_v34 = vld [vmem:[%s22791_s1 + $0x2548] sm:$0xff] }
 0x240   :  { %v1248_v35 = vld [vmem:[%s22791_s1 + $0x2568] sm:$0xff]  ;;  %v15263_v40 = vcombine.high %v1243_v32, %v1247_v33  ;;  %v15262_v47 = vcombine.low %v1243_v32, %v1247_v33 }
 0x241   :  { %v15265_v41 = vcombine.high %v1244_v34, %v1248_v35  ;;  %v15264_v48 = vcombine.low %v1244_v34, %v1248_v35 }
 0x242   :  { %9752 = vmatpush1.bf16.msra.mxu0 %v15214_v25  ;;  %10244 = vmatpush1.bf16.msra.mxu1 %v15216_v42  ;;  %v1251_v25 = vld [vmem:[%s22791_s1 + $0x2580] sm:$0xff] }
 0x243   :  { %9762 = vmatprep.subr.bf16.mxu0 %v15223_v43  ;;  %10254 = vmatprep.subr.bf16.mxu1 %v15225_v44  ;;  %v1255_v42 = vld [vmem:[%s22791_s1 + $0x25a0] sm:$0xff]  ;;  %v1252_v43 = vld [vmem:[%s22791_s1 + $0x2588] sm:$0xff] }
 0x244   :  { %v1256_v44 = vld [vmem:[%s22791_s1 + $0x25a8] sm:$0xff]  ;;  %v15271_v51 = vcombine.high %v1251_v25, %v1255_v42  ;;  %v15270_v61 = vcombine.low %v1251_v25, %v1255_v42 }
 0x245   :  { %9754 = vmatmul.mubr.bf16.vlgmr.msra.gmra.mrb[0].mxu0 %v18709_v50  ;;  %10246 = vmatmul.mubr.bf16.vlgmr.msra.gmra.mrb[0].mxu1 %v18709_v50  ;;  %v15273_v18 = vcombine.high %v1252_v43, %v1256_v44  ;;  %v15272_v39 = vcombine.low %v1252_v43, %v1256_v44 }
 0x246   :  { %9763 = vmatpush1.bf16.msra.mxu0 %v15222_v54  ;;  %10255 = vmatpush1.bf16.msra.mxu1 %v15224_v56  ;;  %v1259_v54 = vld [vmem:[%s22791_s1 + $0x25c0] sm:$0xff] }
 0x247   :  { %9764 = vmatprep.subr.bf16.mxu0 %v15231_v3  ;;  %10256 = vmatprep.subr.bf16.mxu1 %v15233_v60  ;;  %v1263_v56 = vld [vmem:[%s22791_s1 + $0x25e0] sm:$0xff]  ;;  %v1260_v3 = vld [vmem:[%s22791_s1 + $0x25c8] sm:$0xff] }
 0x248   :  { %9794 = vmatprep.mubr.bf16.mxu0 %v18730_v62  ;;  %10286 = vmatprep.mubr.bf16.mxu1 %v18730_v62  ;;  %v1264_v60 = vld [vmem:[%s22791_s1 + $0x25e8] sm:$0xff]  ;;  %v15279_v0 = vcombine.high %v1259_v54, %v1263_v56  ;;  %v15278_v7 = vcombine.low %v1259_v54, %v1263_v56 }
 0x249   :  { %v15281_v2 = vcombine.high %v1260_v3, %v1264_v60  ;;  %v15280_v8 = vcombine.low %v1260_v3, %v1264_v60 }
 0x24a   :  { %9765 = vmatpush1.bf16.msra.mxu0 %v15230_v4  ;;  %10257 = vmatpush1.bf16.msra.mxu1 %v15232_v5  ;;  %v1267_v4 = vld [vmem:[%s22791_s1 + $0x2600] sm:$0xff] }
 0x24b   :  { %9766 = vmatprep.subr.bf16.mxu0 %v15239_v23  ;;  %10258 = vmatprep.subr.bf16.mxu1 %v15241_v6  ;;  %v1271_v5 = vld [vmem:[%s22791_s1 + $0x2620] sm:$0xff]  ;;  %v1268_v23 = vld [vmem:[%s22791_s1 + $0x2608] sm:$0xff] }
 0x24c   :  { %v1272_v6 = vld [vmem:[%s22791_s1 + $0x2628] sm:$0xff]  ;;  %v15287_v10 = vcombine.high %v1267_v4, %v1271_v5  ;;  %v15286_v20 = vcombine.low %v1267_v4, %v1271_v5 }
 0x24d   :  { %v15289_v11 = vcombine.high %v1268_v23, %v1272_v6  ;;  %v15288_v59 = vcombine.low %v1268_v23, %v1272_v6 }
 0x24e   :  { %9767 = vmatpush1.bf16.msra.mxu0 %v15238_v13  ;;  %10259 = vmatpush1.bf16.msra.mxu1 %v15240_v14  ;;  %v1275_v13 = vld [vmem:[%s22791_s1 + $0x2640] sm:$0xff] }
 0x24f   :  { %9768 = vmatprep.subr.bf16.mxu0 %v15247_v17  ;;  %10260 = vmatprep.subr.bf16.mxu1 %v15249_v53  ;;  %v1279_v14 = vld [vmem:[%s22791_s1 + $0x2660] sm:$0xff]  ;;  %v1276_v17 = vld [vmem:[%s22791_s1 + $0x2648] sm:$0xff] }
 0x250   :  { %v1280_v53 = vld [vmem:[%s22791_s1 + $0x2668] sm:$0xff]  ;;  %v15295_v24 = vcombine.high %v1275_v13, %v1279_v14  ;;  %v15294_v32 = vcombine.low %v1275_v13, %v1279_v14 }
 0x251   :  { %v15297_v26 = vcombine.high %v1276_v17, %v1280_v53  ;;  %v15296_v33 = vcombine.low %v1276_v17, %v1280_v53 }
 0x252   :  { %9769 = vmatpush1.bf16.msra.mxu0 %v15246_v49  ;;  %10261 = vmatpush1.bf16.msra.mxu1 %v15248_v15  ;;  %v1283_v49 = vld [vmem:[%s22791_s1 + $0x2680] sm:$0xff] }
 0x253   :  { %9770 = vmatprep.subr.bf16.mxu0 %v15255_v28  ;;  %10262 = vmatprep.subr.bf16.mxu1 %v15257_v29  ;;  %v1287_v15 = vld [vmem:[%s22791_s1 + $0x26a0] sm:$0xff]  ;;  %v1284_v28 = vld [vmem:[%s22791_s1 + $0x2688] sm:$0xff] }
 0x254   :  { %v1288_v29 = vld [vmem:[%s22791_s1 + $0x26a8] sm:$0xff]  ;;  %v15303_v34 = vcombine.high %v1283_v49, %v1287_v15  ;;  %v15302_v25 = vcombine.low %v1283_v49, %v1287_v15 }
 0x255   :  { %v15305_v35 = vcombine.high %v1284_v28, %v1288_v29  ;;  %v15304_v42 = vcombine.low %v1284_v28, %v1288_v29 }
 0x256   :  { %9771 = vmatpush1.bf16.msra.mxu0 %v15254_v37  ;;  %10263 = vmatpush1.bf16.msra.mxu1 %v15256_v38  ;;  %v1291_v37 = vld [vmem:[%s22791_s1 + $0x26c0] sm:$0xff] }
 0x257   :  { %9772 = vmatprep.subr.bf16.mxu0 %v15263_v40  ;;  %10264 = vmatprep.subr.bf16.mxu1 %v15265_v41  ;;  %v1295_v38 = vld [vmem:[%s22791_s1 + $0x26e0] sm:$0xff]  ;;  %v1292_v40 = vld [vmem:[%s22791_s1 + $0x26c8] sm:$0xff] }
 0x258   :  { %v1296_v41 = vld [vmem:[%s22791_s1 + $0x26e8] sm:$0xff]  ;;  %v15311_v43 = vcombine.high %v1291_v37, %v1295_v38  ;;  %v15310_v54 = vcombine.low %v1291_v37, %v1295_v38 }
 0x259   :  { %v15313_v44 = vcombine.high %v1292_v40, %v1296_v41  ;;  %v15312_v56 = vcombine.low %v1292_v40, %v1296_v41 }
 0x25a   :  { %9773 = vmatpush1.bf16.msra.mxu0 %v15262_v47  ;;  %10265 = vmatpush1.bf16.msra.mxu1 %v15264_v48  ;;  %v1299_v47 = vld [vmem:[%s22791_s1 + $0x2700] sm:$0xff] }
 0x25b   :  { %9774 = vmatprep.subr.bf16.mxu0 %v15271_v51  ;;  %10266 = vmatprep.subr.bf16.mxu1 %v15273_v18  ;;  %v1303_v48 = vld [vmem:[%s22791_s1 + $0x2720] sm:$0xff]  ;;  %v1300_v51 = vld [vmem:[%s22791_s1 + $0x2708] sm:$0xff] }
 0x25c   :  { %v1304_v18 = vld [vmem:[%s22791_s1 + $0x2728] sm:$0xff]  ;;  %v15319_v3 = vcombine.high %v1299_v47, %v1303_v48  ;;  %v15318_v4 = vcombine.low %v1299_v47, %v1303_v48  ;;  %v18929_v48 = vld [vmem:[%s22792_s0 + $0x50] sm:$0xff] }
 0x25d   :  { %v15321_v60 = vcombine.high %v1300_v51, %v1304_v18  ;;  %v15320_v5 = vcombine.low %v1300_v51, %v1304_v18  ;;  %v1344_v47 = vld [vmem:[%s22791_s1 + $0x2868] sm:$0xff] }
 0x25e   :  { %9775 = vmatpush1.bf16.msra.mxu0 %v15270_v61  ;;  %10267 = vmatpush1.bf16.msra.mxu1 %v15272_v39  ;;  %v1307_v61 = vld [vmem:[%s22791_s1 + $0x2740] sm:$0xff] }
 0x25f   :  { %9776 = vmatprep.subr.bf16.mxu0 %v15279_v0  ;;  %10268 = vmatprep.subr.bf16.mxu1 %v15281_v2  ;;  %v1311_v39 = vld [vmem:[%s22791_s1 + $0x2760] sm:$0xff]  ;;  %v1308_v0 = vld [vmem:[%s22791_s1 + $0x2748] sm:$0xff] }
 0x260   :  { %v1312_v2 = vld [vmem:[%s22791_s1 + $0x2768] sm:$0xff]  ;;  %v15327_v23 = vcombine.high %v1307_v61, %v1311_v39  ;;  %v15326_v13 = vcombine.low %v1307_v61, %v1311_v39 }
 0x261   :  { %v15329_v6 = vcombine.high %v1308_v0, %v1312_v2  ;;  %v15328_v14 = vcombine.low %v1308_v0, %v1312_v2  ;;  %v1348_v61 = vld [vmem:[%s22791_s1 + $0x2888] sm:$0xff] }
 0x262   :  { %9777 = vmatpush1.bf16.msra.mxu0 %v15278_v7  ;;  %10269 = vmatpush1.bf16.msra.mxu1 %v15280_v8  ;;  %v1315_v7 = vld [vmem:[%s22791_s1 + $0x2780] sm:$0xff]  ;;  %v1352_v39 = vld [vmem:[%s22791_s1 + $0x28a8] sm:$0xff] }
 0x263   :  { %9778 = vmatprep.subr.bf16.mxu0 %v15287_v10  ;;  %10270 = vmatprep.subr.bf16.mxu1 %v15289_v11  ;;  %v1319_v8 = vld [vmem:[%s22791_s1 + $0x27a0] sm:$0xff]  ;;  %v1316_v10 = vld [vmem:[%s22791_s1 + $0x2788] sm:$0xff] }
 0x264   :  { %v1320_v11 = vld [vmem:[%s22791_s1 + $0x27a8] sm:$0xff]  ;;  %v15335_v17 = vcombine.high %v1315_v7, %v1319_v8  ;;  %v15334_v49 = vcombine.low %v1315_v7, %v1319_v8 }
 0x265   :  { %v15337_v53 = vcombine.high %v1316_v10, %v1320_v11  ;;  %v15336_v15 = vcombine.low %v1316_v10, %v1320_v11  ;;  %v1356_v7 = vld [vmem:[%s22791_s1 + $0x28c8] sm:$0xff]  ;;  %v15368_v11 = vcombine.low %v1348_v61, %v1352_v39 }
 0x266   :  { %9779 = vmatpush1.bf16.msra.mxu0 %v15286_v20  ;;  %10271 = vmatpush1.bf16.msra.mxu1 %v15288_v59  ;;  %v1323_v20 = vld [vmem:[%s22791_s1 + $0x27c0] sm:$0xff]  ;;  %v1360_v8 = vld [vmem:[%s22791_s1 + $0x28e8] sm:$0xff] }
 0x267   :  { %9780 = vmatprep.subr.bf16.mxu0 %v15295_v24  ;;  %10272 = vmatprep.subr.bf16.mxu1 %v15297_v26  ;;  %v1327_v59 = vld [vmem:[%s22791_s1 + $0x27e0] sm:$0xff]  ;;  %v1324_v24 = vld [vmem:[%s22791_s1 + $0x27c8] sm:$0xff] }
 0x268   :  { %v1328_v26 = vld [vmem:[%s22791_s1 + $0x27e8] sm:$0xff]  ;;  %v15343_v28 = vcombine.high %v1323_v20, %v1327_v59  ;;  %v15342_v37 = vcombine.low %v1323_v20, %v1327_v59 }
 0x269   :  { %v15345_v29 = vcombine.high %v1324_v24, %v1328_v26  ;;  %v15344_v38 = vcombine.low %v1324_v24, %v1328_v26  ;;  %v1364_v20 = vld [vmem:[%s22791_s1 + $0x2908] sm:$0xff]  ;;  %v15376_v26 = vcombine.low %v1356_v7, %v1360_v8 }
 0x26a   :  { %9781 = vmatpush1.bf16.msra.mxu0 %v15294_v32  ;;  %10273 = vmatpush1.bf16.msra.mxu1 %v15296_v33  ;;  %v1331_v32 = vld [vmem:[%s22791_s1 + $0x2800] sm:$0xff]  ;;  %v1368_v59 = vld [vmem:[%s22791_s1 + $0x2928] sm:$0xff] }
 0x26b   :  { %9782 = vmatprep.subr.bf16.mxu0 %v15303_v34  ;;  %10274 = vmatprep.subr.bf16.mxu1 %v15305_v35  ;;  %v1335_v33 = vld [vmem:[%s22791_s1 + $0x2820] sm:$0xff]  ;;  %v1332_v34 = vld [vmem:[%s22791_s1 + $0x2808] sm:$0xff] }
 0x26c   :  { %v1336_v35 = vld [vmem:[%s22791_s1 + $0x2828] sm:$0xff]  ;;  %v15351_v40 = vcombine.high %v1331_v32, %v1335_v33  ;;  %v15350_v51 = vcombine.low %v1331_v32, %v1335_v33 }
 0x26d   :  { %v15353_v41 = vcombine.high %v1332_v34, %v1336_v35  ;;  %v15352_v18 = vcombine.low %v1332_v34, %v1336_v35  ;;  %v1372_v32 = vld [vmem:[%s22791_s1 + $0x2948] sm:$0xff]  ;;  %v15384_v35 = vcombine.low %v1364_v20, %v1368_v59 }
 0x26e   :  { %9783 = vmatpush1.bf16.msra.mxu0 %v15302_v25  ;;  %10275 = vmatpush1.bf16.msra.mxu1 %v15304_v42  ;;  %v1339_v25 = vld [vmem:[%s22791_s1 + $0x2840] sm:$0xff]  ;;  %v1376_v33 = vld [vmem:[%s22791_s1 + $0x2968] sm:$0xff] }
 0x26f   :  { %9784 = vmatprep.subr.bf16.mxu0 %v15311_v43  ;;  %10276 = vmatprep.subr.bf16.mxu1 %v15313_v44  ;;  %v1343_v42 = vld [vmem:[%s22791_s1 + $0x2860] sm:$0xff]  ;;  %v18918_v43 = vcombine.low %v18720_v52, %v18720_v52  ;;  %v1340_v44 = vld [vmem:[%s22791_s1 + $0x2848] sm:$0xff] }
 0x270   :  { %v15359_v52 = vcombine.high %v1339_v25, %v1343_v42  ;;  %v15358_v0 = vcombine.low %v1339_v25, %v1343_v42  ;;  %v15360_v2 = vcombine.low %v1340_v44, %v1344_v47  ;;  %v1380_v25 = vld [vmem:[%s22791_s1 + $0x2988] sm:$0xff] }
 0x271   :  { %v1384_v42 = vld [vmem:[%s22791_s1 + $0x29a8] sm:$0xff] }
 0x272   :  { %9785 = vmatpush1.bf16.msra.mxu0 %v15310_v54  ;;  %10277 = vmatpush1.bf16.msra.mxu1 %v15312_v56  ;;  %v15361_v54 = vcombine.high %v1340_v44, %v1344_v47  ;;  %v1347_v56 = vld [vmem:[%s22791_s1 + $0x2880] sm:$0xff]  ;;  %v15392_v47 = vcombine.low %v1372_v32, %v1376_v33 }
 0x273   :  { %9786 = vmatprep.subr.bf16.mxu0 %v15319_v3  ;;  %10278 = vmatprep.subr.bf16.mxu1 %v15321_v60  ;;  %v1351_v3 = vld [vmem:[%s22791_s1 + $0x28a0] sm:$0xff]  ;;  %v18939_v60 = vcombine.high %v18929_v48, %v18929_v48 }
 0x274   :  { %v15366_v10 = vcombine.low %v1347_v56, %v1351_v3 }
 0x276   :  { %9787 = vmatpush1.bf16.msra.mxu0 %v15318_v4  ;;  %10279 = vmatpush1.bf16.msra.mxu1 %v15320_v5  ;;  %v15367_v4 = vcombine.high %v1347_v56, %v1351_v3  ;;  %v15369_v5 = vcombine.high %v1348_v61, %v1352_v39  ;;  %v1388_v56 = vld [vmem:[%s22791_s1 + $0x29c8] sm:$0xff]  ;;  %v15400_v39 = vcombine.low %v1380_v25, %v1384_v42 }
 0x277   :  { %9788 = vmatprep.subr.bf16.mxu0 %v15327_v23  ;;  %10280 = vmatprep.subr.bf16.mxu1 %v15329_v6  ;;  %v1355_v23 = vld [vmem:[%s22791_s1 + $0x28c0] sm:$0xff]  ;;  %v1392_v3 = vld [vmem:[%s22791_s1 + $0x29e8] sm:$0xff] }
 0x278   :  { %v1359_v6 = vld [vmem:[%s22791_s1 + $0x28e0] sm:$0xff] }
 0x279   :  { %v15374_v24 = vcombine.low %v1355_v23, %v1359_v6 }
 0x27a   :  { %9789 = vmatpush1.bf16.msra.mxu0 %v15326_v13  ;;  %10281 = vmatpush1.bf16.msra.mxu1 %v15328_v14  ;;  %v15375_v13 = vcombine.high %v1355_v23, %v1359_v6  ;;  %v15377_v14 = vcombine.high %v1356_v7, %v1360_v8  ;;  %v1396_v23 = vld [vmem:[%s22791_s1 + $0x2a08] sm:$0xff]  ;;  %v15408_v8 = vcombine.low %v1388_v56, %v1392_v3 }
 0x27b   :  { %9790 = vmatprep.subr.bf16.mxu0 %v15335_v17  ;;  %10282 = vmatprep.subr.bf16.mxu1 %v15337_v53  ;;  %v1363_v17 = vld [vmem:[%s22791_s1 + $0x2900] sm:$0xff]  ;;  %v1400_v6 = vld [vmem:[%s22791_s1 + $0x2a28] sm:$0xff] }
 0x27c   :  { %v1367_v53 = vld [vmem:[%s22791_s1 + $0x2920] sm:$0xff] }
 0x27d   :  { %v15382_v34 = vcombine.low %v1363_v17, %v1367_v53 }
 0x27e   :  { %9791 = vmatpush1.bf16.msra.mxu0 %v15334_v49  ;;  %10283 = vmatpush1.bf16.msra.mxu1 %v15336_v15  ;;  %v15383_v49 = vcombine.high %v1363_v17, %v1367_v53  ;;  %v15385_v15 = vcombine.high %v1364_v20, %v1368_v59  ;;  %v1404_v17 = vld [vmem:[%s22791_s1 + $0x2a48] sm:$0xff]  ;;  %v15416_v59 = vcombine.low %v1396_v23, %v1400_v6 }
 0x27f   :  { %9792 = vmatprep.subr.bf16.mxu0 %v15343_v28  ;;  %10284 = vmatprep.subr.bf16.mxu1 %v15345_v29  ;;  %v1371_v28 = vld [vmem:[%s22791_s1 + $0x2940] sm:$0xff]  ;;  %v1408_v53 = vld [vmem:[%s22791_s1 + $0x2a68] sm:$0xff] }
 0x280   :  { %v1375_v29 = vld [vmem:[%s22791_s1 + $0x2960] sm:$0xff] }
 0x281   :  { %v15390_v44 = vcombine.low %v1371_v28, %v1375_v29 }
 0x282   :  { %9793 = vmatpush1.bf16.msra.mxu0 %v15342_v37  ;;  %10285 = vmatpush1.bf16.msra.mxu1 %v15344_v38  ;;  %v15391_v37 = vcombine.high %v1371_v28, %v1375_v29  ;;  %v15393_v38 = vcombine.high %v1372_v32, %v1376_v33  ;;  %v1412_v28 = vld [vmem:[%s22791_s1 + $0x2a88] sm:$0xff]  ;;  %v15424_v33 = vcombine.low %v1404_v17, %v1408_v53 }
 0x283   :  { %9803 = vmatprep.subr.bf16.mxu0 %v15351_v40  ;;  %10295 = vmatprep.subr.bf16.mxu1 %v15353_v41  ;;  %v1379_v40 = vld [vmem:[%s22791_s1 + $0x2980] sm:$0xff]  ;;  %v1416_v29 = vld [vmem:[%s22791_s1 + $0x2aa8] sm:$0xff] }
 0x284   :  { %v1383_v41 = vld [vmem:[%s22791_s1 + $0x29a0] sm:$0xff] }
 0x285   :  { %9795 = vmatmul.mubr.bf16.vlgmr.msra.gmra.mrb[0].mxu0 %v18918_v43  ;;  %10287 = vmatmul.mubr.bf16.vlgmr.msra.gmra.mrb[0].mxu1 %v18918_v43  ;;  %v15398_v61 = vcombine.low %v1379_v40, %v1383_v41 }
 0x286   :  { %9804 = vmatpush1.bf16.msra.mxu0 %v15350_v51  ;;  %10296 = vmatpush1.bf16.msra.mxu1 %v15352_v18  ;;  %v15399_v51 = vcombine.high %v1379_v40, %v1383_v41  ;;  %v15401_v18 = vcombine.high %v1380_v25, %v1384_v42  ;;  %v1420_v40 = vld [vmem:[%s22791_s1 + $0x2ac8] sm:$0xff]  ;;  %v15432_v42 = vcombine.low %v1412_v28, %v1416_v29 }
 0x287   :  { %9805 = vmatprep.subr.bf16.mxu0 %v15359_v52  ;;  %10297 = vmatprep.subr.bf16.mxu1 %v15361_v54  ;;  %v1387_v52 = vld [vmem:[%s22791_s1 + $0x29c0] sm:$0xff]  ;;  %v1424_v41 = vld [vmem:[%s22791_s1 + $0x2ae8] sm:$0xff] }
 0x288   :  { %9835 = vmatprep.mubr.bf16.mxu0 %v18939_v60  ;;  %10327 = vmatprep.mubr.bf16.mxu1 %v18939_v60  ;;  %v1391_v54 = vld [vmem:[%s22791_s1 + $0x29e0] sm:$0xff] }
 0x289   :  { %v15406_v7 = vcombine.low %v1387_v52, %v1391_v54 }
 0x28a   :  { %9806 = vmatpush1.bf16.msra.mxu0 %v15358_v0  ;;  %10298 = vmatpush1.bf16.msra.mxu1 %v15360_v2  ;;  %v15407_v0 = vcombine.high %v1387_v52, %v1391_v54  ;;  %v15409_v2 = vcombine.high %v1388_v56, %v1392_v3  ;;  %v1428_v52 = vld [vmem:[%s22791_s1 + $0x2b08] sm:$0xff]  ;;  %v15440_v3 = vcombine.low %v1420_v40, %v1424_v41 }
 0x28b   :  { %9807 = vmatprep.subr.bf16.mxu0 %v15367_v4  ;;  %10299 = vmatprep.subr.bf16.mxu1 %v15369_v5  ;;  %v1395_v4 = vld [vmem:[%s22791_s1 + $0x2a00] sm:$0xff]  ;;  %v1432_v54 = vld [vmem:[%s22791_s1 + $0x2b28] sm:$0xff] }
 0x28c   :  { %v1399_v5 = vld [vmem:[%s22791_s1 + $0x2a20] sm:$0xff] }
 0x28d   :  { %v15414_v20 = vcombine.low %v1395_v4, %v1399_v5 }
 0x28e   :  { %9808 = vmatpush1.bf16.msra.mxu0 %v15366_v10  ;;  %10300 = vmatpush1.bf16.msra.mxu1 %v15368_v11  ;;  %v15415_v10 = vcombine.high %v1395_v4, %v1399_v5  ;;  %v15417_v11 = vcombine.high %v1396_v23, %v1400_v6  ;;  %v1436_v4 = vld [vmem:[%s22791_s1 + $0x2b48] sm:$0xff]  ;;  %v15448_v6 = vcombine.low %v1428_v52, %v1432_v54 }
 0x28f   :  { %9809 = vmatprep.subr.bf16.mxu0 %v15375_v13  ;;  %10301 = vmatprep.subr.bf16.mxu1 %v15377_v14  ;;  %v1403_v13 = vld [vmem:[%s22791_s1 + $0x2a40] sm:$0xff]  ;;  %v1440_v5 = vld [vmem:[%s22791_s1 + $0x2b68] sm:$0xff] }
 0x290   :  { %v1407_v14 = vld [vmem:[%s22791_s1 + $0x2a60] sm:$0xff] }
 0x291   :  { %v15422_v32 = vcombine.low %v1403_v13, %v1407_v14 }
 0x292   :  { %9810 = vmatpush1.bf16.msra.mxu0 %v15374_v24  ;;  %10302 = vmatpush1.bf16.msra.mxu1 %v15376_v26  ;;  %v15423_v24 = vcombine.high %v1403_v13, %v1407_v14  ;;  %v15425_v26 = vcombine.high %v1404_v17, %v1408_v53  ;;  %v1444_v13 = vld [vmem:[%s22791_s1 + $0x2b88] sm:$0xff]  ;;  %v15456_v53 = vcombine.low %v1436_v4, %v1440_v5 }
 0x293   :  { %9811 = vmatprep.subr.bf16.mxu0 %v15383_v49  ;;  %10303 = vmatprep.subr.bf16.mxu1 %v15385_v15  ;;  %v1411_v49 = vld [vmem:[%s22791_s1 + $0x2a80] sm:$0xff]  ;;  %v1448_v14 = vld [vmem:[%s22791_s1 + $0x2ba8] sm:$0xff] }
 0x294   :  { %v1415_v15 = vld [vmem:[%s22791_s1 + $0x2aa0] sm:$0xff] }
 0x295   :  { %v15430_v25 = vcombine.low %v1411_v49, %v1415_v15 }
 0x296   :  { %9812 = vmatpush1.bf16.msra.mxu0 %v15382_v34  ;;  %10304 = vmatpush1.bf16.msra.mxu1 %v15384_v35  ;;  %v15431_v34 = vcombine.high %v1411_v49, %v1415_v15  ;;  %v15433_v35 = vcombine.high %v1412_v28, %v1416_v29  ;;  %v1452_v49 = vld [vmem:[%s22791_s1 + $0x2bc8] sm:$0xff]  ;;  %v15464_v29 = vcombine.low %v1444_v13, %v1448_v14 }
 0x297   :  { %9813 = vmatprep.subr.bf16.mxu0 %v15391_v37  ;;  %10305 = vmatprep.subr.bf16.mxu1 %v15393_v38  ;;  %v1419_v37 = vld [vmem:[%s22791_s1 + $0x2ac0] sm:$0xff]  ;;  %v1456_v15 = vld [vmem:[%s22791_s1 + $0x2be8] sm:$0xff] }
 0x298   :  { %v1423_v38 = vld [vmem:[%s22791_s1 + $0x2ae0] sm:$0xff] }
 0x299   :  { %v15438_v56 = vcombine.low %v1419_v37, %v1423_v38 }
 0x29a   :  { %9814 = vmatpush1.bf16.msra.mxu0 %v15390_v44  ;;  %10306 = vmatpush1.bf16.msra.mxu1 %v15392_v47  ;;  %v15439_v44 = vcombine.high %v1419_v37, %v1423_v38  ;;  %v15441_v47 = vcombine.high %v1420_v40, %v1424_v41  ;;  %v1460_v37 = vld [vmem:[%s22791_s1 + $0x2c08] sm:$0xff]  ;;  %v15472_v41 = vcombine.low %v1452_v49, %v1456_v15 }
 0x29b   :  { %9815 = vmatprep.subr.bf16.mxu0 %v15399_v51  ;;  %10307 = vmatprep.subr.bf16.mxu1 %v15401_v18  ;;  %v1427_v51 = vld [vmem:[%s22791_s1 + $0x2b00] sm:$0xff]  ;;  %v1464_v38 = vld [vmem:[%s22791_s1 + $0x2c28] sm:$0xff] }
 0x29c   :  { %v1431_v18 = vld [vmem:[%s22791_s1 + $0x2b20] sm:$0xff] }
 0x29d   :  { %v15446_v23 = vcombine.low %v1427_v51, %v1431_v18 }
 0x29e   :  { %9816 = vmatpush1.bf16.msra.mxu0 %v15398_v61  ;;  %10308 = vmatpush1.bf16.msra.mxu1 %v15400_v39  ;;  %v15447_v61 = vcombine.high %v1427_v51, %v1431_v18  ;;  %v15449_v39 = vcombine.high %v1428_v52, %v1432_v54  ;;  %v19127_v51 = vcombine.low %v18929_v48, %v18929_v48  ;;  %v1468_v18 = vld [vmem:[%s22791_s1 + $0x2c48] sm:$0xff]  ;;  %v19138_v54 = vld [vmem:[%s22792_s0 + $0x58] sm:$0xff] }
 0x29f   :  { %9817 = vmatprep.subr.bf16.mxu0 %v15407_v0  ;;  %10309 = vmatprep.subr.bf16.mxu1 %v15409_v2  ;;  %v1435_v0 = vld [vmem:[%s22791_s1 + $0x2b40] sm:$0xff]  ;;  %v1472_v52 = vld [vmem:[%s22791_s1 + $0x2c68] sm:$0xff] }
 0x2a0   :  { %v1439_v2 = vld [vmem:[%s22791_s1 + $0x2b60] sm:$0xff] }
 0x2a1   :  { %v15454_v17 = vcombine.low %v1435_v0, %v1439_v2 }
 0x2a2   :  { %9818 = vmatpush1.bf16.msra.mxu0 %v15406_v7  ;;  %10310 = vmatpush1.bf16.msra.mxu1 %v15408_v8  ;;  %v15455_v7 = vcombine.high %v1435_v0, %v1439_v2  ;;  %v15457_v8 = vcombine.high %v1436_v4, %v1440_v5  ;;  %v1479_v0 = vld [vmem:[%s22791_s1 + $0x2ca0] sm:$0xff]  ;;  %v19148_v2 = vcombine.high %v19138_v54, %v19138_v54  ;;  %v1476_v4 = vld [vmem:[%s22791_s1 + $0x2c88] sm:$0xff] }
 0x2a3   :  { %9819 = vmatprep.subr.bf16.mxu0 %v15415_v10  ;;  %10311 = vmatprep.subr.bf16.mxu1 %v15417_v11  ;;  %v1443_v10 = vld [vmem:[%s22791_s1 + $0x2b80] sm:$0xff]  ;;  %v1480_v5 = vld [vmem:[%s22791_s1 + $0x2ca8] sm:$0xff] }
 0x2a4   :  { %v1447_v11 = vld [vmem:[%s22791_s1 + $0x2ba0] sm:$0xff] }
 0x2a5   :  { %v15462_v28 = vcombine.low %v1443_v10, %v1447_v11 }
 0x2a6   :  { %9820 = vmatpush1.bf16.msra.mxu0 %v15414_v20  ;;  %10312 = vmatpush1.bf16.msra.mxu1 %v15416_v59  ;;  %v15463_v20 = vcombine.high %v1443_v10, %v1447_v11  ;;  %v15465_v59 = vcombine.high %v1444_v13, %v1448_v14  ;;  %v1483_v10 = vld [vmem:[%s22791_s1 + $0x2cc0] sm:$0xff]  ;;  %v1484_v13 = vld [vmem:[%s22791_s1 + $0x2cc8] sm:$0xff] }
 0x2a7   :  { %9821 = vmatprep.subr.bf16.mxu0 %v15423_v24  ;;  %10313 = vmatprep.subr.bf16.mxu1 %v15425_v26  ;;  %v1451_v24 = vld [vmem:[%s22791_s1 + $0x2bc0] sm:$0xff]  ;;  %v1488_v14 = vld [vmem:[%s22791_s1 + $0x2ce8] sm:$0xff] }
 0x2a8   :  { %v1455_v26 = vld [vmem:[%s22791_s1 + $0x2be0] sm:$0xff] }
 0x2a9   :  { %v15470_v40 = vcombine.low %v1451_v24, %v1455_v26  ;;  %v1487_v11 = vld [vmem:[%s22791_s1 + $0x2ce0] sm:$0xff] }
 0x2aa   :  { %9822 = vmatpush1.bf16.msra.mxu0 %v15422_v32  ;;  %10314 = vmatpush1.bf16.msra.mxu1 %v15424_v33  ;;  %v15471_v32 = vcombine.high %v1451_v24, %v1455_v26  ;;  %v15473_v33 = vcombine.high %v1452_v49, %v1456_v15  ;;  %v1491_v24 = vld [vmem:[%s22791_s1 + $0x2d00] sm:$0xff]  ;;  %v1492_v49 = vld [vmem:[%s22791_s1 + $0x2d08] sm:$0xff] }
 0x2ab   :  { %9823 = vmatprep.subr.bf16.mxu0 %v15431_v34  ;;  %10315 = vmatprep.subr.bf16.mxu1 %v15433_v35  ;;  %v1459_v34 = vld [vmem:[%s22791_s1 + $0x2c00] sm:$0xff]  ;;  %v1496_v15 = vld [vmem:[%s22791_s1 + $0x2d28] sm:$0xff] }
 0x2ac   :  { %v1463_v35 = vld [vmem:[%s22791_s1 + $0x2c20] sm:$0xff] }
 0x2ad   :  { %v1495_v26 = vld [vmem:[%s22791_s1 + $0x2d20] sm:$0xff] }
 0x2ae   :  { %9824 = vmatpush1.bf16.msra.mxu0 %v15430_v25  ;;  %10316 = vmatpush1.bf16.msra.mxu1 %v15432_v42  ;;  %v15479_v25 = vcombine.high %v1459_v34, %v1463_v35  ;;  %v15481_v42 = vcombine.high %v1460_v37, %v1464_v38 }
 0x2af   :  { %9825 = vmatprep.subr.bf16.mxu0 %v15439_v44  ;;  %10317 = vmatprep.subr.bf16.mxu1 %v15441_v47  ;;  %v1467_v44 = vld [vmem:[%s22791_s1 + $0x2c40] sm:$0xff] }
 0x2b0   :  { %v1471_v47 = vld [vmem:[%s22791_s1 + $0x2c60] sm:$0xff] }
 0x2b1   :  { %v15487_v48 = vcombine.high %v1467_v44, %v1471_v47 }
 0x2b2   :  { %9826 = vmatpush1.bf16.msra.mxu0 %v15438_v56  ;;  %10318 = vmatpush1.bf16.msra.mxu1 %v15440_v3  ;;  %v15478_v56 = vcombine.low %v1459_v34, %v1463_v35  ;;  %v15480_v3 = vcombine.low %v1460_v37, %v1464_v38  ;;  %v1499_v34 = vld [vmem:[%s22791_s1 + $0x2d40] sm:$0xff]  ;;  %v1500_v37 = vld [vmem:[%s22791_s1 + $0x2d48] sm:$0xff] }
 0x2b3   :  { %9827 = vmatprep.subr.bf16.mxu0 %v15447_v61  ;;  %10319 = vmatprep.subr.bf16.mxu1 %v15449_v39  ;;  %v15489_v61 = vcombine.high %v1468_v18, %v1472_v52  ;;  %v1475_v39 = vld [vmem:[%s22791_s1 + $0x2c80] sm:$0xff]  ;;  %v1504_v38 = vld [vmem:[%s22791_s1 + $0x2d68] sm:$0xff] }
 0x2b4   :  { %v1503_v35 = vld [vmem:[%s22791_s1 + $0x2d60] sm:$0xff] }
 0x2b6   :  { %9828 = vmatpush1.bf16.msra.mxu0 %v15446_v23  ;;  %10320 = vmatpush1.bf16.msra.mxu1 %v15448_v6  ;;  %v15486_v23 = vcombine.low %v1467_v44, %v1471_v47  ;;  %v15488_v6 = vcombine.low %v1468_v18, %v1472_v52  ;;  %v1507_v44 = vld [vmem:[%s22791_s1 + $0x2d80] sm:$0xff]  ;;  %v1508_v18 = vld [vmem:[%s22791_s1 + $0x2d88] sm:$0xff] }
 0x2b7   :  { %9829 = vmatprep.subr.bf16.mxu0 %v15455_v7  ;;  %10321 = vmatprep.subr.bf16.mxu1 %v15457_v8  ;;  %v15495_v7 = vcombine.high %v1475_v39, %v1479_v0  ;;  %v15497_v8 = vcombine.high %v1476_v4, %v1480_v5  ;;  %v1511_v47 = vld [vmem:[%s22791_s1 + $0x2da0] sm:$0xff]  ;;  %v1512_v52 = vld [vmem:[%s22791_s1 + $0x2da8] sm:$0xff] }
 0x2ba   :  { %9830 = vmatpush1.bf16.msra.mxu0 %v15454_v17  ;;  %10322 = vmatpush1.bf16.msra.mxu1 %v15456_v53  ;;  %v15494_v17 = vcombine.low %v1475_v39, %v1479_v0  ;;  %v15496_v53 = vcombine.low %v1476_v4, %v1480_v5  ;;  %v1515_v39 = vld [vmem:[%s22791_s1 + $0x2dc0] sm:$0xff]  ;;  %v1516_v4 = vld [vmem:[%s22791_s1 + $0x2dc8] sm:$0xff] }
 0x2bb   :  { %9831 = vmatprep.subr.bf16.mxu0 %v15463_v20  ;;  %10323 = vmatprep.subr.bf16.mxu1 %v15465_v59  ;;  %v15503_v20 = vcombine.high %v1483_v10, %v1487_v11  ;;  %v15505_v59 = vcombine.high %v1484_v13, %v1488_v14  ;;  %v1519_v0 = vld [vmem:[%s22791_s1 + $0x2de0] sm:$0xff]  ;;  %v1520_v5 = vld [vmem:[%s22791_s1 + $0x2de8] sm:$0xff] }
 0x2be   :  { %9832 = vmatpush1.bf16.msra.mxu0 %v15462_v28  ;;  %10324 = vmatpush1.bf16.msra.mxu1 %v15464_v29  ;;  %v15502_v28 = vcombine.low %v1483_v10, %v1487_v11  ;;  %v15504_v29 = vcombine.low %v1484_v13, %v1488_v14  ;;  %v1523_v10 = vld [vmem:[%s22791_s1 + $0x2e00] sm:$0xff]  ;;  %v1524_v13 = vld [vmem:[%s22791_s1 + $0x2e08] sm:$0xff] }
 0x2bf   :  { %9833 = vmatprep.subr.bf16.mxu0 %v15471_v32  ;;  %10325 = vmatprep.subr.bf16.mxu1 %v15473_v33  ;;  %v15511_v32 = vcombine.high %v1491_v24, %v1495_v26  ;;  %v15513_v33 = vcombine.high %v1492_v49, %v1496_v15  ;;  %v1527_v11 = vld [vmem:[%s22791_s1 + $0x2e20] sm:$0xff]  ;;  %v1528_v14 = vld [vmem:[%s22791_s1 + $0x2e28] sm:$0xff] }
 0x2c2   :  { %9834 = vmatpush1.bf16.msra.mxu0 %v15470_v40  ;;  %10326 = vmatpush1.bf16.msra.mxu1 %v15472_v41  ;;  %v15510_v40 = vcombine.low %v1491_v24, %v1495_v26  ;;  %v15512_v41 = vcombine.low %v1492_v49, %v1496_v15  ;;  %v1531_v24 = vld [vmem:[%s22791_s1 + $0x2e40] sm:$0xff]  ;;  %v1532_v49 = vld [vmem:[%s22791_s1 + $0x2e48] sm:$0xff] }
 0x2c3   :  { %9844 = vmatprep.subr.bf16.mxu0 %v15479_v25  ;;  %10336 = vmatprep.subr.bf16.mxu1 %v15481_v42  ;;  %v15519_v25 = vcombine.high %v1499_v34, %v1503_v35  ;;  %v15521_v42 = vcombine.high %v1500_v37, %v1504_v38  ;;  %v1535_v26 = vld [vmem:[%s22791_s1 + $0x2e60] sm:$0xff]  ;;  %v1536_v15 = vld [vmem:[%s22791_s1 + $0x2e68] sm:$0xff] }
 0x2c5   :  { %9836 = vmatmul.mubr.bf16.vlgmr.msra.gmra.mrb[0].mxu0 %v19127_v51  ;;  %10328 = vmatmul.mubr.bf16.vlgmr.msra.gmra.mrb[0].mxu1 %v19127_v51 }
 0x2c6   :  { %9845 = vmatpush1.bf16.msra.mxu0 %v15478_v56  ;;  %10337 = vmatpush1.bf16.msra.mxu1 %v15480_v3  ;;  %v15518_v56 = vcombine.low %v1499_v34, %v1503_v35  ;;  %v15520_v3 = vcombine.low %v1500_v37, %v1504_v38  ;;  %v1539_v34 = vld [vmem:[%s22791_s1 + $0x2e80] sm:$0xff]  ;;  %v1540_v37 = vld [vmem:[%s22791_s1 + $0x2e88] sm:$0xff] }
 0x2c7   :  { %9846 = vmatprep.subr.bf16.mxu0 %v15487_v48  ;;  %10338 = vmatprep.subr.bf16.mxu1 %v15489_v61  ;;  %v15527_v48 = vcombine.high %v1507_v44, %v1511_v47  ;;  %v15529_v61 = vcombine.high %v1508_v18, %v1512_v52  ;;  %v1543_v35 = vld [vmem:[%s22791_s1 + $0x2ea0] sm:$0xff]  ;;  %v1544_v38 = vld [vmem:[%s22791_s1 + $0x2ea8] sm:$0xff] }
 0x2c8   :  { %9876 = vmatprep.mubr.bf16.mxu0 %v19148_v2  ;;  %10368 = vmatprep.mubr.bf16.mxu1 %v19148_v2 }
 0x2ca   :  { %9847 = vmatpush1.bf16.msra.mxu0 %v15486_v23  ;;  %10339 = vmatpush1.bf16.msra.mxu1 %v15488_v6  ;;  %v15526_v23 = vcombine.low %v1507_v44, %v1511_v47  ;;  %v15528_v6 = vcombine.low %v1508_v18, %v1512_v52  ;;  %v1547_v44 = vld [vmem:[%s22791_s1 + $0x2ec0] sm:$0xff]  ;;  %v1548_v18 = vld [vmem:[%s22791_s1 + $0x2ec8] sm:$0xff] }
 0x2cb   :  { %9848 = vmatprep.subr.bf16.mxu0 %v15495_v7  ;;  %10340 = vmatprep.subr.bf16.mxu1 %v15497_v8  ;;  %v15535_v7 = vcombine.high %v1515_v39, %v1519_v0  ;;  %v15537_v8 = vcombine.high %v1516_v4, %v1520_v5  ;;  %v1551_v47 = vld [vmem:[%s22791_s1 + $0x2ee0] sm:$0xff]  ;;  %v1552_v52 = vld [vmem:[%s22791_s1 + $0x2ee8] sm:$0xff] }
 0x2ce   :  { %9849 = vmatpush1.bf16.msra.mxu0 %v15494_v17  ;;  %10341 = vmatpush1.bf16.msra.mxu1 %v15496_v53  ;;  %v15534_v17 = vcombine.low %v1515_v39, %v1519_v0  ;;  %v15536_v53 = vcombine.low %v1516_v4, %v1520_v5  ;;  %v1555_v39 = vld [vmem:[%s22791_s1 + $0x2f00] sm:$0xff]  ;;  %v1556_v4 = vld [vmem:[%s22791_s1 + $0x2f08] sm:$0xff] }
 0x2cf   :  { %9850 = vmatprep.subr.bf16.mxu0 %v15503_v20  ;;  %10342 = vmatprep.subr.bf16.mxu1 %v15505_v59  ;;  %v15543_v20 = vcombine.high %v1523_v10, %v1527_v11  ;;  %v15545_v59 = vcombine.high %v1524_v13, %v1528_v14  ;;  %v1559_v0 = vld [vmem:[%s22791_s1 + $0x2f20] sm:$0xff]  ;;  %v1560_v5 = vld [vmem:[%s22791_s1 + $0x2f28] sm:$0xff] }
 0x2d2   :  { %9851 = vmatpush1.bf16.msra.mxu0 %v15502_v28  ;;  %10343 = vmatpush1.bf16.msra.mxu1 %v15504_v29  ;;  %v15542_v28 = vcombine.low %v1523_v10, %v1527_v11  ;;  %v15544_v29 = vcombine.low %v1524_v13, %v1528_v14  ;;  %v1563_v10 = vld [vmem:[%s22791_s1 + $0x2f40] sm:$0xff]  ;;  %v1564_v13 = vld [vmem:[%s22791_s1 + $0x2f48] sm:$0xff] }
 0x2d3   :  { %9852 = vmatprep.subr.bf16.mxu0 %v15511_v32  ;;  %10344 = vmatprep.subr.bf16.mxu1 %v15513_v33  ;;  %v15551_v32 = vcombine.high %v1531_v24, %v1535_v26  ;;  %v15553_v33 = vcombine.high %v1532_v49, %v1536_v15  ;;  %v1567_v11 = vld [vmem:[%s22791_s1 + $0x2f60] sm:$0xff]  ;;  %v1568_v14 = vld [vmem:[%s22791_s1 + $0x2f68] sm:$0xff] }
 0x2d6   :  { %9853 = vmatpush1.bf16.msra.mxu0 %v15510_v40  ;;  %10345 = vmatpush1.bf16.msra.mxu1 %v15512_v41  ;;  %v15550_v40 = vcombine.low %v1531_v24, %v1535_v26  ;;  %v15552_v41 = vcombine.low %v1532_v49, %v1536_v15  ;;  %v1571_v24 = vld [vmem:[%s22791_s1 + $0x2f80] sm:$0xff]  ;;  %v1572_v49 = vld [vmem:[%s22791_s1 + $0x2f88] sm:$0xff] }
 0x2d7   :  { %9854 = vmatprep.subr.bf16.mxu0 %v15519_v25  ;;  %10346 = vmatprep.subr.bf16.mxu1 %v15521_v42  ;;  %v15559_v25 = vcombine.high %v1539_v34, %v1543_v35  ;;  %v15561_v42 = vcombine.high %v1540_v37, %v1544_v38  ;;  %v1575_v26 = vld [vmem:[%s22791_s1 + $0x2fa0] sm:$0xff]  ;;  %v1576_v15 = vld [vmem:[%s22791_s1 + $0x2fa8] sm:$0xff] }
 0x2da   :  { %9855 = vmatpush1.bf16.msra.mxu0 %v15518_v56  ;;  %10347 = vmatpush1.bf16.msra.mxu1 %v15520_v3  ;;  %v15558_v56 = vcombine.low %v1539_v34, %v1543_v35  ;;  %v15560_v3 = vcombine.low %v1540_v37, %v1544_v38  ;;  %v1579_v34 = vld [vmem:[%s22791_s1 + $0x2fc0] sm:$0xff]  ;;  %v1580_v37 = vld [vmem:[%s22791_s1 + $0x2fc8] sm:$0xff] }
 0x2db   :  { %9856 = vmatprep.subr.bf16.mxu0 %v15527_v48  ;;  %10348 = vmatprep.subr.bf16.mxu1 %v15529_v61  ;;  %v15567_v48 = vcombine.high %v1547_v44, %v1551_v47  ;;  %v15569_v61 = vcombine.high %v1548_v18, %v1552_v52  ;;  %v1583_v35 = vld [vmem:[%s22791_s1 + $0x2fe0] sm:$0xff]  ;;  %v1584_v38 = vld [vmem:[%s22791_s1 + $0x2fe8] sm:$0xff] }
 0x2de   :  { %9857 = vmatpush1.bf16.msra.mxu0 %v15526_v23  ;;  %10349 = vmatpush1.bf16.msra.mxu1 %v15528_v6  ;;  %v15566_v23 = vcombine.low %v1547_v44, %v1551_v47  ;;  %v15568_v6 = vcombine.low %v1548_v18, %v1552_v52  ;;  %v53_v44 = vld [vmem:[%s22791_s1 + $0x10] sm:$0xff]  ;;  %v54_v18 = vld [vmem:[%s22791_s1 + $0x18] sm:$0xff] }
 0x2df   :  { %9858 = vmatprep.subr.bf16.mxu0 %v15535_v7  ;;  %10350 = vmatprep.subr.bf16.mxu1 %v15537_v8  ;;  %v15575_v7 = vcombine.high %v1555_v39, %v1559_v0  ;;  %v15577_v8 = vcombine.high %v1556_v4, %v1560_v5  ;;  %v57_v47 = vld [vmem:[%s22791_s1 + $0x30] sm:$0xff]  ;;  %v58_v52 = vld [vmem:[%s22791_s1 + $0x38] sm:$0xff] }
 0x2e2   :  { %9859 = vmatpush1.bf16.msra.mxu0 %v15534_v17  ;;  %10351 = vmatpush1.bf16.msra.mxu1 %v15536_v53  ;;  %v15574_v17 = vcombine.low %v1555_v39, %v1559_v0  ;;  %v15576_v53 = vcombine.low %v1556_v4, %v1560_v5  ;;  %v61_v39 = vld [vmem:[%s22791_s1 + $0x50] sm:$0xff]  ;;  %v19336_v4 = vcombine.low %v19138_v54, %v19138_v54  ;;  %v62_v5 = vld [vmem:[%s22791_s1 + $0x58] sm:$0xff] }
 0x2e3   :  { %9860 = vmatprep.subr.bf16.mxu0 %v15543_v20  ;;  %10352 = vmatprep.subr.bf16.mxu1 %v15545_v59  ;;  %v15583_v20 = vcombine.high %v1563_v10, %v1567_v11  ;;  %v15585_v59 = vcombine.high %v1564_v13, %v1568_v14  ;;  %v65_v0 = vld [vmem:[%s22791_s1 + $0x70] sm:$0xff] }
 0x2e4   :  { %v69_v54 = vld [vmem:[%s22791_s1 + $0x90] sm:$0xff] }
 0x2e6   :  { %9861 = vmatpush1.bf16.msra.mxu0 %v15542_v28  ;;  %10353 = vmatpush1.bf16.msra.mxu1 %v15544_v29  ;;  %v15582_v28 = vcombine.low %v1563_v10, %v1567_v11  ;;  %v15584_v29 = vcombine.low %v1564_v13, %v1568_v14  ;;  %v73_v11 = vld [vmem:[%s22791_s1 + $0xb0] sm:$0xff]  ;;  %v70_v13 = vld [vmem:[%s22791_s1 + $0x98] sm:$0xff] }
 0x2e7   :  { %9862 = vmatprep.subr.bf16.mxu0 %v15551_v32  ;;  %10354 = vmatprep.subr.bf16.mxu1 %v15553_v33  ;;  %v15591_v32 = vcombine.high %v1571_v24, %v1575_v26  ;;  %v15593_v33 = vcombine.high %v1572_v49, %v1576_v15  ;;  %v74_v14 = vld [vmem:[%s22791_s1 + $0xb8] sm:$0xff] }
 0x2ea   :  { %9863 = vmatpush1.bf16.msra.mxu0 %v15550_v40  ;;  %10355 = vmatpush1.bf16.msra.mxu1 %v15552_v41  ;;  %v15590_v40 = vcombine.low %v1571_v24, %v1575_v26  ;;  %v15592_v41 = vcombine.low %v1572_v49, %v1576_v15  ;;  %v77_v24 = vld [vmem:[%s22791_s1 + $0xd0] sm:$0xff]  ;;  %v78_v49 = vld [vmem:[%s22791_s1 + $0xd8] sm:$0xff] }
 0x2eb   :  { %9864 = vmatprep.subr.bf16.mxu0 %v15559_v25  ;;  %10356 = vmatprep.subr.bf16.mxu1 %v15561_v42  ;;  %v15599_v25 = vcombine.high %v1579_v34, %v1583_v35  ;;  %v15601_v42 = vcombine.high %v1580_v37, %v1584_v38  ;;  %v81_v26 = vld [vmem:[%s22791_s1 + $0xf0] sm:$0xff]  ;;  %v82_v15 = vld [vmem:[%s22791_s1 + $0xf8] sm:$0xff] }
 0x2ee   :  { %9865 = vmatpush1.bf16.msra.mxu0 %v15558_v56  ;;  %10357 = vmatpush1.bf16.msra.mxu1 %v15560_v3  ;;  %v15598_v56 = vcombine.low %v1579_v34, %v1583_v35  ;;  %v15600_v3 = vcombine.low %v1580_v37, %v1584_v38  ;;  %v85_v34 = vld [vmem:[%s22791_s1 + $0x110] sm:$0xff]  ;;  %v90_v37 = vld [vmem:[%s22791_s1 + $0x138] sm:$0xff]  ;;  %v14098_v38 = vcombine.low %v77_v24, %v81_v26 }
 0x2ef   :  { %9866 = vmatprep.subr.bf16.mxu0 %v15567_v48  ;;  %10358 = vmatprep.subr.bf16.mxu1 %v15569_v61  ;;  %v14075_v48 = vcombine.high %v53_v44, %v57_v47  ;;  %v14077_v61 = vcombine.high %v54_v18, %v58_v52  ;;  %v89_v35 = vld [vmem:[%s22791_s1 + $0x130] sm:$0xff] }
 0x2f2   :  { %9867 = vmatpush1.bf16.msra.mxu0 %v15566_v23  ;;  %10359 = vmatpush1.bf16.msra.mxu1 %v15568_v6  ;;  %v66_v23 = vld [vmem:[%s22791_s1 + $0x78] sm:$0xff]  ;;  %v14074_v6 = vcombine.low %v53_v44, %v57_v47  ;;  %v97_v44 = vld [vmem:[%s22791_s1 + $0x170] sm:$0xff] }
 0x2f3   :  { %9868 = vmatprep.subr.bf16.mxu0 %v15575_v7  ;;  %10360 = vmatprep.subr.bf16.mxu1 %v15577_v8  ;;  %v14076_v7 = vcombine.low %v54_v18, %v58_v52  ;;  %v14083_v8 = vcombine.high %v61_v39, %v65_v0  ;;  %v14085_v10 = vcombine.high %v62_v5, %v66_v23  ;;  %v94_v47 = vld [vmem:[%s22791_s1 + $0x158] sm:$0xff] }
 0x2f4   :  { %v98_v18 = vld [vmem:[%s22791_s1 + $0x178] sm:$0xff]  ;;  %v14106_v52 = vcombine.low %v85_v34, %v89_v35 }
 0x2f6   :  { %9869 = vmatpush1.bf16.msra.mxu0 %v15574_v17  ;;  %10361 = vmatpush1.bf16.msra.mxu1 %v15576_v53  ;;  %v14082_v17 = vcombine.low %v61_v39, %v65_v0  ;;  %v14084_v53 = vcombine.low %v62_v5, %v66_v23  ;;  %v105_v39 = vld [vmem:[%s22791_s1 + $0x1b0] sm:$0xff]  ;;  %v102_v0 = vld [vmem:[%s22791_s1 + $0x198] sm:$0xff] }
 0x2f7   :  { %9870 = vmatprep.subr.bf16.mxu0 %v15583_v20  ;;  %10362 = vmatprep.subr.bf16.mxu1 %v15585_v59  ;;  %v14091_v20 = vcombine.high %v69_v54, %v73_v11  ;;  %v14093_v59 = vcombine.high %v70_v13, %v74_v14  ;;  %v106_v5 = vld [vmem:[%s22791_s1 + $0x1b8] sm:$0xff] }
 0x2fa   :  { %9871 = vmatpush1.bf16.msra.mxu0 %v15582_v28  ;;  %10363 = vmatpush1.bf16.msra.mxu1 %v15584_v29  ;;  %v14090_v28 = vcombine.low %v69_v54, %v73_v11  ;;  %v14092_v29 = vcombine.low %v70_v13, %v74_v14  ;;  %v113_v54 = vld [vmem:[%s22791_s1 + $0x1f0] sm:$0xff]  ;;  %v110_v11 = vld [vmem:[%s22791_s1 + $0x1d8] sm:$0xff] }
 0x2fb   :  { %9872 = vmatprep.subr.bf16.mxu0 %v15591_v32  ;;  %10364 = vmatprep.subr.bf16.mxu1 %v15593_v33  ;;  %v14099_v32 = vcombine.high %v77_v24, %v81_v26  ;;  %v14101_v33 = vcombine.high %v78_v49, %v82_v15  ;;  %v114_v13 = vld [vmem:[%s22791_s1 + $0x1f8] sm:$0xff]  ;;  %v121_v24 = vld [vmem:[%s22791_s1 + $0x230] sm:$0xff] }
 0x2fc   :  { %v118_v26 = vld [vmem:[%s22791_s1 + $0x218] sm:$0xff] }
 0x2fe   :  { %9873 = vmatpush1.bf16.msra.mxu0 %v15590_v40  ;;  %10365 = vmatpush1.bf16.msra.mxu1 %v15592_v41  ;;  %v14100_v40 = vcombine.low %v78_v49, %v82_v15  ;;  %v14107_v41 = vcombine.high %v85_v34, %v89_v35  ;;  %v122_v49 = vld [vmem:[%s22791_s1 + $0x238] sm:$0xff]  ;;  %v129_v34 = vld [vmem:[%s22791_s1 + $0x270] sm:$0xff] }
 0x2ff   :  { %9874 = vmatprep.subr.bf16.mxu0 %v15599_v25  ;;  %10366 = vmatprep.subr.bf16.mxu1 %v15601_v42  ;;  %v93_v42 = vld [vmem:[%s22791_s1 + $0x150] sm:$0xff]  ;;  %v126_v35 = vld [vmem:[%s22791_s1 + $0x258] sm:$0xff] }
 0x300   :  { %v14114_v23 = vcombine.low %v93_v42, %v97_v44 }
 0x302   :  { %9875 = vmatpush1.bf16.msra.mxu0 %v15598_v56  ;;  %10367 = vmatpush1.bf16.msra.mxu1 %v15600_v3  ;;  %v14115_v3 = vcombine.high %v93_v42, %v97_v44  ;;  %v137_v42 = vld [vmem:[%s22791_s1 + $0x2b0] sm:$0xff]  ;;  %v134_v44 = vld [vmem:[%s22791_s1 + $0x298] sm:$0xff] }
 0x303   :  { %10377 = vmatprep.subr.bf16.mxu0 %v14075_v48  ;;  %10869 = vmatprep.subr.bf16.mxu1 %v14077_v61  ;;  %v14117_v48 = vcombine.high %v94_v47, %v98_v18  ;;  %v101_v61 = vld [vmem:[%s22791_s1 + $0x190] sm:$0xff] }
 0x304   :  { %v14122_v14 = vcombine.low %v101_v61, %v105_v39 }
 0x305   :  { %9877 = vmatmul.mubr.bf16.vlgmr.msra.gmra.mrb[0].mxu0 %v19336_v4  ;;  %10369 = vmatmul.mubr.bf16.vlgmr.msra.gmra.mrb[0].mxu1 %v19336_v4 }
 0x306   :  { %10378 = vmatpush1.bf16.msra.mxu0 %v14074_v6  ;;  %10870 = vmatpush1.bf16.msra.mxu1 %v14076_v7  ;;  %v14116_v6 = vcombine.low %v94_v47, %v98_v18  ;;  %v14123_v7 = vcombine.high %v101_v61, %v105_v39  ;;  %v138_v47 = vld [vmem:[%s22791_s1 + $0x2b8] sm:$0xff]  ;;  %v145_v61 = vld [vmem:[%s22791_s1 + $0x2f0] sm:$0xff] }
 0x307   :  { %10379 = vmatprep.subr.bf16.mxu0 %v14083_v8  ;;  %10871 = vmatprep.subr.bf16.mxu1 %v14085_v10  ;;  %v14125_v8 = vcombine.high %v102_v0, %v106_v5  ;;  %v109_v10 = vld [vmem:[%s22791_s1 + $0x1d0] sm:$0xff]  ;;  %v142_v39 = vld [vmem:[%s22791_s1 + $0x2d8] sm:$0xff] }
 0x308   :  { %10409 = vmatprep.mubr.bf16.mxu0 %v16911_v57  ;;  %10901 = vmatprep.mubr.bf16.mxu1 %v16911_v57  ;;  %v86_v57 = vld [vmem:[%s22791_s1 + $0x118] sm:$0xff]  ;;  %v14130_v15 = vcombine.low %v109_v10, %v113_v54 }
 0x309   :  { %v14109_v25 = vcombine.high %v86_v57, %v90_v37  ;;  %v14108_v56 = vcombine.low %v86_v57, %v90_v37  ;;  %v130_v57 = vld [vmem:[%s22791_s1 + $0x278] sm:$0xff] }
 0x30a   :  { %10380 = vmatpush1.bf16.msra.mxu0 %v14082_v17  ;;  %10872 = vmatpush1.bf16.msra.mxu1 %v14084_v53  ;;  %v14124_v17 = vcombine.low %v102_v0, %v106_v5  ;;  %v14131_v53 = vcombine.high %v109_v10, %v113_v54  ;;  %v146_v0 = vld [vmem:[%s22791_s1 + $0x2f8] sm:$0xff]  ;;  %v153_v10 = vld [vmem:[%s22791_s1 + $0x330] sm:$0xff] }
 0x30b   :  { %10381 = vmatprep.subr.bf16.mxu0 %v14091_v20  ;;  %10873 = vmatprep.subr.bf16.mxu1 %v14093_v59  ;;  %v14133_v20 = vcombine.high %v110_v11, %v114_v13  ;;  %v117_v59 = vld [vmem:[%s22791_s1 + $0x210] sm:$0xff]  ;;  %v150_v54 = vld [vmem:[%s22791_s1 + $0x318] sm:$0xff] }
 0x30c   :  { %v14138_v37 = vcombine.low %v117_v59, %v121_v24 }
 0x30e   :  { %10382 = vmatpush1.bf16.msra.mxu0 %v14090_v28  ;;  %10874 = vmatpush1.bf16.msra.mxu1 %v14092_v29  ;;  %v14132_v28 = vcombine.low %v110_v11, %v114_v13  ;;  %v14139_v29 = vcombine.high %v117_v59, %v121_v24  ;;  %v154_v11 = vld [vmem:[%s22791_s1 + $0x338] sm:$0xff]  ;;  %v161_v59 = vld [vmem:[%s22791_s1 + $0x370] sm:$0xff] }
 0x30f   :  { %10383 = vmatprep.subr.bf16.mxu0 %v14099_v32  ;;  %10875 = vmatprep.subr.bf16.mxu1 %v14101_v33  ;;  %v14141_v32 = vcombine.high %v118_v26, %v122_v49  ;;  %v125_v33 = vld [vmem:[%s22791_s1 + $0x250] sm:$0xff]  ;;  %v158_v24 = vld [vmem:[%s22791_s1 + $0x358] sm:$0xff] }
 0x310   :  { %v14146_v18 = vcombine.low %v125_v33, %v129_v34 }
 0x312   :  { %10384 = vmatpush1.bf16.msra.mxu0 %v14098_v38  ;;  %10876 = vmatpush1.bf16.msra.mxu1 %v14100_v40  ;;  %v14140_v38 = vcombine.low %v118_v26, %v122_v49  ;;  %v14147_v40 = vcombine.high %v125_v33, %v129_v34  ;;  %v162_v26 = vld [vmem:[%s22791_s1 + $0x378] sm:$0xff]  ;;  %v169_v33 = vld [vmem:[%s22791_s1 + $0x3b0] sm:$0xff] }
 0x313   :  { %10385 = vmatprep.subr.bf16.mxu0 %v14107_v41  ;;  %10877 = vmatprep.subr.bf16.mxu1 %v14109_v25  ;;  %v14149_v41 = vcombine.high %v126_v35, %v130_v57  ;;  %v133_v25 = vld [vmem:[%s22791_s1 + $0x290] sm:$0xff]  ;;  %v166_v34 = vld [vmem:[%s22791_s1 + $0x398] sm:$0xff] }
 0x314   :  { %v14154_v5 = vcombine.low %v133_v25, %v137_v42 }
 0x316   :  { %10386 = vmatpush1.bf16.msra.mxu0 %v14106_v52  ;;  %10878 = vmatpush1.bf16.msra.mxu1 %v14108_v56  ;;  %v14148_v52 = vcombine.low %v126_v35, %v130_v57  ;;  %v14155_v56 = vcombine.high %v133_v25, %v137_v42  ;;  %v170_v35 = vld [vmem:[%s22791_s1 + $0x3b8] sm:$0xff]  ;;  %v177_v25 = vld [vmem:[%s22791_s1 + $0x3f0] sm:$0xff] }
 0x317   :  { %10387 = vmatprep.subr.bf16.mxu0 %v14115_v3  ;;  %10879 = vmatprep.subr.bf16.mxu1 %v14117_v48  ;;  %v14157_v3 = vcombine.high %v134_v44, %v138_v47  ;;  %v141_v48 = vld [vmem:[%s22791_s1 + $0x2d0] sm:$0xff]  ;;  %v174_v42 = vld [vmem:[%s22791_s1 + $0x3d8] sm:$0xff] }
 0x318   :  { %v14162_v13 = vcombine.low %v141_v48, %v145_v61 }
 0x31a   :  { %10388 = vmatpush1.bf16.msra.mxu0 %v14114_v23  ;;  %10880 = vmatpush1.bf16.msra.mxu1 %v14116_v6  ;;  %v14156_v23 = vcombine.low %v134_v44, %v138_v47  ;;  %v14163_v6 = vcombine.high %v141_v48, %v145_v61  ;;  %v178_v44 = vld [vmem:[%s22791_s1 + $0x3f8] sm:$0xff]  ;;  %v185_v48 = vld [vmem:[%s22791_s1 + $0x430] sm:$0xff] }
 0x31b   :  { %10389 = vmatprep.subr.bf16.mxu0 %v14123_v7  ;;  %10881 = vmatprep.subr.bf16.mxu1 %v14125_v8  ;;  %v14165_v7 = vcombine.high %v142_v39, %v146_v0  ;;  %v149_v8 = vld [vmem:[%s22791_s1 + $0x310] sm:$0xff]  ;;  %v182_v61 = vld [vmem:[%s22791_s1 + $0x418] sm:$0xff] }
 0x31c   :  { %v14170_v49 = vcombine.low %v149_v8, %v153_v10 }
 0x31e   :  { %10390 = vmatpush1.bf16.msra.mxu0 %v14122_v14  ;;  %10882 = vmatpush1.bf16.msra.mxu1 %v14124_v17  ;;  %v14164_v14 = vcombine.low %v142_v39, %v146_v0  ;;  %v14171_v17 = vcombine.high %v149_v8, %v153_v10  ;;  %v186_v39 = vld [vmem:[%s22791_s1 + $0x438] sm:$0xff]  ;;  %v193_v8 = vld [vmem:[%s22791_s1 + $0x470] sm:$0xff] }
 0x31f   :  { %10391 = vmatprep.subr.bf16.mxu0 %v14131_v53  ;;  %10883 = vmatprep.subr.bf16.mxu1 %v14133_v20  ;;  %v14173_v53 = vcombine.high %v150_v54, %v154_v11  ;;  %v157_v20 = vld [vmem:[%s22791_s1 + $0x350] sm:$0xff]  ;;  %v190_v10 = vld [vmem:[%s22791_s1 + $0x458] sm:$0xff] }
 0x320   :  { %v14178_v57 = vcombine.low %v157_v20, %v161_v59 }
 0x322   :  { %10392 = vmatpush1.bf16.msra.mxu0 %v14130_v15  ;;  %10884 = vmatpush1.bf16.msra.mxu1 %v14132_v28  ;;  %v14172_v15 = vcombine.low %v150_v54, %v154_v11  ;;  %v14179_v28 = vcombine.high %v157_v20, %v161_v59  ;;  %v194_v54 = vld [vmem:[%s22791_s1 + $0x478] sm:$0xff]  ;;  %v201_v20 = vld [vmem:[%s22791_s1 + $0x4b0] sm:$0xff] }
 0x323   :  { %10393 = vmatprep.subr.bf16.mxu0 %v14139_v29  ;;  %10885 = vmatprep.subr.bf16.mxu1 %v14141_v32  ;;  %v14181_v29 = vcombine.high %v158_v24, %v162_v26  ;;  %v165_v32 = vld [vmem:[%s22791_s1 + $0x390] sm:$0xff]  ;;  %v198_v59 = vld [vmem:[%s22791_s1 + $0x498] sm:$0xff] }
 0x324   :  { %v14186_v47 = vcombine.low %v165_v32, %v169_v33 }
 0x326   :  { %10394 = vmatpush1.bf16.msra.mxu0 %v14138_v37  ;;  %10886 = vmatpush1.bf16.msra.mxu1 %v14140_v38  ;;  %v14180_v37 = vcombine.low %v158_v24, %v162_v26  ;;  %v14187_v38 = vcombine.high %v165_v32, %v169_v33  ;;  %v202_v24 = vld [vmem:[%s22791_s1 + $0x4b8] sm:$0xff]  ;;  %v209_v32 = vld [vmem:[%s22791_s1 + $0x4f0] sm:$0xff] }
 0x327   :  { %10395 = vmatprep.subr.bf16.mxu0 %v14147_v40  ;;  %10887 = vmatprep.subr.bf16.mxu1 %v14149_v41  ;;  %v14189_v40 = vcombine.high %v166_v34, %v170_v35  ;;  %v173_v41 = vld [vmem:[%s22791_s1 + $0x3d0] sm:$0xff]  ;;  %v210_v33 = vld [vmem:[%s22791_s1 + $0x4f8] sm:$0xff] }
 0x328   :  { %v14194_v0 = vcombine.low %v173_v41, %v177_v25 }
 0x32a   :  { %10396 = vmatpush1.bf16.msra.mxu0 %v14146_v18  ;;  %10888 = vmatpush1.bf16.msra.mxu1 %v14148_v52  ;;  %v14188_v18 = vcombine.low %v166_v34, %v170_v35  ;;  %v14195_v52 = vcombine.high %v173_v41, %v177_v25  ;;  %v14220_v35 = vcombine.low %v198_v59, %v202_v24  ;;  %v218_v41 = vld [vmem:[%s22791_s1 + $0x538] sm:$0xff] }
 0x32b   :  { %10397 = vmatprep.subr.bf16.mxu0 %v14155_v56  ;;  %10889 = vmatprep.subr.bf16.mxu1 %v14157_v3  ;;  %v14197_v56 = vcombine.high %v174_v42, %v178_v44  ;;  %v181_v3 = vld [vmem:[%s22791_s1 + $0x410] sm:$0xff] }
 0x32c   :  { %v14202_v11 = vcombine.low %v181_v3, %v185_v48 }
 0x32e   :  { %10398 = vmatpush1.bf16.msra.mxu0 %v14154_v5  ;;  %10890 = vmatpush1.bf16.msra.mxu1 %v14156_v23  ;;  %v14196_v5 = vcombine.low %v174_v42, %v178_v44  ;;  %v14203_v23 = vcombine.high %v181_v3, %v185_v48  ;;  %v226_v3 = vld [vmem:[%s22791_s1 + $0x578] sm:$0xff] }
 0x32f   :  { %10399 = vmatprep.subr.bf16.mxu0 %v14163_v6  ;;  %10891 = vmatprep.subr.bf16.mxu1 %v14165_v7  ;;  %v14205_v6 = vcombine.high %v182_v61, %v186_v39  ;;  %v189_v7 = vld [vmem:[%s22791_s1 + $0x450] sm:$0xff] }
 0x330   :  { %v14210_v26 = vcombine.low %v189_v7, %v193_v8 }
 0x332   :  { %10400 = vmatpush1.bf16.msra.mxu0 %v14162_v13  ;;  %10892 = vmatpush1.bf16.msra.mxu1 %v14164_v14  ;;  %v14204_v13 = vcombine.low %v182_v61, %v186_v39  ;;  %v14211_v14 = vcombine.high %v189_v7, %v193_v8  ;;  %v234_v7 = vld [vmem:[%s22791_s1 + $0x5b8] sm:$0xff] }
 0x333   :  { %10401 = vmatprep.subr.bf16.mxu0 %v14171_v17  ;;  %10893 = vmatprep.subr.bf16.mxu1 %v14173_v53  ;;  %v14213_v17 = vcombine.high %v190_v10, %v194_v54  ;;  %v197_v53 = vld [vmem:[%s22791_s1 + $0x490] sm:$0xff] }
 0x334   :  { %v14218_v34 = vcombine.low %v197_v53, %v201_v20 }
 0x336   :  { %10402 = vmatpush1.bf16.msra.mxu0 %v14170_v49  ;;  %10894 = vmatpush1.bf16.msra.mxu1 %v14172_v15  ;;  %v14212_v49 = vcombine.low %v190_v10, %v194_v54  ;;  %v14219_v15 = vcombine.high %v197_v53, %v201_v20  ;;  %v242_v53 = vld [vmem:[%s22791_s1 + $0x5f8] sm:$0xff] }
 0x337   :  { %10403 = vmatprep.subr.bf16.mxu0 %v14179_v28  ;;  %10895 = vmatprep.subr.bf16.mxu1 %v14181_v29  ;;  %v14221_v28 = vcombine.high %v198_v59, %v202_v24  ;;  %v205_v29 = vld [vmem:[%s22791_s1 + $0x4d0] sm:$0xff] }
 0x338   :  { %v14226_v25 = vcombine.low %v205_v29, %v209_v32 }
 0x33a   :  { %10404 = vmatpush1.bf16.msra.mxu0 %v14178_v57  ;;  %10896 = vmatpush1.bf16.msra.mxu1 %v14180_v37  ;;  %v14227_v57 = vcombine.high %v205_v29, %v209_v32  ;;  %v250_v29 = vld [vmem:[%s22791_s1 + $0x638] sm:$0xff] }
 0x33b   :  { %10405 = vmatprep.subr.bf16.mxu0 %v14187_v38  ;;  %10897 = vmatprep.subr.bf16.mxu1 %v14189_v40  ;;  %v213_v38 = vld [vmem:[%s22791_s1 + $0x510] sm:$0xff] }
 0x33c   :  { %v217_v40 = vld [vmem:[%s22791_s1 + $0x530] sm:$0xff] }
 0x33d   :  { %v14235_v44 = vcombine.high %v213_v38, %v217_v40  ;;  %v14234_v48 = vcombine.low %v213_v38, %v217_v40  ;;  %v258_v38 = vld [vmem:[%s22791_s1 + $0x678] sm:$0xff] }
 0x33e   :  { %10406 = vmatpush1.bf16.msra.mxu0 %v14186_v47  ;;  %10898 = vmatpush1.bf16.msra.mxu1 %v14188_v18  ;;  %v221_v18 = vld [vmem:[%s22791_s1 + $0x550] sm:$0xff] }
 0x33f   :  { %10407 = vmatprep.subr.bf16.mxu0 %v14195_v52  ;;  %10899 = vmatprep.subr.bf16.mxu1 %v14197_v56  ;;  %v225_v52 = vld [vmem:[%s22791_s1 + $0x570] sm:$0xff]  ;;  %v222_v56 = vld [vmem:[%s22791_s1 + $0x558] sm:$0xff] }
 0x340   :  { %v14243_v39 = vcombine.high %v221_v18, %v225_v52  ;;  %v14242_v8 = vcombine.low %v221_v18, %v225_v52  ;;  %v14244_v10 = vcombine.low %v222_v56, %v226_v3  ;;  %v266_v18 = vld [vmem:[%s22791_s1 + $0x6b8] sm:$0xff] }
 0x342   :  { %10408 = vmatpush1.bf16.msra.mxu0 %v14194_v0  ;;  %10900 = vmatpush1.bf16.msra.mxu1 %v14196_v5  ;;  %v14245_v0 = vcombine.high %v222_v56, %v226_v3  ;;  %v229_v5 = vld [vmem:[%s22791_s1 + $0x590] sm:$0xff] }
 0x343   :  { %10418 = vmatprep.subr.bf16.mxu0 %v14203_v23  ;;  %10910 = vmatprep.subr.bf16.mxu1 %v14205_v6  ;;  %v233_v23 = vld [vmem:[%s22791_s1 + $0x5b0] sm:$0xff]  ;;  %v230_v6 = vld [vmem:[%s22791_s1 + $0x598] sm:$0xff] }
 0x344   :  { %v14251_v54 = vcombine.high %v229_v5, %v233_v23  ;;  %v14250_v20 = vcombine.low %v229_v5, %v233_v23  ;;  %v14252_v59 = vcombine.low %v230_v6, %v234_v7  ;;  %v274_v5 = vld [vmem:[%s22791_s1 + $0x6f8] sm:$0xff] }
 0x345   :  { %10410 = vmatmul.mubr.bf16.vlgmr.msra.gmra.mrb[4].mxu0 %v17037_v12  ;;  %10902 = vmatmul.mubr.bf16.vlgmr.msra.gmra.mrb[4].mxu1 %v17037_v12  ;;  %v206_v12 = vld [vmem:[%s22791_s1 + $0x4d8] sm:$0xff] }
 0x346   :  { %10419 = vmatpush1.bf16.msra.mxu0 %v14202_v11  ;;  %10911 = vmatpush1.bf16.msra.mxu1 %v14204_v13  ;;  %v14229_v37 = vcombine.high %v206_v12, %v210_v33  ;;  %v14228_v42 = vcombine.low %v206_v12, %v210_v33  ;;  %v14253_v11 = vcombine.high %v230_v6, %v234_v7  ;;  %v237_v13 = vld [vmem:[%s22791_s1 + $0x5d0] sm:$0xff] }
 0x347   :  { %10420 = vmatprep.subr.bf16.mxu0 %v14211_v14  ;;  %10912 = vmatprep.subr.bf16.mxu1 %v14213_v17  ;;  %v241_v14 = vld [vmem:[%s22791_s1 + $0x5f0] sm:$0xff]  ;;  %v238_v17 = vld [vmem:[%s22791_s1 + $0x5d8] sm:$0xff] }
 0x348   :  { %10450 = vmatprep.mubr.bf16.mxu0 %v17058_v21  ;;  %10942 = vmatprep.mubr.bf16.mxu1 %v17058_v21  ;;  %v214_v21 = vld [vmem:[%s22791_s1 + $0x518] sm:$0xff]  ;;  %v14259_v24 = vcombine.high %v237_v13, %v241_v14  ;;  %v14258_v32 = vcombine.low %v237_v13, %v241_v14  ;;  %v14260_v12 = vcombine.low %v238_v17, %v242_v53 }
 0x349   :  { %v14237_v47 = vcombine.high %v214_v21, %v218_v41  ;;  %v14236_v61 = vcombine.low %v214_v21, %v218_v41  ;;  %v282_v13 = vld [vmem:[%s22791_s1 + $0x738] sm:$0xff] }
 0x34a   :  { %10421 = vmatpush1.bf16.msra.mxu0 %v14210_v26  ;;  %10913 = vmatpush1.bf16.msra.mxu1 %v14212_v49  ;;  %v14261_v26 = vcombine.high %v238_v17, %v242_v53  ;;  %v245_v49 = vld [vmem:[%s22791_s1 + $0x610] sm:$0xff] }
 0x34b   :  { %10422 = vmatprep.subr.bf16.mxu0 %v14219_v15  ;;  %10914 = vmatprep.subr.bf16.mxu1 %v14221_v28  ;;  %v249_v15 = vld [vmem:[%s22791_s1 + $0x630] sm:$0xff]  ;;  %v246_v28 = vld [vmem:[%s22791_s1 + $0x618] sm:$0xff] }
 0x34c   :  { %v14267_v33 = vcombine.high %v245_v49, %v249_v15  ;;  %v14266_v40 = vcombine.low %v245_v49, %v249_v15  ;;  %v14268_v21 = vcombine.low %v246_v28, %v250_v29  ;;  %v290_v49 = vld [vmem:[%s22791_s1 + $0x778] sm:$0xff] }
 0x34e   :  { %10423 = vmatpush1.bf16.msra.mxu0 %v14218_v34  ;;  %10915 = vmatpush1.bf16.msra.mxu1 %v14220_v35  ;;  %v14269_v34 = vcombine.high %v246_v28, %v250_v29  ;;  %v253_v35 = vld [vmem:[%s22791_s1 + $0x650] sm:$0xff] }
 0x34f   :  { %10424 = vmatprep.subr.bf16.mxu0 %v14227_v57  ;;  %10916 = vmatprep.subr.bf16.mxu1 %v14229_v37  ;;  %v257_v57 = vld [vmem:[%s22791_s1 + $0x670] sm:$0xff]  ;;  %v254_v37 = vld [vmem:[%s22791_s1 + $0x658] sm:$0xff] }
 0x350   :  { %v14275_v41 = vcombine.high %v253_v35, %v257_v57  ;;  %v14274_v52 = vcombine.low %v253_v35, %v257_v57  ;;  %v14276_v56 = vcombine.low %v254_v37, %v258_v38  ;;  %v298_v35 = vld [vmem:[%s22791_s1 + $0x7b8] sm:$0xff] }
 0x352   :  { %10425 = vmatpush1.bf16.msra.mxu0 %v14226_v25  ;;  %10917 = vmatpush1.bf16.msra.mxu1 %v14228_v42  ;;  %v14277_v25 = vcombine.high %v254_v37, %v258_v38  ;;  %v261_v42 = vld [vmem:[%s22791_s1 + $0x690] sm:$0xff] }
 0x353   :  { %10426 = vmatprep.subr.bf16.mxu0 %v14235_v44  ;;  %10918 = vmatprep.subr.bf16.mxu1 %v14237_v47  ;;  %v265_v44 = vld [vmem:[%s22791_s1 + $0x6b0] sm:$0xff]  ;;  %v262_v47 = vld [vmem:[%s22791_s1 + $0x698] sm:$0xff] }
 0x354   :  { %v14283_v3 = vcombine.high %v261_v42, %v265_v44  ;;  %v14282_v23 = vcombine.low %v261_v42, %v265_v44  ;;  %v14284_v6 = vcombine.low %v262_v47, %v266_v18  ;;  %v306_v42 = vld [vmem:[%s22791_s1 + $0x7f8] sm:$0xff] }
 0x356   :  { %10427 = vmatpush1.bf16.msra.mxu0 %v14234_v48  ;;  %10919 = vmatpush1.bf16.msra.mxu1 %v14236_v61  ;;  %v14285_v48 = vcombine.high %v262_v47, %v266_v18  ;;  %v269_v61 = vld [vmem:[%s22791_s1 + $0x6d0] sm:$0xff] }
 0x357   :  { %10428 = vmatprep.subr.bf16.mxu0 %v14243_v39  ;;  %10920 = vmatprep.subr.bf16.mxu1 %v14245_v0  ;;  %v273_v39 = vld [vmem:[%s22791_s1 + $0x6f0] sm:$0xff]  ;;  %v270_v0 = vld [vmem:[%s22791_s1 + $0x6d8] sm:$0xff] }
 0x358   :  { %v14291_v7 = vcombine.high %v269_v61, %v273_v39  ;;  %v14290_v14 = vcombine.low %v269_v61, %v273_v39  ;;  %v14292_v17 = vcombine.low %v270_v0, %v274_v5  ;;  %v314_v61 = vld [vmem:[%s22791_s1 + $0x838] sm:$0xff] }
 0x35a   :  { %10429 = vmatpush1.bf16.msra.mxu0 %v14242_v8  ;;  %10921 = vmatpush1.bf16.msra.mxu1 %v14244_v10  ;;  %v14293_v8 = vcombine.high %v270_v0, %v274_v5  ;;  %v277_v10 = vld [vmem:[%s22791_s1 + $0x710] sm:$0xff] }
 0x35b   :  { %10430 = vmatprep.subr.bf16.mxu0 %v14251_v54  ;;  %10922 = vmatprep.subr.bf16.mxu1 %v14253_v11  ;;  %v281_v54 = vld [vmem:[%s22791_s1 + $0x730] sm:$0xff]  ;;  %v278_v11 = vld [vmem:[%s22791_s1 + $0x718] sm:$0xff] }
 0x35c   :  { %v14299_v53 = vcombine.high %v277_v10, %v281_v54  ;;  %v14298_v15 = vcombine.low %v277_v10, %v281_v54  ;;  %v14300_v28 = vcombine.low %v278_v11, %v282_v13  ;;  %v322_v10 = vld [vmem:[%s22791_s1 + $0x878] sm:$0xff] }
 0x35e   :  { %10431 = vmatpush1.bf16.msra.mxu0 %v14250_v20  ;;  %10923 = vmatpush1.bf16.msra.mxu1 %v14252_v59  ;;  %v14301_v20 = vcombine.high %v278_v11, %v282_v13  ;;  %v285_v59 = vld [vmem:[%s22791_s1 + $0x750] sm:$0xff] }
 0x35f   :  { %10432 = vmatprep.subr.bf16.mxu0 %v14259_v24  ;;  %10924 = vmatprep.subr.bf16.mxu1 %v14261_v26  ;;  %v289_v24 = vld [vmem:[%s22791_s1 + $0x770] sm:$0xff]  ;;  %v286_v26 = vld [vmem:[%s22791_s1 + $0x758] sm:$0xff] }
 0x360   :  { %v14307_v29 = vcombine.high %v285_v59, %v289_v24  ;;  %v14306_v57 = vcombine.low %v285_v59, %v289_v24  ;;  %v14308_v37 = vcombine.low %v286_v26, %v290_v49  ;;  %v330_v59 = vld [vmem:[%s22791_s1 + $0x8b8] sm:$0xff] }
 0x362   :  { %10433 = vmatpush1.bf16.msra.mxu0 %v14258_v32  ;;  %10925 = vmatpush1.bf16.msra.mxu1 %v14260_v12  ;;  %v14309_v32 = vcombine.high %v286_v26, %v290_v49  ;;  %v293_v12 = vld [vmem:[%s22791_s1 + $0x790] sm:$0xff] }
 0x363   :  { %10434 = vmatprep.subr.bf16.mxu0 %v14267_v33  ;;  %10926 = vmatprep.subr.bf16.mxu1 %v14269_v34  ;;  %v297_v33 = vld [vmem:[%s22791_s1 + $0x7b0] sm:$0xff]  ;;  %v294_v34 = vld [vmem:[%s22791_s1 + $0x798] sm:$0xff] }
 0x364   :  { %v14315_v38 = vcombine.high %v293_v12, %v297_v33  ;;  %v14314_v44 = vcombine.low %v293_v12, %v297_v33  ;;  %v14316_v47 = vcombine.low %v294_v34, %v298_v35 }
 0x366   :  { %10435 = vmatpush1.bf16.msra.mxu0 %v14266_v40  ;;  %10927 = vmatpush1.bf16.msra.mxu1 %v14268_v21  ;;  %v14317_v40 = vcombine.high %v294_v34, %v298_v35  ;;  %v301_v21 = vld [vmem:[%s22791_s1 + $0x7d0] sm:$0xff] }
 0x367   :  { %10436 = vmatprep.subr.bf16.mxu0 %v14275_v41  ;;  %10928 = vmatprep.subr.bf16.mxu1 %v14277_v25  ;;  %v305_v41 = vld [vmem:[%s22791_s1 + $0x7f0] sm:$0xff]  ;;  %v302_v25 = vld [vmem:[%s22791_s1 + $0x7d8] sm:$0xff] }
 0x368   :  { %v14323_v18 = vcombine.high %v301_v21, %v305_v41  ;;  %v14322_v39 = vcombine.low %v301_v21, %v305_v41  ;;  %v14324_v0 = vcombine.low %v302_v25, %v306_v42 }
 0x36a   :  { %10437 = vmatpush1.bf16.msra.mxu0 %v14274_v52  ;;  %10929 = vmatpush1.bf16.msra.mxu1 %v14276_v56  ;;  %v14325_v52 = vcombine.high %v302_v25, %v306_v42  ;;  %v309_v56 = vld [vmem:[%s22791_s1 + $0x810] sm:$0xff] }
 0x36b   :  { %10438 = vmatprep.subr.bf16.mxu0 %v14283_v3  ;;  %10930 = vmatprep.subr.bf16.mxu1 %v14285_v48  ;;  %v313_v3 = vld [vmem:[%s22791_s1 + $0x830] sm:$0xff]  ;;  %v310_v48 = vld [vmem:[%s22791_s1 + $0x818] sm:$0xff] }
 0x36c   :  { %v14331_v5 = vcombine.high %v309_v56, %v313_v3  ;;  %v14330_v54 = vcombine.low %v309_v56, %v313_v3  ;;  %v14332_v11 = vcombine.low %v310_v48, %v314_v61  ;;  %v349_v42 = vld [vmem:[%s22791_s1 + $0x950] sm:$0xff] }
 0x36e   :  { %10439 = vmatpush1.bf16.msra.mxu0 %v14282_v23  ;;  %10931 = vmatpush1.bf16.msra.mxu1 %v14284_v6  ;;  %v14333_v23 = vcombine.high %v310_v48, %v314_v61  ;;  %v317_v6 = vld [vmem:[%s22791_s1 + $0x850] sm:$0xff] }
 0x36f   :  { %10440 = vmatprep.subr.bf16.mxu0 %v14291_v7  ;;  %10932 = vmatprep.subr.bf16.mxu1 %v14293_v8  ;;  %v321_v7 = vld [vmem:[%s22791_s1 + $0x870] sm:$0xff]  ;;  %v318_v8 = vld [vmem:[%s22791_s1 + $0x858] sm:$0xff] }
 0x370   :  { %v14339_v13 = vcombine.high %v317_v6, %v321_v7  ;;  %v14338_v24 = vcombine.low %v317_v6, %v321_v7  ;;  %v14340_v26 = vcombine.low %v318_v8, %v322_v10  ;;  %v357_v61 = vld [vmem:[%s22791_s1 + $0x990] sm:$0xff] }
 0x372   :  { %10441 = vmatpush1.bf16.msra.mxu0 %v14290_v14  ;;  %10933 = vmatpush1.bf16.msra.mxu1 %v14292_v17  ;;  %v14341_v14 = vcombine.high %v318_v8, %v322_v10  ;;  %v325_v17 = vld [vmem:[%s22791_s1 + $0x890] sm:$0xff] }
 0x373   :  { %10442 = vmatprep.subr.bf16.mxu0 %v14299_v53  ;;  %10934 = vmatprep.subr.bf16.mxu1 %v14301_v20  ;;  %v329_v53 = vld [vmem:[%s22791_s1 + $0x8b0] sm:$0xff]  ;;  %v326_v20 = vld [vmem:[%s22791_s1 + $0x898] sm:$0xff] }
 0x374   :  { %v14347_v49 = vcombine.high %v325_v17, %v329_v53  ;;  %v14346_v12 = vcombine.low %v325_v17, %v329_v53  ;;  %v14348_v33 = vcombine.low %v326_v20, %v330_v59  ;;  %v365_v10 = vld [vmem:[%s22791_s1 + $0x9d0] sm:$0xff] }
 0x376   :  { %10443 = vmatpush1.bf16.msra.mxu0 %v14298_v15  ;;  %10935 = vmatpush1.bf16.msra.mxu1 %v14300_v28  ;;  %v14349_v15 = vcombine.high %v326_v20, %v330_v59  ;;  %v333_v28 = vld [vmem:[%s22791_s1 + $0x8d0] sm:$0xff] }
 0x377   :  { %10444 = vmatprep.subr.bf16.mxu0 %v14307_v29  ;;  %10936 = vmatprep.subr.bf16.mxu1 %v14309_v32  ;;  %v337_v29 = vld [vmem:[%s22791_s1 + $0x8f0] sm:$0xff]  ;;  %v338_v32 = vld [vmem:[%s22791_s1 + $0x8f8] sm:$0xff] }
 0x378   :  { %v14355_v34 = vcombine.high %v333_v28, %v337_v29  ;;  %v373_v59 = vld [vmem:[%s22791_s1 + $0xa10] sm:$0xff] }
 0x37a   :  { %10445 = vmatpush1.bf16.msra.mxu0 %v14306_v57  ;;  %10937 = vmatpush1.bf16.msra.mxu1 %v14308_v37  ;;  %v341_v57 = vld [vmem:[%s22791_s1 + $0x910] sm:$0xff] }
 0x37b   :  { %10446 = vmatprep.subr.bf16.mxu0 %v14315_v38  ;;  %10938 = vmatprep.subr.bf16.mxu1 %v14317_v40  ;;  %v345_v37 = vld [vmem:[%s22791_s1 + $0x930] sm:$0xff]  ;;  %v346_v38 = vld [vmem:[%s22791_s1 + $0x938] sm:$0xff]  ;;  %v14354_v40 = vcombine.low %v333_v28, %v337_v29 }
 0x37c   :  { %v14363_v41 = vcombine.high %v341_v57, %v345_v37 }
 0x37e   :  { %10447 = vmatpush1.bf16.msra.mxu0 %v14314_v44  ;;  %10939 = vmatpush1.bf16.msra.mxu1 %v14316_v47  ;;  %v353_v44 = vld [vmem:[%s22791_s1 + $0x970] sm:$0xff]  ;;  %v350_v47 = vld [vmem:[%s22791_s1 + $0x958] sm:$0xff] }
 0x37f   :  { %10448 = vmatprep.subr.bf16.mxu0 %v14323_v18  ;;  %10940 = vmatprep.subr.bf16.mxu1 %v14325_v52  ;;  %v354_v18 = vld [vmem:[%s22791_s1 + $0x978] sm:$0xff]  ;;  %v14362_v52 = vcombine.low %v341_v57, %v345_v37  ;;  %v14371_v3 = vcombine.high %v349_v42, %v353_v44 }
 0x380   :  { %v14373_v48 = vcombine.high %v350_v47, %v354_v18  ;;  %v14372_v6 = vcombine.low %v350_v47, %v354_v18  ;;  %v397_v18 = vld [vmem:[%s22791_s1 + $0xad0] sm:$0xff] }
 0x382   :  { %10449 = vmatpush1.bf16.msra.mxu0 %v14322_v39  ;;  %10941 = vmatpush1.bf16.msra.mxu1 %v14324_v0  ;;  %v361_v39 = vld [vmem:[%s22791_s1 + $0x9b0] sm:$0xff]  ;;  %v358_v0 = vld [vmem:[%s22791_s1 + $0x998] sm:$0xff] }
 0x383   :  { %10459 = vmatprep.subr.bf16.mxu0 %v14331_v5  ;;  %10951 = vmatprep.subr.bf16.mxu1 %v14333_v23  ;;  %v362_v5 = vld [vmem:[%s22791_s1 + $0x9b8] sm:$0xff]  ;;  %v14370_v23 = vcombine.low %v349_v42, %v353_v44  ;;  %v14379_v7 = vcombine.high %v357_v61, %v361_v39 }
 0x384   :  { %v14381_v8 = vcombine.high %v358_v0, %v362_v5  ;;  %v14380_v17 = vcombine.low %v358_v0, %v362_v5  ;;  %v405_v5 = vld [vmem:[%s22791_s1 + $0xb10] sm:$0xff] }
 0x385   :  { %10451 = vmatmul.mubr.bf16.vlgmr.msra.gmra.mrb[4].mxu0 %v17246_v22  ;;  %10943 = vmatmul.mubr.bf16.vlgmr.msra.gmra.mrb[4].mxu1 %v17246_v22  ;;  %v334_v22 = vld [vmem:[%s22791_s1 + $0x8d8] sm:$0xff] }
 0x386   :  { %10460 = vmatpush1.bf16.msra.mxu0 %v14330_v54  ;;  %10952 = vmatpush1.bf16.msra.mxu1 %v14332_v11  ;;  %v14357_v35 = vcombine.high %v334_v22, %v338_v32  ;;  %v14356_v21 = vcombine.low %v334_v22, %v338_v32  ;;  %v369_v54 = vld [vmem:[%s22791_s1 + $0x9f0] sm:$0xff]  ;;  %v366_v11 = vld [vmem:[%s22791_s1 + $0x9d8] sm:$0xff] }
 0x387   :  { %10461 = vmatprep.subr.bf16.mxu0 %v14339_v13  ;;  %10953 = vmatprep.subr.bf16.mxu1 %v14341_v14  ;;  %v370_v13 = vld [vmem:[%s22791_s1 + $0x9f8] sm:$0xff]  ;;  %v14378_v14 = vcombine.low %v357_v61, %v361_v39  ;;  %v14387_v53 = vcombine.high %v365_v10, %v369_v54  ;;  %v381_v32 = vld [vmem:[%s22791_s1 + $0xa50] sm:$0xff] }
 0x388   :  { %10491 = vmatprep.mubr.bf16.mxu0 %v17267_v31  ;;  %10983 = vmatprep.mubr.bf16.mxu1 %v17267_v31  ;;  %v342_v31 = vld [vmem:[%s22791_s1 + $0x918] sm:$0xff]  ;;  %v14389_v20 = vcombine.high %v366_v11, %v370_v13  ;;  %v14388_v28 = vcombine.low %v366_v11, %v370_v13  ;;  %v413_v13 = vld [vmem:[%s22791_s1 + $0xb50] sm:$0xff] }
 0x389   :  { %v14365_v25 = vcombine.high %v342_v31, %v346_v38  ;;  %v14364_v56 = vcombine.low %v342_v31, %v346_v38  ;;  %v389_v38 = vld [vmem:[%s22791_s1 + $0xa90] sm:$0xff] }
 0x38a   :  { %10462 = vmatpush1.bf16.msra.mxu0 %v14338_v24  ;;  %10954 = vmatpush1.bf16.msra.mxu1 %v14340_v26  ;;  %v377_v24 = vld [vmem:[%s22791_s1 + $0xa30] sm:$0xff]  ;;  %v374_v26 = vld [vmem:[%s22791_s1 + $0xa18] sm:$0xff] }
 0x38b   :  { %10463 = vmatprep.subr.bf16.mxu0 %v14347_v49  ;;  %10955 = vmatprep.subr.bf16.mxu1 %v14349_v15  ;;  %v378_v49 = vld [vmem:[%s22791_s1 + $0xa38] sm:$0xff]  ;;  %v14386_v15 = vcombine.low %v365_v10, %v369_v54  ;;  %v14395_v29 = vcombine.high %v373_v59, %v377_v24 }
 0x38c   :  { %v14397_v22 = vcombine.high %v374_v26, %v378_v49  ;;  %v14396_v57 = vcombine.low %v374_v26, %v378_v49  ;;  %v421_v49 = vld [vmem:[%s22791_s1 + $0xb90] sm:$0xff] }
 0x38e   :  { %10464 = vmatpush1.bf16.msra.mxu0 %v14346_v12  ;;  %10956 = vmatpush1.bf16.msra.mxu1 %v14348_v33  ;;  %v385_v12 = vld [vmem:[%s22791_s1 + $0xa70] sm:$0xff]  ;;  %v382_v33 = vld [vmem:[%s22791_s1 + $0xa58] sm:$0xff] }
 0x38f   :  { %10465 = vmatprep.subr.bf16.mxu0 %v14355_v34  ;;  %10957 = vmatprep.subr.bf16.mxu1 %v14357_v35  ;;  %v386_v34 = vld [vmem:[%s22791_s1 + $0xa78] sm:$0xff]  ;;  %v14394_v35 = vcombine.low %v373_v59, %v377_v24  ;;  %v14403_v37 = vcombine.high %v381_v32, %v385_v12 }
 0x390   :  { %v14405_v31 = vcombine.high %v382_v33, %v386_v34  ;;  %v14404_v42 = vcombine.low %v382_v33, %v386_v34  ;;  %v429_v34 = vld [vmem:[%s22791_s1 + $0xbd0] sm:$0xff] }
 0x392   :  { %10466 = vmatpush1.bf16.msra.mxu0 %v14354_v40  ;;  %10958 = vmatpush1.bf16.msra.mxu1 %v14356_v21  ;;  %v393_v40 = vld [vmem:[%s22791_s1 + $0xab0] sm:$0xff]  ;;  %v390_v21 = vld [vmem:[%s22791_s1 + $0xa98] sm:$0xff] }
 0x393   :  { %10467 = vmatprep.subr.bf16.mxu0 %v14363_v41  ;;  %10959 = vmatprep.subr.bf16.mxu1 %v14365_v25  ;;  %v394_v41 = vld [vmem:[%s22791_s1 + $0xab8] sm:$0xff]  ;;  %v14402_v25 = vcombine.low %v381_v32, %v385_v12  ;;  %v14411_v44 = vcombine.high %v389_v38, %v393_v40 }
 0x394   :  { %v14413_v47 = vcombine.high %v390_v21, %v394_v41  ;;  %v14412_v61 = vcombine.low %v390_v21, %v394_v41  ;;  %v437_v41 = vld [vmem:[%s22791_s1 + $0xc10] sm:$0xff] }
 0x396   :  { %10468 = vmatpush1.bf16.msra.mxu0 %v14362_v52  ;;  %10960 = vmatpush1.bf16.msra.mxu1 %v14364_v56  ;;  %v401_v52 = vld [vmem:[%s22791_s1 + $0xaf0] sm:$0xff]  ;;  %v398_v56 = vld [vmem:[%s22791_s1 + $0xad8] sm:$0xff] }
 0x397   :  { %10469 = vmatprep.subr.bf16.mxu0 %v14371_v3  ;;  %10961 = vmatprep.subr.bf16.mxu1 %v14373_v48  ;;  %v402_v3 = vld [vmem:[%s22791_s1 + $0xaf8] sm:$0xff]  ;;  %v14410_v48 = vcombine.low %v389_v38, %v393_v40  ;;  %v14419_v39 = vcombine.high %v397_v18, %v401_v52 }
 0x398   :  { %v14421_v0 = vcombine.high %v398_v56, %v402_v3  ;;  %v14420_v10 = vcombine.low %v398_v56, %v402_v3  ;;  %v445_v3 = vld [vmem:[%s22791_s1 + $0xc50] sm:$0xff] }
 0x39a   :  { %10470 = vmatpush1.bf16.msra.mxu0 %v14370_v23  ;;  %10962 = vmatpush1.bf16.msra.mxu1 %v14372_v6  ;;  %v409_v23 = vld [vmem:[%s22791_s1 + $0xb30] sm:$0xff]  ;;  %v406_v6 = vld [vmem:[%s22791_s1 + $0xb18] sm:$0xff] }
 0x39b   :  { %10471 = vmatprep.subr.bf16.mxu0 %v14379_v7  ;;  %10963 = vmatprep.subr.bf16.mxu1 %v14381_v8  ;;  %v410_v7 = vld [vmem:[%s22791_s1 + $0xb38] sm:$0xff]  ;;  %v14418_v8 = vcombine.low %v397_v18, %v401_v52  ;;  %v14427_v54 = vcombine.high %v405_v5, %v409_v23 }
 0x39c   :  { %v14429_v11 = vcombine.high %v406_v6, %v410_v7  ;;  %v14428_v59 = vcombine.low %v406_v6, %v410_v7  ;;  %v453_v7 = vld [vmem:[%s22791_s1 + $0xc90] sm:$0xff] }
 0x39e   :  { %10472 = vmatpush1.bf16.msra.mxu0 %v14378_v14  ;;  %10964 = vmatpush1.bf16.msra.mxu1 %v14380_v17  ;;  %v417_v14 = vld [vmem:[%s22791_s1 + $0xb70] sm:$0xff]  ;;  %v414_v17 = vld [vmem:[%s22791_s1 + $0xb58] sm:$0xff] }
 0x39f   :  { %10473 = vmatprep.subr.bf16.mxu0 %v14387_v53  ;;  %10965 = vmatprep.subr.bf16.mxu1 %v14389_v20  ;;  %v418_v53 = vld [vmem:[%s22791_s1 + $0xb78] sm:$0xff]  ;;  %v14426_v20 = vcombine.low %v405_v5, %v409_v23  ;;  %v14435_v24 = vcombine.high %v413_v13, %v417_v14 }
 0x3a0   :  { %v14437_v26 = vcombine.high %v414_v17, %v418_v53  ;;  %v14436_v32 = vcombine.low %v414_v17, %v418_v53  ;;  %v461_v53 = vld [vmem:[%s22791_s1 + $0xcd0] sm:$0xff] }
 0x3a2   :  { %10474 = vmatpush1.bf16.msra.mxu0 %v14386_v15  ;;  %10966 = vmatpush1.bf16.msra.mxu1 %v14388_v28  ;;  %v425_v15 = vld [vmem:[%s22791_s1 + $0xbb0] sm:$0xff]  ;;  %v422_v28 = vld [vmem:[%s22791_s1 + $0xb98] sm:$0xff] }
 0x3a3   :  { %10475 = vmatprep.subr.bf16.mxu0 %v14395_v29  ;;  %10967 = vmatprep.subr.bf16.mxu1 %v14397_v22  ;;  %v426_v29 = vld [vmem:[%s22791_s1 + $0xbb8] sm:$0xff]  ;;  %v14434_v22 = vcombine.low %v413_v13, %v417_v14  ;;  %v14443_v12 = vcombine.high %v421_v49, %v425_v15 }
 0x3a4   :  { %v14445_v33 = vcombine.high %v422_v28, %v426_v29  ;;  %v14444_v38 = vcombine.low %v422_v28, %v426_v29  ;;  %v469_v28 = vld [vmem:[%s22791_s1 + $0xd10] sm:$0xff] }
 0x3a5   :  { %v473_v29 = vld [vmem:[%s22791_s1 + $0xd30] sm:$0xff] }
 0x3a6   :  { %10476 = vmatpush1.bf16.msra.mxu0 %v14394_v35  ;;  %10968 = vmatpush1.bf16.msra.mxu1 %v14396_v57  ;;  %v433_v35 = vld [vmem:[%s22791_s1 + $0xbf0] sm:$0xff]  ;;  %v430_v57 = vld [vmem:[%s22791_s1 + $0xbd8] sm:$0xff] }
 0x3a7   :  { %10477 = vmatprep.subr.bf16.mxu0 %v14403_v37  ;;  %10969 = vmatprep.subr.bf16.mxu1 %v14405_v31  ;;  %v434_v37 = vld [vmem:[%s22791_s1 + $0xbf8] sm:$0xff]  ;;  %v14442_v31 = vcombine.low %v421_v49, %v425_v15  ;;  %v14451_v40 = vcombine.high %v429_v34, %v433_v35 }
 0x3a8   :  { %v14453_v21 = vcombine.high %v430_v57, %v434_v37  ;;  %v14452_v18 = vcombine.low %v430_v57, %v434_v37  ;;  %v481_v57 = vld [vmem:[%s22791_s1 + $0xd70] sm:$0xff]  ;;  %v478_v37 = vld [vmem:[%s22791_s1 + $0xd58] sm:$0xff] }
 0x3aa   :  { %10478 = vmatpush1.bf16.msra.mxu0 %v14402_v25  ;;  %10970 = vmatpush1.bf16.msra.mxu1 %v14404_v42  ;;  %v441_v25 = vld [vmem:[%s22791_s1 + $0xc30] sm:$0xff]  ;;  %v438_v42 = vld [vmem:[%s22791_s1 + $0xc18] sm:$0xff] }
 0x3ab   :  { %10479 = vmatprep.subr.bf16.mxu0 %v14411_v44  ;;  %10971 = vmatprep.subr.bf16.mxu1 %v14413_v47  ;;  %v442_v44 = vld [vmem:[%s22791_s1 + $0xc38] sm:$0xff]  ;;  %v14450_v47 = vcombine.low %v429_v34, %v433_v35  ;;  %v14459_v52 = vcombine.high %v437_v41, %v441_v25  ;;  %v477_v35 = vld [vmem:[%s22791_s1 + $0xd50] sm:$0xff] }
 0x3ac   :  { %v14461_v56 = vcombine.high %v438_v42, %v442_v44  ;;  %v14460_v5 = vcombine.low %v438_v42, %v442_v44  ;;  %v489_v42 = vld [vmem:[%s22791_s1 + $0xdb0] sm:$0xff]  ;;  %v486_v44 = vld [vmem:[%s22791_s1 + $0xd98] sm:$0xff] }
 0x3ae   :  { %10480 = vmatpush1.bf16.msra.mxu0 %v14410_v48  ;;  %10972 = vmatpush1.bf16.msra.mxu1 %v14412_v61  ;;  %v449_v48 = vld [vmem:[%s22791_s1 + $0xc70] sm:$0xff]  ;;  %v446_v61 = vld [vmem:[%s22791_s1 + $0xc58] sm:$0xff] }
 0x3af   :  { %10481 = vmatprep.subr.bf16.mxu0 %v14419_v39  ;;  %10973 = vmatprep.subr.bf16.mxu1 %v14421_v0  ;;  %v450_v39 = vld [vmem:[%s22791_s1 + $0xc78] sm:$0xff]  ;;  %v14458_v0 = vcombine.low %v437_v41, %v441_v25  ;;  %v14467_v23 = vcombine.high %v445_v3, %v449_v48  ;;  %v485_v25 = vld [vmem:[%s22791_s1 + $0xd90] sm:$0xff] }
 0x3b0   :  { %v14469_v6 = vcombine.high %v446_v61, %v450_v39  ;;  %v14468_v13 = vcombine.low %v446_v61, %v450_v39  ;;  %v493_v61 = vld [vmem:[%s22791_s1 + $0xdd0] sm:$0xff] }
 0x3b1   :  { %v497_v39 = vld [vmem:[%s22791_s1 + $0xdf0] sm:$0xff] }
 0x3b2   :  { %10482 = vmatpush1.bf16.msra.mxu0 %v14418_v8  ;;  %10974 = vmatpush1.bf16.msra.mxu1 %v14420_v10  ;;  %v457_v8 = vld [vmem:[%s22791_s1 + $0xcb0] sm:$0xff]  ;;  %v454_v10 = vld [vmem:[%s22791_s1 + $0xc98] sm:$0xff] }
 0x3b3   :  { %10483 = vmatprep.subr.bf16.mxu0 %v14427_v54  ;;  %10975 = vmatprep.subr.bf16.mxu1 %v14429_v11  ;;  %v458_v54 = vld [vmem:[%s22791_s1 + $0xcb8] sm:$0xff]  ;;  %v14466_v11 = vcombine.low %v445_v3, %v449_v48  ;;  %v14475_v14 = vcombine.high %v453_v7, %v457_v8 }
 0x3b4   :  { %v14477_v17 = vcombine.high %v454_v10, %v458_v54 }
 0x3b6   :  { %10484 = vmatpush1.bf16.msra.mxu0 %v14426_v20  ;;  %10976 = vmatpush1.bf16.msra.mxu1 %v14428_v59  ;;  %v465_v20 = vld [vmem:[%s22791_s1 + $0xcf0] sm:$0xff]  ;;  %v466_v59 = vld [vmem:[%s22791_s1 + $0xcf8] sm:$0xff] }
 0x3b7   :  { %10485 = vmatprep.subr.bf16.mxu0 %v14435_v24  ;;  %10977 = vmatprep.subr.bf16.mxu1 %v14437_v26  ;;  %v14474_v24 = vcombine.low %v453_v7, %v457_v8  ;;  %v14476_v26 = vcombine.low %v454_v10, %v458_v54  ;;  %v14483_v49 = vcombine.high %v461_v53, %v465_v20 }
 0x3b8   :  { %v14506_v10 = vcombine.low %v485_v25, %v489_v42 }
 0x3ba   :  { %10486 = vmatpush1.bf16.msra.mxu0 %v14434_v22  ;;  %10978 = vmatpush1.bf16.msra.mxu1 %v14436_v32  ;;  %v474_v22 = vld [vmem:[%s22791_s1 + $0xd38] sm:$0xff]  ;;  %v14482_v32 = vcombine.low %v461_v53, %v465_v20  ;;  %v501_v20 = vld [vmem:[%s22791_s1 + $0xe10] sm:$0xff] }
 0x3bb   :  { %10487 = vmatprep.subr.bf16.mxu0 %v14443_v12  ;;  %10979 = vmatprep.subr.bf16.mxu1 %v14445_v33  ;;  %v14491_v33 = vcombine.high %v469_v28, %v473_v29 }
 0x3be   :  { %10488 = vmatpush1.bf16.msra.mxu0 %v14442_v31  ;;  %10980 = vmatpush1.bf16.msra.mxu1 %v14444_v38  ;;  %v482_v31 = vld [vmem:[%s22791_s1 + $0xd78] sm:$0xff]  ;;  %v14490_v38 = vcombine.low %v469_v28, %v473_v29  ;;  %v509_v29 = vld [vmem:[%s22791_s1 + $0xe50] sm:$0xff] }
 0x3bf   :  { %10489 = vmatprep.subr.bf16.mxu0 %v14451_v40  ;;  %10981 = vmatprep.subr.bf16.mxu1 %v14453_v21  ;;  %v14499_v21 = vcombine.high %v477_v35, %v481_v57  ;;  %v14501_v41 = vcombine.high %v478_v37, %v482_v31 }
 0x3c2   :  { %10490 = vmatpush1.bf16.msra.mxu0 %v14450_v47  ;;  %10982 = vmatpush1.bf16.msra.mxu1 %v14452_v18  ;;  %v490_v47 = vld [vmem:[%s22791_s1 + $0xdb8] sm:$0xff]  ;;  %v14498_v18 = vcombine.low %v477_v35, %v481_v57  ;;  %v517_v57 = vld [vmem:[%s22791_s1 + $0xe90] sm:$0xff] }
 0x3c3   :  { %10500 = vmatprep.subr.bf16.mxu0 %v14459_v52  ;;  %10992 = vmatprep.subr.bf16.mxu1 %v14461_v56  ;;  %v14500_v52 = vcombine.low %v478_v37, %v482_v31  ;;  %v14507_v56 = vcombine.high %v485_v25, %v489_v42  ;;  %v14509_v48 = vcombine.high %v486_v44, %v490_v47  ;;  %v521_v37 = vld [vmem:[%s22791_s1 + $0xeb0] sm:$0xff]  ;;  %v518_v31 = vld [vmem:[%s22791_s1 + $0xe98] sm:$0xff] }
 0x3c4   :  { %v525_v42 = vld [vmem:[%s22791_s1 + $0xed0] sm:$0xff] }
 0x3c5   :  { %10492 = vmatmul.mubr.bf16.vlgmr.msra.gmra.mrb[4].mxu0 %v17455_v36  ;;  %10984 = vmatmul.mubr.bf16.vlgmr.msra.gmra.mrb[4].mxu1 %v17455_v36  ;;  %v462_v36 = vld [vmem:[%s22791_s1 + $0xcd8] sm:$0xff] }
 0x3c6   :  { %10501 = vmatpush1.bf16.msra.mxu0 %v14458_v0  ;;  %10993 = vmatpush1.bf16.msra.mxu1 %v14460_v5  ;;  %v14485_v15 = vcombine.high %v462_v36, %v466_v59  ;;  %v14484_v12 = vcombine.low %v462_v36, %v466_v59  ;;  %v505_v36 = vld [vmem:[%s22791_s1 + $0xe30] sm:$0xff]  ;;  %v502_v59 = vld [vmem:[%s22791_s1 + $0xe18] sm:$0xff] }
 0x3c7   :  { %10502 = vmatprep.subr.bf16.mxu0 %v14467_v23  ;;  %10994 = vmatprep.subr.bf16.mxu1 %v14469_v6  ;;  %v494_v23 = vld [vmem:[%s22791_s1 + $0xdd8] sm:$0xff] }
 0x3c8   :  { %10532 = vmatprep.mubr.bf16.mxu0 %v17476_v45  ;;  %11024 = vmatprep.mubr.bf16.mxu1 %v17476_v45  ;;  %v470_v45 = vld [vmem:[%s22791_s1 + $0xd18] sm:$0xff] }
 0x3c9   :  { %v14493_v34 = vcombine.high %v470_v45, %v474_v22  ;;  %v14492_v40 = vcombine.low %v470_v45, %v474_v22  ;;  %v498_v6 = vld [vmem:[%s22791_s1 + $0xdf8] sm:$0xff]  ;;  %v513_v45 = vld [vmem:[%s22791_s1 + $0xe70] sm:$0xff] }
 0x3ca   :  { %10503 = vmatpush1.bf16.msra.mxu0 %v14466_v11  ;;  %10995 = vmatpush1.bf16.msra.mxu1 %v14468_v13  ;;  %v14508_v13 = vcombine.low %v486_v44, %v490_v47  ;;  %v14517_v53 = vcombine.high %v494_v23, %v498_v6  ;;  %v510_v22 = vld [vmem:[%s22791_s1 + $0xe58] sm:$0xff]  ;;  %v529_v44 = vld [vmem:[%s22791_s1 + $0xef0] sm:$0xff] }
 0x3cb   :  { %10504 = vmatprep.subr.bf16.mxu0 %v14475_v14  ;;  %10996 = vmatprep.subr.bf16.mxu1 %v14477_v17  ;;  %v14515_v14 = vcombine.high %v493_v61, %v497_v39  ;;  %v526_v47 = vld [vmem:[%s22791_s1 + $0xed8] sm:$0xff] }
 0x3ce   :  { %10505 = vmatpush1.bf16.msra.mxu0 %v14474_v24  ;;  %10997 = vmatpush1.bf16.msra.mxu1 %v14476_v26  ;;  %v506_v24 = vld [vmem:[%s22791_s1 + $0xe38] sm:$0xff]  ;;  %v14514_v26 = vcombine.low %v493_v61, %v497_v39  ;;  %v533_v39 = vld [vmem:[%s22791_s1 + $0xf10] sm:$0xff] }
 0x3cf   :  { %10506 = vmatprep.subr.bf16.mxu0 %v14483_v49  ;;  %10998 = vmatprep.subr.bf16.mxu1 %v14485_v15  ;;  %v14516_v49 = vcombine.low %v494_v23, %v498_v6  ;;  %v14523_v15 = vcombine.high %v501_v20, %v505_v36  ;;  %v14525_v28 = vcombine.high %v502_v59, %v506_v24  ;;  %v537_v23 = vld [vmem:[%s22791_s1 + $0xf30] sm:$0xff]  ;;  %v534_v6 = vld [vmem:[%s22791_s1 + $0xf18] sm:$0xff] }
 0x3d2   :  { %10507 = vmatpush1.bf16.msra.mxu0 %v14482_v32  ;;  %10999 = vmatpush1.bf16.msra.mxu1 %v14484_v12  ;;  %v514_v32 = vld [vmem:[%s22791_s1 + $0xe78] sm:$0xff]  ;;  %v14522_v12 = vcombine.low %v501_v20, %v505_v36  ;;  %v14554_v36 = vcombine.low %v533_v39, %v537_v23 }
 0x3d3   :  { %10508 = vmatprep.subr.bf16.mxu0 %v14491_v33  ;;  %11000 = vmatprep.subr.bf16.mxu1 %v14493_v34  ;;  %v14524_v33 = vcombine.low %v502_v59, %v506_v24  ;;  %v14531_v34 = vcombine.high %v509_v29, %v513_v45  ;;  %v14533_v35 = vcombine.high %v510_v22, %v514_v32  ;;  %v546_v20 = vld [vmem:[%s22791_s1 + $0xf78] sm:$0xff] }
 0x3d6   :  { %10509 = vmatpush1.bf16.msra.mxu0 %v14490_v38  ;;  %11001 = vmatpush1.bf16.msra.mxu1 %v14492_v40  ;;  %v522_v38 = vld [vmem:[%s22791_s1 + $0xeb8] sm:$0xff]  ;;  %v14530_v40 = vcombine.low %v509_v29, %v513_v45 }
 0x3d7   :  { %10510 = vmatprep.subr.bf16.mxu0 %v14499_v21  ;;  %11002 = vmatprep.subr.bf16.mxu1 %v14501_v41  ;;  %v14532_v21 = vcombine.low %v510_v22, %v514_v32  ;;  %v14539_v41 = vcombine.high %v517_v57, %v521_v37  ;;  %v14541_v25 = vcombine.high %v518_v31, %v522_v38  ;;  %v554_v29 = vld [vmem:[%s22791_s1 + $0xfb8] sm:$0xff] }
 0x3d8   :  { %v19996_v3 = vpop.f32.mrb[0].mxu0  ;;  %v20004_v0 = vpop.f32.mrb[0].mxu1 }
 0x3d9   :  { %v20006_v5 = vpop.f32.mrb[1].mxu0  ;;  %v20014_v7 = vpop.f32.mrb[1].mxu1 }
 0x3da   :  { %v9882_v8 = vpop.f32.mrb[2].mxu0  ;;  %10511 = vmatpush1.bf16.msra.mxu0 %v14498_v18  ;;  %v10374_v54 = vpop.f32.mrb[2].mxu1  ;;  %11003 = vmatpush1.bf16.msra.mxu1 %v14500_v52  ;;  %v530_v18 = vld [vmem:[%s22791_s1 + $0xef8] sm:$0xff]  ;;  %v14538_v52 = vcombine.low %v517_v57, %v521_v37 }
 0x3db   :  { %v9883_v11 = vpop.f32.mrb[3].mxu0  ;;  %10512 = vmatprep.subr.bf16.mxu0 %v14507_v56  ;;  %v10375_v17 = vpop.f32.mrb[3].mxu1  ;;  %11004 = vmatprep.subr.bf16.mxu1 %v14509_v48  ;;  %v14540_v56 = vcombine.low %v518_v31, %v522_v38  ;;  %v14547_v48 = vcombine.high %v525_v42, %v529_v44  ;;  %v14549_v61 = vcombine.high %v526_v47, %v530_v18  ;;  %v538_v8 = vld [vmem:[%s22791_s1 + $0xf38] sm:$0xff] }
 0x3dc   :  { %v14548_v54 = vcombine.low %v526_v47, %v530_v18  ;;  %v14555_v11 = vcombine.high %v533_v39, %v537_v23  ;;  %v545_v17 = vld [vmem:[%s22791_s1 + $0xf70] sm:$0xff]  ;;  %v14556_v59 = vcombine.low %v534_v6, %v538_v8  ;;  %v562_v57 = vld [vmem:[%s22791_s1 + $0xff8] sm:$0xff] }
 0x3dd   :  { %v578_v39 = vld [vmem:[%s22791_s1 + $0x1078] sm:$0xff] }
 0x3de   :  { %10513 = vmatpush1.bf16.msra.mxu0 %v14506_v10  ;;  %11005 = vmatpush1.bf16.msra.mxu1 %v14508_v13  ;;  %v14546_v10 = vcombine.low %v525_v42, %v529_v44  ;;  %v14557_v13 = vcombine.high %v534_v6, %v538_v8  ;;  %v570_v42 = vld [vmem:[%s22791_s1 + $0x1038] sm:$0xff] }
 0x3df   :  { %10514 = vmatprep.subr.bf16.mxu0 %v14515_v14  ;;  %11006 = vmatprep.subr.bf16.mxu1 %v14517_v53  ;;  %v541_v14 = vld [vmem:[%s22791_s1 + $0xf50] sm:$0xff]  ;;  %v542_v53 = vld [vmem:[%s22791_s1 + $0xf58] sm:$0xff] }
 0x3e0   :  { %v14563_v24 = vcombine.high %v541_v14, %v545_v17  ;;  %v14562_v45 = vcombine.low %v541_v14, %v545_v17  ;;  %v14564_v22 = vcombine.low %v542_v53, %v546_v20  ;;  %v586_v14 = vld [vmem:[%s22791_s1 + $0x10b8] sm:$0xff] }
 0x3e2   :  { %10515 = vmatpush1.bf16.msra.mxu0 %v14514_v26  ;;  %11007 = vmatpush1.bf16.msra.mxu1 %v14516_v49  ;;  %v14565_v26 = vcombine.high %v542_v53, %v546_v20  ;;  %v549_v49 = vld [vmem:[%s22791_s1 + $0xf90] sm:$0xff] }
 0x3e3   :  { %10516 = vmatprep.subr.bf16.mxu0 %v14523_v15  ;;  %11008 = vmatprep.subr.bf16.mxu1 %v14525_v28  ;;  %v553_v15 = vld [vmem:[%s22791_s1 + $0xfb0] sm:$0xff]  ;;  %v550_v28 = vld [vmem:[%s22791_s1 + $0xf98] sm:$0xff] }
 0x3e4   :  { %v14571_v32 = vcombine.high %v549_v49, %v553_v15  ;;  %v14570_v37 = vcombine.low %v549_v49, %v553_v15  ;;  %v14572_v31 = vcombine.low %v550_v28, %v554_v29 }
 0x3e6   :  { %10517 = vmatpush1.bf16.msra.mxu0 %v14522_v12  ;;  %11009 = vmatpush1.bf16.msra.mxu1 %v14524_v33  ;;  %v14573_v12 = vcombine.high %v550_v28, %v554_v29  ;;  %v557_v33 = vld [vmem:[%s22791_s1 + $0xfd0] sm:$0xff] }
 0x3e7   :  { %10518 = vmatprep.subr.bf16.mxu0 %v14531_v34  ;;  %11010 = vmatprep.subr.bf16.mxu1 %v14533_v35  ;;  %v561_v34 = vld [vmem:[%s22791_s1 + $0xff0] sm:$0xff]  ;;  %v558_v35 = vld [vmem:[%s22791_s1 + $0xfd8] sm:$0xff] }
 0x3e8   :  { %v14579_v38 = vcombine.high %v557_v33, %v561_v34  ;;  %v14578_v44 = vcombine.low %v557_v33, %v561_v34  ;;  %v14580_v47 = vcombine.low %v558_v35, %v562_v57 }
 0x3ea   :  { %10519 = vmatpush1.bf16.msra.mxu0 %v14530_v40  ;;  %11011 = vmatpush1.bf16.msra.mxu1 %v14532_v21  ;;  %v14581_v40 = vcombine.high %v558_v35, %v562_v57  ;;  %v565_v21 = vld [vmem:[%s22791_s1 + $0x1010] sm:$0xff] }
 0x3eb   :  { %10520 = vmatprep.subr.bf16.mxu0 %v14539_v41  ;;  %11012 = vmatprep.subr.bf16.mxu1 %v14541_v25  ;;  %v569_v41 = vld [vmem:[%s22791_s1 + $0x1030] sm:$0xff]  ;;  %v566_v25 = vld [vmem:[%s22791_s1 + $0x1018] sm:$0xff] }
 0x3ec   :  { %v14587_v18 = vcombine.high %v565_v21, %v569_v41  ;;  %v14586_v23 = vcombine.low %v565_v21, %v569_v41  ;;  %v14588_v6 = vcombine.low %v566_v25, %v570_v42  ;;  %v605_v57 = vld [vmem:[%s22791_s1 + $0x1150] sm:$0xff] }
 0x3ee   :  { %10521 = vmatpush1.bf16.msra.mxu0 %v14538_v52  ;;  %11013 = vmatpush1.bf16.msra.mxu1 %v14540_v56  ;;  %v14589_v52 = vcombine.high %v566_v25, %v570_v42  ;;  %v573_v56 = vld [vmem:[%s22791_s1 + $0x1050] sm:$0xff] }
 0x3ef   :  { %10522 = vmatprep.subr.bf16.mxu0 %v14547_v48  ;;  %11014 = vmatprep.subr.bf16.mxu1 %v14549_v61  ;;  %v577_v48 = vld [vmem:[%s22791_s1 + $0x1070] sm:$0xff]  ;;  %v574_v61 = vld [vmem:[%s22791_s1 + $0x1058] sm:$0xff] }
 0x3f0   :  { %v14595_v8 = vcombine.high %v573_v56, %v577_v48  ;;  %v14594_v17 = vcombine.low %v573_v56, %v577_v48  ;;  %v14596_v53 = vcombine.low %v574_v61, %v578_v39  ;;  %v613_v42 = vld [vmem:[%s22791_s1 + $0x1190] sm:$0xff] }
 0x3f2   :  { %10523 = vmatpush1.bf16.msra.mxu0 %v14546_v10  ;;  %11015 = vmatpush1.bf16.msra.mxu1 %v14548_v54  ;;  %v14597_v10 = vcombine.high %v574_v61, %v578_v39  ;;  %v581_v54 = vld [vmem:[%s22791_s1 + $0x1090] sm:$0xff] }
 0x3f3   :  { %10524 = vmatprep.subr.bf16.mxu0 %v14555_v11  ;;  %11016 = vmatprep.subr.bf16.mxu1 %v14557_v13  ;;  %v585_v11 = vld [vmem:[%s22791_s1 + $0x10b0] sm:$0xff]  ;;  %v582_v13 = vld [vmem:[%s22791_s1 + $0x1098] sm:$0xff] }
 0x3f4   :  { %v14603_v20 = vcombine.high %v581_v54, %v585_v11  ;;  %v14602_v49 = vcombine.low %v581_v54, %v585_v11  ;;  %v14604_v15 = vcombine.low %v582_v13, %v586_v14  ;;  %v621_v39 = vld [vmem:[%s22791_s1 + $0x11d0] sm:$0xff] }
 0x3f6   :  { %10525 = vmatpush1.bf16.msra.mxu0 %v14554_v36  ;;  %11017 = vmatpush1.bf16.msra.mxu1 %v14556_v59  ;;  %v14605_v36 = vcombine.high %v582_v13, %v586_v14  ;;  %v589_v59 = vld [vmem:[%s22791_s1 + $0x10d0] sm:$0xff] }
 0x3f7   :  { %10526 = vmatprep.subr.bf16.mxu0 %v14563_v24  ;;  %11018 = vmatprep.subr.bf16.mxu1 %v14565_v26  ;;  %v593_v24 = vld [vmem:[%s22791_s1 + $0x10f0] sm:$0xff]  ;;  %v594_v26 = vld [vmem:[%s22791_s1 + $0x10f8] sm:$0xff] }
 0x3f8   :  { %v14611_v28 = vcombine.high %v589_v59, %v593_v24  ;;  %v629_v14 = vld [vmem:[%s22791_s1 + $0x1210] sm:$0xff] }
 0x3fa   :  { %10527 = vmatpush1.bf16.msra.mxu0 %v14562_v45  ;;  %11019 = vmatpush1.bf16.msra.mxu1 %v14564_v22  ;;  %v597_v45 = vld [vmem:[%s22791_s1 + $0x1110] sm:$0xff] }
 0x3fb   :  { %10528 = vmatprep.subr.bf16.mxu0 %v14571_v32  ;;  %11020 = vmatprep.subr.bf16.mxu1 %v14573_v12  ;;  %v601_v22 = vld [vmem:[%s22791_s1 + $0x1130] sm:$0xff]  ;;  %v602_v32 = vld [vmem:[%s22791_s1 + $0x1138] sm:$0xff]  ;;  %v14610_v12 = vcombine.low %v589_v59, %v593_v24 }
 0x3fc   :  { %v14619_v34 = vcombine.high %v597_v45, %v601_v22 }
 0x3fe   :  { %10529 = vmatpush1.bf16.msra.mxu0 %v14570_v37  ;;  %11021 = vmatpush1.bf16.msra.mxu1 %v14572_v31  ;;  %v609_v37 = vld [vmem:[%s22791_s1 + $0x1170] sm:$0xff]  ;;  %v606_v31 = vld [vmem:[%s22791_s1 + $0x1158] sm:$0xff] }
 0x3ff   :  { %10530 = vmatprep.subr.bf16.mxu0 %v14579_v38  ;;  %11022 = vmatprep.subr.bf16.mxu1 %v14581_v40  ;;  %v610_v38 = vld [vmem:[%s22791_s1 + $0x1178] sm:$0xff]  ;;  %v14618_v40 = vcombine.low %v597_v45, %v601_v22  ;;  %v14627_v41 = vcombine.high %v605_v57, %v609_v37 }
 0x400   :  { %v14629_v25 = vcombine.high %v606_v31, %v610_v38  ;;  %v14628_v56 = vcombine.low %v606_v31, %v610_v38  ;;  %v653_v38 = vld [vmem:[%s22791_s1 + $0x12d0] sm:$0xff] }
 0x402   :  { %10531 = vmatpush1.bf16.msra.mxu0 %v14578_v44  ;;  %11023 = vmatpush1.bf16.msra.mxu1 %v14580_v47  ;;  %v617_v44 = vld [vmem:[%s22791_s1 + $0x11b0] sm:$0xff]  ;;  %v614_v47 = vld [vmem:[%s22791_s1 + $0x1198] sm:$0xff] }
 0x403   :  { %10541 = vmatprep.subr.bf16.mxu0 %v14587_v18  ;;  %11033 = vmatprep.subr.bf16.mxu1 %v14589_v52  ;;  %v618_v18 = vld [vmem:[%s22791_s1 + $0x11b8] sm:$0xff]  ;;  %v14626_v52 = vcombine.low %v605_v57, %v609_v37  ;;  %v14635_v48 = vcombine.high %v613_v42, %v617_v44 }
 0x404   :  { %v14637_v61 = vcombine.high %v614_v47, %v618_v18  ;;  %v14636_v54 = vcombine.low %v614_v47, %v618_v18  ;;  %v661_v18 = vld [vmem:[%s22791_s1 + $0x1310] sm:$0xff] }
 0x405   :  { %10533 = vmatmul.mubr.bf16.vlgmr.msra.gmra.mrb[4].mxu0 %v17664_v55  ;;  %11025 = vmatmul.mubr.bf16.vlgmr.msra.gmra.mrb[4].mxu1 %v17664_v55  ;;  %v590_v55 = vld [vmem:[%s22791_s1 + $0x10d8] sm:$0xff] }
 0x406   :  { %10542 = vmatpush1.bf16.msra.mxu0 %v14586_v23  ;;  %11034 = vmatpush1.bf16.msra.mxu1 %v14588_v6  ;;  %v14613_v29 = vcombine.high %v590_v55, %v594_v26  ;;  %v14612_v33 = vcombine.low %v590_v55, %v594_v26  ;;  %v625_v23 = vld [vmem:[%s22791_s1 + $0x11f0] sm:$0xff]  ;;  %v622_v6 = vld [vmem:[%s22791_s1 + $0x11d8] sm:$0xff] }
 0x407   :  { %10543 = vmatprep.subr.bf16.mxu0 %v14595_v8  ;;  %11035 = vmatprep.subr.bf16.mxu1 %v14597_v10  ;;  %v626_v8 = vld [vmem:[%s22791_s1 + $0x11f8] sm:$0xff]  ;;  %v14634_v10 = vcombine.low %v613_v42, %v617_v44  ;;  %v14643_v11 = vcombine.high %v621_v39, %v625_v23  ;;  %v637_v26 = vld [vmem:[%s22791_s1 + $0x1250] sm:$0xff] }
 0x408   :  { %10573 = vmatprep.mubr.bf16.mxu0 %v17685_v1  ;;  %11065 = vmatprep.mubr.bf16.mxu1 %v17685_v1  ;;  %v598_v1 = vld [vmem:[%s22791_s1 + $0x1118] sm:$0xff]  ;;  %v14645_v13 = vcombine.high %v622_v6, %v626_v8  ;;  %v14644_v59 = vcombine.low %v622_v6, %v626_v8  ;;  %v669_v8 = vld [vmem:[%s22791_s1 + $0x1350] sm:$0xff] }
 0x409   :  { %v14621_v35 = vcombine.high %v598_v1, %v602_v32  ;;  %v14620_v21 = vcombine.low %v598_v1, %v602_v32  ;;  %v645_v32 = vld [vmem:[%s22791_s1 + $0x1290] sm:$0xff] }
 0x40a   :  { %10544 = vmatpush1.bf16.msra.mxu0 %v14594_v17  ;;  %11036 = vmatpush1.bf16.msra.mxu1 %v14596_v53  ;;  %v633_v17 = vld [vmem:[%s22791_s1 + $0x1230] sm:$0xff]  ;;  %v630_v53 = vld [vmem:[%s22791_s1 + $0x1218] sm:$0xff] }
 0x40b   :  { %10545 = vmatprep.subr.bf16.mxu0 %v14603_v20  ;;  %11037 = vmatprep.subr.bf16.mxu1 %v14605_v36  ;;  %v634_v20 = vld [vmem:[%s22791_s1 + $0x1238] sm:$0xff]  ;;  %v14642_v36 = vcombine.low %v621_v39, %v625_v23  ;;  %v14651_v24 = vcombine.high %v629_v14, %v633_v17 }
 0x40c   :  { %v14653_v55 = vcombine.high %v630_v53, %v634_v20  ;;  %v14652_v45 = vcombine.low %v630_v53, %v634_v20  ;;  %v677_v20 = vld [vmem:[%s22791_s1 + $0x1390] sm:$0xff] }
 0x40e   :  { %10546 = vmatpush1.bf16.msra.mxu0 %v14602_v49  ;;  %11038 = vmatpush1.bf16.msra.mxu1 %v14604_v15  ;;  %v641_v49 = vld [vmem:[%s22791_s1 + $0x1270] sm:$0xff]  ;;  %v638_v15 = vld [vmem:[%s22791_s1 + $0x1258] sm:$0xff] }
 0x40f   :  { %10547 = vmatprep.subr.bf16.mxu0 %v14611_v28  ;;  %11039 = vmatprep.subr.bf16.mxu1 %v14613_v29  ;;  %v642_v28 = vld [vmem:[%s22791_s1 + $0x1278] sm:$0xff]  ;;  %v14650_v29 = vcombine.low %v629_v14, %v633_v17  ;;  %v14659_v22 = vcombine.high %v637_v26, %v641_v49 }
 0x410   :  { %v14661_v1 = vcombine.high %v638_v15, %v642_v28  ;;  %v14660_v57 = vcombine.low %v638_v15, %v642_v28  ;;  %v685_v28 = vld [vmem:[%s22791_s1 + $0x13d0] sm:$0xff] }
 0x412   :  { %10548 = vmatpush1.bf16.msra.mxu0 %v14610_v12  ;;  %11040 = vmatpush1.bf16.msra.mxu1 %v14612_v33  ;;  %v649_v12 = vld [vmem:[%s22791_s1 + $0x12b0] sm:$0xff]  ;;  %v646_v33 = vld [vmem:[%s22791_s1 + $0x1298] sm:$0xff] }
 0x413   :  { %10549 = vmatprep.subr.bf16.mxu0 %v14619_v34  ;;  %11041 = vmatprep.subr.bf16.mxu1 %v14621_v35  ;;  %v650_v34 = vld [vmem:[%s22791_s1 + $0x12b8] sm:$0xff]  ;;  %v14658_v35 = vcombine.low %v637_v26, %v641_v49  ;;  %v14667_v37 = vcombine.high %v645_v32, %v649_v12 }
 0x414   :  { %v14669_v31 = vcombine.high %v646_v33, %v650_v34  ;;  %v14668_v42 = vcombine.low %v646_v33, %v650_v34  ;;  %v693_v34 = vld [vmem:[%s22791_s1 + $0x1410] sm:$0xff] }
 0x416   :  { %10550 = vmatpush1.bf16.msra.mxu0 %v14618_v40  ;;  %11042 = vmatpush1.bf16.msra.mxu1 %v14620_v21  ;;  %v657_v40 = vld [vmem:[%s22791_s1 + $0x12f0] sm:$0xff]  ;;  %v654_v21 = vld [vmem:[%s22791_s1 + $0x12d8] sm:$0xff] }
 0x417   :  { %10551 = vmatprep.subr.bf16.mxu0 %v14627_v41  ;;  %11043 = vmatprep.subr.bf16.mxu1 %v14629_v25  ;;  %v658_v41 = vld [vmem:[%s22791_s1 + $0x12f8] sm:$0xff]  ;;  %v14666_v25 = vcombine.low %v645_v32, %v649_v12  ;;  %v14675_v44 = vcombine.high %v653_v38, %v657_v40 }
 0x418   :  { %v14677_v47 = vcombine.high %v654_v21, %v658_v41  ;;  %v14676_v39 = vcombine.low %v654_v21, %v658_v41  ;;  %v701_v41 = vld [vmem:[%s22791_s1 + $0x1450] sm:$0xff] }
 0x41a   :  { %10552 = vmatpush1.bf16.msra.mxu0 %v14626_v52  ;;  %11044 = vmatpush1.bf16.msra.mxu1 %v14628_v56  ;;  %v665_v52 = vld [vmem:[%s22791_s1 + $0x1330] sm:$0xff]  ;;  %v662_v56 = vld [vmem:[%s22791_s1 + $0x1318] sm:$0xff] }
 0x41b   :  { %10553 = vmatprep.subr.bf16.mxu0 %v14635_v48  ;;  %11045 = vmatprep.subr.bf16.mxu1 %v14637_v61  ;;  %v666_v48 = vld [vmem:[%s22791_s1 + $0x1338] sm:$0xff]  ;;  %v14674_v61 = vcombine.low %v653_v38, %v657_v40  ;;  %v14683_v23 = vcombine.high %v661_v18, %v665_v52 }
 0x41c   :  { %v14685_v6 = vcombine.high %v662_v56, %v666_v48  ;;  %v14684_v14 = vcombine.low %v662_v56, %v666_v48  ;;  %v709_v48 = vld [vmem:[%s22791_s1 + $0x1490] sm:$0xff] }
 0x41e   :  { %10554 = vmatpush1.bf16.msra.mxu0 %v14634_v10  ;;  %11046 = vmatpush1.bf16.msra.mxu1 %v14636_v54  ;;  %v673_v10 = vld [vmem:[%s22791_s1 + $0x1370] sm:$0xff]  ;;  %v670_v54 = vld [vmem:[%s22791_s1 + $0x1358] sm:$0xff] }
 0x41f   :  { %10555 = vmatprep.subr.bf16.mxu0 %v14643_v11  ;;  %11047 = vmatprep.subr.bf16.mxu1 %v14645_v13  ;;  %v674_v11 = vld [vmem:[%s22791_s1 + $0x1378] sm:$0xff]  ;;  %v14682_v13 = vcombine.low %v661_v18, %v665_v52  ;;  %v14691_v17 = vcombine.high %v669_v8, %v673_v10 }
 0x420   :  { %v14693_v53 = vcombine.high %v670_v54, %v674_v11  ;;  %v14692_v26 = vcombine.low %v670_v54, %v674_v11  ;;  %v717_v11 = vld [vmem:[%s22791_s1 + $0x14d0] sm:$0xff] }
 0x422   :  { %10556 = vmatpush1.bf16.msra.mxu0 %v14642_v36  ;;  %11048 = vmatpush1.bf16.msra.mxu1 %v14644_v59  ;;  %v681_v36 = vld [vmem:[%s22791_s1 + $0x13b0] sm:$0xff]  ;;  %v678_v59 = vld [vmem:[%s22791_s1 + $0x1398] sm:$0xff] }
 0x423   :  { %10557 = vmatprep.subr.bf16.mxu0 %v14651_v24  ;;  %11049 = vmatprep.subr.bf16.mxu1 %v14653_v55  ;;  %v682_v24 = vld [vmem:[%s22791_s1 + $0x13b8] sm:$0xff]  ;;  %v14690_v55 = vcombine.low %v669_v8, %v673_v10  ;;  %v14699_v49 = vcombine.high %v677_v20, %v681_v36 }
 0x424   :  { %v14701_v15 = vcombine.high %v678_v59, %v682_v24  ;;  %v14700_v32 = vcombine.low %v678_v59, %v682_v24  ;;  %v725_v59 = vld [vmem:[%s22791_s1 + $0x1510] sm:$0xff] }
 0x425   :  { %v729_v24 = vld [vmem:[%s22791_s1 + $0x1530] sm:$0xff] }
 0x426   :  { %10558 = vmatpush1.bf16.msra.mxu0 %v14650_v29  ;;  %11050 = vmatpush1.bf16.msra.mxu1 %v14652_v45  ;;  %v689_v29 = vld [vmem:[%s22791_s1 + $0x13f0] sm:$0xff]  ;;  %v686_v45 = vld [vmem:[%s22791_s1 + $0x13d8] sm:$0xff] }
 0x427   :  { %10559 = vmatprep.subr.bf16.mxu0 %v14659_v22  ;;  %11051 = vmatprep.subr.bf16.mxu1 %v14661_v1  ;;  %v690_v22 = vld [vmem:[%s22791_s1 + $0x13f8] sm:$0xff]  ;;  %v14698_v1 = vcombine.low %v677_v20, %v681_v36  ;;  %v14707_v12 = vcombine.high %v685_v28, %v689_v29 }
 0x428   :  { %v14709_v33 = vcombine.high %v686_v45, %v690_v22  ;;  %v14708_v38 = vcombine.low %v686_v45, %v690_v22  ;;  %v737_v45 = vld [vmem:[%s22791_s1 + $0x1570] sm:$0xff]  ;;  %v734_v22 = vld [vmem:[%s22791_s1 + $0x1558] sm:$0xff] }
 0x42a   :  { %10560 = vmatpush1.bf16.msra.mxu0 %v14658_v35  ;;  %11052 = vmatpush1.bf16.msra.mxu1 %v14660_v57  ;;  %v697_v35 = vld [vmem:[%s22791_s1 + $0x1430] sm:$0xff]  ;;  %v694_v57 = vld [vmem:[%s22791_s1 + $0x1418] sm:$0xff] }
 0x42b   :  { %10561 = vmatprep.subr.bf16.mxu0 %v14667_v37  ;;  %11053 = vmatprep.subr.bf16.mxu1 %v14669_v31  ;;  %v698_v37 = vld [vmem:[%s22791_s1 + $0x1438] sm:$0xff]  ;;  %v14706_v31 = vcombine.low %v685_v28, %v689_v29  ;;  %v14715_v40 = vcombine.high %v693_v34, %v697_v35  ;;  %v733_v29 = vld [vmem:[%s22791_s1 + $0x1550] sm:$0xff] }
 0x42c   :  { %v14717_v21 = vcombine.high %v694_v57, %v698_v37  ;;  %v14716_v18 = vcombine.low %v694_v57, %v698_v37  ;;  %v745_v57 = vld [vmem:[%s22791_s1 + $0x15b0] sm:$0xff]  ;;  %v742_v37 = vld [vmem:[%s22791_s1 + $0x1598] sm:$0xff] }
 0x42e   :  { %10562 = vmatpush1.bf16.msra.mxu0 %v14666_v25  ;;  %11054 = vmatpush1.bf16.msra.mxu1 %v14668_v42  ;;  %v705_v25 = vld [vmem:[%s22791_s1 + $0x1470] sm:$0xff]  ;;  %v702_v42 = vld [vmem:[%s22791_s1 + $0x1458] sm:$0xff] }
 0x42f   :  { %10563 = vmatprep.subr.bf16.mxu0 %v14675_v44  ;;  %11055 = vmatprep.subr.bf16.mxu1 %v14677_v47  ;;  %v706_v44 = vld [vmem:[%s22791_s1 + $0x1478] sm:$0xff]  ;;  %v14714_v47 = vcombine.low %v693_v34, %v697_v35  ;;  %v14723_v52 = vcombine.high %v701_v41, %v705_v25  ;;  %v741_v35 = vld [vmem:[%s22791_s1 + $0x1590] sm:$0xff] }
 0x430   :  { %v14725_v56 = vcombine.high %v702_v42, %v706_v44  ;;  %v14724_v8 = vcombine.low %v702_v42, %v706_v44  ;;  %v753_v42 = vld [vmem:[%s22791_s1 + $0x15f0] sm:$0xff]  ;;  %v750_v44 = vld [vmem:[%s22791_s1 + $0x15d8] sm:$0xff] }
 0x432   :  { %10564 = vmatpush1.bf16.msra.mxu0 %v14674_v61  ;;  %11056 = vmatpush1.bf16.msra.mxu1 %v14676_v39  ;;  %v713_v61 = vld [vmem:[%s22791_s1 + $0x14b0] sm:$0xff]  ;;  %v710_v39 = vld [vmem:[%s22791_s1 + $0x1498] sm:$0xff] }
 0x433   :  { %10565 = vmatprep.subr.bf16.mxu0 %v14683_v23  ;;  %11057 = vmatprep.subr.bf16.mxu1 %v14685_v6  ;;  %v714_v23 = vld [vmem:[%s22791_s1 + $0x14b8] sm:$0xff]  ;;  %v14722_v6 = vcombine.low %v701_v41, %v705_v25  ;;  %v14731_v10 = vcombine.high %v709_v48, %v713_v61  ;;  %v749_v25 = vld [vmem:[%s22791_s1 + $0x15d0] sm:$0xff] }
 0x434   :  { %v14733_v54 = vcombine.high %v710_v39, %v714_v23 }
 0x436   :  { %10566 = vmatpush1.bf16.msra.mxu0 %v14682_v13  ;;  %11058 = vmatpush1.bf16.msra.mxu1 %v14684_v14  ;;  %v721_v13 = vld [vmem:[%s22791_s1 + $0x14f0] sm:$0xff]  ;;  %v722_v14 = vld [vmem:[%s22791_s1 + $0x14f8] sm:$0xff] }
 0x437   :  { %10567 = vmatprep.subr.bf16.mxu0 %v14691_v17  ;;  %11059 = vmatprep.subr.bf16.mxu1 %v14693_v53  ;;  %v14730_v17 = vcombine.low %v709_v48, %v713_v61  ;;  %v14732_v53 = vcombine.low %v710_v39, %v714_v23  ;;  %v14739_v20 = vcombine.high %v717_v11, %v721_v13  ;;  %v757_v61 = vld [vmem:[%s22791_s1 + $0x1610] sm:$0xff]  ;;  %v758_v23 = vld [vmem:[%s22791_s1 + $0x1618] sm:$0xff] }
 0x438   :  { %v761_v39 = vld [vmem:[%s22791_s1 + $0x1630] sm:$0xff] }
 0x43a   :  { %10568 = vmatpush1.bf16.msra.mxu0 %v14690_v55  ;;  %11060 = vmatpush1.bf16.msra.mxu1 %v14692_v26  ;;  %v730_v55 = vld [vmem:[%s22791_s1 + $0x1538] sm:$0xff]  ;;  %v14738_v26 = vcombine.low %v717_v11, %v721_v13  ;;  %v765_v13 = vld [vmem:[%s22791_s1 + $0x1650] sm:$0xff] }
 0x43b   :  { %10569 = vmatprep.subr.bf16.mxu0 %v14699_v49  ;;  %11061 = vmatprep.subr.bf16.mxu1 %v14701_v15  ;;  %v14747_v15 = vcombine.high %v725_v59, %v729_v24 }
 0x43e   :  { %10570 = vmatpush1.bf16.msra.mxu0 %v14698_v1  ;;  %11062 = vmatpush1.bf16.msra.mxu1 %v14700_v32  ;;  %v738_v1 = vld [vmem:[%s22791_s1 + $0x1578] sm:$0xff]  ;;  %v14746_v32 = vcombine.low %v725_v59, %v729_v24  ;;  %v773_v24 = vld [vmem:[%s22791_s1 + $0x1690] sm:$0xff] }
 0x43f   :  { %10571 = vmatprep.subr.bf16.mxu0 %v14707_v12  ;;  %11063 = vmatprep.subr.bf16.mxu1 %v14709_v33  ;;  %v14755_v33 = vcombine.high %v733_v29, %v737_v45  ;;  %v14757_v34 = vcombine.high %v734_v22, %v738_v1 }
 0x442   :  { %10572 = vmatpush1.bf16.msra.mxu0 %v14706_v31  ;;  %11064 = vmatpush1.bf16.msra.mxu1 %v14708_v38  ;;  %v746_v31 = vld [vmem:[%s22791_s1 + $0x15b8] sm:$0xff]  ;;  %v14754_v38 = vcombine.low %v733_v29, %v737_v45  ;;  %v781_v45 = vld [vmem:[%s22791_s1 + $0x16d0] sm:$0xff] }
 0x443   :  { %10582 = vmatprep.subr.bf16.mxu0 %v14715_v40  ;;  %11074 = vmatprep.subr.bf16.mxu1 %v14717_v21  ;;  %v14756_v40 = vcombine.low %v734_v22, %v738_v1  ;;  %v14763_v21 = vcombine.high %v741_v35, %v745_v57  ;;  %v14765_v41 = vcombine.high %v742_v37, %v746_v31  ;;  %v785_v22 = vld [vmem:[%s22791_s1 + $0x16f0] sm:$0xff]  ;;  %v782_v1 = vld [vmem:[%s22791_s1 + $0x16d8] sm:$0xff] }
 0x445   :  { %10574 = vmatmul.mubr.bf16.vlgmr.msra.gmra.mrb[4].mxu0 %v17873_v16  ;;  %11066 = vmatmul.mubr.bf16.vlgmr.msra.gmra.mrb[4].mxu1 %v17873_v16  ;;  %v718_v16 = vld [vmem:[%s22791_s1 + $0x14d8] sm:$0xff] }
 0x446   :  { %10583 = vmatpush1.bf16.msra.mxu0 %v14714_v47  ;;  %11075 = vmatpush1.bf16.msra.mxu1 %v14716_v18  ;;  %v14741_v36 = vcombine.high %v718_v16, %v722_v14  ;;  %v14740_v49 = vcombine.low %v718_v16, %v722_v14  ;;  %v754_v47 = vld [vmem:[%s22791_s1 + $0x15f8] sm:$0xff]  ;;  %v14762_v18 = vcombine.low %v741_v35, %v745_v57  ;;  %v769_v16 = vld [vmem:[%s22791_s1 + $0x1670] sm:$0xff] }
 0x447   :  { %10584 = vmatprep.subr.bf16.mxu0 %v14723_v52  ;;  %11076 = vmatprep.subr.bf16.mxu1 %v14725_v56  ;;  %v14764_v52 = vcombine.low %v742_v37, %v746_v31  ;;  %v14771_v56 = vcombine.high %v749_v25, %v753_v42  ;;  %v14773_v48 = vcombine.high %v750_v44, %v754_v47  ;;  %v766_v14 = vld [vmem:[%s22791_s1 + $0x1658] sm:$0xff]  ;;  %v789_v57 = vld [vmem:[%s22791_s1 + $0x1710] sm:$0xff] }
 0x448   :  { %10614 = vmatprep.mubr.bf16.mxu0 %v17894_v27  ;;  %11106 = vmatprep.mubr.bf16.mxu1 %v17894_v27  ;;  %v726_v27 = vld [vmem:[%s22791_s1 + $0x1518] sm:$0xff]  ;;  %v793_v37 = vld [vmem:[%s22791_s1 + $0x1730] sm:$0xff] }
 0x449   :  { %v14749_v28 = vcombine.high %v726_v27, %v730_v55  ;;  %v14748_v12 = vcombine.low %v726_v27, %v730_v55  ;;  %v777_v27 = vld [vmem:[%s22791_s1 + $0x16b0] sm:$0xff]  ;;  %v774_v55 = vld [vmem:[%s22791_s1 + $0x1698] sm:$0xff] }
 0x44a   :  { %10585 = vmatpush1.bf16.msra.mxu0 %v14722_v6  ;;  %11077 = vmatpush1.bf16.msra.mxu1 %v14724_v8  ;;  %v762_v6 = vld [vmem:[%s22791_s1 + $0x1638] sm:$0xff]  ;;  %v14770_v8 = vcombine.low %v749_v25, %v753_v42  ;;  %v797_v42 = vld [vmem:[%s22791_s1 + $0x1750] sm:$0xff] }
 0x44b   :  { %10586 = vmatprep.subr.bf16.mxu0 %v14731_v10  ;;  %11078 = vmatprep.subr.bf16.mxu1 %v14733_v54  ;;  %v14772_v10 = vcombine.low %v750_v44, %v754_v47  ;;  %v14779_v54 = vcombine.high %v757_v61, %v761_v39  ;;  %v14781_v11 = vcombine.high %v758_v23, %v762_v6  ;;  %v790_v31 = vld [vmem:[%s22791_s1 + $0x1718] sm:$0xff]  ;;  %v801_v44 = vld [vmem:[%s22791_s1 + $0x1770] sm:$0xff] }
 0x44c   :  { %v798_v47 = vld [vmem:[%s22791_s1 + $0x1758] sm:$0xff] }
 0x44e   :  { %10587 = vmatpush1.bf16.msra.mxu0 %v14730_v17  ;;  %11079 = vmatpush1.bf16.msra.mxu1 %v14732_v53  ;;  %v770_v17 = vld [vmem:[%s22791_s1 + $0x1678] sm:$0xff]  ;;  %v14778_v53 = vcombine.low %v757_v61, %v761_v39  ;;  %v805_v39 = vld [vmem:[%s22791_s1 + $0x1790] sm:$0xff] }
 0x44f   :  { %10588 = vmatprep.subr.bf16.mxu0 %v14739_v20  ;;  %11080 = vmatprep.subr.bf16.mxu1 %v14741_v36  ;;  %v14780_v20 = vcombine.low %v758_v23, %v762_v6  ;;  %v14787_v36 = vcombine.high %v765_v13, %v769_v16  ;;  %v14789_v59 = vcombine.high %v766_v14, %v770_v17  ;;  %v809_v23 = vld [vmem:[%s22791_s1 + $0x17b0] sm:$0xff]  ;;  %v806_v6 = vld [vmem:[%s22791_s1 + $0x1798] sm:$0xff] }
 0x452   :  { %10589 = vmatpush1.bf16.msra.mxu0 %v14738_v26  ;;  %11081 = vmatpush1.bf16.msra.mxu1 %v14740_v49  ;;  %v778_v26 = vld [vmem:[%s22791_s1 + $0x16b8] sm:$0xff]  ;;  %v14786_v49 = vcombine.low %v765_v13, %v769_v16  ;;  %v813_v16 = vld [vmem:[%s22791_s1 + $0x17d0] sm:$0xff] }
 0x453   :  { %10590 = vmatprep.subr.bf16.mxu0 %v14747_v15  ;;  %11082 = vmatprep.subr.bf16.mxu1 %v14749_v28  ;;  %v14788_v15 = vcombine.low %v766_v14, %v770_v17  ;;  %v14795_v28 = vcombine.high %v773_v24, %v777_v27  ;;  %v14797_v29 = vcombine.high %v774_v55, %v778_v26  ;;  %v817_v14 = vld [vmem:[%s22791_s1 + $0x17f0] sm:$0xff]  ;;  %v814_v17 = vld [vmem:[%s22791_s1 + $0x17d8] sm:$0xff] }
 0x456   :  { %10591 = vmatpush1.bf16.msra.mxu0 %v14746_v32  ;;  %11083 = vmatpush1.bf16.msra.mxu1 %v14748_v12  ;;  %v786_v32 = vld [vmem:[%s22791_s1 + $0x16f8] sm:$0xff]  ;;  %v14794_v12 = vcombine.low %v773_v24, %v777_v27  ;;  %v821_v27 = vld [vmem:[%s22791_s1 + $0x1810] sm:$0xff] }
 0x457   :  { %10592 = vmatprep.subr.bf16.mxu0 %v14755_v33  ;;  %11084 = vmatprep.subr.bf16.mxu1 %v14757_v34  ;;  %v14796_v33 = vcombine.low %v774_v55, %v778_v26  ;;  %v14803_v34 = vcombine.high %v781_v45, %v785_v22  ;;  %v14805_v35 = vcombine.high %v782_v1, %v786_v32  ;;  %v825_v55 = vld [vmem:[%s22791_s1 + $0x1830] sm:$0xff]  ;;  %v822_v26 = vld [vmem:[%s22791_s1 + $0x1818] sm:$0xff] }
 0x45a   :  { %10593 = vmatpush1.bf16.msra.mxu0 %v14754_v38  ;;  %11085 = vmatpush1.bf16.msra.mxu1 %v14756_v40  ;;  %v794_v38 = vld [vmem:[%s22791_s1 + $0x1738] sm:$0xff]  ;;  %v14802_v40 = vcombine.low %v781_v45, %v785_v22  ;;  %v829_v22 = vld [vmem:[%s22791_s1 + $0x1850] sm:$0xff] }
 0x45b   :  { %10594 = vmatprep.subr.bf16.mxu0 %v14763_v21  ;;  %11086 = vmatprep.subr.bf16.mxu1 %v14765_v41  ;;  %v14804_v21 = vcombine.low %v782_v1, %v786_v32  ;;  %v14811_v41 = vcombine.high %v789_v57, %v793_v37  ;;  %v14813_v25 = vcombine.high %v790_v31, %v794_v38  ;;  %v833_v1 = vld [vmem:[%s22791_s1 + $0x1870] sm:$0xff]  ;;  %v830_v32 = vld [vmem:[%s22791_s1 + $0x1858] sm:$0xff] }
 0x45e   :  { %10595 = vmatpush1.bf16.msra.mxu0 %v14762_v18  ;;  %11087 = vmatpush1.bf16.msra.mxu1 %v14764_v52  ;;  %v802_v18 = vld [vmem:[%s22791_s1 + $0x1778] sm:$0xff]  ;;  %v14810_v52 = vcombine.low %v789_v57, %v793_v37  ;;  %v837_v37 = vld [vmem:[%s22791_s1 + $0x1890] sm:$0xff] }
 0x45f   :  { %10596 = vmatprep.subr.bf16.mxu0 %v14771_v56  ;;  %11088 = vmatprep.subr.bf16.mxu1 %v14773_v48  ;;  %v14812_v56 = vcombine.low %v790_v31, %v794_v38  ;;  %v14819_v48 = vcombine.high %v797_v42, %v801_v44  ;;  %v14821_v61 = vcombine.high %v798_v47, %v802_v18  ;;  %v841_v31 = vld [vmem:[%s22791_s1 + $0x18b0] sm:$0xff]  ;;  %v838_v38 = vld [vmem:[%s22791_s1 + $0x1898] sm:$0xff] }
 0x462   :  { %10597 = vmatpush1.bf16.msra.mxu0 %v14770_v8  ;;  %11089 = vmatpush1.bf16.msra.mxu1 %v14772_v10  ;;  %v810_v8 = vld [vmem:[%s22791_s1 + $0x17b8] sm:$0xff]  ;;  %v14818_v10 = vcombine.low %v797_v42, %v801_v44  ;;  %v845_v44 = vld [vmem:[%s22791_s1 + $0x18d0] sm:$0xff] }
 0x463   :  { %10598 = vmatprep.subr.bf16.mxu0 %v14779_v54  ;;  %11090 = vmatprep.subr.bf16.mxu1 %v14781_v11  ;;  %v14820_v54 = vcombine.low %v798_v47, %v802_v18  ;;  %v14827_v11 = vcombine.high %v805_v39, %v809_v23  ;;  %v14829_v13 = vcombine.high %v806_v6, %v810_v8  ;;  %v849_v47 = vld [vmem:[%s22791_s1 + $0x18f0] sm:$0xff]  ;;  %v850_v18 = vld [vmem:[%s22791_s1 + $0x18f8] sm:$0xff] }
 0x466   :  { %10599 = vmatpush1.bf16.msra.mxu0 %v14778_v53  ;;  %11091 = vmatpush1.bf16.msra.mxu1 %v14780_v20  ;;  %v818_v53 = vld [vmem:[%s22791_s1 + $0x17f8] sm:$0xff]  ;;  %v14826_v20 = vcombine.low %v805_v39, %v809_v23  ;;  %v853_v39 = vld [vmem:[%s22791_s1 + $0x1910] sm:$0xff] }
 0x467   :  { %10600 = vmatprep.subr.bf16.mxu0 %v14787_v36  ;;  %11092 = vmatprep.subr.bf16.mxu1 %v14789_v59  ;;  %v14828_v36 = vcombine.low %v806_v6, %v810_v8  ;;  %v14835_v59 = vcombine.high %v813_v16, %v817_v14  ;;  %v14837_v24 = vcombine.high %v814_v17, %v818_v53  ;;  %v857_v23 = vld [vmem:[%s22791_s1 + $0x1930] sm:$0xff]  ;;  %v858_v6 = vld [vmem:[%s22791_s1 + $0x1938] sm:$0xff] }
 0x468   :  { %v14866_v8 = vcombine.low %v845_v44, %v849_v47 }
 0x46a   :  { %10601 = vmatpush1.bf16.msra.mxu0 %v14786_v49  ;;  %11093 = vmatpush1.bf16.msra.mxu1 %v14788_v15  ;;  %v826_v49 = vld [vmem:[%s22791_s1 + $0x1838] sm:$0xff]  ;;  %v14834_v15 = vcombine.low %v813_v16, %v817_v14  ;;  %v865_v16 = vld [vmem:[%s22791_s1 + $0x1970] sm:$0xff] }
 0x46b   :  { %10602 = vmatprep.subr.bf16.mxu0 %v14795_v28  ;;  %11094 = vmatprep.subr.bf16.mxu1 %v14797_v29  ;;  %v14836_v28 = vcombine.low %v814_v17, %v818_v53  ;;  %v14843_v29 = vcombine.high %v821_v27, %v825_v55  ;;  %v14845_v45 = vcombine.high %v822_v26, %v826_v49  ;;  %v862_v14 = vld [vmem:[%s22791_s1 + $0x1958] sm:$0xff] }
 0x46c   :  { %v866_v17 = vld [vmem:[%s22791_s1 + $0x1978] sm:$0xff]  ;;  %v14874_v53 = vcombine.low %v853_v39, %v857_v23 }
 0x46e   :  { %10603 = vmatpush1.bf16.msra.mxu0 %v14794_v12  ;;  %11095 = vmatpush1.bf16.msra.mxu1 %v14796_v33  ;;  %v834_v12 = vld [vmem:[%s22791_s1 + $0x1878] sm:$0xff]  ;;  %v14842_v33 = vcombine.low %v821_v27, %v825_v55  ;;  %v873_v27 = vld [vmem:[%s22791_s1 + $0x19b0] sm:$0xff] }
 0x46f   :  { %10604 = vmatprep.subr.bf16.mxu0 %v14803_v34  ;;  %11096 = vmatprep.subr.bf16.mxu1 %v14805_v35  ;;  %v14844_v34 = vcombine.low %v822_v26, %v826_v49  ;;  %v14851_v35 = vcombine.high %v829_v22, %v833_v1  ;;  %v14853_v57 = vcombine.high %v830_v32, %v834_v12  ;;  %v870_v55 = vld [vmem:[%s22791_s1 + $0x1998] sm:$0xff] }
 0x470   :  { %v874_v26 = vld [vmem:[%s22791_s1 + $0x19b8] sm:$0xff] }
 0x472   :  { %10605 = vmatpush1.bf16.msra.mxu0 %v14802_v40  ;;  %11097 = vmatpush1.bf16.msra.mxu1 %v14804_v21  ;;  %v842_v40 = vld [vmem:[%s22791_s1 + $0x18b8] sm:$0xff]  ;;  %v14850_v21 = vcombine.low %v829_v22, %v833_v1  ;;  %v881_v22 = vld [vmem:[%s22791_s1 + $0x19f0] sm:$0xff] }
 0x473   :  { %10606 = vmatprep.subr.bf16.mxu0 %v14811_v41  ;;  %11098 = vmatprep.subr.bf16.mxu1 %v14813_v25  ;;  %v14852_v41 = vcombine.low %v830_v32, %v834_v12  ;;  %v14859_v25 = vcombine.high %v837_v37, %v841_v31  ;;  %v14861_v42 = vcombine.high %v838_v38, %v842_v40  ;;  %v878_v1 = vld [vmem:[%s22791_s1 + $0x19d8] sm:$0xff] }
 0x474   :  { %v882_v32 = vld [vmem:[%s22791_s1 + $0x19f8] sm:$0xff] }
 0x476   :  { %10607 = vmatpush1.bf16.msra.mxu0 %v14810_v52  ;;  %11099 = vmatpush1.bf16.msra.mxu1 %v14812_v56  ;;  %v14858_v52 = vcombine.low %v837_v37, %v841_v31  ;;  %v14860_v56 = vcombine.low %v838_v38, %v842_v40  ;;  %v889_v37 = vld [vmem:[%s22791_s1 + $0x1a30] sm:$0xff]  ;;  %v886_v31 = vld [vmem:[%s22791_s1 + $0x1a18] sm:$0xff] }
 0x477   :  { %10608 = vmatprep.subr.bf16.mxu0 %v14819_v48  ;;  %11100 = vmatprep.subr.bf16.mxu1 %v14821_v61  ;;  %v14867_v48 = vcombine.high %v845_v44, %v849_v47  ;;  %v890_v38 = vld [vmem:[%s22791_s1 + $0x1a38] sm:$0xff]  ;;  %v897_v44 = vld [vmem:[%s22791_s1 + $0x1a70] sm:$0xff] }
 0x478   :  { %v894_v47 = vld [vmem:[%s22791_s1 + $0x1a58] sm:$0xff] }
 0x47a   :  { %10609 = vmatpush1.bf16.msra.mxu0 %v14818_v10  ;;  %11101 = vmatpush1.bf16.msra.mxu1 %v14820_v54  ;;  %v14875_v54 = vcombine.high %v853_v39, %v857_v23  ;;  %v905_v39 = vld [vmem:[%s22791_s1 + $0x1ab0] sm:$0xff]  ;;  %v902_v23 = vld [vmem:[%s22791_s1 + $0x1a98] sm:$0xff] }
 0x47b   :  { %10610 = vmatprep.subr.bf16.mxu0 %v14827_v11  ;;  %11102 = vmatprep.subr.bf16.mxu1 %v14829_v13  ;;  %v861_v13 = vld [vmem:[%s22791_s1 + $0x1950] sm:$0xff] }
 0x47c   :  { %v14882_v49 = vcombine.low %v861_v13, %v865_v16 }
 0x47e   :  { %10611 = vmatpush1.bf16.msra.mxu0 %v14826_v20  ;;  %11103 = vmatpush1.bf16.msra.mxu1 %v14828_v36  ;;  %v14883_v36 = vcombine.high %v861_v13, %v865_v16  ;;  %v913_v13 = vld [vmem:[%s22791_s1 + $0x1af0] sm:$0xff]  ;;  %v910_v16 = vld [vmem:[%s22791_s1 + $0x1ad8] sm:$0xff] }
 0x47f   :  { %10612 = vmatprep.subr.bf16.mxu0 %v14835_v59  ;;  %11104 = vmatprep.subr.bf16.mxu1 %v14837_v24  ;;  %v14885_v59 = vcombine.high %v862_v14, %v866_v17  ;;  %v869_v24 = vld [vmem:[%s22791_s1 + $0x1990] sm:$0xff] }
 0x480   :  { %v14890_v12 = vcombine.low %v869_v24, %v873_v27 }
 0x482   :  { %10613 = vmatpush1.bf16.msra.mxu0 %v14834_v15  ;;  %11105 = vmatpush1.bf16.msra.mxu1 %v14836_v28  ;;  %v14884_v15 = vcombine.low %v862_v14, %v866_v17  ;;  %v14891_v28 = vcombine.high %v869_v24, %v873_v27  ;;  %v914_v14 = vld [vmem:[%s22791_s1 + $0x1af8] sm:$0xff]  ;;  %v921_v24 = vld [vmem:[%s22791_s1 + $0x1b30] sm:$0xff] }
 0x483   :  { %10623 = vmatprep.subr.bf16.mxu0 %v14843_v29  ;;  %11115 = vmatprep.subr.bf16.mxu1 %v14845_v45  ;;  %v14893_v29 = vcombine.high %v870_v55, %v874_v26  ;;  %v877_v45 = vld [vmem:[%s22791_s1 + $0x19d0] sm:$0xff]  ;;  %v918_v27 = vld [vmem:[%s22791_s1 + $0x1b18] sm:$0xff] }
 0x484   :  { %v14898_v40 = vcombine.low %v877_v45, %v881_v22 }
 0x485   :  { %10615 = vmatmul.mubr.bf16.vlgmr.msra.gmra.mrb[4].mxu0 %v18082_v46  ;;  %11107 = vmatmul.mubr.bf16.vlgmr.msra.gmra.mrb[4].mxu1 %v18082_v46  ;;  %v846_v46 = vld [vmem:[%s22791_s1 + $0x18d8] sm:$0xff] }
 0x486   :  { %10624 = vmatpush1.bf16.msra.mxu0 %v14842_v33  ;;  %11116 = vmatpush1.bf16.msra.mxu1 %v14844_v34  ;;  %v14869_v61 = vcombine.high %v846_v46, %v850_v18  ;;  %v14868_v10 = vcombine.low %v846_v46, %v850_v18  ;;  %v14892_v33 = vcombine.low %v870_v55, %v874_v26  ;;  %v898_v46 = vld [vmem:[%s22791_s1 + $0x1a78] sm:$0xff] }
 0x487   :  { %10625 = vmatprep.subr.bf16.mxu0 %v14851_v35  ;;  %11117 = vmatprep.subr.bf16.mxu1 %v14853_v57  ;;  %v14899_v34 = vcombine.high %v877_v45, %v881_v22  ;;  %v14901_v35 = vcombine.high %v878_v1, %v882_v32  ;;  %v885_v57 = vld [vmem:[%s22791_s1 + $0x1a10] sm:$0xff]  ;;  %v922_v55 = vld [vmem:[%s22791_s1 + $0x1b38] sm:$0xff] }
 0x488   :  { %10655 = vmatprep.mubr.bf16.mxu0 %v18103_v58  ;;  %11147 = vmatprep.mubr.bf16.mxu1 %v18103_v58  ;;  %v854_v58 = vld [vmem:[%s22791_s1 + $0x1918] sm:$0xff]  ;;  %v14906_v18 = vcombine.low %v885_v57, %v889_v37  ;;  %v929_v45 = vld [vmem:[%s22791_s1 + $0x1b70] sm:$0xff] }
 0x489   :  { %v14877_v11 = vcombine.high %v854_v58, %v858_v6  ;;  %v14876_v20 = vcombine.low %v854_v58, %v858_v6  ;;  %v906_v58 = vld [vmem:[%s22791_s1 + $0x1ab8] sm:$0xff] }
 0x48a   :  { %10626 = vmatpush1.bf16.msra.mxu0 %v14850_v21  ;;  %11118 = vmatpush1.bf16.msra.mxu1 %v14852_v41  ;;  %v14900_v21 = vcombine.low %v878_v1, %v882_v32  ;;  %v14907_v41 = vcombine.high %v885_v57, %v889_v37  ;;  %v926_v22 = vld [vmem:[%s22791_s1 + $0x1b58] sm:$0xff]  ;;  %v937_v57 = vld [vmem:[%s22791_s1 + $0x1bb0] sm:$0xff] }
 0x48b   :  { %10627 = vmatprep.subr.bf16.mxu0 %v14859_v25  ;;  %11119 = vmatprep.subr.bf16.mxu1 %v14861_v42  ;;  %v14909_v25 = vcombine.high %v886_v31, %v890_v38  ;;  %v893_v42 = vld [vmem:[%s22791_s1 + $0x1a50] sm:$0xff]  ;;  %v930_v1 = vld [vmem:[%s22791_s1 + $0x1b78] sm:$0xff] }
 0x48c   :  { %v14914_v6 = vcombine.low %v893_v42, %v897_v44  ;;  %v934_v37 = vld [vmem:[%s22791_s1 + $0x1b98] sm:$0xff] }
 0x48e   :  { %10628 = vmatpush1.bf16.msra.mxu0 %v14858_v52  ;;  %11120 = vmatpush1.bf16.msra.mxu1 %v14860_v56  ;;  %v14908_v52 = vcombine.low %v886_v31, %v890_v38  ;;  %v14915_v56 = vcombine.high %v893_v42, %v897_v44  ;;  %v938_v31 = vld [vmem:[%s22791_s1 + $0x1bb8] sm:$0xff]  ;;  %v945_v42 = vld [vmem:[%s22791_s1 + $0x1bf0] sm:$0xff] }
 0x48f   :  { %10629 = vmatprep.subr.bf16.mxu0 %v14867_v48  ;;  %11121 = vmatprep.subr.bf16.mxu1 %v14869_v61  ;;  %v14917_v48 = vcombine.high %v894_v47, %v898_v46  ;;  %v901_v61 = vld [vmem:[%s22791_s1 + $0x1a90] sm:$0xff]  ;;  %v942_v44 = vld [vmem:[%s22791_s1 + $0x1bd8] sm:$0xff] }
 0x490   :  { %v14922_v17 = vcombine.low %v901_v61, %v905_v39 }
 0x492   :  { %10630 = vmatpush1.bf16.msra.mxu0 %v14866_v8  ;;  %11122 = vmatpush1.bf16.msra.mxu1 %v14868_v10  ;;  %v14916_v8 = vcombine.low %v894_v47, %v898_v46  ;;  %v14923_v10 = vcombine.high %v901_v61, %v905_v39  ;;  %v946_v47 = vld [vmem:[%s22791_s1 + $0x1bf8] sm:$0xff]  ;;  %v953_v61 = vld [vmem:[%s22791_s1 + $0x1c30] sm:$0xff] }
 0x493   :  { %10631 = vmatprep.subr.bf16.mxu0 %v14875_v54  ;;  %11123 = vmatprep.subr.bf16.mxu1 %v14877_v11  ;;  %v14925_v54 = vcombine.high %v902_v23, %v906_v58  ;;  %v909_v11 = vld [vmem:[%s22791_s1 + $0x1ad0] sm:$0xff]  ;;  %v950_v39 = vld [vmem:[%s22791_s1 + $0x1c18] sm:$0xff] }
 0x494   :  { %v14930_v26 = vcombine.low %v909_v11, %v913_v13 }
 0x496   :  { %10632 = vmatpush1.bf16.msra.mxu0 %v14874_v53  ;;  %11124 = vmatpush1.bf16.msra.mxu1 %v14876_v20  ;;  %v14924_v53 = vcombine.low %v902_v23, %v906_v58  ;;  %v14931_v20 = vcombine.high %v909_v11, %v913_v13  ;;  %v954_v23 = vld [vmem:[%s22791_s1 + $0x1c38] sm:$0xff]  ;;  %v961_v11 = vld [vmem:[%s22791_s1 + $0x1c70] sm:$0xff] }
 0x497   :  { %10633 = vmatprep.subr.bf16.mxu0 %v14883_v36  ;;  %11125 = vmatprep.subr.bf16.mxu1 %v14885_v59  ;;  %v14933_v36 = vcombine.high %v910_v16, %v914_v14  ;;  %v917_v59 = vld [vmem:[%s22791_s1 + $0x1b10] sm:$0xff]  ;;  %v958_v13 = vld [vmem:[%s22791_s1 + $0x1c58] sm:$0xff] }
 0x498   :  { %v14938_v32 = vcombine.low %v917_v59, %v921_v24 }
 0x49a   :  { %10634 = vmatpush1.bf16.msra.mxu0 %v14882_v49  ;;  %11126 = vmatpush1.bf16.msra.mxu1 %v14884_v15  ;;  %v14932_v49 = vcombine.low %v910_v16, %v914_v14  ;;  %v14939_v15 = vcombine.high %v917_v59, %v921_v24  ;;  %v962_v16 = vld [vmem:[%s22791_s1 + $0x1c78] sm:$0xff]  ;;  %v969_v59 = vld [vmem:[%s22791_s1 + $0x1cb0] sm:$0xff] }
 0x49b   :  { %10635 = vmatprep.subr.bf16.mxu0 %v14891_v28  ;;  %11127 = vmatprep.subr.bf16.mxu1 %v14893_v29  ;;  %v14941_v28 = vcombine.high %v918_v27, %v922_v55  ;;  %v925_v29 = vld [vmem:[%s22791_s1 + $0x1b50] sm:$0xff]  ;;  %v966_v24 = vld [vmem:[%s22791_s1 + $0x1c98] sm:$0xff] }
 0x49c   :  { %v14946_v38 = vcombine.low %v925_v29, %v929_v45 }
 0x49e   :  { %10636 = vmatpush1.bf16.msra.mxu0 %v14890_v12  ;;  %11128 = vmatpush1.bf16.msra.mxu1 %v14892_v33  ;;  %v14940_v12 = vcombine.low %v918_v27, %v922_v55  ;;  %v14947_v33 = vcombine.high %v925_v29, %v929_v45  ;;  %v970_v27 = vld [vmem:[%s22791_s1 + $0x1cb8] sm:$0xff]  ;;  %v977_v29 = vld [vmem:[%s22791_s1 + $0x1cf0] sm:$0xff] }
 0x49f   :  { %10637 = vmatprep.subr.bf16.mxu0 %v14899_v34  ;;  %11129 = vmatprep.subr.bf16.mxu1 %v14901_v35  ;;  %v14949_v34 = vcombine.high %v926_v22, %v930_v1  ;;  %v933_v35 = vld [vmem:[%s22791_s1 + $0x1b90] sm:$0xff]  ;;  %v978_v45 = vld [vmem:[%s22791_s1 + $0x1cf8] sm:$0xff] }
 0x4a0   :  { %v14954_v46 = vcombine.low %v933_v35, %v937_v57 }
 0x4a2   :  { %10638 = vmatpush1.bf16.msra.mxu0 %v14898_v40  ;;  %11130 = vmatpush1.bf16.msra.mxu1 %v14900_v21  ;;  %v14948_v40 = vcombine.low %v926_v22, %v930_v1  ;;  %v14955_v21 = vcombine.high %v933_v35, %v937_v57  ;;  %v14988_v1 = vcombine.low %v966_v24, %v970_v27  ;;  %v986_v35 = vld [vmem:[%s22791_s1 + $0x1d38] sm:$0xff] }
 0x4a3   :  { %10639 = vmatprep.subr.bf16.mxu0 %v14907_v41  ;;  %11131 = vmatprep.subr.bf16.mxu1 %v14909_v25  ;;  %v14957_v41 = vcombine.high %v934_v37, %v938_v31  ;;  %v941_v25 = vld [vmem:[%s22791_s1 + $0x1bd0] sm:$0xff] }
 0x4a4   :  { %v14962_v58 = vcombine.low %v941_v25, %v945_v42 }
 0x4a6   :  { %10640 = vmatpush1.bf16.msra.mxu0 %v14906_v18  ;;  %11132 = vmatpush1.bf16.msra.mxu1 %v14908_v52  ;;  %v14956_v18 = vcombine.low %v934_v37, %v938_v31  ;;  %v14963_v52 = vcombine.high %v941_v25, %v945_v42  ;;  %v994_v25 = vld [vmem:[%s22791_s1 + $0x1d78] sm:$0xff] }
 0x4a7   :  { %10641 = vmatprep.subr.bf16.mxu0 %v14915_v56  ;;  %11133 = vmatprep.subr.bf16.mxu1 %v14917_v48  ;;  %v14965_v56 = vcombine.high %v942_v44, %v946_v47  ;;  %v949_v48 = vld [vmem:[%s22791_s1 + $0x1c10] sm:$0xff] }
 0x4a8   :  { %v14970_v14 = vcombine.low %v949_v48, %v953_v61 }
 0x4aa   :  { %10642 = vmatpush1.bf16.msra.mxu0 %v14914_v6  ;;  %11134 = vmatpush1.bf16.msra.mxu1 %v14916_v8  ;;  %v14964_v6 = vcombine.low %v942_v44, %v946_v47  ;;  %v14971_v8 = vcombine.high %v949_v48, %v953_v61  ;;  %v1002_v48 = vld [vmem:[%s22791_s1 + $0x1db8] sm:$0xff] }
 0x4ab   :  { %10643 = vmatprep.subr.bf16.mxu0 %v14923_v10  ;;  %11135 = vmatprep.subr.bf16.mxu1 %v14925_v54  ;;  %v14973_v10 = vcombine.high %v950_v39, %v954_v23  ;;  %v957_v54 = vld [vmem:[%s22791_s1 + $0x1c50] sm:$0xff] }
 0x4ac   :  { %v14978_v55 = vcombine.low %v957_v54, %v961_v11 }
 0x4ae   :  { %10644 = vmatpush1.bf16.msra.mxu0 %v14922_v17  ;;  %11136 = vmatpush1.bf16.msra.mxu1 %v14924_v53  ;;  %v14972_v17 = vcombine.low %v950_v39, %v954_v23  ;;  %v14979_v53 = vcombine.high %v957_v54, %v961_v11  ;;  %v1010_v54 = vld [vmem:[%s22791_s1 + $0x1df8] sm:$0xff] }
 0x4af   :  { %10645 = vmatprep.subr.bf16.mxu0 %v14931_v20  ;;  %11137 = vmatprep.subr.bf16.mxu1 %v14933_v36  ;;  %v14981_v20 = vcombine.high %v958_v13, %v962_v16  ;;  %v965_v36 = vld [vmem:[%s22791_s1 + $0x1c90] sm:$0xff] }
 0x4b0   :  { %v14986_v22 = vcombine.low %v965_v36, %v969_v59 }
 0x4b2   :  { %10646 = vmatpush1.bf16.msra.mxu0 %v14930_v26  ;;  %11138 = vmatpush1.bf16.msra.mxu1 %v14932_v49  ;;  %v14980_v26 = vcombine.low %v958_v13, %v962_v16  ;;  %v14987_v49 = vcombine.high %v965_v36, %v969_v59  ;;  %v1018_v36 = vld [vmem:[%s22791_s1 + $0x1e38] sm:$0xff] }
 0x4b3   :  { %10647 = vmatprep.subr.bf16.mxu0 %v14939_v15  ;;  %11139 = vmatprep.subr.bf16.mxu1 %v14941_v28  ;;  %v14989_v15 = vcombine.high %v966_v24, %v970_v27  ;;  %v973_v28 = vld [vmem:[%s22791_s1 + $0x1cd0] sm:$0xff] }
 0x4b4   :  { %v14994_v57 = vcombine.low %v973_v28, %v977_v29 }
 0x4b6   :  { %10648 = vmatpush1.bf16.msra.mxu0 %v14938_v32  ;;  %11140 = vmatpush1.bf16.msra.mxu1 %v14940_v12  ;;  %v14995_v32 = vcombine.high %v973_v28, %v977_v29  ;;  %v1026_v28 = vld [vmem:[%s22791_s1 + $0x1e78] sm:$0xff] }
 0x4b7   :  { %10649 = vmatprep.subr.bf16.mxu0 %v14947_v33  ;;  %11141 = vmatprep.subr.bf16.mxu1 %v14949_v34  ;;  %v981_v33 = vld [vmem:[%s22791_s1 + $0x1d10] sm:$0xff] }
 0x4b8   :  { %v985_v34 = vld [vmem:[%s22791_s1 + $0x1d30] sm:$0xff] }
 0x4b9   :  { %v15003_v31 = vcombine.high %v981_v33, %v985_v34  ;;  %v15002_v42 = vcombine.low %v981_v33, %v985_v34  ;;  %v1034_v33 = vld [vmem:[%s22791_s1 + $0x1eb8] sm:$0xff] }
 0x4ba   :  { %10650 = vmatpush1.bf16.msra.mxu0 %v14946_v38  ;;  %11142 = vmatpush1.bf16.msra.mxu1 %v14948_v40  ;;  %v989_v40 = vld [vmem:[%s22791_s1 + $0x1d50] sm:$0xff] }
 0x4bb   :  { %10651 = vmatprep.subr.bf16.mxu0 %v14955_v21  ;;  %11143 = vmatprep.subr.bf16.mxu1 %v14957_v41  ;;  %v993_v21 = vld [vmem:[%s22791_s1 + $0x1d70] sm:$0xff]  ;;  %v990_v41 = vld [vmem:[%s22791_s1 + $0x1d58] sm:$0xff] }
 0x4bc   :  { %v15011_v47 = vcombine.high %v989_v40, %v993_v21  ;;  %v15010_v61 = vcombine.low %v989_v40, %v993_v21  ;;  %v15012_v39 = vcombine.low %v990_v41, %v994_v25  ;;  %v1042_v40 = vld [vmem:[%s22791_s1 + $0x1ef8] sm:$0xff] }
 0x4be   :  { %10652 = vmatpush1.bf16.msra.mxu0 %v14954_v46  ;;  %11144 = vmatpush1.bf16.msra.mxu1 %v14956_v18  ;;  %v15013_v46 = vcombine.high %v990_v41, %v994_v25  ;;  %v997_v18 = vld [vmem:[%s22791_s1 + $0x1d90] sm:$0xff] }
 0x4bf   :  { %10653 = vmatprep.subr.bf16.mxu0 %v14963_v52  ;;  %11145 = vmatprep.subr.bf16.mxu1 %v14965_v56  ;;  %v1001_v52 = vld [vmem:[%s22791_s1 + $0x1db0] sm:$0xff]  ;;  %v998_v56 = vld [vmem:[%s22791_s1 + $0x1d98] sm:$0xff] }
 0x4c0   :  { %v15019_v23 = vcombine.high %v997_v18, %v1001_v52  ;;  %v15018_v11 = vcombine.low %v997_v18, %v1001_v52  ;;  %v15020_v13 = vcombine.low %v998_v56, %v1002_v48  ;;  %v1050_v18 = vld [vmem:[%s22791_s1 + $0x1f38] sm:$0xff] }
 0x4c2   :  { %10654 = vmatpush1.bf16.msra.mxu0 %v14962_v58  ;;  %11146 = vmatpush1.bf16.msra.mxu1 %v14964_v6  ;;  %v15021_v58 = vcombine.high %v998_v56, %v1002_v48  ;;  %v1005_v6 = vld [vmem:[%s22791_s1 + $0x1dd0] sm:$0xff] }
 0x4c3   :  { %10664 = vmatprep.subr.bf16.mxu0 %v14971_v8  ;;  %11156 = vmatprep.subr.bf16.mxu1 %v14973_v10  ;;  %v1009_v8 = vld [vmem:[%s22791_s1 + $0x1df0] sm:$0xff]  ;;  %v1006_v10 = vld [vmem:[%s22791_s1 + $0x1dd8] sm:$0xff] }
 0x4c4   :  { %v15027_v16 = vcombine.high %v1005_v6, %v1009_v8  ;;  %v15026_v59 = vcombine.low %v1005_v6, %v1009_v8  ;;  %v15028_v24 = vcombine.low %v1006_v10, %v1010_v54  ;;  %v1058_v6 = vld [vmem:[%s22791_s1 + $0x1f78] sm:$0xff] }
 0x4c5   :  { %10656 = vmatmul.mubr.bf16.vlgmr.msra.gmra.mrb[4].mxu0 %v18291_v19  ;;  %11148 = vmatmul.mubr.bf16.vlgmr.msra.gmra.mrb[4].mxu1 %v18291_v19  ;;  %v974_v19 = vld [vmem:[%s22791_s1 + $0x1cd8] sm:$0xff] }
 0x4c6   :  { %10665 = vmatpush1.bf16.msra.mxu0 %v14970_v14  ;;  %11157 = vmatpush1.bf16.msra.mxu1 %v14972_v17  ;;  %v14997_v12 = vcombine.high %v974_v19, %v978_v45  ;;  %v14996_v37 = vcombine.low %v974_v19, %v978_v45  ;;  %v15029_v14 = vcombine.high %v1006_v10, %v1010_v54  ;;  %v1013_v17 = vld [vmem:[%s22791_s1 + $0x1e10] sm:$0xff] }
 0x4c7   :  { %10666 = vmatprep.subr.bf16.mxu0 %v14979_v53  ;;  %11158 = vmatprep.subr.bf16.mxu1 %v14981_v20  ;;  %v1017_v53 = vld [vmem:[%s22791_s1 + $0x1e30] sm:$0xff]  ;;  %v1014_v20 = vld [vmem:[%s22791_s1 + $0x1e18] sm:$0xff] }
 0x4c8   :  { %10696 = vmatprep.mubr.bf16.mxu0 %v18312_v30  ;;  %11188 = vmatprep.mubr.bf16.mxu1 %v18312_v30  ;;  %v982_v30 = vld [vmem:[%s22791_s1 + $0x1d18] sm:$0xff]  ;;  %v15035_v27 = vcombine.high %v1013_v17, %v1017_v53  ;;  %v15034_v29 = vcombine.low %v1013_v17, %v1017_v53  ;;  %v15036_v19 = vcombine.low %v1014_v20, %v1018_v36 }
 0x4c9   :  { %v15005_v38 = vcombine.high %v982_v30, %v986_v35  ;;  %v15004_v44 = vcombine.low %v982_v30, %v986_v35  ;;  %v1066_v17 = vld [vmem:[%s22791_s1 + $0x1fb8] sm:$0xff] }
 0x4ca   :  { %10667 = vmatpush1.bf16.msra.mxu0 %v14978_v55  ;;  %11159 = vmatpush1.bf16.msra.mxu1 %v14980_v26  ;;  %v15037_v55 = vcombine.high %v1014_v20, %v1018_v36  ;;  %v1021_v26 = vld [vmem:[%s22791_s1 + $0x1e50] sm:$0xff] }
 0x4cb   :  { %10668 = vmatprep.subr.bf16.mxu0 %v14987_v49  ;;  %11160 = vmatprep.subr.bf16.mxu1 %v14989_v15  ;;  %v1025_v49 = vld [vmem:[%s22791_s1 + $0x1e70] sm:$0xff]  ;;  %v1022_v15 = vld [vmem:[%s22791_s1 + $0x1e58] sm:$0xff] }
 0x4cc   :  { %v15043_v45 = vcombine.high %v1021_v26, %v1025_v49  ;;  %v15042_v34 = vcombine.low %v1021_v26, %v1025_v49  ;;  %v15044_v30 = vcombine.low %v1022_v15, %v1026_v28  ;;  %v1074_v26 = vld [vmem:[%s22791_s1 + $0x1ff8] sm:$0xff] }
 0x4ce   :  { %10669 = vmatpush1.bf16.msra.mxu0 %v14986_v22  ;;  %11161 = vmatpush1.bf16.msra.mxu1 %v14988_v1  ;;  %v15045_v22 = vcombine.high %v1022_v15, %v1026_v28  ;;  %v1029_v1 = vld [vmem:[%s22791_s1 + $0x1e90] sm:$0xff] }
 0x4cf   :  { %10670 = vmatprep.subr.bf16.mxu0 %v14995_v32  ;;  %11162 = vmatprep.subr.bf16.mxu1 %v14997_v12  ;;  %v1033_v32 = vld [vmem:[%s22791_s1 + $0x1eb0] sm:$0xff]  ;;  %v1030_v12 = vld [vmem:[%s22791_s1 + $0x1e98] sm:$0xff] }
 0x4d0   :  { %v15051_v35 = vcombine.high %v1029_v1, %v1033_v32  ;;  %v15050_v21 = vcombine.low %v1029_v1, %v1033_v32  ;;  %v15052_v41 = vcombine.low %v1030_v12, %v1034_v33  ;;  %v1082_v1 = vld [vmem:[%s22791_s1 + $0x2038] sm:$0xff] }
 0x4d2   :  { %10671 = vmatpush1.bf16.msra.mxu0 %v14994_v57  ;;  %11163 = vmatpush1.bf16.msra.mxu1 %v14996_v37  ;;  %v15053_v57 = vcombine.high %v1030_v12, %v1034_v33  ;;  %v1037_v37 = vld [vmem:[%s22791_s1 + $0x1ed0] sm:$0xff] }
 0x4d3   :  { %10672 = vmatprep.subr.bf16.mxu0 %v15003_v31  ;;  %11164 = vmatprep.subr.bf16.mxu1 %v15005_v38  ;;  %v1041_v31 = vld [vmem:[%s22791_s1 + $0x1ef0] sm:$0xff]  ;;  %v1038_v38 = vld [vmem:[%s22791_s1 + $0x1ed8] sm:$0xff] }
 0x4d4   :  { %v15059_v25 = vcombine.high %v1037_v37, %v1041_v31  ;;  %v15058_v52 = vcombine.low %v1037_v37, %v1041_v31  ;;  %v15060_v56 = vcombine.low %v1038_v38, %v1042_v40  ;;  %v1090_v37 = vld [vmem:[%s22791_s1 + $0x2078] sm:$0xff] }
 0x4d6   :  { %10673 = vmatpush1.bf16.msra.mxu0 %v15002_v42  ;;  %11165 = vmatpush1.bf16.msra.mxu1 %v15004_v44  ;;  %v15061_v42 = vcombine.high %v1038_v38, %v1042_v40  ;;  %v1045_v44 = vld [vmem:[%s22791_s1 + $0x1f10] sm:$0xff] }
 0x4d7   :  { %10674 = vmatprep.subr.bf16.mxu0 %v15011_v47  ;;  %11166 = vmatprep.subr.bf16.mxu1 %v15013_v46  ;;  %v1049_v47 = vld [vmem:[%s22791_s1 + $0x1f30] sm:$0xff]  ;;  %v1046_v46 = vld [vmem:[%s22791_s1 + $0x1f18] sm:$0xff] }
 0x4d8   :  { %v15067_v48 = vcombine.high %v1045_v44, %v1049_v47  ;;  %v15066_v8 = vcombine.low %v1045_v44, %v1049_v47  ;;  %v15068_v10 = vcombine.low %v1046_v46, %v1050_v18  ;;  %v1098_v44 = vld [vmem:[%s22791_s1 + $0x20b8] sm:$0xff] }
 0x4da   :  { %10675 = vmatpush1.bf16.msra.mxu0 %v15010_v61  ;;  %11167 = vmatpush1.bf16.msra.mxu1 %v15012_v39  ;;  %v15069_v61 = vcombine.high %v1046_v46, %v1050_v18  ;;  %v1053_v39 = vld [vmem:[%s22791_s1 + $0x1f50] sm:$0xff] }
 0x4db   :  { %10676 = vmatprep.subr.bf16.mxu0 %v15019_v23  ;;  %11168 = vmatprep.subr.bf16.mxu1 %v15021_v58  ;;  %v1057_v23 = vld [vmem:[%s22791_s1 + $0x1f70] sm:$0xff]  ;;  %v1054_v58 = vld [vmem:[%s22791_s1 + $0x1f58] sm:$0xff] }
 0x4dc   :  { %v15075_v54 = vcombine.high %v1053_v39, %v1057_v23  ;;  %v15074_v53 = vcombine.low %v1053_v39, %v1057_v23  ;;  %v15076_v20 = vcombine.low %v1054_v58, %v1058_v6 }
 0x4de   :  { %10677 = vmatpush1.bf16.msra.mxu0 %v15018_v11  ;;  %11169 = vmatpush1.bf16.msra.mxu1 %v15020_v13  ;;  %v15077_v11 = vcombine.high %v1054_v58, %v1058_v6  ;;  %v1061_v13 = vld [vmem:[%s22791_s1 + $0x1f90] sm:$0xff] }
 0x4df   :  { %10678 = vmatprep.subr.bf16.mxu0 %v15027_v16  ;;  %11170 = vmatprep.subr.bf16.mxu1 %v15029_v14  ;;  %v1065_v16 = vld [vmem:[%s22791_s1 + $0x1fb0] sm:$0xff]  ;;  %v1062_v14 = vld [vmem:[%s22791_s1 + $0x1f98] sm:$0xff] }
 0x4e0   :  { %v15083_v36 = vcombine.high %v1061_v13, %v1065_v16  ;;  %v15082_v49 = vcombine.low %v1061_v13, %v1065_v16  ;;  %v15084_v15 = vcombine.low %v1062_v14, %v1066_v17 }
 0x4e2   :  { %10679 = vmatpush1.bf16.msra.mxu0 %v15026_v59  ;;  %11171 = vmatpush1.bf16.msra.mxu1 %v15028_v24  ;;  %v15085_v59 = vcombine.high %v1062_v14, %v1066_v17  ;;  %v1069_v24 = vld [vmem:[%s22791_s1 + $0x1fd0] sm:$0xff] }
 0x4e3   :  { %10680 = vmatprep.subr.bf16.mxu0 %v15035_v27  ;;  %11172 = vmatprep.subr.bf16.mxu1 %v15037_v55  ;;  %v1073_v27 = vld [vmem:[%s22791_s1 + $0x1ff0] sm:$0xff]  ;;  %v1070_v55 = vld [vmem:[%s22791_s1 + $0x1fd8] sm:$0xff] }
 0x4e4   :  { %v15091_v28 = vcombine.high %v1069_v24, %v1073_v27  ;;  %v15090_v32 = vcombine.low %v1069_v24, %v1073_v27  ;;  %v15092_v12 = vcombine.low %v1070_v55, %v1074_v26  ;;  %v1117_v17 = vld [vmem:[%s22791_s1 + $0x2150] sm:$0xff] }
 0x4e6   :  { %10681 = vmatpush1.bf16.msra.mxu0 %v15034_v29  ;;  %11173 = vmatpush1.bf16.msra.mxu1 %v15036_v19  ;;  %v15093_v29 = vcombine.high %v1070_v55, %v1074_v26  ;;  %v1077_v19 = vld [vmem:[%s22791_s1 + $0x2010] sm:$0xff] }
 0x4e7   :  { %10682 = vmatprep.subr.bf16.mxu0 %v15043_v45  ;;  %11174 = vmatprep.subr.bf16.mxu1 %v15045_v22  ;;  %v1081_v45 = vld [vmem:[%s22791_s1 + $0x2030] sm:$0xff]  ;;  %v1078_v22 = vld [vmem:[%s22791_s1 + $0x2018] sm:$0xff] }
 0x4e8   :  { %v15099_v33 = vcombine.high %v1077_v19, %v1081_v45  ;;  %v15098_v31 = vcombine.low %v1077_v19, %v1081_v45  ;;  %v15100_v38 = vcombine.low %v1078_v22, %v1082_v1  ;;  %v1125_v26 = vld [vmem:[%s22791_s1 + $0x2190] sm:$0xff] }
 0x4ea   :  { %10683 = vmatpush1.bf16.msra.mxu0 %v15042_v34  ;;  %11175 = vmatpush1.bf16.msra.mxu1 %v15044_v30  ;;  %v15101_v34 = vcombine.high %v1078_v22, %v1082_v1  ;;  %v1085_v30 = vld [vmem:[%s22791_s1 + $0x2050] sm:$0xff] }
 0x4eb   :  { %10684 = vmatprep.subr.bf16.mxu0 %v15051_v35  ;;  %11176 = vmatprep.subr.bf16.mxu1 %v15053_v57  ;;  %v1089_v35 = vld [vmem:[%s22791_s1 + $0x2070] sm:$0xff]  ;;  %v1086_v57 = vld [vmem:[%s22791_s1 + $0x2058] sm:$0xff] }
 0x4ec   :  { %v15107_v40 = vcombine.high %v1085_v30, %v1089_v35  ;;  %v15106_v47 = vcombine.low %v1085_v30, %v1089_v35  ;;  %v15108_v46 = vcombine.low %v1086_v57, %v1090_v37  ;;  %v1133_v1 = vld [vmem:[%s22791_s1 + $0x21d0] sm:$0xff] }
 0x4ee   :  { %10685 = vmatpush1.bf16.msra.mxu0 %v15050_v21  ;;  %11177 = vmatpush1.bf16.msra.mxu1 %v15052_v41  ;;  %v15109_v21 = vcombine.high %v1086_v57, %v1090_v37  ;;  %v1093_v41 = vld [vmem:[%s22791_s1 + $0x2090] sm:$0xff] }
 0x4ef   :  { %10686 = vmatprep.subr.bf16.mxu0 %v15059_v25  ;;  %11178 = vmatprep.subr.bf16.mxu1 %v15061_v42  ;;  %v1097_v25 = vld [vmem:[%s22791_s1 + $0x20b0] sm:$0xff]  ;;  %v1094_v42 = vld [vmem:[%s22791_s1 + $0x2098] sm:$0xff] }
 0x4f0   :  { %v15115_v18 = vcombine.high %v1093_v41, %v1097_v25  ;;  %v15114_v39 = vcombine.low %v1093_v41, %v1097_v25  ;;  %v15116_v23 = vcombine.low %v1094_v42, %v1098_v44  ;;  %v1141_v37 = vld [vmem:[%s22791_s1 + $0x2210] sm:$0xff] }
 0x4f2   :  { %10687 = vmatpush1.bf16.msra.mxu0 %v15058_v52  ;;  %11179 = vmatpush1.bf16.msra.mxu1 %v15060_v56  ;;  %v15117_v52 = vcombine.high %v1094_v42, %v1098_v44  ;;  %v1101_v56 = vld [vmem:[%s22791_s1 + $0x20d0] sm:$0xff] }
 0x4f3   :  { %10688 = vmatprep.subr.bf16.mxu0 %v15067_v48  ;;  %11180 = vmatprep.subr.bf16.mxu1 %v15069_v61  ;;  %v1105_v48 = vld [vmem:[%s22791_s1 + $0x20f0] sm:$0xff]  ;;  %v1106_v61 = vld [vmem:[%s22791_s1 + $0x20f8] sm:$0xff] }
 0x4f4   :  { %v15123_v58 = vcombine.high %v1101_v56, %v1105_v48  ;;  %v1149_v44 = vld [vmem:[%s22791_s1 + $0x2250] sm:$0xff] }
 0x4f6   :  { %10689 = vmatpush1.bf16.msra.mxu0 %v15066_v8  ;;  %11181 = vmatpush1.bf16.msra.mxu1 %v15068_v10  ;;  %v1109_v8 = vld [vmem:[%s22791_s1 + $0x2110] sm:$0xff] }
 0x4f7   :  { %10690 = vmatprep.subr.bf16.mxu0 %v15075_v54  ;;  %11182 = vmatprep.subr.bf16.mxu1 %v15077_v11  ;;  %v1113_v10 = vld [vmem:[%s22791_s1 + $0x2130] sm:$0xff]  ;;  %v1114_v54 = vld [vmem:[%s22791_s1 + $0x2138] sm:$0xff]  ;;  %v15122_v11 = vcombine.low %v1101_v56, %v1105_v48 }
 0x4f8   :  { %v15131_v16 = vcombine.high %v1109_v8, %v1113_v10 }
 0x4fa   :  { %10691 = vmatpush1.bf16.msra.mxu0 %v15074_v53  ;;  %11183 = vmatpush1.bf16.msra.mxu1 %v15076_v20  ;;  %v1121_v53 = vld [vmem:[%s22791_s1 + $0x2170] sm:$0xff]  ;;  %v1118_v20 = vld [vmem:[%s22791_s1 + $0x2158] sm:$0xff] }
 0x4fb   :  { %10692 = vmatprep.subr.bf16.mxu0 %v15083_v36  ;;  %11184 = vmatprep.subr.bf16.mxu1 %v15085_v59  ;;  %v1122_v36 = vld [vmem:[%s22791_s1 + $0x2178] sm:$0xff]  ;;  %v15130_v59 = vcombine.low %v1109_v8, %v1113_v10  ;;  %v15139_v27 = vcombine.high %v1117_v17, %v1121_v53 }
 0x4fc   :  { %v15141_v55 = vcombine.high %v1118_v20, %v1122_v36  ;;  %v15140_v19 = vcombine.low %v1118_v20, %v1122_v36  ;;  %v1173_v36 = vld [vmem:[%s22791_s1 + $0x2310] sm:$0xff] }
 0x4fe   :  { %10693 = vmatpush1.bf16.msra.mxu0 %v15082_v49  ;;  %11185 = vmatpush1.bf16.msra.mxu1 %v15084_v15  ;;  %v1129_v49 = vld [vmem:[%s22791_s1 + $0x21b0] sm:$0xff]  ;;  %v1126_v15 = vld [vmem:[%s22791_s1 + $0x2198] sm:$0xff] }
 0x4ff   :  { %10694 = vmatprep.subr.bf16.mxu0 %v15091_v28  ;;  %11186 = vmatprep.subr.bf16.mxu1 %v15093_v29  ;;  %v1130_v28 = vld [vmem:[%s22791_s1 + $0x21b8] sm:$0xff]  ;;  %v15138_v29 = vcombine.low %v1117_v17, %v1121_v53  ;;  %v15147_v45 = vcombine.high %v1125_v26, %v1129_v49 }
 0x500   :  { %v15149_v22 = vcombine.high %v1126_v15, %v1130_v28  ;;  %v15148_v30 = vcombine.low %v1126_v15, %v1130_v28  ;;  %v1181_v28 = vld [vmem:[%s22791_s1 + $0x2350] sm:$0xff] }
 0x502   :  { %10695 = vmatpush1.bf16.msra.mxu0 %v15090_v32  ;;  %11187 = vmatpush1.bf16.msra.mxu1 %v15092_v12  ;;  %v1137_v32 = vld [vmem:[%s22791_s1 + $0x21f0] sm:$0xff]  ;;  %v1134_v12 = vld [vmem:[%s22791_s1 + $0x21d8] sm:$0xff] }
 0x503   :  { %10705 = vmatprep.subr.bf16.mxu0 %v15099_v33  ;;  %11197 = vmatprep.subr.bf16.mxu1 %v15101_v34  ;;  %v1138_v33 = vld [vmem:[%s22791_s1 + $0x21f8] sm:$0xff]  ;;  %v15146_v34 = vcombine.low %v1125_v26, %v1129_v49  ;;  %v15155_v35 = vcombine.high %v1133_v1, %v1137_v32 }
 0x504   :  { %v15157_v57 = vcombine.high %v1134_v12, %v1138_v33  ;;  %v15156_v41 = vcombine.low %v1134_v12, %v1138_v33  ;;  %v1189_v33 = vld [vmem:[%s22791_s1 + $0x2390] sm:$0xff] }
 0x505   :  { %10697 = vmatmul.mubr.bf16.vlgmr.msra.gmra.mrb[4].mxu0 %v18500_v63  ;;  %11189 = vmatmul.mubr.bf16.vlgmr.msra.gmra.mrb[4].mxu1 %v18500_v63  ;;  %v1102_v63 = vld [vmem:[%s22791_s1 + $0x20d8] sm:$0xff] }
 0x506   :  { %10706 = vmatpush1.bf16.msra.mxu0 %v15098_v31  ;;  %11198 = vmatpush1.bf16.msra.mxu1 %v15100_v38  ;;  %v15125_v6 = vcombine.high %v1102_v63, %v1106_v61  ;;  %v15124_v13 = vcombine.low %v1102_v63, %v1106_v61  ;;  %v1145_v31 = vld [vmem:[%s22791_s1 + $0x2230] sm:$0xff]  ;;  %v1142_v38 = vld [vmem:[%s22791_s1 + $0x2218] sm:$0xff] }
 0x507   :  { %10707 = vmatprep.subr.bf16.mxu0 %v15107_v40  ;;  %11199 = vmatprep.subr.bf16.mxu1 %v15109_v21  ;;  %v1146_v40 = vld [vmem:[%s22791_s1 + $0x2238] sm:$0xff]  ;;  %v15154_v21 = vcombine.low %v1133_v1, %v1137_v32  ;;  %v15163_v25 = vcombine.high %v1141_v37, %v1145_v31  ;;  %v1157_v61 = vld [vmem:[%s22791_s1 + $0x2290] sm:$0xff] }
 0x508   :  { %10737 = vmatprep.mubr.bf16.mxu0 %v18521_v9  ;;  %11229 = vmatprep.mubr.bf16.mxu1 %v18521_v9  ;;  %v1110_v9 = vld [vmem:[%s22791_s1 + $0x2118] sm:$0xff]  ;;  %v15165_v42 = vcombine.high %v1142_v38, %v1146_v40  ;;  %v15164_v56 = vcombine.low %v1142_v38, %v1146_v40  ;;  %v1197_v40 = vld [vmem:[%s22791_s1 + $0x23d0] sm:$0xff] }
 0x509   :  { %v15133_v14 = vcombine.high %v1110_v9, %v1114_v54  ;;  %v15132_v24 = vcombine.low %v1110_v9, %v1114_v54  ;;  %v1165_v54 = vld [vmem:[%s22791_s1 + $0x22d0] sm:$0xff] }
 0x50a   :  { %10708 = vmatpush1.bf16.msra.mxu0 %v15106_v47  ;;  %11200 = vmatpush1.bf16.msra.mxu1 %v15108_v46  ;;  %v1153_v47 = vld [vmem:[%s22791_s1 + $0x2270] sm:$0xff]  ;;  %v1150_v46 = vld [vmem:[%s22791_s1 + $0x2258] sm:$0xff] }
 0x50b   :  { %10709 = vmatprep.subr.bf16.mxu0 %v15115_v18  ;;  %11201 = vmatprep.subr.bf16.mxu1 %v15117_v52  ;;  %v1154_v18 = vld [vmem:[%s22791_s1 + $0x2278] sm:$0xff]  ;;  %v15162_v52 = vcombine.low %v1141_v37, %v1145_v31  ;;  %v15171_v48 = vcombine.high %v1149_v44, %v1153_v47 }
 0x50c   :  { %v15173_v63 = vcombine.high %v1150_v46, %v1154_v18  ;;  %v15172_v8 = vcombine.low %v1150_v46, %v1154_v18  ;;  %v1205_v18 = vld [vmem:[%s22791_s1 + $0x2410] sm:$0xff] }
 0x50e   :  { %10710 = vmatpush1.bf16.msra.mxu0 %v15114_v39  ;;  %11202 = vmatpush1.bf16.msra.mxu1 %v15116_v23  ;;  %v1161_v39 = vld [vmem:[%s22791_s1 + $0x22b0] sm:$0xff]  ;;  %v1158_v23 = vld [vmem:[%s22791_s1 + $0x2298] sm:$0xff] }
 0x50f   :  { %10711 = vmatprep.subr.bf16.mxu0 %v15123_v58  ;;  %11203 = vmatprep.subr.bf16.mxu1 %v15125_v6  ;;  %v1162_v58 = vld [vmem:[%s22791_s1 + $0x22b8] sm:$0xff]  ;;  %v15170_v6 = vcombine.low %v1149_v44, %v1153_v47  ;;  %v15179_v10 = vcombine.high %v1157_v61, %v1161_v39 }
 0x510   :  { %v15181_v9 = vcombine.high %v1158_v23, %v1162_v58  ;;  %v15180_v17 = vcombine.low %v1158_v23, %v1162_v58  ;;  %v1213_v58 = vld [vmem:[%s22791_s1 + $0x2450] sm:$0xff] }
 0x512   :  { %10712 = vmatpush1.bf16.msra.mxu0 %v15122_v11  ;;  %11204 = vmatpush1.bf16.msra.mxu1 %v15124_v13  ;;  %v1169_v11 = vld [vmem:[%s22791_s1 + $0x22f0] sm:$0xff]  ;;  %v1166_v13 = vld [vmem:[%s22791_s1 + $0x22d8] sm:$0xff] }
 0x513   :  { %10713 = vmatprep.subr.bf16.mxu0 %v15131_v16  ;;  %11205 = vmatprep.subr.bf16.mxu1 %v15133_v14  ;;  %v1170_v16 = vld [vmem:[%s22791_s1 + $0x22f8] sm:$0xff]  ;;  %v15178_v14 = vcombine.low %v1157_v61, %v1161_v39  ;;  %v15187_v53 = vcombine.high %v1165_v54, %v1169_v11 }
 0x514   :  { %v15189_v20 = vcombine.high %v1166_v13, %v1170_v16  ;;  %v15188_v26 = vcombine.low %v1166_v13, %v1170_v16  ;;  %v1221_v16 = vld [vmem:[%s22791_s1 + $0x2490] sm:$0xff] }
 0x516   :  { %10714 = vmatpush1.bf16.msra.mxu0 %v15130_v59  ;;  %11206 = vmatpush1.bf16.msra.mxu1 %v15132_v24  ;;  %v1177_v59 = vld [vmem:[%s22791_s1 + $0x2330] sm:$0xff]  ;;  %v1174_v24 = vld [vmem:[%s22791_s1 + $0x2318] sm:$0xff] }
 0x517   :  { %10715 = vmatprep.subr.bf16.mxu0 %v15139_v27  ;;  %11207 = vmatprep.subr.bf16.mxu1 %v15141_v55  ;;  %v1178_v27 = vld [vmem:[%s22791_s1 + $0x2338] sm:$0xff]  ;;  %v15186_v55 = vcombine.low %v1165_v54, %v1169_v11  ;;  %v15195_v49 = vcombine.high %v1173_v36, %v1177_v59 }
 0x518   :  { %v15197_v15 = vcombine.high %v1174_v24, %v1178_v27  ;;  %v15196_v1 = vcombine.low %v1174_v24, %v1178_v27  ;;  %v1229_v27 = vld [vmem:[%s22791_s1 + $0x24d0] sm:$0xff] }
 0x51a   :  { %10716 = vmatpush1.bf16.msra.mxu0 %v15138_v29  ;;  %11208 = vmatpush1.bf16.msra.mxu1 %v15140_v19  ;;  %v1185_v29 = vld [vmem:[%s22791_s1 + $0x2370] sm:$0xff]  ;;  %v1182_v19 = vld [vmem:[%s22791_s1 + $0x2358] sm:$0xff] }
 0x51b   :  { %10717 = vmatprep.subr.bf16.mxu0 %v15147_v45  ;;  %11209 = vmatprep.subr.bf16.mxu1 %v15149_v22  ;;  %v1186_v45 = vld [vmem:[%s22791_s1 + $0x2378] sm:$0xff]  ;;  %v15194_v22 = vcombine.low %v1173_v36, %v1177_v59  ;;  %v15203_v32 = vcombine.high %v1181_v28, %v1185_v29 }
 0x51c   :  { %v15205_v12 = vcombine.high %v1182_v19, %v1186_v45  ;;  %v15204_v37 = vcombine.low %v1182_v19, %v1186_v45  ;;  %v1237_v19 = vld [vmem:[%s22791_s1 + $0x2510] sm:$0xff] }
 0x51d   :  { %v1241_v45 = vld [vmem:[%s22791_s1 + $0x2530] sm:$0xff] }
 0x51e   :  { %10718 = vmatpush1.bf16.msra.mxu0 %v15146_v34  ;;  %11210 = vmatpush1.bf16.msra.mxu1 %v15148_v30  ;;  %v1193_v34 = vld [vmem:[%s22791_s1 + $0x23b0] sm:$0xff]  ;;  %v1190_v30 = vld [vmem:[%s22791_s1 + $0x2398] sm:$0xff] }
 0x51f   :  { %10719 = vmatprep.subr.bf16.mxu0 %v15155_v35  ;;  %11211 = vmatprep.subr.bf16.mxu1 %v15157_v57  ;;  %v1194_v35 = vld [vmem:[%s22791_s1 + $0x23b8] sm:$0xff]  ;;  %v15202_v57 = vcombine.low %v1181_v28, %v1185_v29  ;;  %v15211_v31 = vcombine.high %v1189_v33, %v1193_v34 }
 0x520   :  { %v15213_v38 = vcombine.high %v1190_v30, %v1194_v35  ;;  %v15212_v44 = vcombine.low %v1190_v30, %v1194_v35  ;;  %v1249_v30 = vld [vmem:[%s22791_s1 + $0x2570] sm:$0xff]  ;;  %v1246_v35 = vld [vmem:[%s22791_s1 + $0x2558] sm:$0xff] }
 0x522   :  { %10720 = vmatpush1.bf16.msra.mxu0 %v15154_v21  ;;  %11212 = vmatpush1.bf16.msra.mxu1 %v15156_v41  ;;  %v1201_v21 = vld [vmem:[%s22791_s1 + $0x23f0] sm:$0xff]  ;;  %v1198_v41 = vld [vmem:[%s22791_s1 + $0x23d8] sm:$0xff] }
 0x523   :  { %10721 = vmatprep.subr.bf16.mxu0 %v15163_v25  ;;  %11213 = vmatprep.subr.bf16.mxu1 %v15165_v42  ;;  %v1202_v25 = vld [vmem:[%s22791_s1 + $0x23f8] sm:$0xff]  ;;  %v15210_v42 = vcombine.low %v1189_v33, %v1193_v34  ;;  %v15219_v47 = vcombine.high %v1197_v40, %v1201_v21  ;;  %v1245_v34 = vld [vmem:[%s22791_s1 + $0x2550] sm:$0xff] }
 0x524   :  { %v15221_v46 = vcombine.high %v1198_v41, %v1202_v25  ;;  %v15220_v61 = vcombine.low %v1198_v41, %v1202_v25  ;;  %v1257_v41 = vld [vmem:[%s22791_s1 + $0x25b0] sm:$0xff]  ;;  %v1254_v25 = vld [vmem:[%s22791_s1 + $0x2598] sm:$0xff] }
 0x526   :  { %10722 = vmatpush1.bf16.msra.mxu0 %v15162_v52  ;;  %11214 = vmatpush1.bf16.msra.mxu1 %v15164_v56  ;;  %v1209_v52 = vld [vmem:[%s22791_s1 + $0x2430] sm:$0xff]  ;;  %v1206_v56 = vld [vmem:[%s22791_s1 + $0x2418] sm:$0xff] }
 0x527   :  { %10723 = vmatprep.subr.bf16.mxu0 %v15171_v48  ;;  %11215 = vmatprep.subr.bf16.mxu1 %v15173_v63  ;;  %v1210_v48 = vld [vmem:[%s22791_s1 + $0x2438] sm:$0xff]  ;;  %v15218_v63 = vcombine.low %v1197_v40, %v1201_v21  ;;  %v15227_v39 = vcombine.high %v1205_v18, %v1209_v52  ;;  %v1253_v21 = vld [vmem:[%s22791_s1 + $0x2590] sm:$0xff] }
 0x528   :  { %v15229_v23 = vcombine.high %v1206_v56, %v1210_v48  ;;  %v15228_v54 = vcombine.low %v1206_v56, %v1210_v48  ;;  %v1265_v56 = vld [vmem:[%s22791_s1 + $0x25f0] sm:$0xff]  ;;  %v1262_v48 = vld [vmem:[%s22791_s1 + $0x25d8] sm:$0xff] }
 0x52a   :  { %10724 = vmatpush1.bf16.msra.mxu0 %v15170_v6  ;;  %11216 = vmatpush1.bf16.msra.mxu1 %v15172_v8  ;;  %v1217_v6 = vld [vmem:[%s22791_s1 + $0x2470] sm:$0xff]  ;;  %v1214_v8 = vld [vmem:[%s22791_s1 + $0x2458] sm:$0xff] }
 0x52b   :  { %10725 = vmatprep.subr.bf16.mxu0 %v15179_v10  ;;  %11217 = vmatprep.subr.bf16.mxu1 %v15181_v9  ;;  %v1218_v10 = vld [vmem:[%s22791_s1 + $0x2478] sm:$0xff]  ;;  %v15226_v9 = vcombine.low %v1205_v18, %v1209_v52  ;;  %v15235_v11 = vcombine.high %v1213_v58, %v1217_v6  ;;  %v1261_v52 = vld [vmem:[%s22791_s1 + $0x25d0] sm:$0xff] }
 0x52c   :  { %v15237_v13 = vcombine.high %v1214_v8, %v1218_v10  ;;  %v15236_v36 = vcombine.low %v1214_v8, %v1218_v10  ;;  %v1273_v8 = vld [vmem:[%s22791_s1 + $0x2630] sm:$0xff]  ;;  %v1270_v10 = vld [vmem:[%s22791_s1 + $0x2618] sm:$0xff] }
 0x52e   :  { %10726 = vmatpush1.bf16.msra.mxu0 %v15178_v14  ;;  %11218 = vmatpush1.bf16.msra.mxu1 %v15180_v17  ;;  %v1225_v14 = vld [vmem:[%s22791_s1 + $0x24b0] sm:$0xff]  ;;  %v1222_v17 = vld [vmem:[%s22791_s1 + $0x2498] sm:$0xff] }
 0x52f   :  { %10727 = vmatprep.subr.bf16.mxu0 %v15187_v53  ;;  %11219 = vmatprep.subr.bf16.mxu1 %v15189_v20  ;;  %v1226_v53 = vld [vmem:[%s22791_s1 + $0x24b8] sm:$0xff]  ;;  %v15234_v20 = vcombine.low %v1213_v58, %v1217_v6  ;;  %v15243_v59 = vcombine.high %v1221_v16, %v1225_v14  ;;  %v1269_v6 = vld [vmem:[%s22791_s1 + $0x2610] sm:$0xff] }
 0x530   :  { %v15245_v24 = vcombine.high %v1222_v17, %v1226_v53 }
 0x532   :  { %10728 = vmatpush1.bf16.msra.mxu0 %v15186_v55  ;;  %11220 = vmatpush1.bf16.msra.mxu1 %v15188_v26  ;;  %v1233_v55 = vld [vmem:[%s22791_s1 + $0x24f0] sm:$0xff]  ;;  %v1234_v26 = vld [vmem:[%s22791_s1 + $0x24f8] sm:$0xff] }
 0x533   :  { %10729 = vmatprep.subr.bf16.mxu0 %v15195_v49  ;;  %11221 = vmatprep.subr.bf16.mxu1 %v15197_v15  ;;  %v15242_v49 = vcombine.low %v1221_v16, %v1225_v14  ;;  %v15244_v15 = vcombine.low %v1222_v17, %v1226_v53  ;;  %v15251_v28 = vcombine.high %v1229_v27, %v1233_v55  ;;  %v1277_v14 = vld [vmem:[%s22791_s1 + $0x2650] sm:$0xff]  ;;  %v1278_v53 = vld [vmem:[%s22791_s1 + $0x2658] sm:$0xff] }
 0x534   :  { %v1281_v17 = vld [vmem:[%s22791_s1 + $0x2670] sm:$0xff] }
 0x536   :  { %10730 = vmatpush1.bf16.msra.mxu0 %v15194_v22  ;;  %11222 = vmatpush1.bf16.msra.mxu1 %v15196_v1  ;;  %v1242_v22 = vld [vmem:[%s22791_s1 + $0x2538] sm:$0xff]  ;;  %v15250_v1 = vcombine.low %v1229_v27, %v1233_v55  ;;  %v1285_v55 = vld [vmem:[%s22791_s1 + $0x2690] sm:$0xff] }
 0x537   :  { %10731 = vmatprep.subr.bf16.mxu0 %v15203_v32  ;;  %11223 = vmatprep.subr.bf16.mxu1 %v15205_v12  ;;  %v15259_v12 = vcombine.high %v1237_v19, %v1241_v45 }
 0x53a   :  { %10732 = vmatpush1.bf16.msra.mxu0 %v15202_v57  ;;  %11224 = vmatpush1.bf16.msra.mxu1 %v15204_v37  ;;  %v1250_v57 = vld [vmem:[%s22791_s1 + $0x2578] sm:$0xff]  ;;  %v15258_v37 = vcombine.low %v1237_v19, %v1241_v45  ;;  %v1293_v45 = vld [vmem:[%s22791_s1 + $0x26d0] sm:$0xff] }
 0x53b   :  { %10733 = vmatprep.subr.bf16.mxu0 %v15211_v31  ;;  %11225 = vmatprep.subr.bf16.mxu1 %v15213_v38  ;;  %v15267_v38 = vcombine.high %v1245_v34, %v1249_v30  ;;  %v15269_v40 = vcombine.high %v1246_v35, %v1250_v57 }
 0x53e   :  { %10734 = vmatpush1.bf16.msra.mxu0 %v15210_v42  ;;  %11226 = vmatpush1.bf16.msra.mxu1 %v15212_v44  ;;  %v1258_v42 = vld [vmem:[%s22791_s1 + $0x25b8] sm:$0xff]  ;;  %v15266_v44 = vcombine.low %v1245_v34, %v1249_v30  ;;  %v1301_v30 = vld [vmem:[%s22791_s1 + $0x2710] sm:$0xff] }
 0x53f   :  { %10735 = vmatprep.subr.bf16.mxu0 %v15219_v47  ;;  %11227 = vmatprep.subr.bf16.mxu1 %v15221_v46  ;;  %v15268_v47 = vcombine.low %v1246_v35, %v1250_v57  ;;  %v15275_v46 = vcombine.high %v1253_v21, %v1257_v41  ;;  %v15277_v18 = vcombine.high %v1254_v25, %v1258_v42  ;;  %v1305_v35 = vld [vmem:[%s22791_s1 + $0x2730] sm:$0xff]  ;;  %v1302_v57 = vld [vmem:[%s22791_s1 + $0x2718] sm:$0xff] }
 0x542   :  { %10736 = vmatpush1.bf16.msra.mxu0 %v15218_v63  ;;  %11228 = vmatpush1.bf16.msra.mxu1 %v15220_v61  ;;  %v1266_v63 = vld [vmem:[%s22791_s1 + $0x25f8] sm:$0xff]  ;;  %v15274_v61 = vcombine.low %v1253_v21, %v1257_v41  ;;  %v1309_v41 = vld [vmem:[%s22791_s1 + $0x2750] sm:$0xff] }
 0x543   :  { %10746 = vmatprep.subr.bf16.mxu0 %v15227_v39  ;;  %11238 = vmatprep.subr.bf16.mxu1 %v15229_v23  ;;  %v15276_v39 = vcombine.low %v1254_v25, %v1258_v42  ;;  %v15283_v23 = vcombine.high %v1261_v52, %v1265_v56  ;;  %v15285_v58 = vcombine.high %v1262_v48, %v1266_v63  ;;  %v1313_v25 = vld [vmem:[%s22791_s1 + $0x2770] sm:$0xff]  ;;  %v1310_v42 = vld [vmem:[%s22791_s1 + $0x2758] sm:$0xff] }
 0x545   :  { %10738 = vmatmul.mubr.bf16.vlgmr.msra.gmra.mrb[4].mxu0 %v18709_v50  ;;  %11230 = vmatmul.mubr.bf16.vlgmr.msra.gmra.mrb[4].mxu1 %v18709_v50  ;;  %v1230_v50 = vld [vmem:[%s22791_s1 + $0x24d8] sm:$0xff] }
 0x546   :  { %10747 = vmatpush1.bf16.msra.mxu0 %v15226_v9  ;;  %11239 = vmatpush1.bf16.msra.mxu1 %v15228_v54  ;;  %v15253_v29 = vcombine.high %v1230_v50, %v1234_v26  ;;  %v15252_v32 = vcombine.low %v1230_v50, %v1234_v26  ;;  %v1274_v9 = vld [vmem:[%s22791_s1 + $0x2638] sm:$0xff]  ;;  %v15282_v54 = vcombine.low %v1261_v52, %v1265_v56  ;;  %v1289_v50 = vld [vmem:[%s22791_s1 + $0x26b0] sm:$0xff] }
 0x547   :  { %10748 = vmatprep.subr.bf16.mxu0 %v15235_v11  ;;  %11240 = vmatprep.subr.bf16.mxu1 %v15237_v13  ;;  %v15284_v11 = vcombine.low %v1262_v48, %v1266_v63  ;;  %v15291_v13 = vcombine.high %v1269_v6, %v1273_v8  ;;  %v15293_v16 = vcombine.high %v1270_v10, %v1274_v9  ;;  %v1286_v26 = vld [vmem:[%s22791_s1 + $0x2698] sm:$0xff]  ;;  %v1317_v56 = vld [vmem:[%s22791_s1 + $0x2790] sm:$0xff] }
 0x548   :  { %10778 = vmatprep.mubr.bf16.mxu0 %v18730_v62  ;;  %11270 = vmatprep.mubr.bf16.mxu1 %v18730_v62  ;;  %v1238_v62 = vld [vmem:[%s22791_s1 + $0x2518] sm:$0xff]  ;;  %v1321_v48 = vld [vmem:[%s22791_s1 + $0x27b0] sm:$0xff] }
 0x549   :  { %v15261_v33 = vcombine.high %v1238_v62, %v1242_v22  ;;  %v15260_v31 = vcombine.low %v1238_v62, %v1242_v22  ;;  %v1297_v62 = vld [vmem:[%s22791_s1 + $0x26f0] sm:$0xff]  ;;  %v1294_v22 = vld [vmem:[%s22791_s1 + $0x26d8] sm:$0xff] }
 0x54a   :  { %10749 = vmatpush1.bf16.msra.mxu0 %v15234_v20  ;;  %11241 = vmatpush1.bf16.msra.mxu1 %v15236_v36  ;;  %v1282_v20 = vld [vmem:[%s22791_s1 + $0x2678] sm:$0xff]  ;;  %v15290_v36 = vcombine.low %v1269_v6, %v1273_v8  ;;  %v1325_v8 = vld [vmem:[%s22791_s1 + $0x27d0] sm:$0xff] }
 0x54b   :  { %10750 = vmatprep.subr.bf16.mxu0 %v15243_v59  ;;  %11242 = vmatprep.subr.bf16.mxu1 %v15245_v24  ;;  %v15292_v59 = vcombine.low %v1270_v10, %v1274_v9  ;;  %v15299_v24 = vcombine.high %v1277_v14, %v1281_v17  ;;  %v15301_v27 = vcombine.high %v1278_v53, %v1282_v20  ;;  %v1318_v63 = vld [vmem:[%s22791_s1 + $0x2798] sm:$0xff]  ;;  %v1329_v10 = vld [vmem:[%s22791_s1 + $0x27f0] sm:$0xff] }
 0x54c   :  { %v1326_v9 = vld [vmem:[%s22791_s1 + $0x27d8] sm:$0xff] }
 0x54e   :  { %10751 = vmatpush1.bf16.msra.mxu0 %v15242_v49  ;;  %11243 = vmatpush1.bf16.msra.mxu1 %v15244_v15  ;;  %v1290_v49 = vld [vmem:[%s22791_s1 + $0x26b8] sm:$0xff]  ;;  %v15298_v15 = vcombine.low %v1277_v14, %v1281_v17  ;;  %v1333_v17 = vld [vmem:[%s22791_s1 + $0x2810] sm:$0xff] }
 0x54f   :  { %10752 = vmatprep.subr.bf16.mxu0 %v15251_v28  ;;  %11244 = vmatprep.subr.bf16.mxu1 %v15253_v29  ;;  %v15300_v28 = vcombine.low %v1278_v53, %v1282_v20  ;;  %v15307_v29 = vcombine.high %v1285_v55, %v1289_v50  ;;  %v15309_v19 = vcombine.high %v1286_v26, %v1290_v49  ;;  %v1337_v53 = vld [vmem:[%s22791_s1 + $0x2830] sm:$0xff]  ;;  %v1334_v20 = vld [vmem:[%s22791_s1 + $0x2818] sm:$0xff] }
 0x552   :  { %10753 = vmatpush1.bf16.msra.mxu0 %v15250_v1  ;;  %11245 = vmatpush1.bf16.msra.mxu1 %v15252_v32  ;;  %v1298_v1 = vld [vmem:[%s22791_s1 + $0x26f8] sm:$0xff]  ;;  %v15306_v32 = vcombine.low %v1285_v55, %v1289_v50  ;;  %v1341_v50 = vld [vmem:[%s22791_s1 + $0x2850] sm:$0xff] }
 0x553   :  { %10754 = vmatprep.subr.bf16.mxu0 %v15259_v12  ;;  %11246 = vmatprep.subr.bf16.mxu1 %v15261_v33  ;;  %v15308_v12 = vcombine.low %v1286_v26, %v1290_v49  ;;  %v15315_v33 = vcombine.high %v1293_v45, %v1297_v62  ;;  %v15317_v34 = vcombine.high %v1294_v22, %v1298_v1  ;;  %v1345_v26 = vld [vmem:[%s22791_s1 + $0x2870] sm:$0xff]  ;;  %v1342_v49 = vld [vmem:[%s22791_s1 + $0x2858] sm:$0xff] }
 0x556   :  { %10755 = vmatpush1.bf16.msra.mxu0 %v15258_v37  ;;  %11247 = vmatpush1.bf16.msra.mxu1 %v15260_v31  ;;  %v1306_v37 = vld [vmem:[%s22791_s1 + $0x2738] sm:$0xff]  ;;  %v15314_v31 = vcombine.low %v1293_v45, %v1297_v62  ;;  %v1349_v45 = vld [vmem:[%s22791_s1 + $0x2890] sm:$0xff] }
 0x557   :  { %10756 = vmatprep.subr.bf16.mxu0 %v15267_v38  ;;  %11248 = vmatprep.subr.bf16.mxu1 %v15269_v40  ;;  %v15316_v38 = vcombine.low %v1294_v22, %v1298_v1  ;;  %v15323_v40 = vcombine.high %v1301_v30, %v1305_v35  ;;  %v15325_v21 = vcombine.high %v1302_v57, %v1306_v37  ;;  %v1353_v62 = vld [vmem:[%s22791_s1 + $0x28b0] sm:$0xff]  ;;  %v1350_v1 = vld [vmem:[%s22791_s1 + $0x2898] sm:$0xff] }
 0x55a   :  { %10757 = vmatpush1.bf16.msra.mxu0 %v15266_v44  ;;  %11249 = vmatpush1.bf16.msra.mxu1 %v15268_v47  ;;  %v1314_v44 = vld [vmem:[%s22791_s1 + $0x2778] sm:$0xff]  ;;  %v15322_v47 = vcombine.low %v1301_v30, %v1305_v35  ;;  %v1357_v35 = vld [vmem:[%s22791_s1 + $0x28d0] sm:$0xff] }
 0x55b   :  { %10758 = vmatprep.subr.bf16.mxu0 %v15275_v46  ;;  %11250 = vmatprep.subr.bf16.mxu1 %v15277_v18  ;;  %v15324_v46 = vcombine.low %v1302_v57, %v1306_v37  ;;  %v15331_v18 = vcombine.high %v1309_v41, %v1313_v25  ;;  %v15333_v52 = vcombine.high %v1310_v42, %v1314_v44  ;;  %v1361_v57 = vld [vmem:[%s22791_s1 + $0x28f0] sm:$0xff]  ;;  %v1358_v37 = vld [vmem:[%s22791_s1 + $0x28d8] sm:$0xff] }
 0x55e   :  { %10759 = vmatpush1.bf16.msra.mxu0 %v15274_v61  ;;  %11251 = vmatpush1.bf16.msra.mxu1 %v15276_v39  ;;  %v1322_v61 = vld [vmem:[%s22791_s1 + $0x27b8] sm:$0xff]  ;;  %v15330_v39 = vcombine.low %v1309_v41, %v1313_v25  ;;  %v1369_v41 = vld [vmem:[%s22791_s1 + $0x2930] sm:$0xff] }
 0x55f   :  { %10760 = vmatprep.subr.bf16.mxu0 %v15283_v23  ;;  %11252 = vmatprep.subr.bf16.mxu1 %v15285_v58  ;;  %v15332_v23 = vcombine.low %v1310_v42, %v1314_v44  ;;  %v15339_v58 = vcombine.high %v1317_v56, %v1321_v48  ;;  %v15341_v6 = vcombine.high %v1318_v63, %v1322_v61  ;;  %v1366_v25 = vld [vmem:[%s22791_s1 + $0x2918] sm:$0xff] }
 0x560   :  { %v1370_v42 = vld [vmem:[%s22791_s1 + $0x2938] sm:$0xff]  ;;  %v15378_v44 = vcombine.low %v1357_v35, %v1361_v57 }
 0x562   :  { %10761 = vmatpush1.bf16.msra.mxu0 %v15282_v54  ;;  %11253 = vmatpush1.bf16.msra.mxu1 %v15284_v11  ;;  %v1330_v54 = vld [vmem:[%s22791_s1 + $0x27f8] sm:$0xff]  ;;  %v15338_v11 = vcombine.low %v1317_v56, %v1321_v48  ;;  %v15389_v48 = vcombine.high %v1366_v25, %v1370_v42 }
 0x563   :  { %10762 = vmatprep.subr.bf16.mxu0 %v15291_v13  ;;  %11254 = vmatprep.subr.bf16.mxu1 %v15293_v16  ;;  %v15340_v13 = vcombine.low %v1318_v63, %v1322_v61  ;;  %v15347_v16 = vcombine.high %v1325_v8, %v1329_v10  ;;  %v15349_v14 = vcombine.high %v1326_v9, %v1330_v54  ;;  %v1374_v56 = vld [vmem:[%s22791_s1 + $0x2958] sm:$0xff] }
 0x564   :  { %v1378_v63 = vld [vmem:[%s22791_s1 + $0x2978] sm:$0xff] }
 0x566   :  { %10763 = vmatpush1.bf16.msra.mxu0 %v15290_v36  ;;  %11255 = vmatpush1.bf16.msra.mxu1 %v15292_v59  ;;  %v1338_v36 = vld [vmem:[%s22791_s1 + $0x2838] sm:$0xff]  ;;  %v15346_v59 = vcombine.low %v1325_v8, %v1329_v10  ;;  %v15397_v10 = vcombine.high %v1374_v56, %v1378_v63 }
 0x567   :  { %10764 = vmatprep.subr.bf16.mxu0 %v15299_v24  ;;  %11256 = vmatprep.subr.bf16.mxu1 %v15301_v27  ;;  %v15348_v24 = vcombine.low %v1326_v9, %v1330_v54  ;;  %v15355_v27 = vcombine.high %v1333_v17, %v1337_v53  ;;  %v15357_v55 = vcombine.high %v1334_v20, %v1338_v36  ;;  %v1382_v8 = vld [vmem:[%s22791_s1 + $0x2998] sm:$0xff] }
 0x568   :  { %v1386_v9 = vld [vmem:[%s22791_s1 + $0x29b8] sm:$0xff] }
 0x56a   :  { %10765 = vmatpush1.bf16.msra.mxu0 %v15298_v15  ;;  %11257 = vmatpush1.bf16.msra.mxu1 %v15300_v28  ;;  %v1346_v15 = vld [vmem:[%s22791_s1 + $0x2878] sm:$0xff]  ;;  %v15354_v28 = vcombine.low %v1333_v17, %v1337_v53  ;;  %v15405_v53 = vcombine.high %v1382_v8, %v1386_v9 }
 0x56b   :  { %10766 = vmatprep.subr.bf16.mxu0 %v15307_v29  ;;  %11258 = vmatprep.subr.bf16.mxu1 %v15309_v19  ;;  %v15356_v29 = vcombine.low %v1334_v20, %v1338_v36  ;;  %v15363_v19 = vcombine.high %v1341_v50, %v1345_v26  ;;  %v15365_v22 = vcombine.high %v1342_v49, %v1346_v15  ;;  %v1390_v17 = vld [vmem:[%s22791_s1 + $0x29d8] sm:$0xff] }
 0x56c   :  { %v1394_v20 = vld [vmem:[%s22791_s1 + $0x29f8] sm:$0xff] }
 0x56e   :  { %10767 = vmatpush1.bf16.msra.mxu0 %v15306_v32  ;;  %11259 = vmatpush1.bf16.msra.mxu1 %v15308_v12  ;;  %v1354_v32 = vld [vmem:[%s22791_s1 + $0x28b8] sm:$0xff]  ;;  %v15362_v12 = vcombine.low %v1341_v50, %v1345_v26  ;;  %v15413_v26 = vcombine.high %v1390_v17, %v1394_v20 }
 0x56f   :  { %10768 = vmatprep.subr.bf16.mxu0 %v15315_v33  ;;  %11260 = vmatprep.subr.bf16.mxu1 %v15317_v34  ;;  %v15364_v33 = vcombine.low %v1342_v49, %v1346_v15  ;;  %v15371_v34 = vcombine.high %v1349_v45, %v1353_v62  ;;  %v15373_v30 = vcombine.high %v1350_v1, %v1354_v32  ;;  %v1398_v50 = vld [vmem:[%s22791_s1 + $0x2a18] sm:$0xff] }
 0x570   :  { %v1402_v49 = vld [vmem:[%s22791_s1 + $0x2a38] sm:$0xff] }
 0x572   :  { %10769 = vmatpush1.bf16.msra.mxu0 %v15314_v31  ;;  %11261 = vmatpush1.bf16.msra.mxu1 %v15316_v38  ;;  %v15370_v31 = vcombine.low %v1349_v45, %v1353_v62  ;;  %v15372_v38 = vcombine.low %v1350_v1, %v1354_v32  ;;  %v1409_v45 = vld [vmem:[%s22791_s1 + $0x2a70] sm:$0xff]  ;;  %v1406_v62 = vld [vmem:[%s22791_s1 + $0x2a58] sm:$0xff] }
 0x573   :  { %10770 = vmatprep.subr.bf16.mxu0 %v15323_v40  ;;  %11262 = vmatprep.subr.bf16.mxu1 %v15325_v21  ;;  %v15379_v40 = vcombine.high %v1357_v35, %v1361_v57  ;;  %v1365_v21 = vld [vmem:[%s22791_s1 + $0x2910] sm:$0xff]  ;;  %v1410_v1 = vld [vmem:[%s22791_s1 + $0x2a78] sm:$0xff] }
 0x574   :  { %v15386_v61 = vcombine.low %v1365_v21, %v1369_v41  ;;  %v1414_v35 = vld [vmem:[%s22791_s1 + $0x2a98] sm:$0xff]  ;;  %v15429_v57 = vcombine.high %v1406_v62, %v1410_v1 }
 0x576   :  { %10771 = vmatpush1.bf16.msra.mxu0 %v15322_v47  ;;  %11263 = vmatpush1.bf16.msra.mxu1 %v15324_v46  ;;  %v15387_v46 = vcombine.high %v1365_v21, %v1369_v41  ;;  %v1425_v21 = vld [vmem:[%s22791_s1 + $0x2af0] sm:$0xff]  ;;  %v1422_v41 = vld [vmem:[%s22791_s1 + $0x2ad8] sm:$0xff] }
 0x577   :  { %10772 = vmatprep.subr.bf16.mxu0 %v15331_v18  ;;  %11264 = vmatprep.subr.bf16.mxu1 %v15333_v52  ;;  %v1373_v18 = vld [vmem:[%s22791_s1 + $0x2950] sm:$0xff] }
 0x578   :  { %v1377_v52 = vld [vmem:[%s22791_s1 + $0x2970] sm:$0xff] }
 0x579   :  { %v15394_v54 = vcombine.low %v1373_v18, %v1377_v52 }
 0x57a   :  { %10773 = vmatpush1.bf16.msra.mxu0 %v15330_v39  ;;  %11265 = vmatpush1.bf16.msra.mxu1 %v15332_v23  ;;  %v15388_v39 = vcombine.low %v1366_v25, %v1370_v42  ;;  %v15395_v23 = vcombine.high %v1373_v18, %v1377_v52  ;;  %v1433_v18 = vld [vmem:[%s22791_s1 + $0x2b30] sm:$0xff]  ;;  %v1430_v52 = vld [vmem:[%s22791_s1 + $0x2b18] sm:$0xff] }
 0x57b   :  { %10774 = vmatprep.subr.bf16.mxu0 %v15339_v58  ;;  %11266 = vmatprep.subr.bf16.mxu1 %v15341_v6  ;;  %v1381_v58 = vld [vmem:[%s22791_s1 + $0x2990] sm:$0xff] }
 0x57c   :  { %v1385_v6 = vld [vmem:[%s22791_s1 + $0x29b0] sm:$0xff] }
 0x57d   :  { %v15402_v36 = vcombine.low %v1381_v58, %v1385_v6 }
 0x57e   :  { %10775 = vmatpush1.bf16.msra.mxu0 %v15338_v11  ;;  %11267 = vmatpush1.bf16.msra.mxu1 %v15340_v13  ;;  %v15396_v11 = vcombine.low %v1374_v56, %v1378_v63  ;;  %v15403_v13 = vcombine.high %v1381_v58, %v1385_v6  ;;  %v1441_v58 = vld [vmem:[%s22791_s1 + $0x2b70] sm:$0xff]  ;;  %v1438_v6 = vld [vmem:[%s22791_s1 + $0x2b58] sm:$0xff] }
 0x57f   :  { %10776 = vmatprep.subr.bf16.mxu0 %v15347_v16  ;;  %11268 = vmatprep.subr.bf16.mxu1 %v15349_v14  ;;  %v1389_v16 = vld [vmem:[%s22791_s1 + $0x29d0] sm:$0xff] }
 0x580   :  { %v1393_v14 = vld [vmem:[%s22791_s1 + $0x29f0] sm:$0xff] }
 0x581   :  { %v15410_v15 = vcombine.low %v1389_v16, %v1393_v14 }
 0x582   :  { %10777 = vmatpush1.bf16.msra.mxu0 %v15346_v59  ;;  %11269 = vmatpush1.bf16.msra.mxu1 %v15348_v24  ;;  %v15404_v59 = vcombine.low %v1382_v8, %v1386_v9  ;;  %v15411_v24 = vcombine.high %v1389_v16, %v1393_v14  ;;  %v1449_v16 = vld [vmem:[%s22791_s1 + $0x2bb0] sm:$0xff]  ;;  %v1446_v14 = vld [vmem:[%s22791_s1 + $0x2b98] sm:$0xff] }
 0x583   :  { %10787 = vmatprep.subr.bf16.mxu0 %v15355_v27  ;;  %11279 = vmatprep.subr.bf16.mxu1 %v15357_v55  ;;  %v1397_v27 = vld [vmem:[%s22791_s1 + $0x2a10] sm:$0xff] }
 0x584   :  { %v1401_v55 = vld [vmem:[%s22791_s1 + $0x2a30] sm:$0xff] }
 0x585   :  { %10779 = vmatmul.mubr.bf16.vlgmr.msra.gmra.mrb[4].mxu0 %v18918_v43  ;;  %11271 = vmatmul.mubr.bf16.vlgmr.msra.gmra.mrb[4].mxu1 %v18918_v43  ;;  %v1362_v43 = vld [vmem:[%s22791_s1 + $0x28f8] sm:$0xff]  ;;  %v15418_v32 = vcombine.low %v1397_v27, %v1401_v55 }
 0x586   :  { %10788 = vmatpush1.bf16.msra.mxu0 %v15354_v28  ;;  %11280 = vmatpush1.bf16.msra.mxu1 %v15356_v29  ;;  %v15380_v47 = vcombine.low %v1358_v37, %v1362_v43  ;;  %v15412_v28 = vcombine.low %v1390_v17, %v1394_v20  ;;  %v15419_v29 = vcombine.high %v1397_v27, %v1401_v55  ;;  %v1457_v27 = vld [vmem:[%s22791_s1 + $0x2bf0] sm:$0xff]  ;;  %v1454_v55 = vld [vmem:[%s22791_s1 + $0x2bd8] sm:$0xff] }
 0x587   :  { %10789 = vmatprep.subr.bf16.mxu0 %v15363_v19  ;;  %11281 = vmatprep.subr.bf16.mxu1 %v15365_v22  ;;  %v1405_v19 = vld [vmem:[%s22791_s1 + $0x2a50] sm:$0xff]  ;;  %v15421_v22 = vcombine.high %v1398_v50, %v1402_v49 }
 0x588   :  { %10819 = vmatprep.mubr.bf16.mxu0 %v18939_v60  ;;  %11311 = vmatprep.mubr.bf16.mxu1 %v18939_v60  ;;  %v15381_v60 = vcombine.high %v1358_v37, %v1362_v43  ;;  %v1418_v37 = vld [vmem:[%s22791_s1 + $0x2ab8] sm:$0xff]  ;;  %v15426_v43 = vcombine.low %v1405_v19, %v1409_v45 }
 0x589   :  { %v15437_v25 = vcombine.high %v1414_v35, %v1418_v37 }
 0x58a   :  { %10790 = vmatpush1.bf16.msra.mxu0 %v15362_v12  ;;  %11282 = vmatpush1.bf16.msra.mxu1 %v15364_v33  ;;  %v15420_v12 = vcombine.low %v1398_v50, %v1402_v49  ;;  %v15427_v33 = vcombine.high %v1405_v19, %v1409_v45  ;;  %v1465_v19 = vld [vmem:[%s22791_s1 + $0x2c30] sm:$0xff]  ;;  %v1462_v45 = vld [vmem:[%s22791_s1 + $0x2c18] sm:$0xff] }
 0x58b   :  { %10791 = vmatprep.subr.bf16.mxu0 %v15371_v34  ;;  %11283 = vmatprep.subr.bf16.mxu1 %v15373_v30  ;;  %v1413_v34 = vld [vmem:[%s22791_s1 + $0x2a90] sm:$0xff] }
 0x58c   :  { %v1417_v30 = vld [vmem:[%s22791_s1 + $0x2ab0] sm:$0xff] }
 0x58d   :  { %v15434_v42 = vcombine.low %v1413_v34, %v1417_v30 }
 0x58e   :  { %10792 = vmatpush1.bf16.msra.mxu0 %v15370_v31  ;;  %11284 = vmatpush1.bf16.msra.mxu1 %v15372_v38  ;;  %v15428_v31 = vcombine.low %v1406_v62, %v1410_v1  ;;  %v15435_v38 = vcombine.high %v1413_v34, %v1417_v30  ;;  %v1473_v34 = vld [vmem:[%s22791_s1 + $0x2c70] sm:$0xff]  ;;  %v1470_v30 = vld [vmem:[%s22791_s1 + $0x2c58] sm:$0xff] }
 0x58f   :  { %10793 = vmatprep.subr.bf16.mxu0 %v15379_v40  ;;  %11285 = vmatprep.subr.bf16.mxu1 %v15381_v60  ;;  %v1421_v40 = vld [vmem:[%s22791_s1 + $0x2ad0] sm:$0xff]  ;;  %v1426_v60 = vld [vmem:[%s22791_s1 + $0x2af8] sm:$0xff] }
 0x590   :  { %v15445_v56 = vcombine.high %v1422_v41, %v1426_v60  ;;  %v15442_v63 = vcombine.low %v1421_v40, %v1425_v21 }
 0x592   :  { %10794 = vmatpush1.bf16.msra.mxu0 %v15378_v44  ;;  %11286 = vmatpush1.bf16.msra.mxu1 %v15380_v47  ;;  %v15436_v44 = vcombine.low %v1414_v35, %v1418_v37  ;;  %v15443_v47 = vcombine.high %v1421_v40, %v1425_v21 }
 0x593   :  { %10795 = vmatprep.subr.bf16.mxu0 %v15387_v46  ;;  %11287 = vmatprep.subr.bf16.mxu1 %v15389_v48  ;;  %v1429_v46 = vld [vmem:[%s22791_s1 + $0x2b10] sm:$0xff]  ;;  %v1434_v48 = vld [vmem:[%s22791_s1 + $0x2b38] sm:$0xff] }
 0x594   :  { %v15453_v8 = vcombine.high %v1430_v52, %v1434_v48  ;;  %v15450_v9 = vcombine.low %v1429_v46, %v1433_v18 }
 0x596   :  { %10796 = vmatpush1.bf16.msra.mxu0 %v15386_v61  ;;  %11288 = vmatpush1.bf16.msra.mxu1 %v15388_v39  ;;  %v15444_v61 = vcombine.low %v1422_v41, %v1426_v60  ;;  %v15451_v39 = vcombine.high %v1429_v46, %v1433_v18  ;;  %v1478_v41 = vld [vmem:[%s22791_s1 + $0x2c98] sm:$0xff]  ;;  %v1485_v46 = vld [vmem:[%s22791_s1 + $0x2cd0] sm:$0xff] }
 0x597   :  { %10797 = vmatprep.subr.bf16.mxu0 %v15395_v23  ;;  %11289 = vmatprep.subr.bf16.mxu1 %v15397_v10  ;;  %v1437_v23 = vld [vmem:[%s22791_s1 + $0x2b50] sm:$0xff]  ;;  %v1442_v10 = vld [vmem:[%s22791_s1 + $0x2b78] sm:$0xff] }
 0x598   :  { %v15461_v17 = vcombine.high %v1438_v6, %v1442_v10  ;;  %v15458_v20 = vcombine.low %v1437_v23, %v1441_v58  ;;  %v1489_v18 = vld [vmem:[%s22791_s1 + $0x2cf0] sm:$0xff] }
 0x59a   :  { %10798 = vmatpush1.bf16.msra.mxu0 %v15394_v54  ;;  %11290 = vmatpush1.bf16.msra.mxu1 %v15396_v11  ;;  %v15452_v54 = vcombine.low %v1430_v52, %v1434_v48  ;;  %v15459_v11 = vcombine.high %v1437_v23, %v1441_v58  ;;  %v1486_v52 = vld [vmem:[%s22791_s1 + $0x2cd8] sm:$0xff] }
 0x59b   :  { %10799 = vmatprep.subr.bf16.mxu0 %v15403_v13  ;;  %11291 = vmatprep.subr.bf16.mxu1 %v15405_v53  ;;  %v1445_v13 = vld [vmem:[%s22791_s1 + $0x2b90] sm:$0xff]  ;;  %v1450_v53 = vld [vmem:[%s22791_s1 + $0x2bb8] sm:$0xff] }
 0x59c   :  { %v15469_v50 = vcombine.high %v1446_v14, %v1450_v53  ;;  %v15466_v49 = vcombine.low %v1445_v13, %v1449_v16  ;;  %v1494_v23 = vld [vmem:[%s22791_s1 + $0x2d18] sm:$0xff] }
 0x59d   :  { %v1498_v58 = vld [vmem:[%s22791_s1 + $0x2d38] sm:$0xff] }
 0x59e   :  { %10800 = vmatpush1.bf16.msra.mxu0 %v15402_v36  ;;  %11292 = vmatpush1.bf16.msra.mxu1 %v15404_v59  ;;  %v15460_v36 = vcombine.low %v1438_v6, %v1442_v10  ;;  %v15467_v59 = vcombine.high %v1445_v13, %v1449_v16  ;;  %v15506_v6 = vcombine.low %v1485_v46, %v1489_v18  ;;  %v1506_v16 = vld [vmem:[%s22791_s1 + $0x2d78] sm:$0xff] }
 0x59f   :  { %10801 = vmatprep.subr.bf16.mxu0 %v15411_v24  ;;  %11293 = vmatprep.subr.bf16.mxu1 %v15413_v26  ;;  %v1453_v24 = vld [vmem:[%s22791_s1 + $0x2bd0] sm:$0xff]  ;;  %v1458_v26 = vld [vmem:[%s22791_s1 + $0x2bf8] sm:$0xff]  ;;  %v15517_v13 = vcombine.high %v1494_v23, %v1498_v58 }
 0x5a0   :  { %v15477_v62 = vcombine.high %v1454_v55, %v1458_v26  ;;  %v15474_v1 = vcombine.low %v1453_v24, %v1457_v27 }
 0x5a2   :  { %10802 = vmatpush1.bf16.msra.mxu0 %v15410_v15  ;;  %11294 = vmatpush1.bf16.msra.mxu1 %v15412_v28  ;;  %v15468_v15 = vcombine.low %v1446_v14, %v1450_v53  ;;  %v15475_v28 = vcombine.high %v1453_v24, %v1457_v27  ;;  %v1514_v27 = vld [vmem:[%s22791_s1 + $0x2db8] sm:$0xff] }
 0x5a3   :  { %10803 = vmatprep.subr.bf16.mxu0 %v15419_v29  ;;  %11295 = vmatprep.subr.bf16.mxu1 %v15421_v22  ;;  %v1461_v29 = vld [vmem:[%s22791_s1 + $0x2c10] sm:$0xff]  ;;  %v1466_v22 = vld [vmem:[%s22791_s1 + $0x2c38] sm:$0xff] }
 0x5a4   :  { %v15485_v35 = vcombine.high %v1462_v45, %v1466_v22  ;;  %v15482_v37 = vcombine.low %v1461_v29, %v1465_v19 }
 0x5a6   :  { %10804 = vmatpush1.bf16.msra.mxu0 %v15418_v32  ;;  %11296 = vmatpush1.bf16.msra.mxu1 %v15420_v12  ;;  %v15476_v32 = vcombine.low %v1454_v55, %v1458_v26  ;;  %v15483_v12 = vcombine.high %v1461_v29, %v1465_v19  ;;  %v1522_v19 = vld [vmem:[%s22791_s1 + $0x2df8] sm:$0xff] }
 0x5a7   :  { %10805 = vmatprep.subr.bf16.mxu0 %v15427_v33  ;;  %11297 = vmatprep.subr.bf16.mxu1 %v15429_v57  ;;  %v1469_v33 = vld [vmem:[%s22791_s1 + $0x2c50] sm:$0xff]  ;;  %v1474_v57 = vld [vmem:[%s22791_s1 + $0x2c78] sm:$0xff] }
 0x5a8   :  { %v15491_v40 = vcombine.high %v1469_v33, %v1473_v34  ;;  %v15493_v21 = vcombine.high %v1470_v30, %v1474_v57  ;;  %v15490_v60 = vcombine.low %v1469_v33, %v1473_v34  ;;  %v1530_v34 = vld [vmem:[%s22791_s1 + $0x2e38] sm:$0xff] }
 0x5aa   :  { %10806 = vmatpush1.bf16.msra.mxu0 %v15426_v43  ;;  %11298 = vmatpush1.bf16.msra.mxu1 %v15428_v31  ;;  %v1477_v43 = vld [vmem:[%s22791_s1 + $0x2c90] sm:$0xff] }
 0x5ab   :  { %10807 = vmatprep.subr.bf16.mxu0 %v15435_v38  ;;  %11299 = vmatprep.subr.bf16.mxu1 %v15437_v25  ;;  %v1481_v31 = vld [vmem:[%s22791_s1 + $0x2cb0] sm:$0xff]  ;;  %v15484_v38 = vcombine.low %v1462_v45, %v1466_v22  ;;  %v1482_v25 = vld [vmem:[%s22791_s1 + $0x2cb8] sm:$0xff] }
 0x5ac   :  { %v15500_v48 = vcombine.low %v1478_v41, %v1482_v25 }
 0x5ae   :  { %10808 = vmatpush1.bf16.msra.mxu0 %v15434_v42  ;;  %11300 = vmatpush1.bf16.msra.mxu1 %v15436_v44  ;;  %v15492_v42 = vcombine.low %v1470_v30, %v1474_v57  ;;  %v15499_v44 = vcombine.high %v1477_v43, %v1481_v31 }
 0x5af   :  { %10809 = vmatprep.subr.bf16.mxu0 %v15443_v47  ;;  %11301 = vmatprep.subr.bf16.mxu1 %v15445_v56  ;;  %v15501_v47 = vcombine.high %v1478_v41, %v1482_v25  ;;  %v15498_v56 = vcombine.low %v1477_v43, %v1481_v31  ;;  %v1537_v43 = vld [vmem:[%s22791_s1 + $0x2e70] sm:$0xff]  ;;  %v1534_v31 = vld [vmem:[%s22791_s1 + $0x2e58] sm:$0xff] }
 0x5b2   :  { %10810 = vmatpush1.bf16.msra.mxu0 %v15442_v63  ;;  %11302 = vmatpush1.bf16.msra.mxu1 %v15444_v61  ;;  %v15507_v63 = vcombine.high %v1485_v46, %v1489_v18  ;;  %v1493_v61 = vld [vmem:[%s22791_s1 + $0x2d10] sm:$0xff]  ;;  %v1546_v46 = vld [vmem:[%s22791_s1 + $0x2eb8] sm:$0xff] }
 0x5b3   :  { %10811 = vmatprep.subr.bf16.mxu0 %v15451_v39  ;;  %11303 = vmatprep.subr.bf16.mxu1 %v15453_v8  ;;  %v1497_v39 = vld [vmem:[%s22791_s1 + $0x2d30] sm:$0xff] }
 0x5b4   :  { %v15515_v10 = vcombine.high %v1493_v61, %v1497_v39  ;;  %v15514_v14 = vcombine.low %v1493_v61, %v1497_v39  ;;  %v1554_v39 = vld [vmem:[%s22791_s1 + $0x2ef8] sm:$0xff] }
 0x5b6   :  { %10812 = vmatpush1.bf16.msra.mxu0 %v15450_v9  ;;  %11304 = vmatpush1.bf16.msra.mxu1 %v15452_v54  ;;  %v1501_v9 = vld [vmem:[%s22791_s1 + $0x2d50] sm:$0xff] }
 0x5b7   :  { %10813 = vmatprep.subr.bf16.mxu0 %v15459_v11  ;;  %11305 = vmatprep.subr.bf16.mxu1 %v15461_v17  ;;  %v1505_v54 = vld [vmem:[%s22791_s1 + $0x2d70] sm:$0xff]  ;;  %v1502_v11 = vld [vmem:[%s22791_s1 + $0x2d58] sm:$0xff]  ;;  %v15516_v17 = vcombine.low %v1494_v23, %v1498_v58 }
 0x5b8   :  { %v15523_v53 = vcombine.high %v1501_v9, %v1505_v54  ;;  %v15525_v24 = vcombine.high %v1502_v11, %v1506_v16  ;;  %v15522_v55 = vcombine.low %v1501_v9, %v1505_v54  ;;  %v1562_v54 = vld [vmem:[%s22791_s1 + $0x2f38] sm:$0xff] }
 0x5ba   :  { %10814 = vmatpush1.bf16.msra.mxu0 %v15458_v20  ;;  %11306 = vmatpush1.bf16.msra.mxu1 %v15460_v36  ;;  %v1509_v20 = vld [vmem:[%s22791_s1 + $0x2d90] sm:$0xff] }
 0x5bb   :  { %10815 = vmatprep.subr.bf16.mxu0 %v15467_v59  ;;  %11307 = vmatprep.subr.bf16.mxu1 %v15469_v50  ;;  %v1513_v36 = vld [vmem:[%s22791_s1 + $0x2db0] sm:$0xff]  ;;  %v1510_v59 = vld [vmem:[%s22791_s1 + $0x2d98] sm:$0xff]  ;;  %v15524_v50 = vcombine.low %v1502_v11, %v1506_v16  ;;  %v1589_v11 = vlaneseq }
 0x5bc   :  { %v15531_v26 = vcombine.high %v1509_v20, %v1513_v36  ;;  %v15533_v29 = vcombine.high %v1510_v59, %v1514_v27  ;;  %v15530_v45 = vcombine.low %v1509_v20, %v1513_v36  ;;  %v1566_v20 = vld [vmem:[%s22791_s1 + $0x2f58] sm:$0xff] }
 0x5be   :  { %10816 = vmatpush1.bf16.msra.mxu0 %v15466_v49  ;;  %11308 = vmatpush1.bf16.msra.mxu1 %v15468_v15  ;;  %v1517_v49 = vld [vmem:[%s22791_s1 + $0x2dd0] sm:$0xff] }
 0x5bf   :  { %10817 = vmatprep.subr.bf16.mxu0 %v15475_v28  ;;  %11309 = vmatprep.subr.bf16.mxu1 %v15477_v62  ;;  %v1521_v15 = vld [vmem:[%s22791_s1 + $0x2df0] sm:$0xff]  ;;  %v1518_v28 = vld [vmem:[%s22791_s1 + $0x2dd8] sm:$0xff]  ;;  %v15532_v62 = vcombine.low %v1510_v59, %v1514_v27 }
 0x5c0   :  { %v15539_v22 = vcombine.high %v1517_v49, %v1521_v15  ;;  %v15541_v33 = vcombine.high %v1518_v28, %v1522_v19  ;;  %v15538_v30 = vcombine.low %v1517_v49, %v1521_v15  ;;  %v1570_v59 = vld [vmem:[%s22791_s1 + $0x2f78] sm:$0xff]  ;;  %v1577_v49 = vld [vmem:[%s22791_s1 + $0x2fb0] sm:$0xff] }
 0x5c1   :  { %v1574_v15 = vld [vmem:[%s22791_s1 + $0x2f98] sm:$0xff] }
 0x5c2   :  { %10818 = vmatpush1.bf16.msra.mxu0 %v15474_v1  ;;  %11310 = vmatpush1.bf16.msra.mxu1 %v15476_v32  ;;  %v1525_v1 = vld [vmem:[%s22791_s1 + $0x2e10] sm:$0xff] }
 0x5c3   :  { %10828 = vmatprep.subr.bf16.mxu0 %v15483_v12  ;;  %11320 = vmatprep.subr.bf16.mxu1 %v15485_v35  ;;  %v1529_v32 = vld [vmem:[%s22791_s1 + $0x2e30] sm:$0xff]  ;;  %v1526_v12 = vld [vmem:[%s22791_s1 + $0x2e18] sm:$0xff]  ;;  %v15540_v35 = vcombine.low %v1518_v28, %v1522_v19  ;;  %v21670_v28 = vld [vmem:[%s22794_s2] sm:$0xff] }
 0x5c4   :  { %v15547_v57 = vcombine.high %v1525_v1, %v1529_v32  ;;  %v15548_v41 = vcombine.low %v1526_v12, %v1530_v34  ;;  %v1578_v19 = vld [vmem:[%s22791_s1 + $0x2fb8] sm:$0xff] }
 0x5c5   :  { %10820 = vmatmul.mubr.bf16.vlgmr.msra.gmra.mrb[4].mxu0 %v19127_v51  ;;  %11312 = vmatmul.mubr.bf16.vlgmr.msra.gmra.mrb[4].mxu1 %v19127_v51  ;;  %v1490_v51 = vld [vmem:[%s22791_s1 + $0x2cf8] sm:$0xff] }
 0x5c6   :  { %10829 = vmatpush1.bf16.msra.mxu0 %v15482_v37  ;;  %11321 = vmatpush1.bf16.msra.mxu1 %v15484_v38  ;;  %v15508_v8 = vcombine.low %v1486_v52, %v1490_v51  ;;  %v1533_v37 = vld [vmem:[%s22791_s1 + $0x2e50] sm:$0xff]  ;;  %v15549_v38 = vcombine.high %v1526_v12, %v1530_v34  ;;  %v15597_v34 = vcombine.high %v1574_v15, %v1578_v19 }
 0x5c7   :  { %10830 = vmatprep.subr.bf16.mxu0 %v15491_v40  ;;  %11322 = vmatprep.subr.bf16.mxu1 %v15493_v21  ;;  %v1538_v40 = vld [vmem:[%s22791_s1 + $0x2e78] sm:$0xff]  ;;  %v15546_v21 = vcombine.low %v1525_v1, %v1529_v32  ;;  %v15555_v25 = vcombine.high %v1533_v37, %v1537_v43  ;;  %v15554_v18 = vcombine.low %v1533_v37, %v1537_v43  ;;  %v1581_v32 = vld [vmem:[%s22791_s1 + $0x2fd0] sm:$0xff] }
 0x5c8   :  { %10860 = vmatprep.mubr.bf16.mxu0 %v19148_v2  ;;  %11352 = vmatprep.mubr.bf16.mxu1 %v19148_v2  ;;  %v15509_v2 = vcombine.high %v1486_v52, %v1490_v51  ;;  %v15556_v52 = vcombine.low %v1534_v31, %v1538_v40  ;;  %v1585_v12 = vld [vmem:[%s22791_s1 + $0x2ff0] sm:$0xff]  ;;  %v15596_v37 = vcombine.low %v1574_v15, %v1578_v19  ;;  %v16306_v15 = vld [vmem:[%s22793_s3 + $0x12c] ss:$16 sps:$4 sm:$0xff]   ;;  %v16304_v19 = vld [vmem:[%s22793_s3 + $0x128] ss:$16 sps:$4 sm:$0xff]  }
 0x5c9   :  { %v15603_v43 = vcombine.high %v1581_v32, %v1585_v12 }
 0x5ca   :  { %10831 = vmatpush1.bf16.msra.mxu0 %v15490_v60  ;;  %11323 = vmatpush1.bf16.msra.mxu1 %v15492_v42  ;;  %v1541_v60 = vld [vmem:[%s22791_s1 + $0x2e90] sm:$0xff] }
 0x5cb   :  { %10832 = vmatprep.subr.bf16.mxu0 %v15499_v44  ;;  %11324 = vmatprep.subr.bf16.mxu1 %v15501_v47  ;;  %v1545_v42 = vld [vmem:[%s22791_s1 + $0x2eb0] sm:$0xff]  ;;  %v1542_v44 = vld [vmem:[%s22791_s1 + $0x2e98] sm:$0xff]  ;;  %v15557_v47 = vcombine.high %v1534_v31, %v1538_v40  ;;  %v15602_v40 = vcombine.low %v1581_v32, %v1585_v12 }
 0x5cc   :  { %v15563_v51 = vcombine.high %v1541_v60, %v1545_v42  ;;  %v15565_v61 = vcombine.high %v1542_v44, %v1546_v46  ;;  %v15562_v23 = vcombine.low %v1541_v60, %v1545_v42  ;;  %v16252_v60 = vld [vmem:[%s22793_s3 + $0xc] ss:$16 sps:$4 sm:$0xff]   ;;  %v16310_v32 = vld [vmem:[%s22793_s3 + $0x148] ss:$16 sps:$4 sm:$0xff]   ;;  %v16315_v12 = vld [vmem:[%s22793_s3 + $0x164] ss:$16 sps:$4 sm:$0xff]  }
 0x5ce   :  { %10833 = vmatpush1.bf16.msra.mxu0 %v15498_v56  ;;  %11325 = vmatpush1.bf16.msra.mxu1 %v15500_v48  ;;  %v1549_v56 = vld [vmem:[%s22791_s1 + $0x2ed0] sm:$0xff] }
 0x5cf   :  { %10834 = vmatprep.subr.bf16.mxu0 %v15507_v63  ;;  %11326 = vmatprep.subr.bf16.mxu1 %v15509_v2  ;;  %v1553_v48 = vld [vmem:[%s22791_s1 + $0x2ef0] sm:$0xff]  ;;  %v1550_v63 = vld [vmem:[%s22791_s1 + $0x2ed8] sm:$0xff]  ;;  %v15564_v2 = vcombine.low %v1542_v44, %v1546_v46 }
 0x5d0   :  { %v15571_v58 = vcombine.high %v1549_v56, %v1553_v48  ;;  %v15573_v9 = vcombine.high %v1550_v63, %v1554_v39  ;;  %v15572_v16 = vcombine.low %v1550_v63, %v1554_v39  ;;  %v16255_v44 = vld [vmem:[%s22793_s3 + $0x24] ss:$16 sps:$4 sm:$0xff]   ;;  %v16258_v46 = vld [vmem:[%s22793_s3 + $0x2c] ss:$16 sps:$4 sm:$0xff]   ;;  %v16265_v39 = vld [vmem:[%s22793_s3 + $0x60] ss:$16 sps:$4 sm:$0xff]  }
 0x5d1   :  { %v16267_v63 = vld [vmem:[%s22793_s3 + $0x64] ss:$16 sps:$4 sm:$0xff]  }
 0x5d2   :  { %10835 = vmatpush1.bf16.msra.mxu0 %v15506_v6  ;;  %11327 = vmatpush1.bf16.msra.mxu1 %v15508_v8  ;;  %v1557_v6 = vld [vmem:[%s22791_s1 + $0x2f10] sm:$0xff] }
 0x5d3   :  { %10836 = vmatprep.subr.bf16.mxu0 %v15515_v10  ;;  %11328 = vmatprep.subr.bf16.mxu1 %v15517_v13  ;;  %v1561_v8 = vld [vmem:[%s22791_s1 + $0x2f30] sm:$0xff]  ;;  %v1558_v10 = vld [vmem:[%s22791_s1 + $0x2f18] sm:$0xff]  ;;  %v15570_v13 = vcombine.low %v1549_v56, %v1553_v48 }
 0x5d4   :  { %v15581_v36 = vcombine.high %v1558_v10, %v1562_v54  ;;  %v15578_v27 = vcombine.low %v1557_v6, %v1561_v8  ;;  %v16259_v56 = vld [vmem:[%s22793_s3 + $0x40] ss:$16 sps:$4 sm:$0xff]   ;;  %v16262_v48 = vld [vmem:[%s22793_s3 + $0x48] ss:$16 sps:$4 sm:$0xff]  }
 0x5d6   :  { %10837 = vmatpush1.bf16.msra.mxu0 %v15514_v14  ;;  %11329 = vmatpush1.bf16.msra.mxu1 %v15516_v17  ;;  %v15579_v14 = vcombine.high %v1557_v6, %v1561_v8  ;;  %v1565_v17 = vld [vmem:[%s22791_s1 + $0x2f50] sm:$0xff]  ;;  %v16274_v8 = vld [vmem:[%s22793_s3 + $0x88] ss:$16 sps:$4 sm:$0xff]  }
 0x5d7   :  { %10838 = vmatprep.subr.bf16.mxu0 %v15523_v53  ;;  %11330 = vmatprep.subr.bf16.mxu1 %v15525_v24  ;;  %v1569_v53 = vld [vmem:[%s22791_s1 + $0x2f70] sm:$0xff]  ;;  %v21656_v24 = vshrl.u32 %v1589_v11, 7  ;;  %v16280_v11 = vld [vmem:[%s22793_s3 + $0xa8] ss:$16 sps:$4 sm:$0xff]  }
 0x5d8   :  { %v16271_v6 = vld [vmem:[%s22793_s3 + $0x80] ss:$16 sps:$4 sm:$0xff]  }
 0x5da   :  { %10839 = vmatpush1.bf16.msra.mxu0 %v15522_v55  ;;  %11331 = vmatpush1.bf16.msra.mxu1 %v15524_v50  ;;  %v15580_v55 = vcombine.low %v1558_v10, %v1562_v54  ;;  %v15587_v50 = vcombine.high %v1565_v17, %v1569_v53  ;;  %v16279_v10 = vld [vmem:[%s22793_s3 + $0xa4] ss:$16 sps:$4 sm:$0xff]   ;;  %v16277_v54 = vld [vmem:[%s22793_s3 + $0xa0] ss:$16 sps:$4 sm:$0xff]  }
 0x5db   :  { %10840 = vmatprep.subr.bf16.mxu0 %v15531_v26  ;;  %11332 = vmatprep.subr.bf16.mxu1 %v15533_v29  ;;  %v1573_v26 = vld [vmem:[%s22791_s1 + $0x2f90] sm:$0xff]  ;;  %v15589_v29 = vcombine.high %v1566_v20, %v1570_v59 }
 0x5dc   :  { %v15595_v1 = vcombine.high %v1573_v26, %v1577_v49 }
 0x5de   :  { %10841 = vmatpush1.bf16.msra.mxu0 %v15530_v45  ;;  %11333 = vmatpush1.bf16.msra.mxu1 %v15532_v62  ;;  %v21676_v45 = vsub.s32 1, %v21656_v24  ;;  %v15586_v62 = vcombine.low %v1565_v17, %v1569_v53  ;;  %v16286_v17 = vld [vmem:[%s22793_s3 + $0xc8] ss:$16 sps:$4 sm:$0xff]   ;;  %v16291_v53 = vld [vmem:[%s22793_s3 + $0xe4] ss:$16 sps:$4 sm:$0xff]  }
 0x5df   :  { %10842 = vmatprep.subr.bf16.mxu0 %v15539_v22  ;;  %11334 = vmatprep.subr.bf16.mxu1 %v15541_v33  ;;  %v15588_v22 = vcombine.low %v1566_v20, %v1570_v59  ;;  %v1582_v33 = vld [vmem:[%s22791_s1 + $0x2fd8] sm:$0xff] }
 0x5e0   :  { %v16294_v20 = vld [vmem:[%s22793_s3 + $0xec] ss:$16 sps:$4 sm:$0xff]   ;;  %v16292_v59 = vld [vmem:[%s22793_s3 + $0xe8] ss:$16 sps:$4 sm:$0xff]  }
 0x5e2   :  { %10843 = vmatpush1.bf16.msra.mxu0 %v15538_v30  ;;  %11335 = vmatpush1.bf16.msra.mxu1 %v15540_v35  ;;  %v1586_v30 = vld [vmem:[%s22791_s1 + $0x2ff8] sm:$0xff]  ;;  %v1596_v35 = vrot.slane %v21670_v28, %v21676_v45 }
 0x5e3   :  { %10844 = vmatprep.subr.bf16.mxu0 %v15547_v57  ;;  %11336 = vmatprep.subr.bf16.mxu1 %v15549_v38  ;;  %v15594_v57 = vcombine.low %v1573_v26, %v1577_v49  ;;  %v15605_v31 = vcombine.high %v1582_v33, %v1586_v30  ;;  %v16298_v26 = vld [vmem:[%s22793_s3 + $0x108] ss:$16 sps:$4 sm:$0xff]   ;;  %v16303_v49 = vld [vmem:[%s22793_s3 + $0x124] ss:$16 sps:$4 sm:$0xff]  }
 0x5e4   :  { %v16004_v38 = vadd.f32 %v20006_v5, %v1596_v35  ;;  %v16250_v5 = vld [vmem:[%s22793_s3 + $0x8] ss:$16 sps:$4 sm:$0xff]   ;;  %v16321_v35 = vld [vmem:[%s22793_s3 + $0x184] ss:$16 sps:$4 sm:$0xff]  }
 0x5e6   :  { %10845 = vmatpush1.bf16.msra.mxu0 %v15546_v21  ;;  %11337 = vmatpush1.bf16.msra.mxu1 %v15548_v41  ;;  %v15604_v21 = vcombine.low %v1582_v33, %v1586_v30  ;;  %v16249_v41 = vld [vmem:[%s22793_s3 + $0x4] ss:$16 sps:$4 sm:$0xff]   ;;  %v11362_v42 = vmax.f32 %v16004_v38, 0.0  ;;  %v16318_v33 = vld [vmem:[%s22793_s3 + $0x16c] ss:$16 sps:$4 sm:$0xff]  }
 0x5e7   :  { %10846 = vmatprep.subr.bf16.mxu0 %v15555_v25  ;;  %11338 = vmatprep.subr.bf16.mxu1 %v15557_v47  ;;  %v16247_v25 = vld [vmem:[%s22793_s3] ss:$16 sps:$4 sm:$0xff]   ;;  %v16316_v30 = vld [vmem:[%s22793_s3 + $0x168] ss:$16 sps:$4 sm:$0xff]   ;;  %v16327_v38 = vld [vmem:[%s22793_s3 + $0x1a4] ss:$16 sps:$4 sm:$0xff]  }
 0x5e8   :  { %v11370_v47 = vpack.c.bf16 %v11362_v42, %v11362_v42  ;;  %v16333_v42 = vld [vmem:[%s22793_s3 + $0x1c4] ss:$16 sps:$4 sm:$0xff]  }
 0x5ea   :  { %10847 = vmatpush1.bf16.msra.mxu0 %v15554_v18  ;;  %11339 = vmatpush1.bf16.msra.mxu1 %v15556_v52  ;;  %v16253_v18 = vld [vmem:[%s22793_s3 + $0x20] ss:$16 sps:$4 sm:$0xff]   ;;  %v16256_v52 = vld [vmem:[%s22793_s3 + $0x28] ss:$16 sps:$4 sm:$0xff]  }
 0x5eb   :  { %10848 = vmatprep.subr.bf16.mxu0 %v15563_v51  ;;  %11340 = vmatprep.subr.bf16.mxu1 %v15565_v61  ;;  %v16261_v51 = vld [vmem:[%s22793_s3 + $0x44] ss:$16 sps:$4 sm:$0xff]   ;;  %v16270_v61 = vld [vmem:[%s22793_s3 + $0x6c] ss:$16 sps:$4 sm:$0xff]  }
 0x5ee   :  { %10849 = vmatpush1.bf16.msra.mxu0 %v15562_v23  ;;  %11341 = vmatpush1.bf16.msra.mxu1 %v15564_v2  ;;  %v16268_v23 = vld [vmem:[%s22793_s3 + $0x68] ss:$16 sps:$4 sm:$0xff]   ;;  %v16273_v2 = vld [vmem:[%s22793_s3 + $0x84] ss:$16 sps:$4 sm:$0xff]  }
 0x5ef   :  { %10850 = vmatprep.subr.bf16.mxu0 %v15571_v58  ;;  %11342 = vmatprep.subr.bf16.mxu1 %v15573_v9  ;;  %v16276_v58 = vld [vmem:[%s22793_s3 + $0x8c] ss:$16 sps:$4 sm:$0xff]  }
 0x5f0   :  { %v16282_v9 = vld [vmem:[%s22793_s3 + $0xac] ss:$16 sps:$4 sm:$0xff]  }
 0x5f2   :  { %10851 = vmatpush1.bf16.msra.mxu0 %v15570_v13  ;;  %11343 = vmatpush1.bf16.msra.mxu1 %v15572_v16  ;;  %v16285_v13 = vld [vmem:[%s22793_s3 + $0xc4] ss:$16 sps:$4 sm:$0xff]   ;;  %v16288_v16 = vld [vmem:[%s22793_s3 + $0xcc] ss:$16 sps:$4 sm:$0xff]  }
 0x5f3   :  { %10852 = vmatprep.subr.bf16.mxu0 %v15579_v14  ;;  %11344 = vmatprep.subr.bf16.mxu1 %v15581_v36  ;;  %v16283_v14 = vld [vmem:[%s22793_s3 + $0xc0] ss:$16 sps:$4 sm:$0xff]  }
 0x5f4   :  { %v16289_v36 = vld [vmem:[%s22793_s3 + $0xe0] ss:$16 sps:$4 sm:$0xff]  }
 0x5f6   :  { %10853 = vmatpush1.bf16.msra.mxu0 %v15578_v27  ;;  %11345 = vmatpush1.bf16.msra.mxu1 %v15580_v55  ;;  %v16297_v27 = vld [vmem:[%s22793_s3 + $0x104] ss:$16 sps:$4 sm:$0xff]   ;;  %v16300_v55 = vld [vmem:[%s22793_s3 + $0x10c] ss:$16 sps:$4 sm:$0xff]  }
 0x5f7   :  { %10854 = vmatprep.subr.bf16.mxu0 %v15587_v50  ;;  %11346 = vmatprep.subr.bf16.mxu1 %v15589_v29  ;;  %v16295_v50 = vld [vmem:[%s22793_s3 + $0x100] ss:$16 sps:$4 sm:$0xff]  }
 0x5f8   :  { %v16301_v29 = vld [vmem:[%s22793_s3 + $0x120] ss:$16 sps:$4 sm:$0xff]  }
 0x5fa   :  { %10855 = vmatpush1.bf16.msra.mxu0 %v15586_v62  ;;  %11347 = vmatpush1.bf16.msra.mxu1 %v15588_v22  ;;  %v16309_v62 = vld [vmem:[%s22793_s3 + $0x144] ss:$16 sps:$4 sm:$0xff]   ;;  %v16312_v22 = vld [vmem:[%s22793_s3 + $0x14c] ss:$16 sps:$4 sm:$0xff]  }
 0x5fb   :  { %10856 = vmatprep.subr.bf16.mxu0 %v15595_v1  ;;  %11348 = vmatprep.subr.bf16.mxu1 %v15597_v34  ;;  %v16307_v1 = vld [vmem:[%s22793_s3 + $0x140] ss:$16 sps:$4 sm:$0xff]  }
 0x5fc   :  { %v16313_v34 = vld [vmem:[%s22793_s3 + $0x160] ss:$16 sps:$4 sm:$0xff]  }
 0x5fe   :  { %10857 = vmatpush1.bf16.msra.mxu0 %v15594_v57  ;;  %11349 = vmatpush1.bf16.msra.mxu1 %v15596_v37  ;;  %v16324_v57 = vld [vmem:[%s22793_s3 + $0x18c] ss:$16 sps:$4 sm:$0xff]   ;;  %v16319_v37 = vld [vmem:[%s22793_s3 + $0x180] ss:$16 sps:$4 sm:$0xff]  }
 0x5ff   :  { %10858 = vmatprep.subr.bf16.mxu0 %v15603_v43  ;;  %11350 = vmatprep.subr.bf16.mxu1 %v15605_v31  ;;  %v21849_v43 = vsub.s32 0, %v21656_v24  ;;  %v16322_v31 = vld [vmem:[%s22793_s3 + $0x188] ss:$16 sps:$4 sm:$0xff]  }
 0x602   :  { %10859 = vmatpush1.bf16.msra.mxu0 %v15602_v40  ;;  %11351 = vmatpush1.bf16.msra.mxu1 %v15604_v21  ;;  %v16330_v40 = vld [vmem:[%s22793_s3 + $0x1ac] ss:$16 sps:$4 sm:$0xff]   ;;  %v1603_v21 = vsub.s32 3, %v21656_v24 }
 0x603   :  { %12935 = vmatprep.subr.bf16.mxu0 %v16249_v41  ;;  %13099 = vmatprep.subr.bf16.mxu1 %v16252_v60  ;;  %v16325_v41 = vld [vmem:[%s22793_s3 + $0x1a0] ss:$16 sps:$4 sm:$0xff]   ;;  %v16328_v60 = vld [vmem:[%s22793_s3 + $0x1a8] ss:$16 sps:$4 sm:$0xff]  }
 0x605   :  { %10861 = vmatmul.mubr.bf16.vlgmr.msra.gmra.mrb[4].mxu0 %v19336_v4  ;;  %11353 = vmatmul.mubr.bf16.vlgmr.msra.gmra.mrb[4].mxu1 %v19336_v4  ;;  %v16264_v4 = vld [vmem:[%s22793_s3 + $0x4c] ss:$16 sps:$4 sm:$0xff]  }
 0x606   :  { %12936 = vmatpush1.bf16.msra.mxu0 %v16247_v25  ;;  %12967 = vmatprep.mubr.bf16.mxu0 %v11370_v47  ;;  %v1592_v25 = vrot.slane %v21670_v28, %v21849_v43 }
 0x607   :  { %13100 = vmatpush1.bf16.msra.mxu1 %v16250_v5  ;;  %13131 = vmatprep.mubr.bf16.mxu1 %v11370_v47  ;;  %v16336_v5 = vld [vmem:[%s22793_s3 + $0x1cc] ss:$16 sps:$4 sm:$0xff]   ;;  %v16331_v47 = vld [vmem:[%s22793_s3 + $0x1c0] ss:$16 sps:$4 sm:$0xff]  }
 0x608   :  { %12937 = vmatprep.subr.bf16.mxu0 %v16255_v44  ;;  %13101 = vmatprep.subr.bf16.mxu1 %v16258_v46  ;;  %v1604_v44 = vrot.slane %v21670_v28, %v1603_v21  ;;  %v16003_v46 = vadd.f32 %v19996_v3, %v1592_v25  ;;  %v16337_v3 = vld [vmem:[%s22793_s3 + $0x1e0] ss:$16 sps:$4 sm:$0xff]   ;;  %v16408_v25 = vld [vmem:[%s22793_s3 + $0x34c] ss:$16 sps:$4 sm:$0xff]  }
 0x60a   :  { %12938 = vmatpush1.bf16.msra.mxu0 %v16253_v18  ;;  %v16334_v18 = vld [vmem:[%s22793_s3 + $0x1c8] ss:$16 sps:$4 sm:$0xff]  }
 0x60b   :  { %13102 = vmatpush1.bf16.msra.mxu1 %v16256_v52  ;;  %12939 = vmatprep.subr.bf16.mxu0 %v16261_v51  ;;  %v16339_v52 = vld [vmem:[%s22793_s3 + $0x1e4] ss:$16 sps:$4 sm:$0xff]   ;;  %v16342_v51 = vld [vmem:[%s22793_s3 + $0x1ec] ss:$16 sps:$4 sm:$0xff]  }
 0x60c   :  { %13103 = vmatprep.subr.bf16.mxu1 %v16264_v4  ;;  %v16006_v4 = vadd.f32 %v20014_v7, %v1604_v44  ;;  %v16348_v7 = vld [vmem:[%s22793_s3 + $0x20c] ss:$16 sps:$4 sm:$0xff]  }
 0x60d   :  { %v16414_v44 = vld [vmem:[%s22793_s3 + $0x36c] ss:$16 sps:$4 sm:$0xff]  }
 0x60e   :  { %12940 = vmatpush1.bf16.msra.mxu0 %v16259_v56  ;;  %v11361_v56 = vmax.f32 %v16003_v46, 0.0  ;;  %v16412_v46 = vld [vmem:[%s22793_s3 + $0x368] ss:$16 sps:$4 sm:$0xff]  }
 0x60f   :  { %13104 = vmatpush1.bf16.msra.mxu1 %v16262_v48  ;;  %12941 = vmatprep.subr.bf16.mxu0 %v16267_v63  ;;  %v16340_v48 = vld [vmem:[%s22793_s3 + $0x1e8] ss:$16 sps:$4 sm:$0xff]   ;;  %v16345_v63 = vld [vmem:[%s22793_s3 + $0x204] ss:$16 sps:$4 sm:$0xff]  }
 0x610   :  { %13105 = vmatprep.subr.bf16.mxu1 %v16270_v61  ;;  %v11364_v61 = vmax.f32 %v16006_v4, 0.0  ;;  %v1599_v4 = vsub.s32 2, %v21656_v24 }
 0x612   :  { %12942 = vmatpush1.bf16.msra.mxu0 %v16265_v39  ;;  %v16343_v39 = vld [vmem:[%s22793_s3 + $0x200] ss:$16 sps:$4 sm:$0xff]  }
 0x613   :  { %13106 = vmatpush1.bf16.msra.mxu1 %v16268_v23  ;;  %12943 = vmatprep.subr.bf16.mxu0 %v16273_v2  ;;  %v11369_v23 = vpack.c.bf16 %v11361_v56, %v11361_v56  ;;  %v16346_v2 = vld [vmem:[%s22793_s3 + $0x208] ss:$16 sps:$4 sm:$0xff]   ;;  %v16423_v56 = vld [vmem:[%s22793_s3 + $0x3a4] ss:$16 sps:$4 sm:$0xff]  }
 0x614   :  { %13107 = vmatprep.subr.bf16.mxu1 %v16276_v58  ;;  %v16351_v58 = vld [vmem:[%s22793_s3 + $0x224] ss:$16 sps:$4 sm:$0xff]  }
 0x616   :  { %12944 = vmatpush1.bf16.msra.mxu0 %v16271_v6  ;;  %v11372_v6 = vpack.c.bf16 %v11364_v61, %v11364_v61  ;;  %v16424_v61 = vld [vmem:[%s22793_s3 + $0x3a8] ss:$16 sps:$4 sm:$0xff]  }
 0x617   :  { %13108 = vmatpush1.bf16.msra.mxu1 %v16274_v8  ;;  %12945 = vmatprep.subr.bf16.mxu0 %v16279_v10  ;;  %v16354_v8 = vld [vmem:[%s22793_s3 + $0x22c] ss:$16 sps:$4 sm:$0xff]   ;;  %v16349_v10 = vld [vmem:[%s22793_s3 + $0x220] ss:$16 sps:$4 sm:$0xff]  }
 0x618   :  { %13109 = vmatprep.subr.bf16.mxu1 %v16282_v9  ;;  %v16352_v9 = vld [vmem:[%s22793_s3 + $0x228] ss:$16 sps:$4 sm:$0xff]  }
 0x61a   :  { %12946 = vmatpush1.bf16.msra.mxu0 %v16277_v54  ;;  %v16357_v54 = vld [vmem:[%s22793_s3 + $0x244] ss:$16 sps:$4 sm:$0xff]  }
 0x61b   :  { %13110 = vmatpush1.bf16.msra.mxu1 %v16280_v11  ;;  %12947 = vmatprep.subr.bf16.mxu0 %v16285_v13  ;;  %v16360_v11 = vld [vmem:[%s22793_s3 + $0x24c] ss:$16 sps:$4 sm:$0xff]   ;;  %v16355_v13 = vld [vmem:[%s22793_s3 + $0x240] ss:$16 sps:$4 sm:$0xff]  }
 0x61c   :  { %13111 = vmatprep.subr.bf16.mxu1 %v16288_v16  ;;  %v16358_v16 = vld [vmem:[%s22793_s3 + $0x248] ss:$16 sps:$4 sm:$0xff]  }
 0x61e   :  { %12948 = vmatpush1.bf16.msra.mxu0 %v16283_v14  ;;  %v16363_v14 = vld [vmem:[%s22793_s3 + $0x264] ss:$16 sps:$4 sm:$0xff]  }
 0x61f   :  { %13112 = vmatpush1.bf16.msra.mxu1 %v16286_v17  ;;  %12949 = vmatprep.subr.bf16.mxu0 %v16291_v53  ;;  %v16366_v17 = vld [vmem:[%s22793_s3 + $0x26c] ss:$16 sps:$4 sm:$0xff]   ;;  %v16361_v53 = vld [vmem:[%s22793_s3 + $0x260] ss:$16 sps:$4 sm:$0xff]  }
 0x620   :  { %13113 = vmatprep.subr.bf16.mxu1 %v16294_v20  ;;  %v16364_v20 = vld [vmem:[%s22793_s3 + $0x268] ss:$16 sps:$4 sm:$0xff]  }
 0x622   :  { %12950 = vmatpush1.bf16.msra.mxu0 %v16289_v36  ;;  %v16369_v36 = vld [vmem:[%s22793_s3 + $0x284] ss:$16 sps:$4 sm:$0xff]  }
 0x623   :  { %13114 = vmatpush1.bf16.msra.mxu1 %v16292_v59  ;;  %12951 = vmatprep.subr.bf16.mxu0 %v16297_v27  ;;  %v16372_v59 = vld [vmem:[%s22793_s3 + $0x28c] ss:$16 sps:$4 sm:$0xff]   ;;  %v16367_v27 = vld [vmem:[%s22793_s3 + $0x280] ss:$16 sps:$4 sm:$0xff]  }
 0x624   :  { %13115 = vmatprep.subr.bf16.mxu1 %v16300_v55  ;;  %v16370_v55 = vld [vmem:[%s22793_s3 + $0x288] ss:$16 sps:$4 sm:$0xff]  }
 0x626   :  { %12952 = vmatpush1.bf16.msra.mxu0 %v16295_v50  ;;  %v16375_v50 = vld [vmem:[%s22793_s3 + $0x2a4] ss:$16 sps:$4 sm:$0xff]  }
 0x627   :  { %13116 = vmatpush1.bf16.msra.mxu1 %v16298_v26  ;;  %12953 = vmatprep.subr.bf16.mxu0 %v16303_v49  ;;  %v16378_v26 = vld [vmem:[%s22793_s3 + $0x2ac] ss:$16 sps:$4 sm:$0xff]   ;;  %v16373_v49 = vld [vmem:[%s22793_s3 + $0x2a0] ss:$16 sps:$4 sm:$0xff]  }
 0x628   :  { %13117 = vmatprep.subr.bf16.mxu1 %v16306_v15  ;;  %v16376_v15 = vld [vmem:[%s22793_s3 + $0x2a8] ss:$16 sps:$4 sm:$0xff]  }
 0x62a   :  { %12954 = vmatpush1.bf16.msra.mxu0 %v16301_v29  ;;  %v16381_v29 = vld [vmem:[%s22793_s3 + $0x2c4] ss:$16 sps:$4 sm:$0xff]  }
 0x62b   :  { %13118 = vmatpush1.bf16.msra.mxu1 %v16304_v19  ;;  %12955 = vmatprep.subr.bf16.mxu0 %v16309_v62  ;;  %v16384_v19 = vld [vmem:[%s22793_s3 + $0x2cc] ss:$16 sps:$4 sm:$0xff]   ;;  %v16379_v62 = vld [vmem:[%s22793_s3 + $0x2c0] ss:$16 sps:$4 sm:$0xff]  }
 0x62c   :  { %13119 = vmatprep.subr.bf16.mxu1 %v16312_v22  ;;  %v16382_v22 = vld [vmem:[%s22793_s3 + $0x2c8] ss:$16 sps:$4 sm:$0xff]  }
 0x62e   :  { %12956 = vmatpush1.bf16.msra.mxu0 %v16307_v1  ;;  %v16387_v1 = vld [vmem:[%s22793_s3 + $0x2e4] ss:$16 sps:$4 sm:$0xff]  }
 0x62f   :  { %13120 = vmatpush1.bf16.msra.mxu1 %v16310_v32  ;;  %12957 = vmatprep.subr.bf16.mxu0 %v16315_v12  ;;  %v16390_v32 = vld [vmem:[%s22793_s3 + $0x2ec] ss:$16 sps:$4 sm:$0xff]   ;;  %v16385_v12 = vld [vmem:[%s22793_s3 + $0x2e0] ss:$16 sps:$4 sm:$0xff]  }
 0x630   :  { %13121 = vmatprep.subr.bf16.mxu1 %v16318_v33  ;;  %v16388_v33 = vld [vmem:[%s22793_s3 + $0x2e8] ss:$16 sps:$4 sm:$0xff]  }
 0x632   :  { %12958 = vmatpush1.bf16.msra.mxu0 %v16313_v34  ;;  %v16393_v34 = vld [vmem:[%s22793_s3 + $0x304] ss:$16 sps:$4 sm:$0xff]  }
 0x633   :  { %13122 = vmatpush1.bf16.msra.mxu1 %v16316_v30  ;;  %12959 = vmatprep.subr.bf16.mxu0 %v16321_v35  ;;  %v16396_v30 = vld [vmem:[%s22793_s3 + $0x30c] ss:$16 sps:$4 sm:$0xff]   ;;  %v16391_v35 = vld [vmem:[%s22793_s3 + $0x300] ss:$16 sps:$4 sm:$0xff]  }
 0x634   :  { %13123 = vmatprep.subr.bf16.mxu1 %v16324_v57  ;;  %v16394_v57 = vld [vmem:[%s22793_s3 + $0x308] ss:$16 sps:$4 sm:$0xff]  }
 0x636   :  { %12960 = vmatpush1.bf16.msra.mxu0 %v16319_v37  ;;  %v16399_v37 = vld [vmem:[%s22793_s3 + $0x324] ss:$16 sps:$4 sm:$0xff]  }
 0x637   :  { %13124 = vmatpush1.bf16.msra.mxu1 %v16322_v31  ;;  %12961 = vmatprep.subr.bf16.mxu0 %v16327_v38  ;;  %v16402_v31 = vld [vmem:[%s22793_s3 + $0x32c] ss:$16 sps:$4 sm:$0xff]   ;;  %v16397_v38 = vld [vmem:[%s22793_s3 + $0x320] ss:$16 sps:$4 sm:$0xff]  }
 0x638   :  { %13125 = vmatprep.subr.bf16.mxu1 %v16330_v40  ;;  %v16400_v40 = vld [vmem:[%s22793_s3 + $0x328] ss:$16 sps:$4 sm:$0xff]  }
 0x63a   :  { %12962 = vmatpush1.bf16.msra.mxu0 %v16325_v41  ;;  %v16405_v41 = vld [vmem:[%s22793_s3 + $0x344] ss:$16 sps:$4 sm:$0xff]  }
 0x63b   :  { %13126 = vmatpush1.bf16.msra.mxu1 %v16328_v60  ;;  %12963 = vmatprep.subr.bf16.mxu0 %v16333_v42  ;;  %v16403_v60 = vld [vmem:[%s22793_s3 + $0x340] ss:$16 sps:$4 sm:$0xff]   ;;  %v16406_v42 = vld [vmem:[%s22793_s3 + $0x348] ss:$16 sps:$4 sm:$0xff]  }
 0x63c   :  { %13127 = vmatprep.subr.bf16.mxu1 %v16336_v5  ;;  %v16411_v5 = vld [vmem:[%s22793_s3 + $0x364] ss:$16 sps:$4 sm:$0xff]  }
 0x63e   :  { %12964 = vmatpush1.bf16.msra.mxu0 %v16331_v47  ;;  %v16409_v47 = vld [vmem:[%s22793_s3 + $0x360] ss:$16 sps:$4 sm:$0xff]  }
 0x63f   :  { %13128 = vmatpush1.bf16.msra.mxu1 %v16334_v18  ;;  %12965 = vmatprep.subr.bf16.mxu0 %v16339_v52  ;;  %v16417_v18 = vld [vmem:[%s22793_s3 + $0x384] ss:$16 sps:$4 sm:$0xff]   ;;  %v16420_v52 = vld [vmem:[%s22793_s3 + $0x38c] ss:$16 sps:$4 sm:$0xff]  }
 0x640   :  { %13129 = vmatprep.subr.bf16.mxu1 %v16342_v51  ;;  %v16415_v51 = vld [vmem:[%s22793_s3 + $0x380] ss:$16 sps:$4 sm:$0xff]  }
 0x642   :  { %12966 = vmatpush1.bf16.msra.mxu0 %v16337_v3  ;;  %v16418_v3 = vld [vmem:[%s22793_s3 + $0x388] ss:$16 sps:$4 sm:$0xff]  }
 0x643   :  { %13130 = vmatpush1.bf16.msra.mxu1 %v16340_v48  ;;  %12976 = vmatprep.subr.bf16.mxu0 %v16345_v63  ;;  %v16426_v48 = vld [vmem:[%s22793_s3 + $0x3ac] ss:$16 sps:$4 sm:$0xff]   ;;  %v16421_v63 = vld [vmem:[%s22793_s3 + $0x3a0] ss:$16 sps:$4 sm:$0xff]  }
 0x644   :  { %13140 = vmatprep.subr.bf16.mxu1 %v16348_v7  ;;  %v1600_v7 = vrot.slane %v21670_v28, %v1599_v4  ;;  %v16427_v28 = vld [vmem:[%s22793_s3 + $0x3c0] ss:$16 sps:$4 sm:$0xff]  }
 0x645   :  { %12968 = vmatmul.mubr.bf16.vlgmr.msra.gmra.mrb[8].mxu0 %v11369_v23 }
 0x646   :  { %13132 = vmatmul.mubr.bf16.vlgmr.msra.gmra.mrb[8].mxu1 %v11369_v23  ;;  %12977 = vmatpush1.bf16.msra.mxu0 %v16343_v39  ;;  %v16429_v39 = vld [vmem:[%s22793_s3 + $0x3c4] ss:$16 sps:$4 sm:$0xff]   ;;  %v16432_v23 = vld [vmem:[%s22793_s3 + $0x3cc] ss:$16 sps:$4 sm:$0xff]  }
 0x647   :  { %13008 = vmatprep.mubr.bf16.mxu0 %v11372_v6  ;;  %13141 = vmatpush1.bf16.msra.mxu1 %v16346_v2  ;;  %v16005_v2 = vadd.f32 %v20004_v0, %v1600_v7  ;;  %v16433_v0 = vld [vmem:[%s22793_s3 + $0x3e0] ss:$16 sps:$4 sm:$0xff]  }
 0x648   :  { %13172 = vmatprep.mubr.bf16.mxu1 %v11372_v6  ;;  %12978 = vmatprep.subr.bf16.mxu0 %v16351_v58  ;;  %v16430_v58 = vld [vmem:[%s22793_s3 + $0x3c8] ss:$16 sps:$4 sm:$0xff]   ;;  %v16435_v6 = vld [vmem:[%s22793_s3 + $0x3e4] ss:$16 sps:$4 sm:$0xff]   ;;  %v16505_v7 = vld [vmem:[%s22793_s3 + $0x560] ss:$16 sps:$4 sm:$0xff]  }
 0x649   :  { %13142 = vmatprep.subr.bf16.mxu1 %v16354_v8  ;;  %v16438_v8 = vld [vmem:[%s22793_s3 + $0x3ec] ss:$16 sps:$4 sm:$0xff]  }
 0x64a   :  { %12979 = vmatpush1.bf16.msra.mxu0 %v16349_v10  ;;  %v11363_v10 = vmax.f32 %v16005_v2, 0.0  ;;  %v16514_v2 = vld [vmem:[%s22793_s3 + $0x588] ss:$16 sps:$4 sm:$0xff]  }
 0x64b   :  { %13143 = vmatpush1.bf16.msra.mxu1 %v16352_v9  ;;  %12980 = vmatprep.subr.bf16.mxu0 %v16357_v54  ;;  %v16436_v9 = vld [vmem:[%s22793_s3 + $0x3e8] ss:$16 sps:$4 sm:$0xff]   ;;  %v16441_v54 = vld [vmem:[%s22793_s3 + $0x404] ss:$16 sps:$4 sm:$0xff]  }
 0x64c   :  { %13144 = vmatprep.subr.bf16.mxu1 %v16360_v11  ;;  %v16444_v11 = vld [vmem:[%s22793_s3 + $0x40c] ss:$16 sps:$4 sm:$0xff]  }
 0x64e   :  { %12981 = vmatpush1.bf16.msra.mxu0 %v16355_v13  ;;  %v16439_v13 = vld [vmem:[%s22793_s3 + $0x400] ss:$16 sps:$4 sm:$0xff]  }
 0x64f   :  { %13145 = vmatpush1.bf16.msra.mxu1 %v16358_v16  ;;  %12982 = vmatprep.subr.bf16.mxu0 %v16363_v14  ;;  %v11371_v16 = vpack.c.bf16 %v11363_v10, %v11363_v10  ;;  %v16442_v14 = vld [vmem:[%s22793_s3 + $0x408] ss:$16 sps:$4 sm:$0xff]   ;;  %v16525_v10 = vld [vmem:[%s22793_s3 + $0x5c4] ss:$16 sps:$4 sm:$0xff]  }
 0x650   :  { %13146 = vmatprep.subr.bf16.mxu1 %v16366_v17  ;;  %v16447_v17 = vld [vmem:[%s22793_s3 + $0x424] ss:$16 sps:$4 sm:$0xff]  }
 0x652   :  { %12983 = vmatpush1.bf16.msra.mxu0 %v16361_v53  ;;  %v16450_v53 = vld [vmem:[%s22793_s3 + $0x42c] ss:$16 sps:$4 sm:$0xff]  }
 0x653   :  { %13147 = vmatpush1.bf16.msra.mxu1 %v16364_v20  ;;  %12984 = vmatprep.subr.bf16.mxu0 %v16369_v36  ;;  %v16445_v20 = vld [vmem:[%s22793_s3 + $0x420] ss:$16 sps:$4 sm:$0xff]   ;;  %v16448_v36 = vld [vmem:[%s22793_s3 + $0x428] ss:$16 sps:$4 sm:$0xff]  }
 0x654   :  { %13148 = vmatprep.subr.bf16.mxu1 %v16372_v59  ;;  %v16453_v59 = vld [vmem:[%s22793_s3 + $0x444] ss:$16 sps:$4 sm:$0xff]  }
 0x656   :  { %12985 = vmatpush1.bf16.msra.mxu0 %v16367_v27  ;;  %v16456_v27 = vld [vmem:[%s22793_s3 + $0x44c] ss:$16 sps:$4 sm:$0xff]  }
 0x657   :  { %13149 = vmatpush1.bf16.msra.mxu1 %v16370_v55  ;;  %12986 = vmatprep.subr.bf16.mxu0 %v16375_v50  ;;  %v16451_v55 = vld [vmem:[%s22793_s3 + $0x440] ss:$16 sps:$4 sm:$0xff]   ;;  %v16454_v50 = vld [vmem:[%s22793_s3 + $0x448] ss:$16 sps:$4 sm:$0xff]  }
 0x658   :  { %13150 = vmatprep.subr.bf16.mxu1 %v16378_v26  ;;  %v16459_v26 = vld [vmem:[%s22793_s3 + $0x464] ss:$16 sps:$4 sm:$0xff]  }
 0x65a   :  { %12987 = vmatpush1.bf16.msra.mxu0 %v16373_v49  ;;  %v16462_v49 = vld [vmem:[%s22793_s3 + $0x46c] ss:$16 sps:$4 sm:$0xff]  }
 0x65b   :  { %13151 = vmatpush1.bf16.msra.mxu1 %v16376_v15  ;;  %12988 = vmatprep.subr.bf16.mxu0 %v16381_v29  ;;  %v16457_v15 = vld [vmem:[%s22793_s3 + $0x460] ss:$16 sps:$4 sm:$0xff]   ;;  %v16460_v29 = vld [vmem:[%s22793_s3 + $0x468] ss:$16 sps:$4 sm:$0xff]  }
 0x65c   :  { %13152 = vmatprep.subr.bf16.mxu1 %v16384_v19  ;;  %v16465_v19 = vld [vmem:[%s22793_s3 + $0x484] ss:$16 sps:$4 sm:$0xff]  }
 0x65e   :  { %12989 = vmatpush1.bf16.msra.mxu0 %v16379_v62  ;;  %v16468_v62 = vld [vmem:[%s22793_s3 + $0x48c] ss:$16 sps:$4 sm:$0xff]  }
 0x65f   :  { %13153 = vmatpush1.bf16.msra.mxu1 %v16382_v22  ;;  %12990 = vmatprep.subr.bf16.mxu0 %v16387_v1  ;;  %v16463_v22 = vld [vmem:[%s22793_s3 + $0x480] ss:$16 sps:$4 sm:$0xff]   ;;  %v16466_v1 = vld [vmem:[%s22793_s3 + $0x488] ss:$16 sps:$4 sm:$0xff]  }
 0x660   :  { %13154 = vmatprep.subr.bf16.mxu1 %v16390_v32  ;;  %v16471_v32 = vld [vmem:[%s22793_s3 + $0x4a4] ss:$16 sps:$4 sm:$0xff]  }
 0x662   :  { %12991 = vmatpush1.bf16.msra.mxu0 %v16385_v12  ;;  %v16474_v12 = vld [vmem:[%s22793_s3 + $0x4ac] ss:$16 sps:$4 sm:$0xff]  }
 0x663   :  { %13155 = vmatpush1.bf16.msra.mxu1 %v16388_v33  ;;  %12992 = vmatprep.subr.bf16.mxu0 %v16393_v34  ;;  %v16469_v33 = vld [vmem:[%s22793_s3 + $0x4a0] ss:$16 sps:$4 sm:$0xff]   ;;  %v16472_v34 = vld [vmem:[%s22793_s3 + $0x4a8] ss:$16 sps:$4 sm:$0xff]  }
 0x664   :  { %13156 = vmatprep.subr.bf16.mxu1 %v16396_v30  ;;  %v16477_v30 = vld [vmem:[%s22793_s3 + $0x4c4] ss:$16 sps:$4 sm:$0xff]  }
 0x666   :  { %12993 = vmatpush1.bf16.msra.mxu0 %v16391_v35  ;;  %v16480_v35 = vld [vmem:[%s22793_s3 + $0x4cc] ss:$16 sps:$4 sm:$0xff]  }
 0x667   :  { %13157 = vmatpush1.bf16.msra.mxu1 %v16394_v57  ;;  %12994 = vmatprep.subr.bf16.mxu0 %v16399_v37  ;;  %v16475_v57 = vld [vmem:[%s22793_s3 + $0x4c0] ss:$16 sps:$4 sm:$0xff]   ;;  %v16478_v37 = vld [vmem:[%s22793_s3 + $0x4c8] ss:$16 sps:$4 sm:$0xff]  }
 0x668   :  { %13158 = vmatprep.subr.bf16.mxu1 %v16402_v31  ;;  %v16483_v31 = vld [vmem:[%s22793_s3 + $0x4e4] ss:$16 sps:$4 sm:$0xff]  }
 0x66a   :  { %12995 = vmatpush1.bf16.msra.mxu0 %v16397_v38  ;;  %v16486_v38 = vld [vmem:[%s22793_s3 + $0x4ec] ss:$16 sps:$4 sm:$0xff]  }
 0x66b   :  { %13159 = vmatpush1.bf16.msra.mxu1 %v16400_v40  ;;  %12996 = vmatprep.subr.bf16.mxu0 %v16405_v41  ;;  %v16481_v40 = vld [vmem:[%s22793_s3 + $0x4e0] ss:$16 sps:$4 sm:$0xff]   ;;  %v16484_v41 = vld [vmem:[%s22793_s3 + $0x4e8] ss:$16 sps:$4 sm:$0xff]  }
 0x66c   :  { %13160 = vmatprep.subr.bf16.mxu1 %v16408_v25  ;;  %v16489_v25 = vld [vmem:[%s22793_s3 + $0x504] ss:$16 sps:$4 sm:$0xff]  }
 0x66e   :  { %12997 = vmatpush1.bf16.msra.mxu0 %v16403_v60  ;;  %v16492_v60 = vld [vmem:[%s22793_s3 + $0x50c] ss:$16 sps:$4 sm:$0xff]  }
 0x66f   :  { %13161 = vmatpush1.bf16.msra.mxu1 %v16406_v42  ;;  %12998 = vmatprep.subr.bf16.mxu0 %v16411_v5  ;;  %v16487_v42 = vld [vmem:[%s22793_s3 + $0x500] ss:$16 sps:$4 sm:$0xff]   ;;  %v16490_v5 = vld [vmem:[%s22793_s3 + $0x508] ss:$16 sps:$4 sm:$0xff]  }
 0x670   :  { %13162 = vmatprep.subr.bf16.mxu1 %v16414_v44  ;;  %v16495_v44 = vld [vmem:[%s22793_s3 + $0x524] ss:$16 sps:$4 sm:$0xff]  }
 0x672   :  { %12999 = vmatpush1.bf16.msra.mxu0 %v16409_v47  ;;  %v16493_v47 = vld [vmem:[%s22793_s3 + $0x520] ss:$16 sps:$4 sm:$0xff]  }
 0x673   :  { %13163 = vmatpush1.bf16.msra.mxu1 %v16412_v46  ;;  %13000 = vmatprep.subr.bf16.mxu0 %v16417_v18  ;;  %v16498_v46 = vld [vmem:[%s22793_s3 + $0x52c] ss:$16 sps:$4 sm:$0xff]   ;;  %v16496_v18 = vld [vmem:[%s22793_s3 + $0x528] ss:$16 sps:$4 sm:$0xff]  }
 0x674   :  { %13164 = vmatprep.subr.bf16.mxu1 %v16420_v52  ;;  %v16501_v52 = vld [vmem:[%s22793_s3 + $0x544] ss:$16 sps:$4 sm:$0xff]  }
 0x676   :  { %13001 = vmatpush1.bf16.msra.mxu0 %v16415_v51  ;;  %v16504_v51 = vld [vmem:[%s22793_s3 + $0x54c] ss:$16 sps:$4 sm:$0xff]  }
 0x677   :  { %13165 = vmatpush1.bf16.msra.mxu1 %v16418_v3  ;;  %13002 = vmatprep.subr.bf16.mxu0 %v16423_v56  ;;  %v16499_v3 = vld [vmem:[%s22793_s3 + $0x540] ss:$16 sps:$4 sm:$0xff]   ;;  %v16502_v56 = vld [vmem:[%s22793_s3 + $0x548] ss:$16 sps:$4 sm:$0xff]  }
 0x678   :  { %13166 = vmatprep.subr.bf16.mxu1 %v16426_v48  ;;  %v16507_v48 = vld [vmem:[%s22793_s3 + $0x564] ss:$16 sps:$4 sm:$0xff]  }
 0x67a   :  { %13003 = vmatpush1.bf16.msra.mxu0 %v16421_v63  ;;  %v16510_v63 = vld [vmem:[%s22793_s3 + $0x56c] ss:$16 sps:$4 sm:$0xff]  }
 0x67b   :  { %13167 = vmatpush1.bf16.msra.mxu1 %v16424_v61  ;;  %13004 = vmatprep.subr.bf16.mxu0 %v16429_v39  ;;  %v16508_v61 = vld [vmem:[%s22793_s3 + $0x568] ss:$16 sps:$4 sm:$0xff]   ;;  %v16513_v39 = vld [vmem:[%s22793_s3 + $0x584] ss:$16 sps:$4 sm:$0xff]  }
 0x67c   :  { %13168 = vmatprep.subr.bf16.mxu1 %v16432_v23  ;;  %v16516_v23 = vld [vmem:[%s22793_s3 + $0x58c] ss:$16 sps:$4 sm:$0xff]  }
 0x67e   :  { %13005 = vmatpush1.bf16.msra.mxu0 %v16427_v28  ;;  %v16511_v28 = vld [vmem:[%s22793_s3 + $0x580] ss:$16 sps:$4 sm:$0xff]  }
 0x67f   :  { %13169 = vmatpush1.bf16.msra.mxu1 %v16430_v58  ;;  %13006 = vmatprep.subr.bf16.mxu0 %v16435_v6  ;;  %v16519_v58 = vld [vmem:[%s22793_s3 + $0x5a4] ss:$16 sps:$4 sm:$0xff]   ;;  %v16522_v6 = vld [vmem:[%s22793_s3 + $0x5ac] ss:$16 sps:$4 sm:$0xff]  }
 0x680   :  { %13170 = vmatprep.subr.bf16.mxu1 %v16438_v8  ;;  %v16517_v8 = vld [vmem:[%s22793_s3 + $0x5a0] ss:$16 sps:$4 sm:$0xff]  }
 0x682   :  { %13007 = vmatpush1.bf16.msra.mxu0 %v16433_v0  ;;  %v16520_v0 = vld [vmem:[%s22793_s3 + $0x5a8] ss:$16 sps:$4 sm:$0xff]  }
 0x683   :  { %13171 = vmatpush1.bf16.msra.mxu1 %v16436_v9  ;;  %13017 = vmatprep.subr.bf16.mxu0 %v16441_v54  ;;  %v16528_v9 = vld [vmem:[%s22793_s3 + $0x5cc] ss:$16 sps:$4 sm:$0xff]   ;;  %v16523_v54 = vld [vmem:[%s22793_s3 + $0x5c0] ss:$16 sps:$4 sm:$0xff]  }
 0x684   :  { %13181 = vmatprep.subr.bf16.mxu1 %v16444_v11  ;;  %v16526_v11 = vld [vmem:[%s22793_s3 + $0x5c8] ss:$16 sps:$4 sm:$0xff]  }
 0x685   :  { %13009 = vmatmul.mubr.bf16.vlgmr.msra.gmra.mrb[8].mxu0 %v11371_v16 }
 0x686   :  { %13173 = vmatmul.mubr.bf16.vlgmr.msra.gmra.mrb[8].mxu1 %v11371_v16  ;;  %13018 = vmatpush1.bf16.msra.mxu0 %v16439_v13  ;;  %v16531_v13 = vld [vmem:[%s22793_s3 + $0x5e4] ss:$16 sps:$4 sm:$0xff]   ;;  %v16534_v16 = vld [vmem:[%s22793_s3 + $0x5ec] ss:$16 sps:$4 sm:$0xff]  }
 0x687   :  { %13182 = vmatpush1.bf16.msra.mxu1 %v16442_v14  ;;  %13019 = vmatprep.subr.bf16.mxu0 %v16447_v17  ;;  %v16529_v14 = vld [vmem:[%s22793_s3 + $0x5e0] ss:$16 sps:$4 sm:$0xff]   ;;  %v16532_v17 = vld [vmem:[%s22793_s3 + $0x5e8] ss:$16 sps:$4 sm:$0xff]  }
 0x688   :  { %13183 = vmatprep.subr.bf16.mxu1 %v16450_v53  ;;  %v16537_v53 = vld [vmem:[%s22793_s3 + $0x604] ss:$16 sps:$4 sm:$0xff]  }
 0x68a   :  { %13020 = vmatpush1.bf16.msra.mxu0 %v16445_v20  ;;  %v16540_v20 = vld [vmem:[%s22793_s3 + $0x60c] ss:$16 sps:$4 sm:$0xff]  }
 0x68b   :  { %13184 = vmatpush1.bf16.msra.mxu1 %v16448_v36  ;;  %13021 = vmatprep.subr.bf16.mxu0 %v16453_v59  ;;  %v1607_v36 = vsub.s32 4, %v21656_v24  ;;  %v1611_v59 = vsub.s32 5, %v21656_v24 }
 0x68c   :  { %13185 = vmatprep.subr.bf16.mxu1 %v16456_v27  ;;  %v1619_v27 = vsub.s32 7, %v21656_v24 }
 0x68e   :  { %13022 = vmatpush1.bf16.msra.mxu0 %v16451_v55  ;;  %v22299_v55 = vld [vmem:[%s22794_s2] sm:$0xff] }
 0x68f   :  { %13186 = vmatpush1.bf16.msra.mxu1 %v16454_v50  ;;  %13023 = vmatprep.subr.bf16.mxu0 %v16459_v26  ;;  %v1608_v50 = vrot.slane %v22299_v55, %v1607_v36  ;;  %v1612_v26 = vrot.slane %v22299_v55, %v1611_v59  ;;  %v16594_v36 = vld [vmem:[%s22793_s3 + $0x72c] ss:$16 sps:$4 sm:$0xff]   ;;  %v16589_v59 = vld [vmem:[%s22793_s3 + $0x720] ss:$16 sps:$4 sm:$0xff]  }
 0x690   :  { %13187 = vmatprep.subr.bf16.mxu1 %v16462_v49  ;;  %v1620_v49 = vrot.slane %v22299_v55, %v1619_v27  ;;  %v16592_v27 = vld [vmem:[%s22793_s3 + $0x728] ss:$16 sps:$4 sm:$0xff]  }
 0x692   :  { %13024 = vmatpush1.bf16.msra.mxu0 %v16457_v15 }
 0x693   :  { %13188 = vmatpush1.bf16.msra.mxu1 %v16460_v29  ;;  %13025 = vmatprep.subr.bf16.mxu0 %v16465_v19 }
 0x694   :  { %13189 = vmatprep.subr.bf16.mxu1 %v16468_v62 }
 0x696   :  { %13026 = vmatpush1.bf16.msra.mxu0 %v16463_v22 }
 0x697   :  { %13190 = vmatpush1.bf16.msra.mxu1 %v16466_v1  ;;  %13027 = vmatprep.subr.bf16.mxu0 %v16471_v32 }
 0x698   :  { %13191 = vmatprep.subr.bf16.mxu1 %v16474_v12 }
 0x69a   :  { %13028 = vmatpush1.bf16.msra.mxu0 %v16469_v33 }
 0x69b   :  { %13192 = vmatpush1.bf16.msra.mxu1 %v16472_v34  ;;  %13029 = vmatprep.subr.bf16.mxu0 %v16477_v30 }
 0x69c   :  { %13193 = vmatprep.subr.bf16.mxu1 %v16480_v35 }
 0x69e   :  { %13030 = vmatpush1.bf16.msra.mxu0 %v16475_v57 }
 0x69f   :  { %13194 = vmatpush1.bf16.msra.mxu1 %v16478_v37  ;;  %13031 = vmatprep.subr.bf16.mxu0 %v16483_v31 }
 0x6a0   :  { %13195 = vmatprep.subr.bf16.mxu1 %v16486_v38  ;;  %v16535_v38 = vld [vmem:[%s22793_s3 + $0x600] ss:$16 sps:$4 sm:$0xff]  }
 0x6a2   :  { %13032 = vmatpush1.bf16.msra.mxu0 %v16481_v40  ;;  %v16538_v40 = vld [vmem:[%s22793_s3 + $0x608] ss:$16 sps:$4 sm:$0xff]  }
 0x6a3   :  { %13196 = vmatpush1.bf16.msra.mxu1 %v16484_v41  ;;  %13033 = vmatprep.subr.bf16.mxu0 %v16489_v25  ;;  %v16543_v25 = vld [vmem:[%s22793_s3 + $0x624] ss:$16 sps:$4 sm:$0xff]  }
 0x6a4   :  { %13197 = vmatprep.subr.bf16.mxu1 %v16492_v60  ;;  %v16546_v60 = vld [vmem:[%s22793_s3 + $0x62c] ss:$16 sps:$4 sm:$0xff]  }
 0x6a6   :  { %13034 = vmatpush1.bf16.msra.mxu0 %v16487_v42 }
 0x6a7   :  { %13198 = vmatpush1.bf16.msra.mxu1 %v16490_v5  ;;  %13035 = vmatprep.subr.bf16.mxu0 %v16495_v44  ;;  %v16541_v5 = vld [vmem:[%s22793_s3 + $0x620] ss:$16 sps:$4 sm:$0xff]   ;;  %v16544_v44 = vld [vmem:[%s22793_s3 + $0x628] ss:$16 sps:$4 sm:$0xff]  }
 0x6a8   :  { %13199 = vmatprep.subr.bf16.mxu1 %v16498_v46  ;;  %v16552_v46 = vld [vmem:[%s22793_s3 + $0x64c] ss:$16 sps:$4 sm:$0xff]  }
 0x6aa   :  { %13036 = vmatpush1.bf16.msra.mxu0 %v16493_v47  ;;  %v16549_v47 = vld [vmem:[%s22793_s3 + $0x644] ss:$16 sps:$4 sm:$0xff]  }
 0x6ab   :  { %13200 = vmatpush1.bf16.msra.mxu1 %v16496_v18  ;;  %13037 = vmatprep.subr.bf16.mxu0 %v16501_v52  ;;  %v16547_v18 = vld [vmem:[%s22793_s3 + $0x640] ss:$16 sps:$4 sm:$0xff]   ;;  %v16550_v52 = vld [vmem:[%s22793_s3 + $0x648] ss:$16 sps:$4 sm:$0xff]  }
 0x6ac   :  { %13201 = vmatprep.subr.bf16.mxu1 %v16504_v51  ;;  %v16555_v51 = vld [vmem:[%s22793_s3 + $0x664] ss:$16 sps:$4 sm:$0xff]  }
 0x6ae   :  { %13038 = vmatpush1.bf16.msra.mxu0 %v16499_v3  ;;  %v16558_v3 = vld [vmem:[%s22793_s3 + $0x66c] ss:$16 sps:$4 sm:$0xff]  }
 0x6af   :  { %13202 = vmatpush1.bf16.msra.mxu1 %v16502_v56  ;;  %13039 = vmatprep.subr.bf16.mxu0 %v16507_v48  ;;  %v16553_v56 = vld [vmem:[%s22793_s3 + $0x660] ss:$16 sps:$4 sm:$0xff]   ;;  %v16556_v48 = vld [vmem:[%s22793_s3 + $0x668] ss:$16 sps:$4 sm:$0xff]  }
 0x6b0   :  { %13203 = vmatprep.subr.bf16.mxu1 %v16510_v63  ;;  %v16561_v63 = vld [vmem:[%s22793_s3 + $0x684] ss:$16 sps:$4 sm:$0xff]  }
 0x6b2   :  { %13040 = vmatpush1.bf16.msra.mxu0 %v16505_v7  ;;  %v16564_v7 = vld [vmem:[%s22793_s3 + $0x68c] ss:$16 sps:$4 sm:$0xff]  }
 0x6b3   :  { %13204 = vmatpush1.bf16.msra.mxu1 %v16508_v61  ;;  %13041 = vmatprep.subr.bf16.mxu0 %v16513_v39  ;;  %v16559_v61 = vld [vmem:[%s22793_s3 + $0x680] ss:$16 sps:$4 sm:$0xff]   ;;  %v16562_v39 = vld [vmem:[%s22793_s3 + $0x688] ss:$16 sps:$4 sm:$0xff]  }
 0x6b4   :  { %13205 = vmatprep.subr.bf16.mxu1 %v16516_v23  ;;  %v16567_v23 = vld [vmem:[%s22793_s3 + $0x6a4] ss:$16 sps:$4 sm:$0xff]  }
 0x6b6   :  { %13042 = vmatpush1.bf16.msra.mxu0 %v16511_v28  ;;  %v16570_v28 = vld [vmem:[%s22793_s3 + $0x6ac] ss:$16 sps:$4 sm:$0xff]  }
 0x6b7   :  { %13206 = vmatpush1.bf16.msra.mxu1 %v16514_v2  ;;  %13043 = vmatprep.subr.bf16.mxu0 %v16519_v58  ;;  %v16565_v2 = vld [vmem:[%s22793_s3 + $0x6a0] ss:$16 sps:$4 sm:$0xff]   ;;  %v16568_v58 = vld [vmem:[%s22793_s3 + $0x6a8] ss:$16 sps:$4 sm:$0xff]  }
 0x6b8   :  { %13207 = vmatprep.subr.bf16.mxu1 %v16522_v6  ;;  %v16573_v6 = vld [vmem:[%s22793_s3 + $0x6c4] ss:$16 sps:$4 sm:$0xff]  }
 0x6ba   :  { %13044 = vmatpush1.bf16.msra.mxu0 %v16517_v8  ;;  %v16576_v8 = vld [vmem:[%s22793_s3 + $0x6cc] ss:$16 sps:$4 sm:$0xff]  }
 0x6bb   :  { %13208 = vmatpush1.bf16.msra.mxu1 %v16520_v0  ;;  %13045 = vmatprep.subr.bf16.mxu0 %v16525_v10  ;;  %v16571_v0 = vld [vmem:[%s22793_s3 + $0x6c0] ss:$16 sps:$4 sm:$0xff]   ;;  %v16574_v10 = vld [vmem:[%s22793_s3 + $0x6c8] ss:$16 sps:$4 sm:$0xff]  }
 0x6bc   :  { %13209 = vmatprep.subr.bf16.mxu1 %v16528_v9  ;;  %v16579_v9 = vld [vmem:[%s22793_s3 + $0x6e4] ss:$16 sps:$4 sm:$0xff]  }
 0x6be   :  { %13046 = vmatpush1.bf16.msra.mxu0 %v16523_v54  ;;  %v16582_v54 = vld [vmem:[%s22793_s3 + $0x6ec] ss:$16 sps:$4 sm:$0xff]  }
 0x6bf   :  { %13210 = vmatpush1.bf16.msra.mxu1 %v16526_v11  ;;  %13047 = vmatprep.subr.bf16.mxu0 %v16531_v13  ;;  %v16577_v11 = vld [vmem:[%s22793_s3 + $0x6e0] ss:$16 sps:$4 sm:$0xff]   ;;  %v16580_v13 = vld [vmem:[%s22793_s3 + $0x6e8] ss:$16 sps:$4 sm:$0xff]  }
 0x6c0   :  { %13211 = vmatprep.subr.bf16.mxu1 %v16534_v16  ;;  %v16585_v16 = vld [vmem:[%s22793_s3 + $0x704] ss:$16 sps:$4 sm:$0xff]  }
 0x6c2   :  { %13048 = vmatpush1.bf16.msra.mxu0 %v16529_v14  ;;  %v16588_v14 = vld [vmem:[%s22793_s3 + $0x70c] ss:$16 sps:$4 sm:$0xff]  }
 0x6c3   :  { %13212 = vmatpush1.bf16.msra.mxu1 %v16532_v17  ;;  %13058 = vmatprep.subr.bf16.mxu0 %v16537_v53  ;;  %v16583_v17 = vld [vmem:[%s22793_s3 + $0x700] ss:$16 sps:$4 sm:$0xff]   ;;  %v16586_v53 = vld [vmem:[%s22793_s3 + $0x708] ss:$16 sps:$4 sm:$0xff]  }
 0x6c4   :  { %13222 = vmatprep.subr.bf16.mxu1 %v16540_v20  ;;  %v16591_v20 = vld [vmem:[%s22793_s3 + $0x724] ss:$16 sps:$4 sm:$0xff]  }
 0x6d8   :  { %v10862_v15 = vpop.f32.mrb[4].mxu0  ;;  %v22304_v19 = vpop.f32.mrb[4].mxu1 }
 0x6d9   :  { %v16007_v29 = vadd.f32 %v10862_v15, %v1608_v50  ;;  %v10864_v62 = vpop.f32.mrb[5].mxu0  ;;  %v11356_v1 = vpop.f32.mrb[5].mxu1  ;;  %v16597_v50 = vld [vmem:[%s22793_s3 + $0x744] ss:$16 sps:$4 sm:$0xff]   ;;  %v16598_v15 = vld [vmem:[%s22793_s3 + $0x748] ss:$16 sps:$4 sm:$0xff]  }
 0x6da   :  { %v16008_v22 = vadd.f32 %v10864_v62, %v1612_v26  ;;  %v10866_v32 = vpop.f32.mrb[6].mxu0  ;;  %v16010_v33 = vadd.f32 %v11356_v1, %v1620_v49  ;;  %v11358_v34 = vpop.f32.mrb[6].mxu1  ;;  %v16600_v26 = vld [vmem:[%s22793_s3 + $0x74c] ss:$16 sps:$4 sm:$0xff]   ;;  %v16595_v49 = vld [vmem:[%s22793_s3 + $0x740] ss:$16 sps:$4 sm:$0xff]  }
 0x6db   :  { %v11365_v12 = vmax.f32 %v16007_v29, 0.0  ;;  %v10867_v30 = vpop.f32.mrb[7].mxu0  ;;  %v11359_v57 = vpop.f32.mrb[7].mxu1  ;;  %v16603_v29 = vld [vmem:[%s22793_s3 + $0x764] ss:$16 sps:$4 sm:$0xff]  }
 0x6dc   :  { %v11366_v35 = vmax.f32 %v16008_v22, 0.0  ;;  %v11368_v37 = vmax.f32 %v16010_v33, 0.0  ;;  %v16606_v62 = vld [vmem:[%s22793_s3 + $0x76c] ss:$16 sps:$4 sm:$0xff]   ;;  %v16601_v22 = vld [vmem:[%s22793_s3 + $0x760] ss:$16 sps:$4 sm:$0xff]  }
 0x6dd   :  { %v11373_v41 = vpack.c.bf16 %v11365_v12, %v11365_v12  ;;  %v16604_v1 = vld [vmem:[%s22793_s3 + $0x768] ss:$16 sps:$4 sm:$0xff]   ;;  %v16609_v32 = vld [vmem:[%s22793_s3 + $0x784] ss:$16 sps:$4 sm:$0xff]   ;;  %v16612_v12 = vld [vmem:[%s22793_s3 + $0x78c] ss:$16 sps:$4 sm:$0xff]  }
 0x6de   :  { %v11374_v31 = vpack.c.bf16 %v11366_v35, %v11366_v35  ;;  %v11376_v42 = vpack.c.bf16 %v11368_v37, %v11368_v37  ;;  %v16607_v33 = vld [vmem:[%s22793_s3 + $0x780] ss:$16 sps:$4 sm:$0xff]   ;;  %v16610_v34 = vld [vmem:[%s22793_s3 + $0x788] ss:$16 sps:$4 sm:$0xff]   ;;  %v1615_v30 = vsub.s32 6, %v21656_v24 }
 0x6df   :  { %v16615_v35 = vld [vmem:[%s22793_s3 + $0x7a4] ss:$16 sps:$4 sm:$0xff]   ;;  %v16618_v57 = vld [vmem:[%s22793_s3 + $0x7ac] ss:$16 sps:$4 sm:$0xff]   ;;  %v16613_v37 = vld [vmem:[%s22793_s3 + $0x7a0] ss:$16 sps:$4 sm:$0xff]  }
 0x6e0   :  { %13049 = vmatprep.mubr.bf16.mxu0 %v11374_v31  ;;  %13213 = vmatprep.mubr.bf16.mxu1 %v11374_v31  ;;  %v16616_v31 = vld [vmem:[%s22793_s3 + $0x7a8] ss:$16 sps:$4 sm:$0xff]  }
 0x6e1   :  { %13050 = vmatmul.mubr.bf16.vlgmr.msra.gmra.mrb[8].mxu0 %v11373_v41  ;;  %13214 = vmatmul.mubr.bf16.vlgmr.msra.gmra.mrb[8].mxu1 %v11373_v41  ;;  %v16624_v41 = vld [vmem:[%s22793_s3 + $0x7cc] ss:$16 sps:$4 sm:$0xff]   ;;  %v16724_v24 = vld [vmem:[%s22795_s5 + $0x1f0] ss:$8 sps:$4 sm:$0xff]  }
 0x6e2   :  { %13059 = vmatpush1.bf16.msra.mxu0 %v16535_v38  ;;  %13223 = vmatpush1.bf16.msra.mxu1 %v16538_v40  ;;  %v1616_v38 = vrot.slane %v22299_v55, %v1615_v30  ;;  %v16621_v40 = vld [vmem:[%s22793_s3 + $0x7c4] ss:$16 sps:$4 sm:$0xff]   ;;  %v16622_v55 = vld [vmem:[%s22793_s3 + $0x7c8] ss:$16 sps:$4 sm:$0xff]  }
 0x6e3   :  { %13090 = vmatprep.mubr.bf16.mxu0 %v11376_v42  ;;  %13254 = vmatprep.mubr.bf16.mxu1 %v11376_v42  ;;  %v16627_v42 = vld [vmem:[%s22793_s3 + $0x7e4] ss:$16 sps:$4 sm:$0xff]  }
 0x6e4   :  { %13060 = vmatprep.subr.bf16.mxu0 %v16543_v25  ;;  %13224 = vmatprep.subr.bf16.mxu1 %v16546_v60  ;;  %v16619_v25 = vld [vmem:[%s22793_s3 + $0x7c0] ss:$16 sps:$4 sm:$0xff]   ;;  %v16009_v60 = vadd.f32 %v22304_v19, %v1616_v38  ;;  %v16628_v19 = vld [vmem:[%s22793_s3 + $0x7e8] ss:$16 sps:$4 sm:$0xff]  }
 0x6e5   :  { %v16736_v30 = vld [vmem:[%s22796_s7 + $0x20] sm:$0xff]  }
 0x6e6   :  { %13061 = vmatpush1.bf16.msra.mxu0 %v16541_v5  ;;  %13225 = vmatpush1.bf16.msra.mxu1 %v16544_v44  ;;  %v16630_v5 = vld [vmem:[%s22793_s3 + $0x7ec] ss:$16 sps:$4 sm:$0xff]   ;;  %v16625_v44 = vld [vmem:[%s22793_s3 + $0x7e0] ss:$16 sps:$4 sm:$0xff]  }
 0x6e7   :  { %13062 = vmatprep.subr.bf16.mxu0 %v16549_v47  ;;  %13226 = vmatprep.subr.bf16.mxu1 %v16552_v46  ;;  %v11367_v47 = vmax.f32 %v16009_v60, 0.0  ;;  %v16633_v46 = vld [vmem:[%s22795_s5 + $0x4] ss:$8 sps:$4 sm:$0xff]  }
 0x6ea   :  { %13063 = vmatpush1.bf16.msra.mxu0 %v16547_v18  ;;  %13227 = vmatpush1.bf16.msra.mxu1 %v16550_v52  ;;  %v16631_v18 = vld [vmem:[%s22795_s5] ss:$8 sps:$4 sm:$0xff]   ;;  %v11375_v52 = vpack.c.bf16 %v11367_v47, %v11367_v47 }
 0x6eb   :  { %13064 = vmatprep.subr.bf16.mxu0 %v16555_v51  ;;  %13228 = vmatprep.subr.bf16.mxu1 %v16558_v3  ;;  %v16636_v51 = vld [vmem:[%s22795_s5 + $0x14] ss:$8 sps:$4 sm:$0xff]   ;;  %v16634_v3 = vld [vmem:[%s22795_s5 + $0x10] ss:$8 sps:$4 sm:$0xff]  }
 0x6ee   :  { %13065 = vmatpush1.bf16.msra.mxu0 %v16553_v56  ;;  %13229 = vmatpush1.bf16.msra.mxu1 %v16556_v48  ;;  %v16639_v56 = vld [vmem:[%s22795_s5 + $0x24] ss:$8 sps:$4 sm:$0xff]   ;;  %v16637_v48 = vld [vmem:[%s22795_s5 + $0x20] ss:$8 sps:$4 sm:$0xff]  }
 0x6ef   :  { %13066 = vmatprep.subr.bf16.mxu0 %v16561_v63  ;;  %13230 = vmatprep.subr.bf16.mxu1 %v16564_v7  ;;  %v16642_v63 = vld [vmem:[%s22795_s5 + $0x34] ss:$8 sps:$4 sm:$0xff]   ;;  %v16640_v7 = vld [vmem:[%s22795_s5 + $0x30] ss:$8 sps:$4 sm:$0xff]  }
 0x6f2   :  { %13067 = vmatpush1.bf16.msra.mxu0 %v16559_v61  ;;  %13231 = vmatpush1.bf16.msra.mxu1 %v16562_v39  ;;  %v16645_v61 = vld [vmem:[%s22795_s5 + $0x44] ss:$8 sps:$4 sm:$0xff]   ;;  %v16643_v39 = vld [vmem:[%s22795_s5 + $0x40] ss:$8 sps:$4 sm:$0xff]  }
 0x6f3   :  { %13068 = vmatprep.subr.bf16.mxu0 %v16567_v23  ;;  %13232 = vmatprep.subr.bf16.mxu1 %v16570_v28  ;;  %v16648_v23 = vld [vmem:[%s22795_s5 + $0x54] ss:$8 sps:$4 sm:$0xff]   ;;  %v16646_v28 = vld [vmem:[%s22795_s5 + $0x50] ss:$8 sps:$4 sm:$0xff]  }
 0x6f6   :  { %13069 = vmatpush1.bf16.msra.mxu0 %v16565_v2  ;;  %13233 = vmatpush1.bf16.msra.mxu1 %v16568_v58  ;;  %v16651_v2 = vld [vmem:[%s22795_s5 + $0x64] ss:$8 sps:$4 sm:$0xff]   ;;  %v16649_v58 = vld [vmem:[%s22795_s5 + $0x60] ss:$8 sps:$4 sm:$0xff]  }
 0x6f7   :  { %13070 = vmatprep.subr.bf16.mxu0 %v16573_v6  ;;  %13234 = vmatprep.subr.bf16.mxu1 %v16576_v8  ;;  %v16654_v6 = vld [vmem:[%s22795_s5 + $0x74] ss:$8 sps:$4 sm:$0xff]   ;;  %v16652_v8 = vld [vmem:[%s22795_s5 + $0x70] ss:$8 sps:$4 sm:$0xff]  }
 0x6fa   :  { %13071 = vmatpush1.bf16.msra.mxu0 %v16571_v0  ;;  %13235 = vmatpush1.bf16.msra.mxu1 %v16574_v10  ;;  %v16657_v0 = vld [vmem:[%s22795_s5 + $0x84] ss:$8 sps:$4 sm:$0xff]   ;;  %v16655_v10 = vld [vmem:[%s22795_s5 + $0x80] ss:$8 sps:$4 sm:$0xff]  }
 0x6fb   :  { %13072 = vmatprep.subr.bf16.mxu0 %v16579_v9  ;;  %13236 = vmatprep.subr.bf16.mxu1 %v16582_v54  ;;  %v16660_v9 = vld [vmem:[%s22795_s5 + $0x94] ss:$8 sps:$4 sm:$0xff]   ;;  %v16658_v54 = vld [vmem:[%s22795_s5 + $0x90] ss:$8 sps:$4 sm:$0xff]  }
 0x6fe   :  { %13073 = vmatpush1.bf16.msra.mxu0 %v16577_v11  ;;  %13237 = vmatpush1.bf16.msra.mxu1 %v16580_v13  ;;  %v16663_v11 = vld [vmem:[%s22795_s5 + $0xa4] ss:$8 sps:$4 sm:$0xff]   ;;  %v16661_v13 = vld [vmem:[%s22795_s5 + $0xa0] ss:$8 sps:$4 sm:$0xff]  }
 0x6ff   :  { %13074 = vmatprep.subr.bf16.mxu0 %v16585_v16  ;;  %13238 = vmatprep.subr.bf16.mxu1 %v16588_v14  ;;  %v16666_v16 = vld [vmem:[%s22795_s5 + $0xb4] ss:$8 sps:$4 sm:$0xff]   ;;  %v16664_v14 = vld [vmem:[%s22795_s5 + $0xb0] ss:$8 sps:$4 sm:$0xff]  }
 0x702   :  { %13075 = vmatpush1.bf16.msra.mxu0 %v16583_v17  ;;  %13239 = vmatpush1.bf16.msra.mxu1 %v16586_v53  ;;  %v16669_v17 = vld [vmem:[%s22795_s5 + $0xc4] ss:$8 sps:$4 sm:$0xff]   ;;  %v16667_v53 = vld [vmem:[%s22795_s5 + $0xc0] ss:$8 sps:$4 sm:$0xff]  }
 0x703   :  { %13076 = vmatprep.subr.bf16.mxu0 %v16591_v20  ;;  %13240 = vmatprep.subr.bf16.mxu1 %v16594_v36  ;;  %v16672_v20 = vld [vmem:[%s22795_s5 + $0xd4] ss:$8 sps:$4 sm:$0xff]   ;;  %v16670_v36 = vld [vmem:[%s22795_s5 + $0xd0] ss:$8 sps:$4 sm:$0xff]  }
 0x706   :  { %13077 = vmatpush1.bf16.msra.mxu0 %v16589_v59  ;;  %13241 = vmatpush1.bf16.msra.mxu1 %v16592_v27  ;;  %v16675_v59 = vld [vmem:[%s22795_s5 + $0xe4] ss:$8 sps:$4 sm:$0xff]   ;;  %v16673_v27 = vld [vmem:[%s22795_s5 + $0xe0] ss:$8 sps:$4 sm:$0xff]  }
 0x707   :  { %13078 = vmatprep.subr.bf16.mxu0 %v16597_v50  ;;  %13242 = vmatprep.subr.bf16.mxu1 %v16600_v26  ;;  %v16678_v50 = vld [vmem:[%s22795_s5 + $0xf4] ss:$8 sps:$4 sm:$0xff]   ;;  %v16676_v26 = vld [vmem:[%s22795_s5 + $0xf0] ss:$8 sps:$4 sm:$0xff]  }
 0x70a   :  { %13079 = vmatpush1.bf16.msra.mxu0 %v16595_v49  ;;  %13243 = vmatpush1.bf16.msra.mxu1 %v16598_v15  ;;  %v16681_v49 = vld [vmem:[%s22795_s5 + $0x104] ss:$8 sps:$4 sm:$0xff]  }
 0x70b   :  { %13080 = vmatprep.subr.bf16.mxu0 %v16603_v29  ;;  %13244 = vmatprep.subr.bf16.mxu1 %v16606_v62  ;;  %v16727_v15 = vld [vmem:[%s22796_s7 + $0x40] sm:$0xff]   ;;  %v16729_v62 = vld [vmem:[%s22796_s7 + $0x48] sm:$0xff]  }
 0x70c   :  { %v16728_v29 = vld [vmem:[%s22796_s7] sm:$0xff]  }
 0x70e   :  { %13081 = vmatpush1.bf16.msra.mxu0 %v16601_v22  ;;  %13245 = vmatpush1.bf16.msra.mxu1 %v16604_v1  ;;  %v16730_v22 = vld [vmem:[%s22796_s7 + $0x8] sm:$0xff]   ;;  %v16731_v1 = vld [vmem:[%s22796_s7 + $0x50] sm:$0xff]  }
 0x70f   :  { %13082 = vmatprep.subr.bf16.mxu0 %v16609_v32  ;;  %13246 = vmatprep.subr.bf16.mxu1 %v16612_v12  ;;  %v16732_v32 = vld [vmem:[%s22796_s7 + $0x10] sm:$0xff]   ;;  %v16733_v12 = vld [vmem:[%s22796_s7 + $0x58] sm:$0xff]  }
 0x712   :  { %13083 = vmatpush1.bf16.msra.mxu0 %v16607_v33  ;;  %13247 = vmatpush1.bf16.msra.mxu1 %v16610_v34  ;;  %v16734_v33 = vld [vmem:[%s22796_s7 + $0x18] sm:$0xff]   ;;  %v16735_v34 = vld [vmem:[%s22796_s7 + $0x60] sm:$0xff]  }
 0x713   :  { %13084 = vmatprep.subr.bf16.mxu0 %v16615_v35  ;;  %13248 = vmatprep.subr.bf16.mxu1 %v16618_v57  ;;  %v16737_v35 = vld [vmem:[%s22796_s7 + $0x68] sm:$0xff]  }
 0x714   :  { %v16738_v57 = vld [vmem:[%s22796_s7 + $0x28] sm:$0xff]  }
 0x716   :  { %13085 = vmatpush1.bf16.msra.mxu0 %v16613_v37  ;;  %13249 = vmatpush1.bf16.msra.mxu1 %v16616_v31  ;;  %v22633_v37 = vld [vmem:[%s22797_s4] sm:$0xf] }
 0x717   :  { %13086 = vmatprep.subr.bf16.mxu0 %v16621_v40  ;;  %13250 = vmatprep.subr.bf16.mxu1 %v16624_v41  ;;  %v11638_v31 = vrot.slane %v22633_v37, %v21849_v43  ;;  %v11642_v38 = vrot.slane %v22633_v37, %v21676_v45  ;;  %v11650_v40 = vrot.slane %v22633_v37, %v1603_v21  ;;  %v16679_v21 = vld [vmem:[%s22795_s5 + $0x100] ss:$8 sps:$4 sm:$0xff]  }
 0x71a   :  { %13087 = vmatpush1.bf16.msra.mxu0 %v16619_v25  ;;  %13251 = vmatpush1.bf16.msra.mxu1 %v16622_v55 }
 0x71b   :  { %13088 = vmatprep.subr.bf16.mxu0 %v16627_v42  ;;  %13252 = vmatprep.subr.bf16.mxu1 %v16630_v5 }
 0x71e   :  { %13089 = vmatpush1.bf16.msra.mxu0 %v16625_v44  ;;  %13253 = vmatpush1.bf16.msra.mxu1 %v16628_v19 }
 0x71f   :  { %13667 = vmatprep.subr.bf16.mxu0 %v16633_v46  ;;  %15952 = vmatprep.subr.bf16.mxu1 %v16727_v15  ;;  %v11646_v15 = vrot.slane %v22633_v37, %v1599_v4 }
 0x721   :  { %13091 = vmatmul.mubr.bf16.vlgmr.msra.gmra.mrb[8].mxu0 %v11375_v52  ;;  %13255 = vmatmul.mubr.bf16.vlgmr.msra.gmra.mrb[8].mxu1 %v11375_v52 }
 0x722   :  { %13668 = vmatpush1.bf16.msra.mxu0 %v16631_v18  ;;  %15953 = vmatpush3.bf16.msra.mxu1 %v16728_v29  ;;  %v16723_v29 = vld [vmem:[%s22795_s5 + $0x1e4] ss:$8 sps:$4 sm:$0xff]  }
 0x723   :  { %13669 = vmatprep.subr.bf16.mxu0 %v16636_v51  ;;  %15954 = vmatprep.subr.bf16.mxu1 %v16729_v62  ;;  %v16721_v62 = vld [vmem:[%s22795_s5 + $0x1e0] ss:$8 sps:$4 sm:$0xff]  }
 0x726   :  { %13670 = vmatpush1.bf16.msra.mxu0 %v16634_v3  ;;  %15955 = vmatpush3.bf16.msra.mxu1 %v16730_v22 }
 0x727   :  { %13671 = vmatprep.subr.bf16.mxu0 %v16639_v56  ;;  %15956 = vmatprep.subr.bf16.mxu1 %v16731_v1  ;;  %v16726_v1 = vld [vmem:[%s22795_s5 + $0x1f4] ss:$8 sps:$4 sm:$0xff]  }
 0x72a   :  { %13672 = vmatpush1.bf16.msra.mxu0 %v16637_v48  ;;  %15957 = vmatpush3.bf16.msra.mxu1 %v16732_v32 }
 0x72b   :  { %13673 = vmatprep.subr.bf16.mxu0 %v16642_v63  ;;  %15958 = vmatprep.subr.bf16.mxu1 %v16733_v12  ;;  %v16684_v63 = vld [vmem:[%s22795_s5 + $0x114] ss:$8 sps:$4 sm:$0xff]  }
 0x72c   :  { %v16739_v12 = vld [vmem:[%s22796_s7 + $0x70] sm:$0xff]  }
 0x72e   :  { %13674 = vmatpush1.bf16.msra.mxu0 %v16640_v7  ;;  %15959 = vmatpush3.bf16.msra.mxu1 %v16734_v33  ;;  %v16740_v33 = vld [vmem:[%s22796_s7 + $0x30] sm:$0xff]  }
 0x72f   :  { %13675 = vmatprep.subr.bf16.mxu0 %v16645_v61  ;;  %15960 = vmatprep.subr.bf16.mxu1 %v16735_v34  ;;  %v16682_v61 = vld [vmem:[%s22795_s5 + $0x110] ss:$8 sps:$4 sm:$0xff]  }
 0x730   :  { %v16741_v34 = vld [vmem:[%s22796_s7 + $0x78] sm:$0xff]  }
 0x732   :  { %13676 = vmatpush1.bf16.msra.mxu0 %v16643_v39  ;;  %15961 = vmatpush3.bf16.msra.mxu1 %v16736_v30  ;;  %v16687_v39 = vld [vmem:[%s22795_s5 + $0x124] ss:$8 sps:$4 sm:$0xff]   ;;  %v16742_v30 = vld [vmem:[%s22796_s7 + $0x38] sm:$0xff]  }
 0x733   :  { %13677 = vmatprep.subr.bf16.mxu0 %v16648_v23  ;;  %15962 = vmatprep.subr.bf16.mxu1 %v16737_v35  ;;  %v16685_v23 = vld [vmem:[%s22795_s5 + $0x120] ss:$8 sps:$4 sm:$0xff]   ;;  %v16752_v35 = vmov 0.0  }
 0x736   :  { %13678 = vmatpush1.bf16.msra.mxu0 %v16646_v28  ;;  %15963 = vmatpush3.bf16.msra.mxu1 %v16738_v57  ;;  %v16690_v28 = vld [vmem:[%s22795_s5 + $0x134] ss:$8 sps:$4 sm:$0xff]   ;;  %v13335_v57 = vld [vmem:[%s22799_s6] sm:$0x3] }
 0x737   :  { %13679 = vmatprep.subr.bf16.mxu0 %v16651_v2  ;;  %v16688_v2 = vld [vmem:[%s22795_s5 + $0x130] ss:$8 sps:$4 sm:$0xff]   ;;  %15964 = vmatprep.subr.bf16.mxu1 %v16739_v12  ;;  %v13340_v37 = vrot.slane %v13335_v57, %v21849_v43 }
 0x738   :  { %v16745_v43 = vld [vmem:[%s22798_s9 + $0x10] sm:$0xff]  }
 0x73a   :  { %13680 = vmatpush1.bf16.msra.mxu0 %v16649_v58  ;;  %v16693_v58 = vld [vmem:[%s22795_s5 + $0x144] ss:$8 sps:$4 sm:$0xff]   ;;  %15965 = vmatpush3.bf16.msra.mxu1 %v16740_v33 }
 0x73b   :  { %13681 = vmatprep.subr.bf16.mxu0 %v16654_v6  ;;  %v16691_v6 = vld [vmem:[%s22795_s5 + $0x140] ss:$8 sps:$4 sm:$0xff]   ;;  %15966 = vmatprep.subr.bf16.mxu1 %v16741_v34 }
 0x73e   :  { %13682 = vmatpush1.bf16.msra.mxu0 %v16652_v8  ;;  %v16696_v8 = vld [vmem:[%s22795_s5 + $0x154] ss:$8 sps:$4 sm:$0xff]   ;;  %15967 = vmatpush3.bf16.msra.mxu1 %v16742_v30 }
 0x73f   :  { %13683 = vmatprep.subr.bf16.mxu0 %v16657_v0  ;;  %v16694_v0 = vld [vmem:[%s22795_s5 + $0x150] ss:$8 sps:$4 sm:$0xff]   ;;  %15983 = vmatprep.subr.bf16.mxu1 %v16752_v35 }
 0x742   :  { %13684 = vmatpush1.bf16.msra.mxu0 %v16655_v10  ;;  %v16699_v10 = vld [vmem:[%s22795_s5 + $0x164] ss:$8 sps:$4 sm:$0xff]  }
 0x743   :  { %13685 = vmatprep.subr.bf16.mxu0 %v16660_v9  ;;  %v16697_v9 = vld [vmem:[%s22795_s5 + $0x160] ss:$8 sps:$4 sm:$0xff]  }
 0x746   :  { %13686 = vmatpush1.bf16.msra.mxu0 %v16658_v54  ;;  %v16702_v54 = vld [vmem:[%s22795_s5 + $0x174] ss:$8 sps:$4 sm:$0xff]  }
 0x747   :  { %13687 = vmatprep.subr.bf16.mxu0 %v16663_v11  ;;  %v16700_v11 = vld [vmem:[%s22795_s5 + $0x170] ss:$8 sps:$4 sm:$0xff]  }
 0x74a   :  { %13688 = vmatpush1.bf16.msra.mxu0 %v16661_v13  ;;  %v16705_v13 = vld [vmem:[%s22795_s5 + $0x184] ss:$8 sps:$4 sm:$0xff]  }
 0x74b   :  { %13689 = vmatprep.subr.bf16.mxu0 %v16666_v16  ;;  %v16703_v16 = vld [vmem:[%s22795_s5 + $0x180] ss:$8 sps:$4 sm:$0xff]  }
 0x74e   :  { %13690 = vmatpush1.bf16.msra.mxu0 %v16664_v14  ;;  %v16708_v14 = vld [vmem:[%s22795_s5 + $0x194] ss:$8 sps:$4 sm:$0xff]  }
 0x74f   :  { %13691 = vmatprep.subr.bf16.mxu0 %v16669_v17  ;;  %v16706_v17 = vld [vmem:[%s22795_s5 + $0x190] ss:$8 sps:$4 sm:$0xff]  }
 0x752   :  { %13692 = vmatpush1.bf16.msra.mxu0 %v16667_v53  ;;  %v16711_v53 = vld [vmem:[%s22795_s5 + $0x1a4] ss:$8 sps:$4 sm:$0xff]  }
 0x753   :  { %13693 = vmatprep.subr.bf16.mxu0 %v16672_v20  ;;  %v16709_v20 = vld [vmem:[%s22795_s5 + $0x1a0] ss:$8 sps:$4 sm:$0xff]  }
 0x756   :  { %13694 = vmatpush1.bf16.msra.mxu0 %v16670_v36  ;;  %v16714_v36 = vld [vmem:[%s22795_s5 + $0x1b4] ss:$8 sps:$4 sm:$0xff]  }
 0x757   :  { %13695 = vmatprep.subr.bf16.mxu0 %v16675_v59  ;;  %v16712_v59 = vld [vmem:[%s22795_s5 + $0x1b0] ss:$8 sps:$4 sm:$0xff]  }
 0x75a   :  { %13696 = vmatpush1.bf16.msra.mxu0 %v16673_v27  ;;  %v16717_v27 = vld [vmem:[%s22795_s5 + $0x1c4] ss:$8 sps:$4 sm:$0xff]  }
 0x75b   :  { %13697 = vmatprep.subr.bf16.mxu0 %v16678_v50  ;;  %v16715_v50 = vld [vmem:[%s22795_s5 + $0x1c0] ss:$8 sps:$4 sm:$0xff]  }
 0x75e   :  { %13698 = vmatpush1.bf16.msra.mxu0 %v16676_v26  ;;  %v16720_v26 = vld [vmem:[%s22795_s5 + $0x1d4] ss:$8 sps:$4 sm:$0xff]  }
 0x75f   :  { %13708 = vmatprep.subr.bf16.mxu0 %v16681_v49  ;;  %v16718_v49 = vld [vmem:[%s22795_s5 + $0x1d0] ss:$8 sps:$4 sm:$0xff]  }
 0x7f4   :  { %v13092_v41 = vpop.f32.mrb[8].mxu0  ;;  %v22642_v25 = vpop.f32.mrb[8].mxu1 }
 0x7f5   :  { %v16011_v55 = vadd.f32 %v13092_v41, %v11638_v31  ;;  %v13094_v60 = vpop.f32.mrb[9].mxu0  ;;  %v13258_v42 = vpop.f32.mrb[9].mxu1  ;;  %v16013_v22 = vadd.f32 %v22642_v25, %v11646_v15  ;;  %v13344_v31 = vrot.slane %v13335_v57, %v21676_v45  ;;  %v16744_v45 = vld [vmem:[%s22798_s9 + $0x8] sm:$0xff]  }
 0x7f6   :  { %v16012_v5 = vadd.f32 %v13094_v60, %v11642_v38  ;;  %v16014_v44 = vadd.f32 %v13258_v42, %v11650_v40  ;;  %v13096_v19 = vpop.f32.mrb[10].mxu0  ;;  %v13260_v47 = vpop.f32.mrb[10].mxu1 }
 0x7f7   :  { %v13263_v46 = vmax.f32 %v16011_v55, 0.0  ;;  %v13097_v18 = vpop.f32.mrb[11].mxu0  ;;  %v13261_v52 = vpop.f32.mrb[11].mxu1  ;;  %v13265_v4 = vmax.f32 %v16013_v22, 0.0  ;;  %v16743_v19 = vld [vmem:[%s22798_s9] sm:$0xff]  }
 0x7f8   :  { %v13264_v51 = vmax.f32 %v16012_v5, 0.0  ;;  %v13266_v3 = vmax.f32 %v16014_v44, 0.0  ;;  %v16747_v18 = vld [vmem:[%s22798_s9 + $0x20] sm:$0xff]   ;;  %v16748_v52 = vld [vmem:[%s22798_s9 + $0x28] sm:$0xff]  }
 0x7f9   :  { %v13267_v48 = vpack.c.bf16 %v13263_v46, %v13263_v46  ;;  %v13269_v32 = vpack.c.bf16 %v13265_v4, %v13265_v4  ;;  %v16746_v46 = vld [vmem:[%s22798_s9 + $0x18] sm:$0xff]  }
 0x7fa   :  { %v13268_v56 = vpack.c.bf16 %v13264_v51, %v13264_v51  ;;  %v13270_v7 = vpack.c.bf16 %v13266_v3, %v13266_v3  ;;  %v16749_v51 = vld [vmem:[%s22798_s9 + $0x30] sm:$0xff]   ;;  %v16750_v3 = vld [vmem:[%s22798_s9 + $0x38] sm:$0xff]  }
 0x7fc   :  { %13699 = vmatprep.mubr.bf16.mxu0 %v13268_v56 }
 0x7fd   :  { %13700 = vmatmul.mubr.bf16.vlgmr.msra.gmra.mrb[12].mxu0 %v13267_v48 }
 0x7fe   :  { %13709 = vmatpush1.bf16.msra.mxu0 %v16679_v21  ;;  %13740 = vmatprep.mubr.bf16.mxu0 %v13270_v7  ;;  %v15926_v21 = vld [vmem:[%s22800_s8] ss:$0 sm:$0xff] }
 0x7ff   :  { %13710 = vmatprep.subr.bf16.mxu0 %v16684_v63 }
 0x802   :  { %13711 = vmatpush1.bf16.msra.mxu0 %v16682_v61 }
 0x803   :  { %13712 = vmatprep.subr.bf16.mxu0 %v16687_v39 }
 0x806   :  { %13713 = vmatpush1.bf16.msra.mxu0 %v16685_v23 }
 0x807   :  { %13714 = vmatprep.subr.bf16.mxu0 %v16690_v28 }
 0x80a   :  { %13715 = vmatpush1.bf16.msra.mxu0 %v16688_v2  ;;  %v15943_v2 = vld [vmem:[%s22801_s10] ss:$0 sm:$0xff] }
 0x80b   :  { %13716 = vmatprep.subr.bf16.mxu0 %v16693_v58 }
 0x80e   :  { %13717 = vmatpush1.bf16.msra.mxu0 %v16691_v6 }
 0x80f   :  { %13718 = vmatprep.subr.bf16.mxu0 %v16696_v8 }
 0x812   :  { %13719 = vmatpush1.bf16.msra.mxu0 %v16694_v0 }
 0x813   :  { %13720 = vmatprep.subr.bf16.mxu0 %v16699_v10 }
 0x816   :  { %13721 = vmatpush1.bf16.msra.mxu0 %v16697_v9 }
 0x817   :  { %13722 = vmatprep.subr.bf16.mxu0 %v16702_v54 }
 0x81a   :  { %13723 = vmatpush1.bf16.msra.mxu0 %v16700_v11 }
 0x81b   :  { %13724 = vmatprep.subr.bf16.mxu0 %v16705_v13 }
 0x81e   :  { %13725 = vmatpush1.bf16.msra.mxu0 %v16703_v16 }
 0x81f   :  { %13726 = vmatprep.subr.bf16.mxu0 %v16708_v14 }
 0x822   :  { %13727 = vmatpush1.bf16.msra.mxu0 %v16706_v17 }
 0x823   :  { %13728 = vmatprep.subr.bf16.mxu0 %v16711_v53 }
 0x826   :  { %13729 = vmatpush1.bf16.msra.mxu0 %v16709_v20 }
 0x827   :  { %13730 = vmatprep.subr.bf16.mxu0 %v16714_v36 }
 0x82a   :  { %13731 = vmatpush1.bf16.msra.mxu0 %v16712_v59 }
 0x82b   :  { %13732 = vmatprep.subr.bf16.mxu0 %v16717_v27 }
 0x82e   :  { %13733 = vmatpush1.bf16.msra.mxu0 %v16715_v50 }
 0x82f   :  { %13734 = vmatprep.subr.bf16.mxu0 %v16720_v26 }
 0x832   :  { %13735 = vmatpush1.bf16.msra.mxu0 %v16718_v49 }
 0x833   :  { %13736 = vmatprep.subr.bf16.mxu0 %v16723_v29 }
 0x836   :  { %13737 = vmatpush1.bf16.msra.mxu0 %v16721_v62 }
 0x837   :  { %13738 = vmatprep.subr.bf16.mxu0 %v16726_v1 }
 0x83a   :  { %13739 = vmatpush1.bf16.msra.mxu0 %v16724_v24 }
 0x83d   :  { %13741 = vmatmul.mubr.bf16.vlgmr.msra.gmra.mrb[12].mxu0 %v13269_v32 }
 0x910   :  { %v13742_v38 = vpop.f32.mrb[12].mxu0 }
 0x911   :  { %v16015_v40 = vadd.f32 %v13742_v38, %v13340_v37  ;;  %v13744_v41 = vpop.f32.mrb[13].mxu0 }
 0x912   :  { %v16016_v25 = vadd.f32 %v13744_v41, %v13344_v31  ;;  %v13746_v55 = vpop.f32.mrb[14].mxu0 }
 0x913   :  { %v13749_v60 = vmax.f32 %v16015_v40, 0.0  ;;  %v13747_v42 = vpop.f32.mrb[15].mxu0 }
 0x914   :  { %v13750_v5 = vmax.f32 %v16016_v25, 0.0 }
 0x915   :  { %v13751_v47 = vpack.c.bf16 %v13749_v60, %v13749_v60 }
 0x916   :  { %v13752_v44 = vpack.c.bf16 %v13750_v5, %v13750_v5 }
 0x918   :  { %13920 = vmatprep.mubr.bf16.mxu1 %v13752_v44 }
 0x919   :  { %13921 = vmatmul.mubr.bf16.vlgmr.msra.gmra.mrb[12].mxu1 %v13751_v47 }
 0x91a   :  { %15984 = vmatpush3.bf16.msra.mxu1 %v16743_v19  ;;  %15999 = vmatprep.mubr.msk.bf16.mxu1 %vm16753_vm0, %v16752_v35 }
 0x91b   :  { %15985 = vmatprep.subr.bf16.mxu1 %v16752_v35 }
 0x91e   :  { %15986 = vmatpush3.bf16.msra.mxu1 %v16744_v45 }
 0x91f   :  { %15987 = vmatprep.subr.bf16.mxu1 %v16752_v35 }
 0x922   :  { %15988 = vmatpush3.bf16.msra.mxu1 %v16745_v43 }
 0x923   :  { %15989 = vmatprep.subr.bf16.mxu1 %v16752_v35 }
 0x926   :  { %15990 = vmatpush3.bf16.msra.mxu1 %v16746_v46 }
 0x927   :  { %15991 = vmatprep.subr.bf16.mxu1 %v16752_v35 }
 0x92a   :  { %15992 = vmatpush3.bf16.msra.mxu1 %v16747_v18 }
 0x92b   :  { %15993 = vmatprep.subr.bf16.mxu1 %v16752_v35 }
 0x92e   :  { %15994 = vmatpush3.bf16.msra.mxu1 %v16748_v52 }
 0x92f   :  { %15995 = vmatprep.subr.bf16.mxu1 %v16752_v35 }
 0x932   :  { %15996 = vmatpush3.bf16.msra.mxu1 %v16749_v51 }
 0x933   :  { %15997 = vmatprep.subr.bf16.mxu1 %v16752_v35 }
 0x936   :  { %15998 = vmatpush3.bf16.msra.mxu1 %v16750_v3 }
 0x9ec   :  { %v15968_v56 = vpop.f32.mrb[12].mxu1 }
 0x9ed   :  { %v15969_v48 = vpop.f32.mrb[13].mxu1 }
 0x9ee   :  { %v15970_v63 = vadd.f32 %v15969_v48, %v15968_v56  ;;  %v15971_v7 = vpop.f32.mrb[14].mxu1 }
 0x9ef   :  { %v15972_v61 = vpop.f32.mrb[15].mxu1 }
 0x9f0   :  { %v13923_v39 = vadd.f32 %v15970_v63, %v15926_v21 }
 0x9f2   :  { %v13928_v23 = vmax.f32 %v13923_v39, 0.0 }
 0x9f4   :  { %v13929_v28 = vpack.c.bf16 %v13928_v23, %v13928_v23 }
 0x9f6   :  { %16000 = vmatmul.mubr.bf16.vlgmr.msra.gmra.mrb[16].mxu1 %v13929_v28 }
 0xac9   :  { %v14035_v58 = vpop.f32.mrb[16].mxu1 }
 0xaca   :  { %v14036_v6 = vadd.f32 %v15943_v2, %v14035_v58  ;;  %v16001_v8 = vpop.f32.mrb[17].mxu1 }
 0xacb   :  { %v14038_v0 = vpop.f32.mrb[18].mxu1 }
 0xacc   :  { %14041 = vst [vmem:[%s22802_s11] sm:$0xff] %v14036_v6  ;;  %v16002_v10 = vpop.f32.mrb[19].mxu1 }

</bundles_post_ra>
